<compile_context>
chip_gen: v7x
topology: tpu7x:2x2x1
jax: 0.10.0
libtpu: 0.0.40
codegen_flags: <defaults>
</compile_context>

<pallas_src>
import jax
import jax.numpy as jnp
from jax.experimental import pallas as pl
from jax.experimental.pallas import tpu as pltpu

IN_DIM, HID_DIM, OUT_DIM = 1412, 1256, 41          # original module widths
HID_PAD, OUT_PAD = 1280, 128                        # 128-lane-padded widths


def _round_up(x, m):
    return (x + m - 1) // m * m


def _vmem_capacity_bytes():
    try:
        return pltpu.get_tpu_info().vmem_capacity_bytes
    except Exception:
        return 64 << 20                              # conservative (v7x-sized)


def _mlp_kernel(x_ref, w1_ref, b1_ref, w2_ref, b2_ref, w3_ref, b3_ref,
                w4_ref, b4_ref, o_ref):
    # f32 -> bf16 cast fused in-kernel (VPU work, hidden under the MXU).
    x = x_ref[...].astype(jnp.bfloat16)
    # fc1 + relu  (bf16 operands, f32 MXU accumulation, f32 bias add)
    h = jnp.dot(x, w1_ref[...], preferred_element_type=jnp.float32) + b1_ref[...]
    h = jnp.maximum(h, 0.0)
    # fc2 + relu
    h = jnp.dot(h.astype(jnp.bfloat16), w2_ref[...],
                preferred_element_type=jnp.float32) + b2_ref[...]
    h = jnp.maximum(h, 0.0)
    # fc3 + relu
    h = jnp.dot(h.astype(jnp.bfloat16), w3_ref[...],
                preferred_element_type=jnp.float32) + b3_ref[...]
    h = jnp.maximum(h, 0.0)
    # fc4 + sigmoid
    h = jnp.dot(h.astype(jnp.bfloat16), w4_ref[...],
                preferred_element_type=jnp.float32) + b4_ref[...]
    o_ref[...] = jax.nn.sigmoid(h).astype(o_ref.dtype)


def ff_fingerprint_forward(x, p, *, block_b=None):
    """x: [B, 1412] float32.  p: padded/bf16 params from prepare_params()."""
    B = x.shape[0]

    vmem_cap = _vmem_capacity_bytes()
    big_vmem = vmem_cap >= (100 << 20)               # v5e/v6e: 128 MiB per TC
    if block_b is None:
        block_b = 1024 if big_vmem else 512          # v7x: 64 MiB per TC
    vmem_limit = (96 << 20) if big_vmem else (56 << 20)

    # Adaptive batch tile: minimize last-tile padding (sublane multiple of 8).
    num_tiles = pl.cdiv(max(B, 1), block_b)
    tb = _round_up(pl.cdiv(max(B, 1), num_tiles), 8)
    b_pad = tb * num_tiles
    if b_pad != B:
        x = jnp.pad(x, ((0, b_pad - B), (0, 0)))     # row pad only, no cast pass

    resident = lambda i: (0, 0)                      # weights stay VMEM-resident
    single = pl.Buffered(1)                          # constant index -> 1 buffer

    weight_bytes = 2 * (IN_DIM * HID_PAD + 2 * HID_PAD * HID_PAD
                        + HID_PAD * OUT_PAD)
    flops = 2 * b_pad * (IN_DIM * HID_PAD + 2 * HID_PAD * HID_PAD
                         + HID_PAD * OUT_PAD)
    bytes_accessed = (weight_bytes + 4 * (3 * HID_PAD + OUT_PAD)
                      + 4 * b_pad * IN_DIM + 2 * b_pad * OUT_PAD)

    out = pl.pallas_call(
        _mlp_kernel,
        out_shape=jax.ShapeDtypeStruct((b_pad, OUT_PAD), jnp.bfloat16),
        grid_spec=pltpu.PrefetchScalarGridSpec(
            num_scalar_prefetch=0,
            grid=(num_tiles,),
            in_specs=[
                pl.BlockSpec((tb, IN_DIM), lambda i: (i, 0)),   # x: batch-tiled
                pl.BlockSpec((IN_DIM, HID_PAD), resident, pipeline_mode=single),
                pl.BlockSpec((1, HID_PAD), resident, pipeline_mode=single),
                pl.BlockSpec((HID_PAD, HID_PAD), resident, pipeline_mode=single),
                pl.BlockSpec((1, HID_PAD), resident, pipeline_mode=single),
                pl.BlockSpec((HID_PAD, HID_PAD), resident, pipeline_mode=single),
                pl.BlockSpec((1, HID_PAD), resident, pipeline_mode=single),
                pl.BlockSpec((HID_PAD, OUT_PAD), resident, pipeline_mode=single),
                pl.BlockSpec((1, OUT_PAD), resident, pipeline_mode=single),
            ],
            out_specs=pl.BlockSpec((tb, OUT_PAD), lambda i: (i, 0)),
        ),
        compiler_params=pltpu.CompilerParams(
            # Small grids: one TC (weight-HBM-bound; sharding doubles weight
            # DMA).  Large grids: shard batch tiles across TCs (v7x megacore).
            dimension_semantics=(("parallel",) if num_tiles > 2
                                 else ("arbitrary",)),
            vmem_limit_bytes=vmem_limit,
        ),
        cost_estimate=pl.CostEstimate(
            flops=flops,
            transcendentals=b_pad * OUT_PAD,
            bytes_accessed=bytes_accessed),
    )(x, p["w1"], p["b1"], p["w2"], p["b2"], p["w3"], p["b3"],
      p["w4"], p["b4"])

    return out[:B, :OUT_DIM].astype(jnp.float32)


def init_params(key):
    """Deterministic synthetic parameters (shapes from the module __init__)."""
    ks = jax.random.split(key, 8)

    def linear(kw, kb, fan_in, fan_out):
        bound = 1.0 / (fan_in ** 0.5)   # torch.nn.Linear default init range
        w = jax.random.uniform(kw, (fan_in, fan_out), jnp.float32, -bound, bound)
        b = jax.random.uniform(kb, (1, fan_out), jnp.float32, -bound, bound)
        return w, b

    w1, b1 = linear(ks[0], ks[1], IN_DIM, HID_DIM)
    w2, b2 = linear(ks[2], ks[3], HID_DIM, HID_DIM)
    w3, b3 = linear(ks[4], ks[5], HID_DIM, HID_DIM)
    w4, b4 = linear(ks[6], ks[7], HID_DIM, OUT_DIM)
    return dict(w1=w1, b1=b1, w2=w2, b2=b2, w3=w3, b3=b3, w4=w4, b4=b4)


def prepare_params(p):
    """Zero-pad output dims to 128-lane multiples; weights bf16, biases f32.
    fc1 keeps its natural 1412-row contraction dim (x is streamed unpadded)."""
    def pad_w(w, rin, cout):
        wp = jnp.zeros((rin, cout), jnp.float32)
        return wp.at[:w.shape[0], :w.shape[1]].set(w).astype(jnp.bfloat16)

    def pad_b(b, cout):
        return jnp.zeros((1, cout), jnp.float32).at[:, :b.shape[1]].set(b)

    return dict(
        w1=pad_w(p["w1"], IN_DIM, HID_PAD),  b1=pad_b(p["b1"], HID_PAD),
        w2=pad_w(p["w2"], HID_PAD, HID_PAD), b2=pad_b(p["b2"], HID_PAD),
        w3=pad_w(p["w3"], HID_PAD, HID_PAD), b3=pad_b(p["b3"], HID_PAD),
        w4=pad_w(p["w4"], HID_PAD, OUT_PAD), b4=pad_b(p["b4"], OUT_PAD),
    )


def reference_forward(x, p):
    """Same math as the kernel: bf16 operands, f32 accumulation, f32 bias."""
    def dense(h, w, b):
        return jnp.dot(h.astype(jnp.bfloat16), w.astype(jnp.bfloat16),
                       preferred_element_type=jnp.float32) + b
    h = jnp.maximum(dense(x, p["w1"], p["b1"]), 0.0)
    h = jnp.maximum(dense(h, p["w2"], p["b2"]), 0.0)
    h = jnp.maximum(dense(h, p["w3"], p["b3"]), 0.0)
    return jax.nn.sigmoid(dense(h, p["w4"], p["b4"]))


if __name__ == "__main__":
    key = jax.random.PRNGKey(0)
    k_x, k_p = jax.random.split(key)

    B = 2
    x = jax.random.normal(k_x, (B, IN_DIM), jnp.float32)
    params = init_params(k_p)
    padded = prepare_params(params)

    out = jax.block_until_ready(ff_fingerprint_forward(x, padded))
    ref = jax.block_until_ready(reference_forward(x, params))

    assert out.shape == (B, OUT_DIM), out.shape
    # Tolerance covers bf16 MXU operands plus the bf16 output rounding step.
    err = float(jnp.max(jnp.abs(out - ref)))
    assert err < 5e-3, err
    print("KERNEL_OK")
</pallas_src>

<mosaic_0001>
module attributes {stable_mosaic.version = 11 : i64} {
  func.func @_mlp_kernel(%arg0: i32, %arg1: memref<8x1412xf32, #tpu.memory_space<vmem>>, %arg2: memref<1412x1280xbf16, #tpu.memory_space<vmem>>, %arg3: memref<1x1280xf32, #tpu.memory_space<vmem>>, %arg4: memref<1280x1280xbf16, #tpu.memory_space<vmem>>, %arg5: memref<1x1280xf32, #tpu.memory_space<vmem>>, %arg6: memref<1280x1280xbf16, #tpu.memory_space<vmem>>, %arg7: memref<1x1280xf32, #tpu.memory_space<vmem>>, %arg8: memref<1280x128xbf16, #tpu.memory_space<vmem>>, %arg9: memref<1x128xf32, #tpu.memory_space<vmem>>, %arg10: memref<8x128xbf16, #tpu.memory_space<vmem>>) attributes {dimension_semantics = [#tpu.dimension_semantics<arbitrary>], iteration_bounds = array<i64: 1>, scalar_prefetch = 0 : i64, scratch_operands = 0 : i64, tpu.core_type = #tpu.core_type<tc>, window_params = [{transform_indices = @transform_0, window_bounds = array<i64: 8, 1412>}, {pipeline_mode = #tpu.pipeline_mode<synchronous>, transform_indices = @transform_1, window_bounds = array<i64: 1412, 1280>}, {pipeline_mode = #tpu.pipeline_mode<synchronous>, transform_indices = @transform_2, window_bounds = array<i64: 1, 1280>}, {pipeline_mode = #tpu.pipeline_mode<synchronous>, transform_indices = @transform_3, window_bounds = array<i64: 1280, 1280>}, {pipeline_mode = #tpu.pipeline_mode<synchronous>, transform_indices = @transform_4, window_bounds = array<i64: 1, 1280>}, {pipeline_mode = #tpu.pipeline_mode<synchronous>, transform_indices = @transform_5, window_bounds = array<i64: 1280, 1280>}, {pipeline_mode = #tpu.pipeline_mode<synchronous>, transform_indices = @transform_6, window_bounds = array<i64: 1, 1280>}, {pipeline_mode = #tpu.pipeline_mode<synchronous>, transform_indices = @transform_7, window_bounds = array<i64: 1280, 128>}, {pipeline_mode = #tpu.pipeline_mode<synchronous>, transform_indices = @transform_8, window_bounds = array<i64: 1, 128>}, {transform_indices = @transform_9, window_bounds = array<i64: 8, 128>}]} {
    %c0 = arith.constant 0 : index
    %c0_0 = arith.constant 0 : index
    %0 = vector.load %arg1[%c0, %c0_0] : memref<8x1412xf32, #tpu.memory_space<vmem>>, vector<8x1412xf32>
    %1 = arith.truncf %0 : vector<8x1412xf32> to vector<8x1412xbf16>
    %c0_1 = arith.constant 0 : index
    %c0_2 = arith.constant 0 : index
    %2 = vector.load %arg2[%c0_1, %c0_2] : memref<1412x1280xbf16, #tpu.memory_space<vmem>>, vector<1412x1280xbf16>
    %cst = arith.constant dense<0.000000e+00> : vector<8x1280xf32>
    %3 = tpu.matmul %1, %2, %cst {dimension_numbers = #tpu.dot_dimension_numbers<[1], [0], [0], [1], [0, 0, 1, 1], [], []>} : vector<8x1412xbf16>, vector<1412x1280xbf16>, vector<8x1280xf32> -> vector<8x1280xf32>
    %c0_3 = arith.constant 0 : index
    %c0_4 = arith.constant 0 : index
    %4 = vector.load %arg3[%c0_3, %c0_4] : memref<1x1280xf32, #tpu.memory_space<vmem>>, vector<1x1280xf32>
    %5 = vector.broadcast %4 : vector<1x1280xf32> to vector<8x1280xf32>
    %6 = arith.addf %3, %5 : vector<8x1280xf32>
    %cst_5 = arith.constant 0.000000e+00 : f32
    %7 = vector.broadcast %cst_5 : f32 to vector<8x1280xf32>
    %8 = arith.maximumf %6, %7 : vector<8x1280xf32>
    %9 = arith.truncf %8 : vector<8x1280xf32> to vector<8x1280xbf16>
    %c0_6 = arith.constant 0 : index
    %c0_7 = arith.constant 0 : index
    %10 = vector.load %arg4[%c0_6, %c0_7] : memref<1280x1280xbf16, #tpu.memory_space<vmem>>, vector<1280x1280xbf16>
    %cst_8 = arith.constant dense<0.000000e+00> : vector<8x1280xf32>
    %11 = tpu.matmul %9, %10, %cst_8 {dimension_numbers = #tpu.dot_dimension_numbers<[1], [0], [0], [1], [0, 0, 1, 1], [], []>} : vector<8x1280xbf16>, vector<1280x1280xbf16>, vector<8x1280xf32> -> vector<8x1280xf32>
    %c0_9 = arith.constant 0 : index
    %c0_10 = arith.constant 0 : index
    %12 = vector.load %arg5[%c0_9, %c0_10] : memref<1x1280xf32, #tpu.memory_space<vmem>>, vector<1x1280xf32>
    %13 = vector.broadcast %12 : vector<1x1280xf32> to vector<8x1280xf32>
    %14 = arith.addf %11, %13 : vector<8x1280xf32>
    %cst_11 = arith.constant 0.000000e+00 : f32
    %15 = vector.broadcast %cst_11 : f32 to vector<8x1280xf32>
    %16 = arith.maximumf %14, %15 : vector<8x1280xf32>
    %17 = arith.truncf %16 : vector<8x1280xf32> to vector<8x1280xbf16>
    %c0_12 = arith.constant 0 : index
    %c0_13 = arith.constant 0 : index
    %18 = vector.load %arg6[%c0_12, %c0_13] : memref<1280x1280xbf16, #tpu.memory_space<vmem>>, vector<1280x1280xbf16>
    %cst_14 = arith.constant dense<0.000000e+00> : vector<8x1280xf32>
    %19 = tpu.matmul %17, %18, %cst_14 {dimension_numbers = #tpu.dot_dimension_numbers<[1], [0], [0], [1], [0, 0, 1, 1], [], []>} : vector<8x1280xbf16>, vector<1280x1280xbf16>, vector<8x1280xf32> -> vector<8x1280xf32>
    %c0_15 = arith.constant 0 : index
    %c0_16 = arith.constant 0 : index
    %20 = vector.load %arg7[%c0_15, %c0_16] : memref<1x1280xf32, #tpu.memory_space<vmem>>, vector<1x1280xf32>
    %21 = vector.broadcast %20 : vector<1x1280xf32> to vector<8x1280xf32>
    %22 = arith.addf %19, %21 : vector<8x1280xf32>
    %cst_17 = arith.constant 0.000000e+00 : f32
    %23 = vector.broadcast %cst_17 : f32 to vector<8x1280xf32>
    %24 = arith.maximumf %22, %23 : vector<8x1280xf32>
    %25 = arith.truncf %24 : vector<8x1280xf32> to vector<8x1280xbf16>
    %c0_18 = arith.constant 0 : index
    %c0_19 = arith.constant 0 : index
    %26 = vector.load %arg8[%c0_18, %c0_19] : memref<1280x128xbf16, #tpu.memory_space<vmem>>, vector<1280x128xbf16>
    %cst_20 = arith.constant dense<0.000000e+00> : vector<8x128xf32>
    %27 = tpu.matmul %25, %26, %cst_20 {dimension_numbers = #tpu.dot_dimension_numbers<[1], [0], [0], [1], [0, 0, 1, 1], [], []>} : vector<8x1280xbf16>, vector<1280x128xbf16>, vector<8x128xf32> -> vector<8x128xf32>
    %c0_21 = arith.constant 0 : index
    %c0_22 = arith.constant 0 : index
    %28 = vector.load %arg9[%c0_21, %c0_22] : memref<1x128xf32, #tpu.memory_space<vmem>>, vector<1x128xf32>
    %29 = vector.broadcast %28 : vector<1x128xf32> to vector<8x128xf32>
    %30 = arith.addf %27, %29 : vector<8x128xf32>
    %31 = arith.negf %30 : vector<8x128xf32>
    %32 = math.exp %31 : vector<8x128xf32>
    %cst_23 = arith.constant 1.000000e+00 : f32
    %33 = vector.broadcast %cst_23 : f32 to vector<8x128xf32>
    %34 = arith.addf %33, %32 : vector<8x128xf32>
    %35 = arith.divf %33, %34 : vector<8x128xf32>
    %36 = arith.truncf %35 : vector<8x128xf32> to vector<8x128xbf16>
    %c0_24 = arith.constant 0 : index
    %c0_25 = arith.constant 0 : index
    %37 = vector.load %arg10[%c0_24, %c0_25] : memref<8x128xbf16, #tpu.memory_space<vmem>>, vector<8x128xbf16>
    tpu.vector_store %arg10[%c0_24, %c0_25], %36 {strides = array<i32>} : memref<8x128xbf16, #tpu.memory_space<vmem>>, vector<8x128xbf16>,
    return
  }
  func.func @transform_0(%arg0: i32) -> (i32, i32) {
    %c0_i32 = arith.constant 0 : i32
    %c0_i32_0 = arith.constant 0 : i32
    return %arg0, %c0_i32 : i32, i32
  }
  func.func @transform_1(%arg0: i32) -> (i32, i32) {
    %c0_i32 = arith.constant 0 : i32
    %c0_i32_0 = arith.constant 0 : i32
    %c0_i32_1 = arith.constant 0 : i32
    return %c0_i32, %c0_i32_0 : i32, i32
  }
  func.func @transform_2(%arg0: i32) -> (i32, i32) {
    %c0_i32 = arith.constant 0 : i32
    %c0_i32_0 = arith.constant 0 : i32
    %c0_i32_1 = arith.constant 0 : i32
    return %c0_i32, %c0_i32_0 : i32, i32
  }
  func.func @transform_3(%arg0: i32) -> (i32, i32) {
    %c0_i32 = arith.constant 0 : i32
    %c0_i32_0 = arith.constant 0 : i32
    %c0_i32_1 = arith.constant 0 : i32
    return %c0_i32, %c0_i32_0 : i32, i32
  }
  func.func @transform_4(%arg0: i32) -> (i32, i32) {
    %c0_i32 = arith.constant 0 : i32
    %c0_i32_0 = arith.constant 0 : i32
    %c0_i32_1 = arith.constant 0 : i32
    return %c0_i32, %c0_i32_0 : i32, i32
  }
  func.func @transform_5(%arg0: i32) -> (i32, i32) {
    %c0_i32 = arith.constant 0 : i32
    %c0_i32_0 = arith.constant 0 : i32
    %c0_i32_1 = arith.constant 0 : i32
    return %c0_i32, %c0_i32_0 : i32, i32
  }
  func.func @transform_6(%arg0: i32) -> (i32, i32) {
    %c0_i32 = arith.constant 0 : i32
    %c0_i32_0 = arith.constant 0 : i32
    %c0_i32_1 = arith.constant 0 : i32
    return %c0_i32, %c0_i32_0 : i32, i32
  }
  func.func @transform_7(%arg0: i32) -> (i32, i32) {
    %c0_i32 = arith.constant 0 : i32
    %c0_i32_0 = arith.constant 0 : i32
    %c0_i32_1 = arith.constant 0 : i32
    return %c0_i32, %c0_i32_0 : i32, i32
  }
  func.func @transform_8(%arg0: i32) -> (i32, i32) {
    %c0_i32 = arith.constant 0 : i32
    %c0_i32_0 = arith.constant 0 : i32
    %c0_i32_1 = arith.constant 0 : i32
    return %c0_i32, %c0_i32_0 : i32, i32
  }
  func.func @transform_9(%arg0: i32) -> (i32, i32) {
    %c0_i32 = arith.constant 0 : i32
    %c0_i32_0 = arith.constant 0 : i32
    return %arg0, %c0_i32 : i32, i32
  }
}

</mosaic_0001>

<bundles_post_ra>
// kernel: tpu_custom_call.1
= control target key start
LH: loop header
LB: loop body
LE: loop exit
PB: predicated region body
PF: predicated region fallthrough
CT: control target
= control target key end

     0   :  { %14 = vsyncpa [#allocation3], 0  ;;  %s27118_s0 = inlined_call_operand.hbm [shape: f32[8,1412], index: 0, kind: input, shape index: {}]   ;;  %s27119_s1 = inlined_call_operand.hbm [shape: bf16[1412,1280], index: 1, kind: input, shape index: {}]   ;;  %s27120_s2 = inlined_call_operand.hbm [shape: f32[1,1280], index: 2, kind: input, shape index: {}]   ;;  %s27121_s3 = inlined_call_operand.hbm [shape: bf16[1280,1280], index: 3, kind: input, shape index: {}]   ;;  %s27122_s4 = inlined_call_operand.hbm [shape: f32[1,1280], index: 4, kind: input, shape index: {}]   ;;  %s27123_s5 = inlined_call_operand.hbm [shape: bf16[1280,1280], index: 5, kind: input, shape index: {}]   ;;  %s27124_s6 = inlined_call_operand.hbm [shape: f32[1,1280], index: 6, kind: input, shape index: {}]   ;;  %s27125_s7 = inlined_call_operand.hbm [shape: bf16[1280,128], index: 7, kind: input, shape index: {}]   ;;  %s27126_s8 = inlined_call_operand.hbm [shape: f32[1,128], index: 8, kind: input, shape index: {}]   ;;  %s27127_s9 = inlined_call_operand.hbm [shape: bf16[8,128], index: 9, kind: output, shape index: {}]  }
   0x1   :  { %15 = vsyncpa [#allocation6], 0 }
   0x2   :  { %16 = vsyncpa [#allocation9], 0 }
   0x3   :  { %17 = vsyncpa [#allocation12], 0 }
   0x4   :  { %18 = vsyncpa [#allocation15], 0 }
   0x5   :  { %19 = vsyncpa [#allocation4], 0  ;;  %s26533_s30 = smov [#allocation5]   ;;  %s26301_s13 = scalar_lea.hbm %s27119_s1, 113280 }
   0x6   :  { %s35_s10 = sshll.u32 %s26533_s30, 4  ;;  %p26302_p0 = scmp.ne.s32.totalorder %s27119_s1, %s26301_s13  ;;  %s36_s10 = int_to_ptr.vmem [resolvable:$true] %s35_s10 }
   0x7   :  { %p26305_p1 = scmp.lt.u32.totalorder %s26301_s13, %s27119_s1 }
   0x9   :  { %p26307_p2 = pnand %p26305_p1, %p26302_p0 }
   0xb   :  { %26310 = shalt.err (!%p26307_p2)
}
   0xc   :  { %s26311_s18 = scalar_lea.vmem %s36_s10, 113280  ;;  %p26316_p4 = scmp.lt.s32.totalorder %s36_s10, %s36_s10 }
   0xd   :  { %p26312_p3 = scmp.ne.s32.totalorder %s36_s10, %s26311_s18  ;;  %p26317_p5 = scmp.lt.s32.totalorder %s26311_s18, %s26311_s18 }
   0xf   :  { %p26318_p6 = por %p26317_p5, %p26316_p4 }
  0x11   :  { %p26319_p7 = pnand %p26318_p6, %p26312_p3 }
  0x13   :  { %26322 = shalt.err (!%p26319_p7)
}
  0x14   :  { %s26534_s19 = smov 640   ;;  %s26535_s20 = smov 40  }
  0x15   :  { %41 = dma.hbm_to_vmem [thread:$0]  %s27119_s1, 113280, %s36_s10, [#allocation6], %s26534_s19, %s26534_s19, %s26535_s20  }
  0x16   :  { %s26536_s23 = smov [#allocation8]   ;;  %s26537_s25 = smov [#allocation11]  }
  0x17   :  { %s57_s24 = sshll.u32 %s26536_s23, 4  ;;  %s79_s26 = sshll.u32 %s26537_s25, 4  ;;  %s58_s24 = int_to_ptr.vmem [resolvable:$true] %s57_s24  ;;  %s80_s26 = int_to_ptr.vmem [resolvable:$true] %s79_s26 }
  0x18   :  { %s26323_s29 = scalar_lea.hbm %s27121_s3, 102400 }
  0x19   :  { %p26324_p8 = scmp.ne.s32.totalorder %s27121_s3, %s26323_s29  ;;  %p26327_p9 = scmp.lt.u32.totalorder %s26323_s29, %s27121_s3 }
  0x1b   :  { %p26329_p10 = pnand %p26327_p9, %p26324_p8 }
  0x1d   :  { %26332 = shalt.err (!%p26329_p10)
}
  0x1e   :  { %s26333_s1 = scalar_lea.vmem %s58_s24, 102400  ;;  %p26338_p12 = scmp.lt.s32.totalorder %s58_s24, %s58_s24 }
  0x1f   :  { %p26334_p11 = scmp.ne.s32.totalorder %s58_s24, %s26333_s1  ;;  %p26339_p13 = scmp.lt.s32.totalorder %s26333_s1, %s26333_s1 }
  0x21   :  { %p26340_p0 = por %p26339_p13, %p26338_p12 }
  0x23   :  { %p26341_p1 = pnand %p26340_p0, %p26334_p11 }
  0x25   :  { %26344 = shalt.err (!%p26341_p1)
}
  0x26   :  { %63 = dma.hbm_to_vmem [thread:$0]  %s27121_s3, 102400, %s58_s24, [#allocation9], %s26534_s19, %s26534_s19, %s26535_s20  }
  0x27   :  { %s26345_s17 = scalar_lea.hbm %s27123_s5, 102400 }
  0x28   :  { %p26346_p2 = scmp.ne.s32.totalorder %s27123_s5, %s26345_s17  ;;  %p26349_p3 = scmp.lt.u32.totalorder %s26345_s17, %s27123_s5 }
  0x2a   :  { %p26351_p4 = pnand %p26349_p3, %p26346_p2 }
  0x2c   :  { %26354 = shalt.err (!%p26351_p4)
}
  0x2d   :  { %s26355_s25 = scalar_lea.vmem %s80_s26, 102400  ;;  %p26360_p6 = scmp.lt.s32.totalorder %s80_s26, %s80_s26 }
  0x2e   :  { %p26356_p5 = scmp.ne.s32.totalorder %s80_s26, %s26355_s25  ;;  %p26361_p7 = scmp.lt.s32.totalorder %s26355_s25, %s26355_s25 }
  0x30   :  { %p26362_p8 = por %p26361_p7, %p26360_p6 }
  0x32   :  { %p26363_p9 = pnand %p26362_p8, %p26356_p5 }
  0x34   :  { %26366 = shalt.err (!%p26363_p9)
}
  0x35   :  { %85 = dma.hbm_to_vmem [thread:$0]  %s27123_s5, 102400, %s80_s26, [#allocation12], %s26534_s19, %s26534_s19, %s26535_s20  }
  0x36   :  { %s26538_s27 = smov [#allocation14]   ;;  %s26367_s11 = scalar_lea.hbm %s27125_s7, 10240 }
  0x37   :  { %s101_s28 = sshll.u32 %s26538_s27, 4  ;;  %p26368_p10 = scmp.ne.s32.totalorder %s27125_s7, %s26367_s11  ;;  %s102_s28 = int_to_ptr.vmem [resolvable:$true] %s101_s28 }
  0x38   :  { %p26371_p11 = scmp.lt.u32.totalorder %s26367_s11, %s27125_s7 }
  0x3a   :  { %p26373_p12 = pnand %p26371_p11, %p26368_p10 }
  0x3c   :  { %26376 = shalt.err (!%p26373_p12)
}
  0x3d   :  { %s26377_s14 = scalar_lea.vmem %s102_s28, 10240  ;;  %p26382_p0 = scmp.lt.s32.totalorder %s102_s28, %s102_s28 }
  0x3e   :  { %p26378_p13 = scmp.ne.s32.totalorder %s102_s28, %s26377_s14  ;;  %p26383_p1 = scmp.lt.s32.totalorder %s26377_s14, %s26377_s14 }
  0x40   :  { %p26384_p2 = por %p26383_p1, %p26382_p0 }
  0x42   :  { %p26385_p3 = pnand %p26384_p2, %p26378_p13 }
  0x44   :  { %26388 = shalt.err (!%p26385_p3)
}
  0x45   :  { %s26539_s5 = smov 64   ;;  %s26540_s19 = smov 4  }
  0x46   :  { %107 = dma.hbm_to_vmem [thread:$0]  %s27125_s7, 10240, %s102_s28, [#allocation15], %s26539_s5, %s26539_s5, %s26540_s19  }
  0x47   :  { %s26541_s15 = smov [#allocation2]   ;;  %s26542_s17 = smov [#allocation7]  }
  0x48   :  { %s26_s16 = sshll.u32 %s26541_s15, 4  ;;  %s48_s18 = sshll.u32 %s26542_s17, 4  ;;  %s27_s16 = int_to_ptr.vmem [resolvable:$true] %s26_s16  ;;  %s49_s18 = int_to_ptr.vmem [resolvable:$true] %s48_s18 }
  0x49   :  { %s26389_s23 = scalar_lea.hbm %s27118_s0, 1536 }
  0x4a   :  { %p26390_p4 = scmp.ne.s32.totalorder %s27118_s0, %s26389_s23  ;;  %p26393_p5 = scmp.lt.u32.totalorder %s26389_s23, %s27118_s0 }
  0x4c   :  { %p26395_p6 = pnand %p26393_p5, %p26390_p4 }
  0x4e   :  { %26398 = shalt.err (!%p26395_p6)
}
  0x4f   :  { %s26399_s7 = scalar_lea.vmem %s27_s16, 1536  ;;  %p26404_p8 = scmp.lt.s32.totalorder %s27_s16, %s27_s16 }
  0x50   :  { %p26400_p7 = scmp.ne.s32.totalorder %s27_s16, %s26399_s7  ;;  %p26405_p9 = scmp.lt.s32.totalorder %s26399_s7, %s26399_s7 }
  0x52   :  { %p26406_p10 = por %p26405_p9, %p26404_p8 }
  0x54   :  { %p26407_p11 = pnand %p26406_p10, %p26400_p7 }
  0x56   :  { %26410 = shalt.err (!%p26407_p11)
}
  0x57   :  { %29 = dma.hbm_to_vmem [thread:$0]  %s27118_s0, 1536, %s27_s16, [#allocation3]  }
  0x58   :  { %s26411_s12 = scalar_lea.hbm %s27120_s2, 160 }
  0x59   :  { %p26412_p12 = scmp.ne.s32.totalorder %s27120_s2, %s26411_s12  ;;  %p26415_p13 = scmp.lt.u32.totalorder %s26411_s12, %s27120_s2 }
  0x5b   :  { %p26417_p0 = pnand %p26415_p13, %p26412_p12 }
  0x5d   :  { %26420 = shalt.err (!%p26417_p0)
}
  0x5e   :  { %s26421_s5 = scalar_lea.vmem %s49_s18, 160  ;;  %p26426_p2 = scmp.lt.s32.totalorder %s49_s18, %s49_s18 }
  0x5f   :  { %p26422_p1 = scmp.ne.s32.totalorder %s49_s18, %s26421_s5  ;;  %p26427_p3 = scmp.lt.s32.totalorder %s26421_s5, %s26421_s5 }
  0x61   :  { %p26428_p4 = por %p26427_p3, %p26426_p2 }
  0x63   :  { %p26429_p5 = pnand %p26428_p4, %p26422_p1 }
  0x65   :  { %26432 = shalt.err (!%p26429_p5)
}
  0x66   :  { %51 = dma.hbm_to_vmem [thread:$0]  %s27120_s2, 160, %s49_s18, [#allocation6]  }
  0x67   :  { %s26543_s20 = smov [#allocation10]   ;;  %s26544_s15 = smov [#allocation13]  }
  0x68   :  { %s70_s26 = sshll.u32 %s26543_s20, 4  ;;  %s92_s16 = sshll.u32 %s26544_s15, 4  ;;  %s71_s26 = int_to_ptr.vmem [resolvable:$true] %s70_s26  ;;  %s93_s16 = int_to_ptr.vmem [resolvable:$true] %s92_s16 }
  0x69   :  { %s26433_s22 = scalar_lea.hbm %s27122_s4, 160 }
  0x6a   :  { %p26434_p6 = scmp.ne.s32.totalorder %s27122_s4, %s26433_s22  ;;  %p26437_p7 = scmp.lt.u32.totalorder %s26433_s22, %s27122_s4 }
  0x6c   :  { %p26439_p8 = pnand %p26437_p7, %p26434_p6 }
  0x6e   :  { %26442 = shalt.err (!%p26439_p8)
}
  0x6f   :  { %s26443_s2 = scalar_lea.vmem %s71_s26, 160  ;;  %p26448_p10 = scmp.lt.s32.totalorder %s71_s26, %s71_s26 }
  0x70   :  { %p26444_p9 = scmp.ne.s32.totalorder %s71_s26, %s26443_s2  ;;  %p26449_p11 = scmp.lt.s32.totalorder %s26443_s2, %s26443_s2 }
  0x72   :  { %p26450_p12 = por %p26449_p11, %p26448_p10 }
  0x74   :  { %p26451_p13 = pnand %p26450_p12, %p26444_p9 }
  0x76   :  { %26454 = shalt.err (!%p26451_p13)
}
  0x77   :  { %73 = dma.hbm_to_vmem [thread:$0]  %s27122_s4, 160, %s71_s26, [#allocation9]  }
  0x78   :  { %s26455_s29 = scalar_lea.hbm %s27124_s6, 160 }
  0x79   :  { %p26456_p0 = scmp.ne.s32.totalorder %s27124_s6, %s26455_s29  ;;  %p26459_p1 = scmp.lt.u32.totalorder %s26455_s29, %s27124_s6 }
  0x7b   :  { %p26461_p2 = pnand %p26459_p1, %p26456_p0 }
  0x7d   :  { %26464 = shalt.err (!%p26461_p2)
}
  0x7e   :  { %s26465_s1 = scalar_lea.vmem %s93_s16, 160  ;;  %p26470_p4 = scmp.lt.s32.totalorder %s93_s16, %s93_s16 }
  0x7f   :  { %p26466_p3 = scmp.ne.s32.totalorder %s93_s16, %s26465_s1  ;;  %p26471_p5 = scmp.lt.s32.totalorder %s26465_s1, %s26465_s1 }
  0x81   :  { %p26472_p6 = por %p26471_p5, %p26470_p4 }
  0x83   :  { %p26473_p7 = pnand %p26472_p6, %p26466_p3 }
  0x85   :  { %26476 = shalt.err (!%p26473_p7)
}
  0x86   :  { %95 = dma.hbm_to_vmem [thread:$0]  %s27124_s6, 160, %s93_s16, [#allocation12]  }
  0x87   :  { %s26545_s14 = smov [#allocation16]   ;;  %s26477_s20 = scalar_lea.hbm %s27126_s8, 16 }
  0x88   :  { %s114_s5 = sshll.u32 %s26545_s14, 4  ;;  %p26478_p8 = scmp.ne.s32.totalorder %s27126_s8, %s26477_s20  ;;  %s115_s5 = int_to_ptr.vmem [resolvable:$true] %s114_s5 }
  0x89   :  { %p26481_p9 = scmp.lt.u32.totalorder %s26477_s20, %s27126_s8 }
  0x8b   :  { %p26483_p10 = pnand %p26481_p9, %p26478_p8 }
  0x8d   :  { %26486 = shalt.err (!%p26483_p10)
}
  0x8e   :  { %s26487_s22 = scalar_lea.vmem %s115_s5, 16  ;;  %s26491_s6 = scalar_lea.vmem %s115_s5, 32 }
  0x8f   :  { %p26488_p11 = scmp.ne.s32.totalorder %s115_s5, %s26487_s22  ;;  %p26492_p12 = scmp.lt.s32.totalorder %s115_s5, %s115_s5 }
  0x90   :  { %p26493_p13 = scmp.lt.s32.totalorder %s26491_s6, %s26487_s22 }
  0x92   :  { %p26494_p0 = por %p26493_p13, %p26492_p12 }
  0x94   :  { %p26495_p1 = pnand %p26494_p0, %p26488_p11 }
  0x96   :  { %26498 = shalt.err (!%p26495_p1)
}
  0x97   :  { %117 = dma.hbm_to_vmem [thread:$0]  %s27126_s8, 16, %s115_s5, [#allocation15]  }
  0x98   :  { %26521 = dma.done.wait [#allocation3], 1536  }
  0x99   :  { %26522 = vsyncadd [#allocation3], 4294965760 }
  0x9a   :  { %26523 = dma.done.wait [#allocation6], 113440  }
  0x9b   :  { %26524 = vsyncadd [#allocation6], 4294853856 }
  0x9c   :  { %26525 = dma.done.wait [#allocation9], 102560  }
  0x9d   :  { %26526 = vsyncadd [#allocation9], 4294864736 }
  0x9e   :  { %26527 = dma.done.wait [#allocation12], 102560  }
  0x9f   :  { %26528 = vsyncadd [#allocation12], 4294864736 }
  0xa0   :  { %26529 = dma.done.wait [#allocation15], 10256  }
  0xa1   :  { %26530 = vsyncadd [#allocation15], 4294957040  ;;  %v22485_v0 = vld [vmem:[#allocation5 + $0x4] ss:$40 sps:$4 sm:$0xff]   ;;  %v22489_v2 = vld [vmem:[#allocation5] ss:$40 sps:$4 sm:$0xff]  }
  0xa2   :  { %v22487_v1 = vld [vmem:[#allocation5 + $0x50c] ss:$40 sps:$4 sm:$0xff]   ;;  %5569 = vmatprep.subr.bf16.mxu0 %v22485_v0  ;;  %v22490_v3 = vld [vmem:[#allocation5 + $0x508] ss:$40 sps:$4 sm:$0xff]   ;;  %v22493_v5 = vld [vmem:[#allocation5 + $0x55c] ss:$40 sps:$4 sm:$0xff]  }
  0xa3   :  { %5856 = vmatprep.subr.bf16.mxu1 %v22487_v1  ;;  %v22491_v4 = vld [vmem:[#allocation5 + $0x54] ss:$40 sps:$4 sm:$0xff]   ;;  %5570 = vmatpush1.bf16.msra.mxu0 %v22489_v2  ;;  %v22495_v6 = vld [vmem:[#allocation5 + $0x50] ss:$40 sps:$4 sm:$0xff]   ;;  %v22497_v8 = vld [vmem:[#allocation5 + $0xa4] ss:$40 sps:$4 sm:$0xff]  }
  0xa4   :  { %5857 = vmatpush1.bf16.msra.mxu1 %v22490_v3  ;;  %5571 = vmatprep.subr.bf16.mxu0 %v22491_v4  ;;  %v22496_v7 = vld [vmem:[#allocation5 + $0x558] ss:$40 sps:$4 sm:$0xff]   ;;  %v22499_v9 = vld [vmem:[#allocation5 + $0x5ac] ss:$40 sps:$4 sm:$0xff]   ;;  %v22502_v11 = vld [vmem:[#allocation5 + $0x5a8] ss:$40 sps:$4 sm:$0xff]  }
  0xa5   :  { %5858 = vmatprep.subr.bf16.mxu1 %v22493_v5  ;;  %v22501_v10 = vld [vmem:[#allocation5 + $0xa0] ss:$40 sps:$4 sm:$0xff]   ;;  %v22503_v12 = vld [vmem:[#allocation5 + $0xf4] ss:$40 sps:$4 sm:$0xff]   ;;  %v22507_v14 = vld [vmem:[#allocation5 + $0xf0] ss:$40 sps:$4 sm:$0xff]  }
  0xa6   :  { %v22505_v13 = vld [vmem:[#allocation5 + $0x5fc] ss:$40 sps:$4 sm:$0xff]   ;;  %v22508_v15 = vld [vmem:[#allocation5 + $0x5f8] ss:$40 sps:$4 sm:$0xff]   ;;  %v22511_v17 = vld [vmem:[#allocation5 + $0x64c] ss:$40 sps:$4 sm:$0xff]  }
  0xa7   :  { %5572 = vmatpush1.bf16.msra.mxu0 %v22495_v6  ;;  %v22509_v16 = vld [vmem:[#allocation5 + $0x144] ss:$40 sps:$4 sm:$0xff]   ;;  %v22513_v18 = vld [vmem:[#allocation5 + $0x140] ss:$40 sps:$4 sm:$0xff]   ;;  %v22515_v20 = vld [vmem:[#allocation5 + $0x194] ss:$40 sps:$4 sm:$0xff]  }
  0xa8   :  { %5859 = vmatpush1.bf16.msra.mxu1 %v22496_v7  ;;  %5573 = vmatprep.subr.bf16.mxu0 %v22497_v8  ;;  %v22514_v19 = vld [vmem:[#allocation5 + $0x648] ss:$40 sps:$4 sm:$0xff]   ;;  %v22517_v21 = vld [vmem:[#allocation5 + $0x69c] ss:$40 sps:$4 sm:$0xff]   ;;  %v22520_v23 = vld [vmem:[#allocation5 + $0x698] ss:$40 sps:$4 sm:$0xff]  }
  0xa9   :  { %5860 = vmatprep.subr.bf16.mxu1 %v22499_v9  ;;  %v22519_v22 = vld [vmem:[#allocation5 + $0x190] ss:$40 sps:$4 sm:$0xff]   ;;  %v22521_v24 = vld [vmem:[#allocation5 + $0x1e4] ss:$40 sps:$4 sm:$0xff]   ;;  %v22525_v26 = vld [vmem:[#allocation5 + $0x1e0] ss:$40 sps:$4 sm:$0xff]  }
  0xaa   :  { %v22523_v25 = vld [vmem:[#allocation5 + $0x6ec] ss:$40 sps:$4 sm:$0xff]   ;;  %v22526_v27 = vld [vmem:[#allocation5 + $0x6e8] ss:$40 sps:$4 sm:$0xff]   ;;  %v22529_v29 = vld [vmem:[#allocation5 + $0x73c] ss:$40 sps:$4 sm:$0xff]  }
  0xab   :  { %5574 = vmatpush1.bf16.msra.mxu0 %v22501_v10  ;;  %v22527_v28 = vld [vmem:[#allocation5 + $0x234] ss:$40 sps:$4 sm:$0xff]   ;;  %v22531_v30 = vld [vmem:[#allocation5 + $0x230] ss:$40 sps:$4 sm:$0xff]   ;;  %v22533_v32 = vld [vmem:[#allocation5 + $0x284] ss:$40 sps:$4 sm:$0xff]  }
  0xac   :  { %5861 = vmatpush1.bf16.msra.mxu1 %v22502_v11  ;;  %5575 = vmatprep.subr.bf16.mxu0 %v22503_v12  ;;  %v22532_v31 = vld [vmem:[#allocation5 + $0x738] ss:$40 sps:$4 sm:$0xff]   ;;  %v22535_v33 = vld [vmem:[#allocation5 + $0x78c] ss:$40 sps:$4 sm:$0xff]   ;;  %v22538_v35 = vld [vmem:[#allocation5 + $0x788] ss:$40 sps:$4 sm:$0xff]  }
  0xad   :  { %5862 = vmatprep.subr.bf16.mxu1 %v22505_v13  ;;  %v22537_v34 = vld [vmem:[#allocation5 + $0x280] ss:$40 sps:$4 sm:$0xff]   ;;  %v22539_v36 = vld [vmem:[#allocation5 + $0x2d4] ss:$40 sps:$4 sm:$0xff]   ;;  %v22543_v38 = vld [vmem:[#allocation5 + $0x2d0] ss:$40 sps:$4 sm:$0xff]  }
  0xae   :  { %v22541_v37 = vld [vmem:[#allocation5 + $0x7dc] ss:$40 sps:$4 sm:$0xff]   ;;  %v22544_v39 = vld [vmem:[#allocation5 + $0x7d8] ss:$40 sps:$4 sm:$0xff]   ;;  %v22547_v41 = vld [vmem:[#allocation5 + $0x82c] ss:$40 sps:$4 sm:$0xff]  }
  0xaf   :  { %5576 = vmatpush1.bf16.msra.mxu0 %v22507_v14  ;;  %v22545_v40 = vld [vmem:[#allocation5 + $0x324] ss:$40 sps:$4 sm:$0xff]   ;;  %v22549_v42 = vld [vmem:[#allocation5 + $0x320] ss:$40 sps:$4 sm:$0xff]   ;;  %v22551_v44 = vld [vmem:[#allocation5 + $0x374] ss:$40 sps:$4 sm:$0xff]  }
  0xb0   :  { %5863 = vmatpush1.bf16.msra.mxu1 %v22508_v15  ;;  %5577 = vmatprep.subr.bf16.mxu0 %v22509_v16  ;;  %v22550_v43 = vld [vmem:[#allocation5 + $0x828] ss:$40 sps:$4 sm:$0xff]   ;;  %v22553_v45 = vld [vmem:[#allocation5 + $0x87c] ss:$40 sps:$4 sm:$0xff]   ;;  %v22556_v49 = vld [vmem:[#allocation5 + $0x878] ss:$40 sps:$4 sm:$0xff]  }
  0xb1   :  { %5864 = vmatprep.subr.bf16.mxu1 %v22511_v17  ;;  %v147_v46 = vld [vmem:[#allocation2 + $0x8] sm:$0xff]  ;;  %v22555_v47 = vld [vmem:[#allocation5 + $0x370] ss:$40 sps:$4 sm:$0xff]   ;;  %v22563_v56 = vld [vmem:[#allocation5 + $0x414] ss:$40 sps:$4 sm:$0xff]   ;;  %vm5534_vm0 = vcmask 31744  }
  0xb2   :  { %v26714_v48 = vpack.c.bf16 %v147_v46, %v147_v46  ;;  %v149_v50 = vld [vmem:[#allocation2 + $0x18] sm:$0xff]  ;;  %v22557_v51 = vld [vmem:[#allocation5 + $0x3c4] ss:$40 sps:$4 sm:$0xff]   ;;  %v22561_v54 = vld [vmem:[#allocation5 + $0x3c0] ss:$40 sps:$4 sm:$0xff]   ;;  %vm5538_vm1 = vcmask 1041408  }
  0xb3   :  { %5578 = vmatpush1.bf16.msra.mxu0 %v22513_v18  ;;  %v22559_v52 = vld [vmem:[#allocation5 + $0x8cc] ss:$40 sps:$4 sm:$0xff]   ;;  %v26716_v53 = vpack.c.bf16 %v149_v50, %v149_v50  ;;  %v22562_v55 = vld [vmem:[#allocation5 + $0x8c8] ss:$40 sps:$4 sm:$0xff]   ;;  %v22565_v57 = vld [vmem:[#allocation5 + $0x91c] ss:$40 sps:$4 sm:$0xff]  }
  0xb4   :  { %5865 = vmatpush1.bf16.msra.mxu1 %v22514_v19  ;;  %5579 = vmatprep.subr.bf16.mxu0 %v22515_v20  ;;  %v22567_v58 = vld [vmem:[#allocation5 + $0x410] ss:$40 sps:$4 sm:$0xff]   ;;  %v22569_v60 = vld [vmem:[#allocation5 + $0x464] ss:$40 sps:$4 sm:$0xff]   ;;  %v22573_v62 = vld [vmem:[#allocation5 + $0x460] ss:$40 sps:$4 sm:$0xff]  }
  0xb5   :  { %5866 = vmatprep.subr.bf16.mxu1 %v22517_v21  ;;  %5601 = vmatprep.mubr.bf16.mxu0 %v26714_v48  ;;  %v22568_v59 = vld [vmem:[#allocation5 + $0x918] ss:$40 sps:$4 sm:$0xff]   ;;  %v22571_v61 = vld [vmem:[#allocation5 + $0x96c] ss:$40 sps:$4 sm:$0xff]   ;;  %v22574_v63 = vld [vmem:[#allocation5 + $0x968] ss:$40 sps:$4 sm:$0xff]  }
  0xb6   :  { %5888 = vmatprep.mubr.bf16.mxu1 %v26716_v53  ;;  %v22575_v0 = vld [vmem:[#allocation5 + $0x4b4] ss:$40 sps:$4 sm:$0xff]   ;;  %v22579_v2 = vld [vmem:[#allocation5 + $0x4b0] ss:$40 sps:$4 sm:$0xff]   ;;  %v22583_v4 = vld [vmem:[#allocation5 + $0x504] ss:$40 sps:$4 sm:$0xff]  }
  0xb7   :  { %5580 = vmatpush1.bf16.msra.mxu0 %v22519_v22  ;;  %v22577_v1 = vld [vmem:[#allocation5 + $0x9bc] ss:$40 sps:$4 sm:$0xff]   ;;  %v22580_v3 = vld [vmem:[#allocation5 + $0x9b8] ss:$40 sps:$4 sm:$0xff]   ;;  %v148_v6 = vld [vmem:[#allocation2 + $0x10] sm:$0xff]  ;;  %s26546_s8 = smov [#allocation17]  }
  0xb8   :  { %5867 = vmatpush1.bf16.msra.mxu1 %v22520_v23  ;;  %5581 = vmatprep.subr.bf16.mxu0 %v22521_v24  ;;  %v146_v5 = vld [vmem:[#allocation2] sm:$0xff]  ;;  %v22586_v7 = vld [vmem:[#allocation5 + $0xa0c] ss:$40 sps:$4 sm:$0xff]   ;;  %v22584_v9 = vld [vmem:[#allocation5 + $0xa08] ss:$40 sps:$4 sm:$0xff]   ;;  %v26722_v11 = vpack.c.bf16 %v148_v6, %v148_v6  ;;  %s19478_s25 = sshll.u32 %s26546_s8, 4  ;;  %s19479_s25 = int_to_ptr.vmem [resolvable:$true] %s19478_s25 }
  0xb9   :  { %5868 = vmatprep.subr.bf16.mxu1 %v22523_v25  ;;  %v22581_v8 = vld [vmem:[#allocation5 + $0x500] ss:$40 sps:$4 sm:$0xff]   ;;  %v26720_v10 = vpack.c.bf16 %v146_v5, %v146_v5  ;;  %v22589_v12 = vld [vmem:[#allocation5 + $0x554] ss:$40 sps:$4 sm:$0xff]   ;;  %v22587_v14 = vld [vmem:[#allocation5 + $0x550] ss:$40 sps:$4 sm:$0xff]   ;;  %p26504_p3 = scmp.lt.s32.totalorder %s19479_s25, %s19479_s25 }
  0xba   :  { %v22592_v13 = vld [vmem:[#allocation5 + $0xa5c] ss:$40 sps:$4 sm:$0xff]   ;;  %v22590_v15 = vld [vmem:[#allocation5 + $0xa58] ss:$40 sps:$4 sm:$0xff]   ;;  %v22598_v17 = vld [vmem:[#allocation5 + $0xaac] ss:$40 sps:$4 sm:$0xff]  }
  0xbb   :  { %5582 = vmatpush1.bf16.msra.mxu0 %v22525_v26  ;;  %v22595_v16 = vld [vmem:[#allocation5 + $0x5a4] ss:$40 sps:$4 sm:$0xff]   ;;  %v22593_v18 = vld [vmem:[#allocation5 + $0x5a0] ss:$40 sps:$4 sm:$0xff]   ;;  %v22601_v20 = vld [vmem:[#allocation5 + $0x5f4] ss:$40 sps:$4 sm:$0xff]  }
  0xbc   :  { %5869 = vmatpush1.bf16.msra.mxu1 %v22526_v27  ;;  %5583 = vmatprep.subr.bf16.mxu0 %v22527_v28  ;;  %v22596_v19 = vld [vmem:[#allocation5 + $0xaa8] ss:$40 sps:$4 sm:$0xff]   ;;  %v22604_v21 = vld [vmem:[#allocation5 + $0xafc] ss:$40 sps:$4 sm:$0xff]   ;;  %v22602_v23 = vld [vmem:[#allocation5 + $0xaf8] ss:$40 sps:$4 sm:$0xff]  }
  0xbd   :  { %5870 = vmatprep.subr.bf16.mxu1 %v22529_v29  ;;  %v22599_v22 = vld [vmem:[#allocation5 + $0x5f0] ss:$40 sps:$4 sm:$0xff]   ;;  %v22607_v24 = vld [vmem:[#allocation5 + $0x644] ss:$40 sps:$4 sm:$0xff]   ;;  %v22605_v26 = vld [vmem:[#allocation5 + $0x640] ss:$40 sps:$4 sm:$0xff]  }
  0xbe   :  { %v22610_v25 = vld [vmem:[#allocation5 + $0xb4c] ss:$40 sps:$4 sm:$0xff]   ;;  %v22608_v27 = vld [vmem:[#allocation5 + $0xb48] ss:$40 sps:$4 sm:$0xff]   ;;  %v22616_v29 = vld [vmem:[#allocation5 + $0xb9c] ss:$40 sps:$4 sm:$0xff]  }
  0xbf   :  { %5584 = vmatpush1.bf16.msra.mxu0 %v22531_v30  ;;  %v22613_v28 = vld [vmem:[#allocation5 + $0x694] ss:$40 sps:$4 sm:$0xff]   ;;  %v22611_v30 = vld [vmem:[#allocation5 + $0x690] ss:$40 sps:$4 sm:$0xff]   ;;  %v22665_v6 = vld [vmem:[#allocation5 + $0x960] ss:$40 sps:$4 sm:$0xff]  }
  0xc0   :  { %5871 = vmatpush1.bf16.msra.mxu1 %v22532_v31  ;;  %5585 = vmatprep.subr.bf16.mxu0 %v22533_v32  ;;  %v22614_v31 = vld [vmem:[#allocation5 + $0xb98] ss:$40 sps:$4 sm:$0xff]   ;;  %v22619_v32 = vld [vmem:[#allocation5 + $0x6e4] ss:$40 sps:$4 sm:$0xff]   ;;  %v22637_v46 = vld [vmem:[#allocation5 + $0x7d4] ss:$40 sps:$4 sm:$0xff]  }
  0xc1   :  { %5872 = vmatprep.subr.bf16.mxu1 %v22535_v33  ;;  %v22622_v33 = vld [vmem:[#allocation5 + $0xbec] ss:$40 sps:$4 sm:$0xff]   ;;  %v22638_v50 = vld [vmem:[#allocation5 + $0xcd8] ss:$40 sps:$4 sm:$0xff]   ;;  %s26499_s3 = scalar_lea.vmem %s19479_s25, 64 }
  0xc2   :  { %v22670_v5 = vld [vmem:[#allocation5 + $0xe6c] ss:$40 sps:$4 sm:$0xff]   ;;  %p26500_p2 = scmp.ne.s32.totalorder %s19479_s25, %s26499_s3  ;;  %p26505_p4 = scmp.lt.s32.totalorder %s26499_s3, %s26499_s3 }
  0xc3   :  { %5586 = vmatpush1.bf16.msra.mxu0 %v22537_v34  ;;  %v22617_v34 = vld [vmem:[#allocation5 + $0x6e0] ss:$40 sps:$4 sm:$0xff]  }
  0xc4   :  { %5873 = vmatpush1.bf16.msra.mxu1 %v22538_v35  ;;  %5587 = vmatprep.subr.bf16.mxu0 %v22539_v36  ;;  %v22620_v35 = vld [vmem:[#allocation5 + $0xbe8] ss:$40 sps:$4 sm:$0xff]   ;;  %p26506_p5 = por %p26505_p4, %p26504_p3 }
  0xc5   :  { %5874 = vmatprep.subr.bf16.mxu1 %v22541_v37  ;;  %v151_v36 = vld [vmem:[#allocation2 + $0x28] sm:$0xff]  ;;  %v22625_v37 = vld [vmem:[#allocation5 + $0x734] ss:$40 sps:$4 sm:$0xff]  }
  0xc6   :  { %p26507_p6 = pnand %p26506_p5, %p26500_p2 }
  0xc7   :  { %5588 = vmatpush1.bf16.msra.mxu0 %v22543_v38  ;;  %v22628_v38 = vld [vmem:[#allocation5 + $0xc3c] ss:$40 sps:$4 sm:$0xff]  }
  0xc8   :  { %5875 = vmatpush1.bf16.msra.mxu1 %v22544_v39  ;;  %5589 = vmatprep.subr.bf16.mxu0 %v22545_v40  ;;  %v26727_v39 = vpack.c.bf16 %v151_v36, %v151_v36  ;;  %v22623_v40 = vld [vmem:[#allocation5 + $0x730] ss:$40 sps:$4 sm:$0xff]   ;;  %v22701_v36 = vld [vmem:[#allocation5 + $0xb40] ss:$40 sps:$4 sm:$0xff]  }
  0xc9   :  { %5876 = vmatprep.subr.bf16.mxu1 %v22547_v41  ;;  %v22626_v41 = vld [vmem:[#allocation5 + $0xc38] ss:$40 sps:$4 sm:$0xff]  }
  0xcb   :  { %5590 = vmatpush1.bf16.msra.mxu0 %v22549_v42  ;;  %v22631_v42 = vld [vmem:[#allocation5 + $0x784] ss:$40 sps:$4 sm:$0xff]  }
  0xcc   :  { %5877 = vmatpush1.bf16.msra.mxu1 %v22550_v43  ;;  %5591 = vmatprep.subr.bf16.mxu0 %v22551_v44  ;;  %v22634_v43 = vld [vmem:[#allocation5 + $0xc8c] ss:$40 sps:$4 sm:$0xff]   ;;  %v22629_v44 = vld [vmem:[#allocation5 + $0x780] ss:$40 sps:$4 sm:$0xff]  }
  0xcd   :  { %5878 = vmatprep.subr.bf16.mxu1 %v22553_v45  ;;  %v22632_v45 = vld [vmem:[#allocation5 + $0xc88] ss:$40 sps:$4 sm:$0xff]  }
  0xcf   :  { %5592 = vmatpush1.bf16.msra.mxu0 %v22555_v47  ;;  %v22640_v47 = vld [vmem:[#allocation5 + $0xcdc] ss:$40 sps:$4 sm:$0xff]  }
  0xd0   :  { %5879 = vmatpush1.bf16.msra.mxu1 %v22556_v49  ;;  %5593 = vmatprep.subr.bf16.mxu0 %v22557_v51  ;;  %v22635_v49 = vld [vmem:[#allocation5 + $0x7d0] ss:$40 sps:$4 sm:$0xff]   ;;  %v22643_v51 = vld [vmem:[#allocation5 + $0x824] ss:$40 sps:$4 sm:$0xff]  }
  0xd1   :  { %5880 = vmatprep.subr.bf16.mxu1 %v22559_v52  ;;  %v22646_v52 = vld [vmem:[#allocation5 + $0xd2c] ss:$40 sps:$4 sm:$0xff]  }
  0xd3   :  { %5594 = vmatpush1.bf16.msra.mxu0 %v22561_v54  ;;  %v22641_v54 = vld [vmem:[#allocation5 + $0x820] ss:$40 sps:$4 sm:$0xff]  }
  0xd4   :  { %5881 = vmatpush1.bf16.msra.mxu1 %v22562_v55  ;;  %5595 = vmatprep.subr.bf16.mxu0 %v22563_v56  ;;  %v22644_v55 = vld [vmem:[#allocation5 + $0xd28] ss:$40 sps:$4 sm:$0xff]   ;;  %v22649_v56 = vld [vmem:[#allocation5 + $0x874] ss:$40 sps:$4 sm:$0xff]  }
  0xd5   :  { %5882 = vmatprep.subr.bf16.mxu1 %v22565_v57  ;;  %v22652_v57 = vld [vmem:[#allocation5 + $0xd7c] ss:$40 sps:$4 sm:$0xff]  }
  0xd7   :  { %5596 = vmatpush1.bf16.msra.mxu0 %v22567_v58  ;;  %v22647_v58 = vld [vmem:[#allocation5 + $0x870] ss:$40 sps:$4 sm:$0xff]  }
  0xd8   :  { %5883 = vmatpush1.bf16.msra.mxu1 %v22568_v59  ;;  %5597 = vmatprep.subr.bf16.mxu0 %v22569_v60  ;;  %v22650_v59 = vld [vmem:[#allocation5 + $0xd78] ss:$40 sps:$4 sm:$0xff]   ;;  %v22655_v60 = vld [vmem:[#allocation5 + $0x8c4] ss:$40 sps:$4 sm:$0xff]  }
  0xd9   :  { %5884 = vmatprep.subr.bf16.mxu1 %v22571_v61  ;;  %v22658_v61 = vld [vmem:[#allocation5 + $0xdcc] ss:$40 sps:$4 sm:$0xff]  }
  0xdb   :  { %5598 = vmatpush1.bf16.msra.mxu0 %v22573_v62  ;;  %v22653_v62 = vld [vmem:[#allocation5 + $0x8c0] ss:$40 sps:$4 sm:$0xff]  }
  0xdc   :  { %5885 = vmatpush1.bf16.msra.mxu1 %v22574_v63  ;;  %5599 = vmatprep.subr.bf16.mxu0 %v22575_v0  ;;  %v22656_v63 = vld [vmem:[#allocation5 + $0xdc8] ss:$40 sps:$4 sm:$0xff]   ;;  %v22661_v0 = vld [vmem:[#allocation5 + $0x914] ss:$40 sps:$4 sm:$0xff]  }
  0xdd   :  { %5886 = vmatprep.subr.bf16.mxu1 %v22577_v1  ;;  %v22664_v1 = vld [vmem:[#allocation5 + $0xe1c] ss:$40 sps:$4 sm:$0xff]  }
  0xdf   :  { %5600 = vmatpush1.bf16.msra.mxu0 %v22579_v2  ;;  %v22659_v2 = vld [vmem:[#allocation5 + $0x910] ss:$40 sps:$4 sm:$0xff]  }
  0xe0   :  { %5887 = vmatpush1.bf16.msra.mxu1 %v22580_v3  ;;  %5610 = vmatprep.subr.bf16.mxu0 %v22583_v4  ;;  %v22662_v3 = vld [vmem:[#allocation5 + $0xe18] ss:$40 sps:$4 sm:$0xff]   ;;  %v22667_v4 = vld [vmem:[#allocation5 + $0x964] ss:$40 sps:$4 sm:$0xff]  }
  0xe1   :  { %5897 = vmatprep.subr.bf16.mxu1 %v22586_v7  ;;  %v22668_v7 = vld [vmem:[#allocation5 + $0xe68] ss:$40 sps:$4 sm:$0xff]  }
  0xe2   :  { %5602 = vmatmul.mubr.bf16.vlgmr.msra.gmra.mrb[0].mxu0 %v26720_v10 }
  0xe3   :  { %5889 = vmatmul.mubr.bf16.vlgmr.msra.gmra.mrb[0].mxu1 %v26722_v11  ;;  %5611 = vmatpush1.bf16.msra.mxu0 %v22581_v8  ;;  %v22673_v8 = vld [vmem:[#allocation5 + $0x9b4] ss:$40 sps:$4 sm:$0xff]  }
  0xe4   :  { %5898 = vmatpush1.bf16.msra.mxu1 %v22584_v9  ;;  %5612 = vmatprep.subr.bf16.mxu0 %v22589_v12  ;;  %v22676_v9 = vld [vmem:[#allocation5 + $0xebc] ss:$40 sps:$4 sm:$0xff]   ;;  %v22671_v12 = vld [vmem:[#allocation5 + $0x9b0] ss:$40 sps:$4 sm:$0xff]  }
  0xe5   :  { %5899 = vmatprep.subr.bf16.mxu1 %v22592_v13  ;;  %5642 = vmatprep.mubr.bf16.mxu0 %v26716_v53  ;;  %v22674_v13 = vld [vmem:[#allocation5 + $0xeb8] ss:$40 sps:$4 sm:$0xff]  }
  0xe6   :  { %5929 = vmatprep.mubr.bf16.mxu1 %v26727_v39 }
  0xe7   :  { %5613 = vmatpush1.bf16.msra.mxu0 %v22587_v14  ;;  %v150_v14 = vld [vmem:[#allocation2 + $0x20] sm:$0xff] }
  0xe8   :  { %5900 = vmatpush1.bf16.msra.mxu1 %v22590_v15  ;;  %5614 = vmatprep.subr.bf16.mxu0 %v22595_v16  ;;  %v22679_v15 = vld [vmem:[#allocation5 + $0xa04] ss:$40 sps:$4 sm:$0xff]  }
  0xe9   :  { %5901 = vmatprep.subr.bf16.mxu1 %v22598_v17  ;;  %v22682_v16 = vld [vmem:[#allocation5 + $0xf0c] ss:$40 sps:$4 sm:$0xff]   ;;  %v26730_v17 = vpack.c.bf16 %v150_v14, %v150_v14  ;;  %v22758_v14 = vld [vmem:[#allocation5 + $0x1318] ss:$40 sps:$4 sm:$0xff]  }
  0xeb   :  { %5615 = vmatpush1.bf16.msra.mxu0 %v22593_v18  ;;  %v22677_v18 = vld [vmem:[#allocation5 + $0xa00] ss:$40 sps:$4 sm:$0xff]  }
  0xec   :  { %5902 = vmatpush1.bf16.msra.mxu1 %v22596_v19  ;;  %5616 = vmatprep.subr.bf16.mxu0 %v22601_v20  ;;  %v22680_v19 = vld [vmem:[#allocation5 + $0xf08] ss:$40 sps:$4 sm:$0xff]   ;;  %v22685_v20 = vld [vmem:[#allocation5 + $0xa54] ss:$40 sps:$4 sm:$0xff]  }
  0xed   :  { %5903 = vmatprep.subr.bf16.mxu1 %v22604_v21  ;;  %v22688_v21 = vld [vmem:[#allocation5 + $0xf5c] ss:$40 sps:$4 sm:$0xff]  }
  0xef   :  { %5617 = vmatpush1.bf16.msra.mxu0 %v22599_v22  ;;  %v22683_v22 = vld [vmem:[#allocation5 + $0xa50] ss:$40 sps:$4 sm:$0xff]  }
  0xf0   :  { %5904 = vmatpush1.bf16.msra.mxu1 %v22602_v23  ;;  %5618 = vmatprep.subr.bf16.mxu0 %v22607_v24  ;;  %v153_v23 = vld [vmem:[#allocation2 + $0x38] sm:$0xff] }
  0xf1   :  { %5905 = vmatprep.subr.bf16.mxu1 %v22610_v25  ;;  %v22686_v24 = vld [vmem:[#allocation5 + $0xf58] ss:$40 sps:$4 sm:$0xff]   ;;  %v22691_v25 = vld [vmem:[#allocation5 + $0xaa4] ss:$40 sps:$4 sm:$0xff]  }
  0xf3   :  { %5619 = vmatpush1.bf16.msra.mxu0 %v22605_v26  ;;  %v26734_v26 = vpack.c.bf16 %v153_v23, %v153_v23  ;;  %v22770_v23 = vld [vmem:[#allocation5 + $0x13b8] ss:$40 sps:$4 sm:$0xff]  }
  0xf4   :  { %5906 = vmatpush1.bf16.msra.mxu1 %v22608_v27  ;;  %5620 = vmatprep.subr.bf16.mxu0 %v22613_v28  ;;  %v22694_v27 = vld [vmem:[#allocation5 + $0xfac] ss:$40 sps:$4 sm:$0xff]   ;;  %v22689_v28 = vld [vmem:[#allocation5 + $0xaa0] ss:$40 sps:$4 sm:$0xff]  }
  0xf5   :  { %5907 = vmatprep.subr.bf16.mxu1 %v22616_v29  ;;  %v22692_v29 = vld [vmem:[#allocation5 + $0xfa8] ss:$40 sps:$4 sm:$0xff]  }
  0xf7   :  { %5621 = vmatpush1.bf16.msra.mxu0 %v22611_v30  ;;  %v22697_v30 = vld [vmem:[#allocation5 + $0xaf4] ss:$40 sps:$4 sm:$0xff]  }
  0xf8   :  { %5908 = vmatpush1.bf16.msra.mxu1 %v22614_v31  ;;  %5622 = vmatprep.subr.bf16.mxu0 %v22619_v32  ;;  %v22700_v31 = vld [vmem:[#allocation5 + $0xffc] ss:$40 sps:$4 sm:$0xff]   ;;  %v22695_v32 = vld [vmem:[#allocation5 + $0xaf0] ss:$40 sps:$4 sm:$0xff]  }
  0xf9   :  { %5909 = vmatprep.subr.bf16.mxu1 %v22622_v33  ;;  %v22698_v33 = vld [vmem:[#allocation5 + $0xff8] ss:$40 sps:$4 sm:$0xff]  }
  0xfb   :  { %5623 = vmatpush1.bf16.msra.mxu0 %v22617_v34  ;;  %v22703_v34 = vld [vmem:[#allocation5 + $0xb44] ss:$40 sps:$4 sm:$0xff]  }
  0xfc   :  { %5910 = vmatpush1.bf16.msra.mxu1 %v22620_v35  ;;  %5624 = vmatprep.subr.bf16.mxu0 %v22625_v37  ;;  %v22706_v35 = vld [vmem:[#allocation5 + $0x104c] ss:$40 sps:$4 sm:$0xff]   ;;  %v22704_v37 = vld [vmem:[#allocation5 + $0x1048] ss:$40 sps:$4 sm:$0xff]  }
  0xfd   :  { %5911 = vmatprep.subr.bf16.mxu1 %v22628_v38  ;;  %v22709_v38 = vld [vmem:[#allocation5 + $0xb94] ss:$40 sps:$4 sm:$0xff]  }
  0xff   :  { %5625 = vmatpush1.bf16.msra.mxu0 %v22623_v40  ;;  %v22712_v40 = vld [vmem:[#allocation5 + $0x109c] ss:$40 sps:$4 sm:$0xff]  }
 0x100   :  { %5912 = vmatpush1.bf16.msra.mxu1 %v22626_v41  ;;  %5626 = vmatprep.subr.bf16.mxu0 %v22631_v42  ;;  %v22707_v41 = vld [vmem:[#allocation5 + $0xb90] ss:$40 sps:$4 sm:$0xff]  }
 0x101   :  { %5913 = vmatprep.subr.bf16.mxu1 %v22634_v43  ;;  %v22710_v42 = vld [vmem:[#allocation5 + $0x1098] ss:$40 sps:$4 sm:$0xff]   ;;  %v22715_v43 = vld [vmem:[#allocation5 + $0xbe4] ss:$40 sps:$4 sm:$0xff]  }
 0x103   :  { %5627 = vmatpush1.bf16.msra.mxu0 %v22629_v44  ;;  %v22718_v44 = vld [vmem:[#allocation5 + $0x10ec] ss:$40 sps:$4 sm:$0xff]  }
 0x104   :  { %5914 = vmatpush1.bf16.msra.mxu1 %v22632_v45  ;;  %5628 = vmatprep.subr.bf16.mxu0 %v22637_v46  ;;  %v22713_v45 = vld [vmem:[#allocation5 + $0xbe0] ss:$40 sps:$4 sm:$0xff]  }
 0x105   :  { %5915 = vmatprep.subr.bf16.mxu1 %v22640_v47  ;;  %v22716_v46 = vld [vmem:[#allocation5 + $0x10e8] ss:$40 sps:$4 sm:$0xff]   ;;  %v22721_v47 = vld [vmem:[#allocation5 + $0xc34] ss:$40 sps:$4 sm:$0xff]  }
 0x107   :  { %5629 = vmatpush1.bf16.msra.mxu0 %v22635_v49  ;;  %v22724_v49 = vld [vmem:[#allocation5 + $0x113c] ss:$40 sps:$4 sm:$0xff]  }
 0x108   :  { %5916 = vmatpush1.bf16.msra.mxu1 %v22638_v50  ;;  %5630 = vmatprep.subr.bf16.mxu0 %v22643_v51  ;;  %v22719_v50 = vld [vmem:[#allocation5 + $0xc30] ss:$40 sps:$4 sm:$0xff]  }
 0x109   :  { %5917 = vmatprep.subr.bf16.mxu1 %v22646_v52  ;;  %v22722_v51 = vld [vmem:[#allocation5 + $0x1138] ss:$40 sps:$4 sm:$0xff]   ;;  %v22727_v52 = vld [vmem:[#allocation5 + $0xc84] ss:$40 sps:$4 sm:$0xff]  }
 0x10b   :  { %5631 = vmatpush1.bf16.msra.mxu0 %v22641_v54  ;;  %v22730_v54 = vld [vmem:[#allocation5 + $0x118c] ss:$40 sps:$4 sm:$0xff]  }
 0x10c   :  { %5918 = vmatpush1.bf16.msra.mxu1 %v22644_v55  ;;  %5632 = vmatprep.subr.bf16.mxu0 %v22649_v56  ;;  %v22725_v55 = vld [vmem:[#allocation5 + $0xc80] ss:$40 sps:$4 sm:$0xff]  }
 0x10d   :  { %5919 = vmatprep.subr.bf16.mxu1 %v22652_v57  ;;  %v22728_v56 = vld [vmem:[#allocation5 + $0x1188] ss:$40 sps:$4 sm:$0xff]   ;;  %v22733_v57 = vld [vmem:[#allocation5 + $0xcd4] ss:$40 sps:$4 sm:$0xff]  }
 0x10f   :  { %5633 = vmatpush1.bf16.msra.mxu0 %v22647_v58  ;;  %v22736_v58 = vld [vmem:[#allocation5 + $0x11dc] ss:$40 sps:$4 sm:$0xff]  }
 0x110   :  { %5920 = vmatpush1.bf16.msra.mxu1 %v22650_v59  ;;  %5634 = vmatprep.subr.bf16.mxu0 %v22655_v60  ;;  %v22731_v59 = vld [vmem:[#allocation5 + $0xcd0] ss:$40 sps:$4 sm:$0xff]  }
 0x111   :  { %5921 = vmatprep.subr.bf16.mxu1 %v22658_v61  ;;  %v22734_v60 = vld [vmem:[#allocation5 + $0x11d8] ss:$40 sps:$4 sm:$0xff]   ;;  %v22739_v61 = vld [vmem:[#allocation5 + $0xd24] ss:$40 sps:$4 sm:$0xff]  }
 0x113   :  { %5635 = vmatpush1.bf16.msra.mxu0 %v22653_v62  ;;  %v22742_v62 = vld [vmem:[#allocation5 + $0x122c] ss:$40 sps:$4 sm:$0xff]  }
 0x114   :  { %5922 = vmatpush1.bf16.msra.mxu1 %v22656_v63  ;;  %5636 = vmatprep.subr.bf16.mxu0 %v22661_v0  ;;  %v22737_v63 = vld [vmem:[#allocation5 + $0xd20] ss:$40 sps:$4 sm:$0xff]  }
 0x115   :  { %5923 = vmatprep.subr.bf16.mxu1 %v22664_v1  ;;  %v22740_v0 = vld [vmem:[#allocation5 + $0x1228] ss:$40 sps:$4 sm:$0xff]   ;;  %v22745_v1 = vld [vmem:[#allocation5 + $0xd74] ss:$40 sps:$4 sm:$0xff]  }
 0x117   :  { %5637 = vmatpush1.bf16.msra.mxu0 %v22659_v2  ;;  %v22748_v2 = vld [vmem:[#allocation5 + $0x127c] ss:$40 sps:$4 sm:$0xff]  }
 0x118   :  { %5924 = vmatpush1.bf16.msra.mxu1 %v22662_v3  ;;  %5638 = vmatprep.subr.bf16.mxu0 %v22667_v4  ;;  %v22743_v3 = vld [vmem:[#allocation5 + $0xd70] ss:$40 sps:$4 sm:$0xff]  }
 0x119   :  { %5925 = vmatprep.subr.bf16.mxu1 %v22670_v5  ;;  %v22746_v4 = vld [vmem:[#allocation5 + $0x1278] ss:$40 sps:$4 sm:$0xff]   ;;  %v22751_v5 = vld [vmem:[#allocation5 + $0xdc4] ss:$40 sps:$4 sm:$0xff]  }
 0x11b   :  { %5639 = vmatpush1.bf16.msra.mxu0 %v22665_v6  ;;  %v22754_v6 = vld [vmem:[#allocation5 + $0x12cc] ss:$40 sps:$4 sm:$0xff]  }
 0x11c   :  { %5926 = vmatpush1.bf16.msra.mxu1 %v22668_v7  ;;  %5640 = vmatprep.subr.bf16.mxu0 %v22673_v8  ;;  %v22749_v7 = vld [vmem:[#allocation5 + $0xdc0] ss:$40 sps:$4 sm:$0xff]  }
 0x11d   :  { %5927 = vmatprep.subr.bf16.mxu1 %v22676_v9  ;;  %v22752_v8 = vld [vmem:[#allocation5 + $0x12c8] ss:$40 sps:$4 sm:$0xff]   ;;  %v22757_v9 = vld [vmem:[#allocation5 + $0xe14] ss:$40 sps:$4 sm:$0xff]  }
 0x11f   :  { %5641 = vmatpush1.bf16.msra.mxu0 %v22671_v12  ;;  %v22760_v12 = vld [vmem:[#allocation5 + $0x131c] ss:$40 sps:$4 sm:$0xff]  }
 0x120   :  { %5928 = vmatpush1.bf16.msra.mxu1 %v22674_v13  ;;  %5651 = vmatprep.subr.bf16.mxu0 %v22679_v15  ;;  %v22755_v13 = vld [vmem:[#allocation5 + $0xe10] ss:$40 sps:$4 sm:$0xff]   ;;  %v22763_v15 = vld [vmem:[#allocation5 + $0xe64] ss:$40 sps:$4 sm:$0xff]  }
 0x121   :  { %5938 = vmatprep.subr.bf16.mxu1 %v22682_v16  ;;  %v22766_v16 = vld [vmem:[#allocation5 + $0x136c] ss:$40 sps:$4 sm:$0xff]  }
 0x122   :  { %5643 = vmatmul.mubr.bf16.vlgmr.msra.gmra.mrb[0].mxu0 %v26722_v11 }
 0x123   :  { %5930 = vmatmul.mubr.bf16.vlgmr.msra.gmra.mrb[0].mxu1 %v26730_v17  ;;  %5652 = vmatpush1.bf16.msra.mxu0 %v22677_v18  ;;  %v22761_v18 = vld [vmem:[#allocation5 + $0xe60] ss:$40 sps:$4 sm:$0xff]  }
 0x124   :  { %5939 = vmatpush1.bf16.msra.mxu1 %v22680_v19  ;;  %5653 = vmatprep.subr.bf16.mxu0 %v22685_v20  ;;  %v22764_v19 = vld [vmem:[#allocation5 + $0x1368] ss:$40 sps:$4 sm:$0xff]   ;;  %v22769_v20 = vld [vmem:[#allocation5 + $0xeb4] ss:$40 sps:$4 sm:$0xff]  }
 0x125   :  { %5940 = vmatprep.subr.bf16.mxu1 %v22688_v21  ;;  %5683 = vmatprep.mubr.bf16.mxu0 %v26727_v39  ;;  %v22772_v21 = vld [vmem:[#allocation5 + $0x13bc] ss:$40 sps:$4 sm:$0xff]  }
 0x126   :  { %5970 = vmatprep.mubr.bf16.mxu1 %v26734_v26 }
 0x127   :  { %5654 = vmatpush1.bf16.msra.mxu0 %v22683_v22  ;;  %v22767_v22 = vld [vmem:[#allocation5 + $0xeb0] ss:$40 sps:$4 sm:$0xff]  }
 0x128   :  { %5941 = vmatpush1.bf16.msra.mxu1 %v22686_v24  ;;  %5655 = vmatprep.subr.bf16.mxu0 %v22691_v25  ;;  %v152_v24 = vld [vmem:[#allocation2 + $0x30] sm:$0xff]  ;;  %v22775_v25 = vld [vmem:[#allocation5 + $0xf04] ss:$40 sps:$4 sm:$0xff]  }
 0x129   :  { %5942 = vmatprep.subr.bf16.mxu1 %v22694_v27  ;;  %v22778_v27 = vld [vmem:[#allocation5 + $0x140c] ss:$40 sps:$4 sm:$0xff]  }
 0x12b   :  { %5656 = vmatpush1.bf16.msra.mxu0 %v22689_v28  ;;  %v26738_v28 = vpack.c.bf16 %v152_v24, %v152_v24  ;;  %v22856_v24 = vld [vmem:[#allocation5 + $0x181c] ss:$40 sps:$4 sm:$0xff]  }
 0x12c   :  { %5943 = vmatpush1.bf16.msra.mxu1 %v22692_v29  ;;  %5657 = vmatprep.subr.bf16.mxu0 %v22697_v30  ;;  %v155_v29 = vld [vmem:[#allocation2 + $0x48] sm:$0xff] }
 0x12d   :  { %5944 = vmatprep.subr.bf16.mxu1 %v22700_v31  ;;  %v22773_v30 = vld [vmem:[#allocation5 + $0xf00] ss:$40 sps:$4 sm:$0xff]  }
 0x12e   :  { %v22776_v31 = vld [vmem:[#allocation5 + $0x1408] ss:$40 sps:$4 sm:$0xff]  }
 0x12f   :  { %5658 = vmatpush1.bf16.msra.mxu0 %v22695_v32  ;;  %v22781_v32 = vld [vmem:[#allocation5 + $0xf54] ss:$40 sps:$4 sm:$0xff]  }
 0x130   :  { %5945 = vmatpush1.bf16.msra.mxu1 %v22698_v33  ;;  %5659 = vmatprep.subr.bf16.mxu0 %v22703_v34  ;;  %v22784_v33 = vld [vmem:[#allocation5 + $0x145c] ss:$40 sps:$4 sm:$0xff]   ;;  %v26740_v34 = vpack.c.bf16 %v155_v29, %v155_v29 }
 0x131   :  { %5946 = vmatprep.subr.bf16.mxu1 %v22706_v35  ;;  %v22779_v35 = vld [vmem:[#allocation5 + $0xf50] ss:$40 sps:$4 sm:$0xff]   ;;  %v22859_v29 = vld [vmem:[#allocation5 + $0x1364] ss:$40 sps:$4 sm:$0xff]  }
 0x133   :  { %5660 = vmatpush1.bf16.msra.mxu0 %v22701_v36  ;;  %v22782_v36 = vld [vmem:[#allocation5 + $0x1458] ss:$40 sps:$4 sm:$0xff]  }
 0x134   :  { %5947 = vmatpush1.bf16.msra.mxu1 %v22704_v37  ;;  %5661 = vmatprep.subr.bf16.mxu0 %v22709_v38  ;;  %v22787_v37 = vld [vmem:[#allocation5 + $0xfa4] ss:$40 sps:$4 sm:$0xff]  }
 0x135   :  { %5948 = vmatprep.subr.bf16.mxu1 %v22712_v40  ;;  %v22790_v38 = vld [vmem:[#allocation5 + $0x14ac] ss:$40 sps:$4 sm:$0xff]   ;;  %v22785_v40 = vld [vmem:[#allocation5 + $0xfa0] ss:$40 sps:$4 sm:$0xff]  }
 0x137   :  { %5662 = vmatpush1.bf16.msra.mxu0 %v22707_v41  ;;  %v22788_v41 = vld [vmem:[#allocation5 + $0x14a8] ss:$40 sps:$4 sm:$0xff]  }
 0x138   :  { %5949 = vmatpush1.bf16.msra.mxu1 %v22710_v42  ;;  %5663 = vmatprep.subr.bf16.mxu0 %v22715_v43  ;;  %v22793_v42 = vld [vmem:[#allocation5 + $0xff4] ss:$40 sps:$4 sm:$0xff]  }
 0x139   :  { %5950 = vmatprep.subr.bf16.mxu1 %v22718_v44  ;;  %v22796_v43 = vld [vmem:[#allocation5 + $0x14fc] ss:$40 sps:$4 sm:$0xff]   ;;  %v22791_v44 = vld [vmem:[#allocation5 + $0xff0] ss:$40 sps:$4 sm:$0xff]  }
 0x13b   :  { %5664 = vmatpush1.bf16.msra.mxu0 %v22713_v45  ;;  %v22794_v45 = vld [vmem:[#allocation5 + $0x14f8] ss:$40 sps:$4 sm:$0xff]  }
 0x13c   :  { %5951 = vmatpush1.bf16.msra.mxu1 %v22716_v46  ;;  %5665 = vmatprep.subr.bf16.mxu0 %v22721_v47  ;;  %v22799_v46 = vld [vmem:[#allocation5 + $0x1044] ss:$40 sps:$4 sm:$0xff]  }
 0x13d   :  { %5952 = vmatprep.subr.bf16.mxu1 %v22724_v49  ;;  %v22802_v47 = vld [vmem:[#allocation5 + $0x154c] ss:$40 sps:$4 sm:$0xff]   ;;  %v22797_v49 = vld [vmem:[#allocation5 + $0x1040] ss:$40 sps:$4 sm:$0xff]  }
 0x13f   :  { %5666 = vmatpush1.bf16.msra.mxu0 %v22719_v50  ;;  %v22800_v50 = vld [vmem:[#allocation5 + $0x1548] ss:$40 sps:$4 sm:$0xff]  }
 0x140   :  { %5953 = vmatpush1.bf16.msra.mxu1 %v22722_v51  ;;  %5667 = vmatprep.subr.bf16.mxu0 %v22727_v52  ;;  %v22805_v51 = vld [vmem:[#allocation5 + $0x1094] ss:$40 sps:$4 sm:$0xff]  }
 0x141   :  { %5954 = vmatprep.subr.bf16.mxu1 %v22730_v54  ;;  %v22808_v52 = vld [vmem:[#allocation5 + $0x159c] ss:$40 sps:$4 sm:$0xff]   ;;  %v22803_v54 = vld [vmem:[#allocation5 + $0x1090] ss:$40 sps:$4 sm:$0xff]  }
 0x143   :  { %5668 = vmatpush1.bf16.msra.mxu0 %v22725_v55  ;;  %v22806_v55 = vld [vmem:[#allocation5 + $0x1598] ss:$40 sps:$4 sm:$0xff]  }
 0x144   :  { %5955 = vmatpush1.bf16.msra.mxu1 %v22728_v56  ;;  %5669 = vmatprep.subr.bf16.mxu0 %v22733_v57  ;;  %v22811_v56 = vld [vmem:[#allocation5 + $0x10e4] ss:$40 sps:$4 sm:$0xff]  }
 0x145   :  { %5956 = vmatprep.subr.bf16.mxu1 %v22736_v58  ;;  %v22814_v57 = vld [vmem:[#allocation5 + $0x15ec] ss:$40 sps:$4 sm:$0xff]   ;;  %v22809_v58 = vld [vmem:[#allocation5 + $0x10e0] ss:$40 sps:$4 sm:$0xff]  }
 0x147   :  { %5670 = vmatpush1.bf16.msra.mxu0 %v22731_v59  ;;  %v22812_v59 = vld [vmem:[#allocation5 + $0x15e8] ss:$40 sps:$4 sm:$0xff]  }
 0x148   :  { %5957 = vmatpush1.bf16.msra.mxu1 %v22734_v60  ;;  %5671 = vmatprep.subr.bf16.mxu0 %v22739_v61  ;;  %v22817_v60 = vld [vmem:[#allocation5 + $0x1134] ss:$40 sps:$4 sm:$0xff]  }
 0x149   :  { %5958 = vmatprep.subr.bf16.mxu1 %v22742_v62  ;;  %v22820_v61 = vld [vmem:[#allocation5 + $0x163c] ss:$40 sps:$4 sm:$0xff]   ;;  %v22815_v62 = vld [vmem:[#allocation5 + $0x1130] ss:$40 sps:$4 sm:$0xff]  }
 0x14b   :  { %5672 = vmatpush1.bf16.msra.mxu0 %v22737_v63  ;;  %v22818_v63 = vld [vmem:[#allocation5 + $0x1638] ss:$40 sps:$4 sm:$0xff]  }
 0x14c   :  { %5959 = vmatpush1.bf16.msra.mxu1 %v22740_v0  ;;  %5673 = vmatprep.subr.bf16.mxu0 %v22745_v1  ;;  %v22823_v0 = vld [vmem:[#allocation5 + $0x1184] ss:$40 sps:$4 sm:$0xff]  }
 0x14d   :  { %5960 = vmatprep.subr.bf16.mxu1 %v22748_v2  ;;  %v22826_v1 = vld [vmem:[#allocation5 + $0x168c] ss:$40 sps:$4 sm:$0xff]   ;;  %v22821_v2 = vld [vmem:[#allocation5 + $0x1180] ss:$40 sps:$4 sm:$0xff]  }
 0x14f   :  { %5674 = vmatpush1.bf16.msra.mxu0 %v22743_v3  ;;  %v22824_v3 = vld [vmem:[#allocation5 + $0x1688] ss:$40 sps:$4 sm:$0xff]  }
 0x150   :  { %5961 = vmatpush1.bf16.msra.mxu1 %v22746_v4  ;;  %5675 = vmatprep.subr.bf16.mxu0 %v22751_v5  ;;  %v22829_v4 = vld [vmem:[#allocation5 + $0x11d4] ss:$40 sps:$4 sm:$0xff]  }
 0x151   :  { %5962 = vmatprep.subr.bf16.mxu1 %v22754_v6  ;;  %v22832_v5 = vld [vmem:[#allocation5 + $0x16dc] ss:$40 sps:$4 sm:$0xff]   ;;  %v22827_v6 = vld [vmem:[#allocation5 + $0x11d0] ss:$40 sps:$4 sm:$0xff]  }
 0x153   :  { %5676 = vmatpush1.bf16.msra.mxu0 %v22749_v7  ;;  %v22830_v7 = vld [vmem:[#allocation5 + $0x16d8] ss:$40 sps:$4 sm:$0xff]  }
 0x154   :  { %5963 = vmatpush1.bf16.msra.mxu1 %v22752_v8  ;;  %5677 = vmatprep.subr.bf16.mxu0 %v22757_v9  ;;  %v22835_v8 = vld [vmem:[#allocation5 + $0x1224] ss:$40 sps:$4 sm:$0xff]  }
 0x155   :  { %5964 = vmatprep.subr.bf16.mxu1 %v22760_v12  ;;  %v22838_v9 = vld [vmem:[#allocation5 + $0x172c] ss:$40 sps:$4 sm:$0xff]   ;;  %v22833_v12 = vld [vmem:[#allocation5 + $0x1220] ss:$40 sps:$4 sm:$0xff]  }
 0x157   :  { %5678 = vmatpush1.bf16.msra.mxu0 %v22755_v13  ;;  %v22836_v13 = vld [vmem:[#allocation5 + $0x1728] ss:$40 sps:$4 sm:$0xff]  }
 0x158   :  { %5965 = vmatpush1.bf16.msra.mxu1 %v22758_v14  ;;  %5679 = vmatprep.subr.bf16.mxu0 %v22763_v15  ;;  %v22841_v14 = vld [vmem:[#allocation5 + $0x1274] ss:$40 sps:$4 sm:$0xff]  }
 0x159   :  { %5966 = vmatprep.subr.bf16.mxu1 %v22766_v16  ;;  %v22844_v15 = vld [vmem:[#allocation5 + $0x177c] ss:$40 sps:$4 sm:$0xff]   ;;  %v22839_v16 = vld [vmem:[#allocation5 + $0x1270] ss:$40 sps:$4 sm:$0xff]  }
 0x15b   :  { %5680 = vmatpush1.bf16.msra.mxu0 %v22761_v18  ;;  %v22842_v18 = vld [vmem:[#allocation5 + $0x1778] ss:$40 sps:$4 sm:$0xff]  }
 0x15c   :  { %5967 = vmatpush1.bf16.msra.mxu1 %v22764_v19  ;;  %5681 = vmatprep.subr.bf16.mxu0 %v22769_v20  ;;  %v22847_v19 = vld [vmem:[#allocation5 + $0x12c4] ss:$40 sps:$4 sm:$0xff]  }
 0x15d   :  { %5968 = vmatprep.subr.bf16.mxu1 %v22772_v21  ;;  %v22850_v20 = vld [vmem:[#allocation5 + $0x17cc] ss:$40 sps:$4 sm:$0xff]   ;;  %v22845_v21 = vld [vmem:[#allocation5 + $0x12c0] ss:$40 sps:$4 sm:$0xff]  }
 0x15f   :  { %5682 = vmatpush1.bf16.msra.mxu0 %v22767_v22  ;;  %v22848_v22 = vld [vmem:[#allocation5 + $0x17c8] ss:$40 sps:$4 sm:$0xff]  }
 0x160   :  { %5969 = vmatpush1.bf16.msra.mxu1 %v22770_v23  ;;  %5692 = vmatprep.subr.bf16.mxu0 %v22775_v25  ;;  %v22853_v23 = vld [vmem:[#allocation5 + $0x1314] ss:$40 sps:$4 sm:$0xff]   ;;  %v22851_v25 = vld [vmem:[#allocation5 + $0x1310] ss:$40 sps:$4 sm:$0xff]  }
 0x161   :  { %5979 = vmatprep.subr.bf16.mxu1 %v22778_v27  ;;  %v22854_v27 = vld [vmem:[#allocation5 + $0x1818] ss:$40 sps:$4 sm:$0xff]  }
 0x162   :  { %5684 = vmatmul.mubr.bf16.vlgmr.msra.gmra.mrb[0].mxu0 %v26730_v17 }
 0x163   :  { %5971 = vmatmul.mubr.bf16.vlgmr.msra.gmra.mrb[0].mxu1 %v26738_v28  ;;  %5693 = vmatpush1.bf16.msra.mxu0 %v22773_v30  ;;  %v22862_v30 = vld [vmem:[#allocation5 + $0x186c] ss:$40 sps:$4 sm:$0xff]  }
 0x164   :  { %5980 = vmatpush1.bf16.msra.mxu1 %v22776_v31  ;;  %5694 = vmatprep.subr.bf16.mxu0 %v22781_v32  ;;  %v22857_v31 = vld [vmem:[#allocation5 + $0x1360] ss:$40 sps:$4 sm:$0xff]  }
 0x165   :  { %5981 = vmatprep.subr.bf16.mxu1 %v22784_v33  ;;  %5724 = vmatprep.mubr.bf16.mxu0 %v26734_v26  ;;  %v22860_v32 = vld [vmem:[#allocation5 + $0x1868] ss:$40 sps:$4 sm:$0xff]   ;;  %v22865_v33 = vld [vmem:[#allocation5 + $0x13b4] ss:$40 sps:$4 sm:$0xff]  }
 0x166   :  { %6011 = vmatprep.mubr.bf16.mxu1 %v26740_v34 }
 0x167   :  { %5695 = vmatpush1.bf16.msra.mxu0 %v22779_v35  ;;  %v22868_v35 = vld [vmem:[#allocation5 + $0x18bc] ss:$40 sps:$4 sm:$0xff]  }
 0x168   :  { %5982 = vmatpush1.bf16.msra.mxu1 %v22782_v36  ;;  %5696 = vmatprep.subr.bf16.mxu0 %v22787_v37  ;;  %v22863_v36 = vld [vmem:[#allocation5 + $0x13b0] ss:$40 sps:$4 sm:$0xff]  }
 0x169   :  { %5983 = vmatprep.subr.bf16.mxu1 %v22790_v38  ;;  %v22866_v37 = vld [vmem:[#allocation5 + $0x18b8] ss:$40 sps:$4 sm:$0xff]  }
 0x16a   :  { %v154_v38 = vld [vmem:[#allocation2 + $0x40] sm:$0xff] }
 0x16b   :  { %5697 = vmatpush1.bf16.msra.mxu0 %v22785_v40  ;;  %v22871_v40 = vld [vmem:[#allocation5 + $0x1404] ss:$40 sps:$4 sm:$0xff]  }
 0x16c   :  { %5984 = vmatpush1.bf16.msra.mxu1 %v22788_v41  ;;  %5698 = vmatprep.subr.bf16.mxu0 %v22793_v42  ;;  %v22874_v41 = vld [vmem:[#allocation5 + $0x190c] ss:$40 sps:$4 sm:$0xff]   ;;  %v26746_v42 = vpack.c.bf16 %v154_v38, %v154_v38  ;;  %v22937_v38 = vld [vmem:[#allocation5 + $0xb8] ss:$40 sps:$4 sm:$0xff]  }
 0x16d   :  { %5985 = vmatprep.subr.bf16.mxu1 %v22796_v43  ;;  %v157_v43 = vld [vmem:[#allocation2 + $0x58] sm:$0xff] }
 0x16f   :  { %5699 = vmatpush1.bf16.msra.mxu0 %v22791_v44  ;;  %v22869_v44 = vld [vmem:[#allocation5 + $0x1400] ss:$40 sps:$4 sm:$0xff]  }
 0x170   :  { %5986 = vmatpush1.bf16.msra.mxu1 %v22794_v45  ;;  %5700 = vmatprep.subr.bf16.mxu0 %v22799_v46  ;;  %v22872_v45 = vld [vmem:[#allocation5 + $0x1908] ss:$40 sps:$4 sm:$0xff]   ;;  %v22877_v46 = vld [vmem:[#allocation5 + $0x1454] ss:$40 sps:$4 sm:$0xff]  }
 0x171   :  { %5987 = vmatprep.subr.bf16.mxu1 %v22802_v47  ;;  %v22880_v47 = vld [vmem:[#allocation5 + $0x195c] ss:$40 sps:$4 sm:$0xff]  }
 0x173   :  { %5701 = vmatpush1.bf16.msra.mxu0 %v22797_v49  ;;  %v26748_v49 = vpack.c.bf16 %v157_v43, %v157_v43  ;;  %v22940_v43 = vld [vmem:[#allocation5 + $0x17c0] ss:$40 sps:$4 sm:$0xff]  }
 0x174   :  { %5988 = vmatpush1.bf16.msra.mxu1 %v22800_v50  ;;  %5702 = vmatprep.subr.bf16.mxu0 %v22805_v51  ;;  %v22875_v50 = vld [vmem:[#allocation5 + $0x1450] ss:$40 sps:$4 sm:$0xff]  }
 0x175   :  { %5989 = vmatprep.subr.bf16.mxu1 %v22808_v52  ;;  %v22878_v51 = vld [vmem:[#allocation5 + $0x1958] ss:$40 sps:$4 sm:$0xff]   ;;  %v22883_v52 = vld [vmem:[#allocation5 + $0x14a4] ss:$40 sps:$4 sm:$0xff]  }
 0x177   :  { %5703 = vmatpush1.bf16.msra.mxu0 %v22803_v54  ;;  %v22886_v54 = vld [vmem:[#allocation5 + $0x19ac] ss:$40 sps:$4 sm:$0xff]  }
 0x178   :  { %5990 = vmatpush1.bf16.msra.mxu1 %v22806_v55  ;;  %5704 = vmatprep.subr.bf16.mxu0 %v22811_v56  ;;  %v22881_v55 = vld [vmem:[#allocation5 + $0x14a0] ss:$40 sps:$4 sm:$0xff]  }
 0x179   :  { %5991 = vmatprep.subr.bf16.mxu1 %v22814_v57  ;;  %v22884_v56 = vld [vmem:[#allocation5 + $0x19a8] ss:$40 sps:$4 sm:$0xff]   ;;  %v22889_v57 = vld [vmem:[#allocation5 + $0x14f4] ss:$40 sps:$4 sm:$0xff]  }
 0x17b   :  { %5705 = vmatpush1.bf16.msra.mxu0 %v22809_v58  ;;  %v22892_v58 = vld [vmem:[#allocation5 + $0x19fc] ss:$40 sps:$4 sm:$0xff]  }
 0x17c   :  { %5992 = vmatpush1.bf16.msra.mxu1 %v22812_v59  ;;  %5706 = vmatprep.subr.bf16.mxu0 %v22817_v60  ;;  %v22887_v59 = vld [vmem:[#allocation5 + $0x14f0] ss:$40 sps:$4 sm:$0xff]  }
 0x17d   :  { %5993 = vmatprep.subr.bf16.mxu1 %v22820_v61  ;;  %v22890_v60 = vld [vmem:[#allocation5 + $0x19f8] ss:$40 sps:$4 sm:$0xff]   ;;  %v22895_v61 = vld [vmem:[#allocation5 + $0x1544] ss:$40 sps:$4 sm:$0xff]  }
 0x17f   :  { %5707 = vmatpush1.bf16.msra.mxu0 %v22815_v62  ;;  %v22898_v62 = vld [vmem:[#allocation5 + $0x1a4c] ss:$40 sps:$4 sm:$0xff]  }
 0x180   :  { %5994 = vmatpush1.bf16.msra.mxu1 %v22818_v63  ;;  %5708 = vmatprep.subr.bf16.mxu0 %v22823_v0  ;;  %v22893_v63 = vld [vmem:[#allocation5 + $0x1540] ss:$40 sps:$4 sm:$0xff]  }
 0x181   :  { %5995 = vmatprep.subr.bf16.mxu1 %v22826_v1  ;;  %v22896_v0 = vld [vmem:[#allocation5 + $0x1a48] ss:$40 sps:$4 sm:$0xff]   ;;  %v22901_v1 = vld [vmem:[#allocation5 + $0x1594] ss:$40 sps:$4 sm:$0xff]  }
 0x183   :  { %5709 = vmatpush1.bf16.msra.mxu0 %v22821_v2  ;;  %v22904_v2 = vld [vmem:[#allocation5 + $0x1a9c] ss:$40 sps:$4 sm:$0xff]  }
 0x184   :  { %5996 = vmatpush1.bf16.msra.mxu1 %v22824_v3  ;;  %5710 = vmatprep.subr.bf16.mxu0 %v22829_v4  ;;  %v22899_v3 = vld [vmem:[#allocation5 + $0x1590] ss:$40 sps:$4 sm:$0xff]  }
 0x185   :  { %5997 = vmatprep.subr.bf16.mxu1 %v22832_v5  ;;  %v22902_v4 = vld [vmem:[#allocation5 + $0x1a98] ss:$40 sps:$4 sm:$0xff]   ;;  %v22907_v5 = vld [vmem:[#allocation5 + $0x15e4] ss:$40 sps:$4 sm:$0xff]  }
 0x187   :  { %5711 = vmatpush1.bf16.msra.mxu0 %v22827_v6  ;;  %v22910_v6 = vld [vmem:[#allocation5 + $0x1aec] ss:$40 sps:$4 sm:$0xff]  }
 0x188   :  { %5998 = vmatpush1.bf16.msra.mxu1 %v22830_v7  ;;  %5712 = vmatprep.subr.bf16.mxu0 %v22835_v8  ;;  %v22905_v7 = vld [vmem:[#allocation5 + $0x15e0] ss:$40 sps:$4 sm:$0xff]  }
 0x189   :  { %5999 = vmatprep.subr.bf16.mxu1 %v22838_v9  ;;  %v22908_v8 = vld [vmem:[#allocation5 + $0x1ae8] ss:$40 sps:$4 sm:$0xff]   ;;  %v22913_v9 = vld [vmem:[#allocation5 + $0x1634] ss:$40 sps:$4 sm:$0xff]  }
 0x18b   :  { %5713 = vmatpush1.bf16.msra.mxu0 %v22833_v12  ;;  %v22916_v12 = vld [vmem:[#allocation5 + $0x1b3c] ss:$40 sps:$4 sm:$0xff]  }
 0x18c   :  { %6000 = vmatpush1.bf16.msra.mxu1 %v22836_v13  ;;  %5714 = vmatprep.subr.bf16.mxu0 %v22841_v14  ;;  %v1051_v13 = vld [vmem:[#allocation5 + $0x1b88] sm:$0x33]  ;;  %v22911_v14 = vld [vmem:[#allocation5 + $0x1630] ss:$40 sps:$4 sm:$0xff]  }
 0x18d   :  { %6001 = vmatprep.subr.bf16.mxu1 %v22844_v15  ;;  %v22914_v15 = vld [vmem:[#allocation5 + $0x1b38] ss:$40 sps:$4 sm:$0xff]  }
 0x18f   :  { %5715 = vmatpush1.bf16.msra.mxu0 %v22839_v16  ;;  %v22919_v16 = vld [vmem:[#allocation5 + $0x1684] ss:$40 sps:$4 sm:$0xff]  }
 0x190   :  { %6002 = vmatpush1.bf16.msra.mxu1 %v22842_v18  ;;  %5716 = vmatprep.subr.bf16.mxu0 %v22847_v19  ;;  %v20374_v18 = vcombine.high %v1051_v13, %v1051_v13  ;;  %v20373_v19 = vcombine.low %v1051_v13, %v1051_v13  ;;  %v22985_v13 = vld [vmem:[#allocation5 + $0x338] ss:$40 sps:$4 sm:$0xff]  }
 0x191   :  { %6003 = vmatprep.subr.bf16.mxu1 %v22850_v20  ;;  %v22917_v20 = vld [vmem:[#allocation5 + $0x1680] ss:$40 sps:$4 sm:$0xff]  }
 0x193   :  { %5717 = vmatpush1.bf16.msra.mxu0 %v22845_v21  ;;  %v156_v21 = vld [vmem:[#allocation2 + $0x50] sm:$0xff] }
 0x194   :  { %6004 = vmatpush1.bf16.msra.mxu1 %v22848_v22  ;;  %5718 = vmatprep.subr.bf16.mxu0 %v22853_v23  ;;  %v5546_v22 = vsel %vm5538_vm1, %v20373_v19, 0  ;;  %v22924_v23 = vld [vmem:[#allocation5 + $0x16d4] ss:$40 sps:$4 sm:$0xff]  }
 0x195   :  { %6005 = vmatprep.subr.bf16.mxu1 %v22856_v24  ;;  %v22927_v24 = vld [vmem:[#allocation5 + $0x1c] ss:$40 sps:$4 sm:$0xff]  }
 0x196   :  { %v22996_v19 = vld [vmem:[#allocation5 + $0x1a94] ss:$40 sps:$4 sm:$0xff]  }
 0x197   :  { %5719 = vmatpush1.bf16.msra.mxu0 %v22851_v25  ;;  %v22922_v25 = vld [vmem:[#allocation5 + $0x16d0] ss:$40 sps:$4 sm:$0xff]  }
 0x198   :  { %6006 = vmatpush1.bf16.msra.mxu1 %v22854_v27  ;;  %5720 = vmatprep.subr.bf16.mxu0 %v22859_v29  ;;  %v22925_v27 = vld [vmem:[#allocation5 + $0x18] ss:$40 sps:$4 sm:$0xff]   ;;  %v26757_v29 = vpack.c.bf16 %v156_v21, %v156_v21 }
 0x199   :  { %6007 = vmatprep.subr.bf16.mxu1 %v22862_v30  ;;  %v22930_v30 = vld [vmem:[#allocation5 + $0x1724] ss:$40 sps:$4 sm:$0xff]   ;;  %v22994_v21 = vld [vmem:[#allocation5 + $0x1a90] ss:$40 sps:$4 sm:$0xff]  }
 0x19b   :  { %5721 = vmatpush1.bf16.msra.mxu0 %v22857_v31  ;;  %v22933_v31 = vld [vmem:[#allocation5 + $0x6c] ss:$40 sps:$4 sm:$0xff]  }
 0x19c   :  { %6008 = vmatpush1.bf16.msra.mxu1 %v22860_v32  ;;  %5722 = vmatprep.subr.bf16.mxu0 %v22865_v33  ;;  %v22928_v32 = vld [vmem:[#allocation5 + $0x1720] ss:$40 sps:$4 sm:$0xff]  }
 0x19d   :  { %6009 = vmatprep.subr.bf16.mxu1 %v22868_v35  ;;  %v22931_v33 = vld [vmem:[#allocation5 + $0x68] ss:$40 sps:$4 sm:$0xff]   ;;  %v22936_v35 = vld [vmem:[#allocation5 + $0x1774] ss:$40 sps:$4 sm:$0xff]  }
 0x19f   :  { %5723 = vmatpush1.bf16.msra.mxu0 %v22863_v36  ;;  %v22939_v36 = vld [vmem:[#allocation5 + $0xbc] ss:$40 sps:$4 sm:$0xff]  }
 0x1a0   :  { %6010 = vmatpush1.bf16.msra.mxu1 %v22866_v37  ;;  %5733 = vmatprep.subr.bf16.mxu0 %v22871_v40  ;;  %v22934_v37 = vld [vmem:[#allocation5 + $0x1770] ss:$40 sps:$4 sm:$0xff]   ;;  %v22942_v40 = vld [vmem:[#allocation5 + $0x17c4] ss:$40 sps:$4 sm:$0xff]  }
 0x1a1   :  { %6020 = vmatprep.subr.bf16.mxu1 %v22874_v41  ;;  %v22945_v41 = vld [vmem:[#allocation5 + $0x10c] ss:$40 sps:$4 sm:$0xff]  }
 0x1a2   :  { %5725 = vmatmul.mubr.bf16.vlgmr.msra.gmra.mrb[0].mxu0 %v26738_v28 }
 0x1a3   :  { %6012 = vmatmul.mubr.bf16.vlgmr.msra.gmra.mrb[0].mxu1 %v26746_v42  ;;  %5734 = vmatpush1.bf16.msra.mxu0 %v22869_v44  ;;  %v22943_v44 = vld [vmem:[#allocation5 + $0x108] ss:$40 sps:$4 sm:$0xff]  }
 0x1a4   :  { %6021 = vmatpush1.bf16.msra.mxu1 %v22872_v45  ;;  %5735 = vmatprep.subr.bf16.mxu0 %v22877_v46  ;;  %v22948_v45 = vld [vmem:[#allocation5 + $0x1814] ss:$40 sps:$4 sm:$0xff]  }
 0x1a5   :  { %6022 = vmatprep.subr.bf16.mxu1 %v22880_v47  ;;  %20384 = vmatprep.mubr.msk.bf16.mxu1 %vm5534_vm0, %v26748_v49  ;;  %v22951_v46 = vld [vmem:[#allocation5 + $0x15c] ss:$40 sps:$4 sm:$0xff]   ;;  %v22946_v47 = vld [vmem:[#allocation5 + $0x1810] ss:$40 sps:$4 sm:$0xff]  }
 0x1a6   :  { %5765 = vmatprep.mubr.bf16.mxu0 %v26740_v34 }
 0x1a7   :  { %5736 = vmatpush1.bf16.msra.mxu0 %v22875_v50  ;;  %v22949_v50 = vld [vmem:[#allocation5 + $0x158] ss:$40 sps:$4 sm:$0xff]  }
 0x1a8   :  { %6023 = vmatpush1.bf16.msra.mxu1 %v22878_v51  ;;  %5737 = vmatprep.subr.bf16.mxu0 %v22883_v52  ;;  %v22954_v51 = vld [vmem:[#allocation5 + $0x1864] ss:$40 sps:$4 sm:$0xff]  }
 0x1a9   :  { %6024 = vmatprep.subr.bf16.mxu1 %v22886_v54  ;;  %v22957_v52 = vld [vmem:[#allocation5 + $0x1ac] ss:$40 sps:$4 sm:$0xff]   ;;  %v22952_v54 = vld [vmem:[#allocation5 + $0x1860] ss:$40 sps:$4 sm:$0xff]  }
 0x1ab   :  { %5738 = vmatpush1.bf16.msra.mxu0 %v22881_v55  ;;  %v22955_v55 = vld [vmem:[#allocation5 + $0x1a8] ss:$40 sps:$4 sm:$0xff]  }
 0x1ac   :  { %6025 = vmatpush1.bf16.msra.mxu1 %v22884_v56  ;;  %5739 = vmatprep.subr.bf16.mxu0 %v22889_v57  ;;  %v22960_v56 = vld [vmem:[#allocation5 + $0x18b4] ss:$40 sps:$4 sm:$0xff]  }
 0x1ad   :  { %6026 = vmatprep.subr.bf16.mxu1 %v22892_v58  ;;  %v22963_v57 = vld [vmem:[#allocation5 + $0x1fc] ss:$40 sps:$4 sm:$0xff]   ;;  %v22958_v58 = vld [vmem:[#allocation5 + $0x18b0] ss:$40 sps:$4 sm:$0xff]  }
 0x1af   :  { %5740 = vmatpush1.bf16.msra.mxu0 %v22887_v59  ;;  %v22961_v59 = vld [vmem:[#allocation5 + $0x1f8] ss:$40 sps:$4 sm:$0xff]  }
 0x1b0   :  { %6027 = vmatpush1.bf16.msra.mxu1 %v22890_v60  ;;  %5741 = vmatprep.subr.bf16.mxu0 %v22895_v61  ;;  %v22966_v60 = vld [vmem:[#allocation5 + $0x1904] ss:$40 sps:$4 sm:$0xff]  }
 0x1b1   :  { %6028 = vmatprep.subr.bf16.mxu1 %v22898_v62  ;;  %v22969_v61 = vld [vmem:[#allocation5 + $0x24c] ss:$40 sps:$4 sm:$0xff]   ;;  %v22964_v62 = vld [vmem:[#allocation5 + $0x1900] ss:$40 sps:$4 sm:$0xff]  }
 0x1b3   :  { %5742 = vmatpush1.bf16.msra.mxu0 %v22893_v63  ;;  %v22967_v63 = vld [vmem:[#allocation5 + $0x248] ss:$40 sps:$4 sm:$0xff]  }
 0x1b4   :  { %6029 = vmatpush1.bf16.msra.mxu1 %v22896_v0  ;;  %5743 = vmatprep.subr.bf16.mxu0 %v22901_v1  ;;  %v22972_v0 = vld [vmem:[#allocation5 + $0x1954] ss:$40 sps:$4 sm:$0xff]  }
 0x1b5   :  { %6030 = vmatprep.subr.bf16.mxu1 %v22904_v2  ;;  %v22975_v1 = vld [vmem:[#allocation5 + $0x29c] ss:$40 sps:$4 sm:$0xff]   ;;  %v22970_v2 = vld [vmem:[#allocation5 + $0x1950] ss:$40 sps:$4 sm:$0xff]  }
 0x1b7   :  { %5744 = vmatpush1.bf16.msra.mxu0 %v22899_v3  ;;  %v22973_v3 = vld [vmem:[#allocation5 + $0x298] ss:$40 sps:$4 sm:$0xff]  }
 0x1b8   :  { %6031 = vmatpush1.bf16.msra.mxu1 %v22902_v4  ;;  %5745 = vmatprep.subr.bf16.mxu0 %v22907_v5  ;;  %v22978_v4 = vld [vmem:[#allocation5 + $0x19a4] ss:$40 sps:$4 sm:$0xff]  }
 0x1b9   :  { %6032 = vmatprep.subr.bf16.mxu1 %v22910_v6  ;;  %v22981_v5 = vld [vmem:[#allocation5 + $0x2ec] ss:$40 sps:$4 sm:$0xff]   ;;  %v22976_v6 = vld [vmem:[#allocation5 + $0x19a0] ss:$40 sps:$4 sm:$0xff]  }
 0x1bb   :  { %5746 = vmatpush1.bf16.msra.mxu0 %v22905_v7  ;;  %v22979_v7 = vld [vmem:[#allocation5 + $0x2e8] ss:$40 sps:$4 sm:$0xff]  }
 0x1bc   :  { %6033 = vmatpush1.bf16.msra.mxu1 %v22908_v8  ;;  %5747 = vmatprep.subr.bf16.mxu0 %v22913_v9  ;;  %v22984_v8 = vld [vmem:[#allocation5 + $0x19f4] ss:$40 sps:$4 sm:$0xff]  }
 0x1bd   :  { %6034 = vmatprep.subr.bf16.mxu1 %v22916_v12  ;;  %v22987_v9 = vld [vmem:[#allocation5 + $0x33c] ss:$40 sps:$4 sm:$0xff]   ;;  %v22982_v12 = vld [vmem:[#allocation5 + $0x19f0] ss:$40 sps:$4 sm:$0xff]  }
 0x1bf   :  { %5748 = vmatpush1.bf16.msra.mxu0 %v22911_v14  ;;  %v22990_v14 = vld [vmem:[#allocation5 + $0x1a44] ss:$40 sps:$4 sm:$0xff]  }
 0x1c0   :  { %6035 = vmatpush1.bf16.msra.mxu1 %v22914_v15  ;;  %5749 = vmatprep.subr.bf16.mxu0 %v22919_v16  ;;  %v22993_v15 = vld [vmem:[#allocation5 + $0x38c] ss:$40 sps:$4 sm:$0xff]   ;;  %v22988_v16 = vld [vmem:[#allocation5 + $0x1a40] ss:$40 sps:$4 sm:$0xff]  }
 0x1c1   :  { %20383 = vmatprep.subr.msk.bf16.mxu1 %vm5538_vm1, %v20374_v18  ;;  %v22991_v18 = vld [vmem:[#allocation5 + $0x388] ss:$40 sps:$4 sm:$0xff]  }
 0x1c3   :  { %5750 = vmatpush1.bf16.msra.mxu0 %v22917_v20  ;;  %v22999_v20 = vld [vmem:[#allocation5 + $0x3dc] ss:$40 sps:$4 sm:$0xff]  }
 0x1c4   :  { %6037 = vmatpush1.bf16.msra.mxu1 %v5546_v22  ;;  %5751 = vmatprep.subr.bf16.mxu0 %v22924_v23  ;;  %v22997_v22 = vld [vmem:[#allocation5 + $0x3d8] ss:$40 sps:$4 sm:$0xff]   ;;  %v23002_v23 = vld [vmem:[#allocation5 + $0x1ae4] ss:$40 sps:$4 sm:$0xff]  }
 0x1c5   :  { %6307 = vmatprep.subr.bf16.mxu1 %v22927_v24  ;;  %v23005_v24 = vld [vmem:[#allocation5 + $0x42c] ss:$40 sps:$4 sm:$0xff]  }
 0x1c7   :  { %6053 = vmatmul.mubr.bf16.vlgmr.msra.gmra.mrb[0].mxu1 %v26757_v29  ;;  %5752 = vmatpush1.bf16.msra.mxu0 %v22922_v25  ;;  %v23000_v25 = vld [vmem:[#allocation5 + $0x1ae0] ss:$40 sps:$4 sm:$0xff]  }
 0x1c8   :  { %6308 = vmatpush1.bf16.msra.mxu1 %v22925_v27  ;;  %5753 = vmatprep.subr.bf16.mxu0 %v22930_v30  ;;  %v23003_v27 = vld [vmem:[#allocation5 + $0x428] ss:$40 sps:$4 sm:$0xff]   ;;  %v23008_v30 = vld [vmem:[#allocation5 + $0x1b34] ss:$40 sps:$4 sm:$0xff]  }
 0x1c9   :  { %6309 = vmatprep.subr.bf16.mxu1 %v22933_v31  ;;  %6339 = vmatprep.mubr.bf16.mxu1 %v26714_v48  ;;  %v23011_v31 = vld [vmem:[#allocation5 + $0x47c] ss:$40 sps:$4 sm:$0xff]  }
 0x1cb   :  { %5754 = vmatpush1.bf16.msra.mxu0 %v22928_v32  ;;  %v1050_v32 = vld [vmem:[#allocation5 + $0x1b80] sm:$0x33] }
 0x1cc   :  { %6310 = vmatpush1.bf16.msra.mxu1 %v22931_v33  ;;  %5755 = vmatprep.subr.bf16.mxu0 %v22936_v35  ;;  %v23006_v33 = vld [vmem:[#allocation5 + $0x1b30] ss:$40 sps:$4 sm:$0xff]  }
 0x1cd   :  { %6311 = vmatprep.subr.bf16.mxu1 %v22939_v36  ;;  %v23009_v35 = vld [vmem:[#allocation5 + $0x478] ss:$40 sps:$4 sm:$0xff]   ;;  %v20372_v36 = vcombine.high %v1050_v32, %v1050_v32 }
 0x1cf   :  { %5756 = vmatpush1.bf16.msra.mxu0 %v22934_v37  ;;  %v23015_v37 = vld [vmem:[#allocation5 + $0x4cc] ss:$40 sps:$4 sm:$0xff]  }
 0x1d0   :  { %6312 = vmatpush1.bf16.msra.mxu1 %v22937_v38  ;;  %5757 = vmatprep.subr.bf16.mxu0 %v22942_v40  ;;  %v20371_v38 = vcombine.low %v1050_v32, %v1050_v32  ;;  %v23013_v40 = vld [vmem:[#allocation5 + $0x4c8] ss:$40 sps:$4 sm:$0xff]   ;;  %v23085_v32 = vld [vmem:[#allocation5 + $0x37c] ss:$40 sps:$4 sm:$0xff]  }
 0x1d1   :  { %6313 = vmatprep.subr.bf16.mxu1 %v22945_v41 }
 0x1d2   :  { %v5540_v41 = vsel %vm5538_vm1, %v20371_v38, 0  ;;  %v23094_v38 = vld [vmem:[#allocation5 + $0x8dc] ss:$40 sps:$4 sm:$0xff]  }
 0x1d3   :  { %5758 = vmatpush1.bf16.msra.mxu0 %v22940_v43  ;;  %v23019_v43 = vld [vmem:[#allocation5 + $0xc] ss:$40 sps:$4 sm:$0xff]  }
 0x1d4   :  { %6314 = vmatpush1.bf16.msra.mxu1 %v22943_v44  ;;  %5759 = vmatprep.subr.bf16.mxu0 %v22948_v45  ;;  %v23022_v44 = vld [vmem:[#allocation5 + $0x51c] ss:$40 sps:$4 sm:$0xff]   ;;  %v23017_v45 = vld [vmem:[#allocation5 + $0x8] ss:$40 sps:$4 sm:$0xff]  }
 0x1d5   :  { %6315 = vmatprep.subr.bf16.mxu1 %v22951_v46  ;;  %v23020_v46 = vld [vmem:[#allocation5 + $0x518] ss:$40 sps:$4 sm:$0xff]  }
 0x1d7   :  { %5760 = vmatpush1.bf16.msra.mxu0 %v22946_v47  ;;  %v23025_v47 = vld [vmem:[#allocation5 + $0x5c] ss:$40 sps:$4 sm:$0xff]  }
 0x1d8   :  { %6316 = vmatpush1.bf16.msra.mxu1 %v22949_v50  ;;  %5761 = vmatprep.subr.bf16.mxu0 %v22954_v51  ;;  %v23028_v50 = vld [vmem:[#allocation5 + $0x56c] ss:$40 sps:$4 sm:$0xff]   ;;  %v23023_v51 = vld [vmem:[#allocation5 + $0x58] ss:$40 sps:$4 sm:$0xff]  }
 0x1d9   :  { %6317 = vmatprep.subr.bf16.mxu1 %v22957_v52  ;;  %v23026_v52 = vld [vmem:[#allocation5 + $0x568] ss:$40 sps:$4 sm:$0xff]  }
 0x1db   :  { %5762 = vmatpush1.bf16.msra.mxu0 %v22952_v54  ;;  %v23031_v54 = vld [vmem:[#allocation5 + $0xac] ss:$40 sps:$4 sm:$0xff]  }
 0x1dc   :  { %6318 = vmatpush1.bf16.msra.mxu1 %v22955_v55  ;;  %5763 = vmatprep.subr.bf16.mxu0 %v22960_v56  ;;  %v23034_v55 = vld [vmem:[#allocation5 + $0x5bc] ss:$40 sps:$4 sm:$0xff]   ;;  %v23029_v56 = vld [vmem:[#allocation5 + $0xa8] ss:$40 sps:$4 sm:$0xff]  }
 0x1dd   :  { %6319 = vmatprep.subr.bf16.mxu1 %v22963_v57  ;;  %v23032_v57 = vld [vmem:[#allocation5 + $0x5b8] ss:$40 sps:$4 sm:$0xff]  }
 0x1df   :  { %5764 = vmatpush1.bf16.msra.mxu0 %v22958_v58  ;;  %v23037_v58 = vld [vmem:[#allocation5 + $0xfc] ss:$40 sps:$4 sm:$0xff]  }
 0x1e0   :  { %6320 = vmatpush1.bf16.msra.mxu1 %v22961_v59  ;;  %5774 = vmatprep.subr.bf16.mxu0 %v22966_v60  ;;  %v23040_v59 = vld [vmem:[#allocation5 + $0x60c] ss:$40 sps:$4 sm:$0xff]   ;;  %v23035_v60 = vld [vmem:[#allocation5 + $0xf8] ss:$40 sps:$4 sm:$0xff]  }
 0x1e1   :  { %6321 = vmatprep.subr.bf16.mxu1 %v22969_v61  ;;  %v23038_v61 = vld [vmem:[#allocation5 + $0x608] ss:$40 sps:$4 sm:$0xff]  }
 0x1e2   :  { %5766 = vmatmul.mubr.bf16.vlgmr.msra.gmra.mrb[0].mxu0 %v26746_v42 }
 0x1e3   :  { %5775 = vmatpush1.bf16.msra.mxu0 %v22964_v62  ;;  %20382 = vmatprep.mubr.msk.bf16.mxu0 %vm5534_vm0, %v26748_v49  ;;  %v23043_v62 = vld [vmem:[#allocation5 + $0x14c] ss:$40 sps:$4 sm:$0xff]  }
 0x1e4   :  { %6322 = vmatpush1.bf16.msra.mxu1 %v22967_v63  ;;  %5776 = vmatprep.subr.bf16.mxu0 %v22972_v0  ;;  %v23046_v63 = vld [vmem:[#allocation5 + $0x65c] ss:$40 sps:$4 sm:$0xff]   ;;  %v23041_v0 = vld [vmem:[#allocation5 + $0x148] ss:$40 sps:$4 sm:$0xff]  }
 0x1e5   :  { %6323 = vmatprep.subr.bf16.mxu1 %v22975_v1  ;;  %v23044_v1 = vld [vmem:[#allocation5 + $0x658] ss:$40 sps:$4 sm:$0xff]  }
 0x1e7   :  { %5777 = vmatpush1.bf16.msra.mxu0 %v22970_v2  ;;  %v23049_v2 = vld [vmem:[#allocation5 + $0x19c] ss:$40 sps:$4 sm:$0xff]  }
 0x1e8   :  { %6324 = vmatpush1.bf16.msra.mxu1 %v22973_v3  ;;  %5778 = vmatprep.subr.bf16.mxu0 %v22978_v4  ;;  %v23052_v3 = vld [vmem:[#allocation5 + $0x6ac] ss:$40 sps:$4 sm:$0xff]   ;;  %v23047_v4 = vld [vmem:[#allocation5 + $0x198] ss:$40 sps:$4 sm:$0xff]  }
 0x1e9   :  { %6325 = vmatprep.subr.bf16.mxu1 %v22981_v5  ;;  %v23050_v5 = vld [vmem:[#allocation5 + $0x6a8] ss:$40 sps:$4 sm:$0xff]  }
 0x1eb   :  { %5779 = vmatpush1.bf16.msra.mxu0 %v22976_v6  ;;  %v23055_v6 = vld [vmem:[#allocation5 + $0x1ec] ss:$40 sps:$4 sm:$0xff]  }
 0x1ec   :  { %6326 = vmatpush1.bf16.msra.mxu1 %v22979_v7  ;;  %5780 = vmatprep.subr.bf16.mxu0 %v22984_v8  ;;  %v23058_v7 = vld [vmem:[#allocation5 + $0x6fc] ss:$40 sps:$4 sm:$0xff]   ;;  %v23053_v8 = vld [vmem:[#allocation5 + $0x1e8] ss:$40 sps:$4 sm:$0xff]  }
 0x1ed   :  { %6327 = vmatprep.subr.bf16.mxu1 %v22987_v9  ;;  %v23056_v9 = vld [vmem:[#allocation5 + $0x6f8] ss:$40 sps:$4 sm:$0xff]  }
 0x1ef   :  { %5781 = vmatpush1.bf16.msra.mxu0 %v22982_v12  ;;  %v23061_v12 = vld [vmem:[#allocation5 + $0x23c] ss:$40 sps:$4 sm:$0xff]  }
 0x1f0   :  { %6328 = vmatpush1.bf16.msra.mxu1 %v22985_v13  ;;  %5782 = vmatprep.subr.bf16.mxu0 %v22990_v14  ;;  %v23064_v13 = vld [vmem:[#allocation5 + $0x74c] ss:$40 sps:$4 sm:$0xff]   ;;  %v23059_v14 = vld [vmem:[#allocation5 + $0x238] ss:$40 sps:$4 sm:$0xff]  }
 0x1f1   :  { %6329 = vmatprep.subr.bf16.mxu1 %v22993_v15  ;;  %v23062_v15 = vld [vmem:[#allocation5 + $0x748] ss:$40 sps:$4 sm:$0xff]  }
 0x1f3   :  { %5783 = vmatpush1.bf16.msra.mxu0 %v22988_v16  ;;  %v23067_v16 = vld [vmem:[#allocation5 + $0x28c] ss:$40 sps:$4 sm:$0xff]  }
 0x1f4   :  { %6330 = vmatpush1.bf16.msra.mxu1 %v22991_v18  ;;  %5784 = vmatprep.subr.bf16.mxu0 %v22996_v19  ;;  %v23070_v18 = vld [vmem:[#allocation5 + $0x79c] ss:$40 sps:$4 sm:$0xff]   ;;  %v23065_v19 = vld [vmem:[#allocation5 + $0x288] ss:$40 sps:$4 sm:$0xff]  }
 0x1f5   :  { %6331 = vmatprep.subr.bf16.mxu1 %v22999_v20  ;;  %v23068_v20 = vld [vmem:[#allocation5 + $0x798] ss:$40 sps:$4 sm:$0xff]  }
 0x1f7   :  { %5785 = vmatpush1.bf16.msra.mxu0 %v22994_v21  ;;  %v23073_v21 = vld [vmem:[#allocation5 + $0x2dc] ss:$40 sps:$4 sm:$0xff]  }
 0x1f8   :  { %6332 = vmatpush1.bf16.msra.mxu1 %v22997_v22  ;;  %5786 = vmatprep.subr.bf16.mxu0 %v23002_v23  ;;  %v23076_v22 = vld [vmem:[#allocation5 + $0x7ec] ss:$40 sps:$4 sm:$0xff]   ;;  %v23071_v23 = vld [vmem:[#allocation5 + $0x2d8] ss:$40 sps:$4 sm:$0xff]  }
 0x1f9   :  { %6333 = vmatprep.subr.bf16.mxu1 %v23005_v24  ;;  %v23074_v24 = vld [vmem:[#allocation5 + $0x7e8] ss:$40 sps:$4 sm:$0xff]  }
 0x1fb   :  { %5787 = vmatpush1.bf16.msra.mxu0 %v23000_v25  ;;  %v23079_v25 = vld [vmem:[#allocation5 + $0x32c] ss:$40 sps:$4 sm:$0xff]  }
 0x1fc   :  { %6334 = vmatpush1.bf16.msra.mxu1 %v23003_v27  ;;  %5788 = vmatprep.subr.bf16.mxu0 %v23008_v30  ;;  %v23082_v27 = vld [vmem:[#allocation5 + $0x83c] ss:$40 sps:$4 sm:$0xff]   ;;  %v23077_v30 = vld [vmem:[#allocation5 + $0x328] ss:$40 sps:$4 sm:$0xff]  }
 0x1fd   :  { %6335 = vmatprep.subr.bf16.mxu1 %v23011_v31  ;;  %v23080_v31 = vld [vmem:[#allocation5 + $0x838] ss:$40 sps:$4 sm:$0xff]  }
 0x1ff   :  { %5789 = vmatpush1.bf16.msra.mxu0 %v23006_v33  ;;  %v23088_v33 = vld [vmem:[#allocation5 + $0x88c] ss:$40 sps:$4 sm:$0xff]  }
 0x200   :  { %6336 = vmatpush1.bf16.msra.mxu1 %v23009_v35  ;;  %20381 = vmatprep.subr.msk.bf16.mxu0 %vm5538_vm1, %v20372_v36  ;;  %v23083_v35 = vld [vmem:[#allocation5 + $0x378] ss:$40 sps:$4 sm:$0xff]   ;;  %v23086_v36 = vld [vmem:[#allocation5 + $0x888] ss:$40 sps:$4 sm:$0xff]  }
 0x201   :  { %6337 = vmatprep.subr.bf16.mxu1 %v23015_v37  ;;  %v23091_v37 = vld [vmem:[#allocation5 + $0x3cc] ss:$40 sps:$4 sm:$0xff]  }
 0x203   :  { %5791 = vmatpush1.bf16.msra.mxu0 %v5540_v41  ;;  %v23092_v41 = vld [vmem:[#allocation5 + $0x8d8] ss:$40 sps:$4 sm:$0xff]  }
 0x204   :  { %6338 = vmatpush1.bf16.msra.mxu1 %v23013_v40  ;;  %5815 = vmatprep.subr.bf16.mxu0 %v23019_v43  ;;  %v23089_v40 = vld [vmem:[#allocation5 + $0x3c8] ss:$40 sps:$4 sm:$0xff]   ;;  %v23097_v43 = vld [vmem:[#allocation5 + $0x41c] ss:$40 sps:$4 sm:$0xff]  }
 0x205   :  { %6348 = vmatprep.subr.bf16.mxu1 %v23022_v44  ;;  %v23100_v44 = vld [vmem:[#allocation5 + $0x92c] ss:$40 sps:$4 sm:$0xff]  }
 0x206   :  { %5807 = vmatmul.mubr.bf16.vlgmr.msra.gmra.mrb[0].mxu0 %v26757_v29 }
 0x207   :  { %6340 = vmatmul.mubr.bf16.vlgmr.msra.gmra.mrb[4].mxu1 %v26720_v10  ;;  %5816 = vmatpush1.bf16.msra.mxu0 %v23017_v45  ;;  %v23095_v45 = vld [vmem:[#allocation5 + $0x418] ss:$40 sps:$4 sm:$0xff]  }
 0x208   :  { %6349 = vmatpush1.bf16.msra.mxu1 %v23020_v46  ;;  %5817 = vmatprep.subr.bf16.mxu0 %v23025_v47  ;;  %v23098_v46 = vld [vmem:[#allocation5 + $0x928] ss:$40 sps:$4 sm:$0xff]   ;;  %v23103_v47 = vld [vmem:[#allocation5 + $0x46c] ss:$40 sps:$4 sm:$0xff]  }
 0x209   :  { %6350 = vmatprep.subr.bf16.mxu1 %v23028_v50  ;;  %5847 = vmatprep.mubr.bf16.mxu0 %v26714_v48  ;;  %v23106_v50 = vld [vmem:[#allocation5 + $0x97c] ss:$40 sps:$4 sm:$0xff]  }
 0x20a   :  { %6380 = vmatprep.mubr.bf16.mxu1 %v26716_v53 }
 0x20b   :  { %5818 = vmatpush1.bf16.msra.mxu0 %v23023_v51  ;;  %v23101_v51 = vld [vmem:[#allocation5 + $0x468] ss:$40 sps:$4 sm:$0xff]  }
 0x20c   :  { %6351 = vmatpush1.bf16.msra.mxu1 %v23026_v52  ;;  %5819 = vmatprep.subr.bf16.mxu0 %v23031_v54  ;;  %v23104_v52 = vld [vmem:[#allocation5 + $0x978] ss:$40 sps:$4 sm:$0xff]   ;;  %v23109_v54 = vld [vmem:[#allocation5 + $0x4bc] ss:$40 sps:$4 sm:$0xff]  }
 0x20d   :  { %6352 = vmatprep.subr.bf16.mxu1 %v23034_v55  ;;  %v23112_v55 = vld [vmem:[#allocation5 + $0x9cc] ss:$40 sps:$4 sm:$0xff]  }
 0x20f   :  { %5820 = vmatpush1.bf16.msra.mxu0 %v23029_v56  ;;  %v23107_v56 = vld [vmem:[#allocation5 + $0x4b8] ss:$40 sps:$4 sm:$0xff]  }
 0x210   :  { %6353 = vmatpush1.bf16.msra.mxu1 %v23032_v57  ;;  %5821 = vmatprep.subr.bf16.mxu0 %v23037_v58  ;;  %v23110_v57 = vld [vmem:[#allocation5 + $0x9c8] ss:$40 sps:$4 sm:$0xff]   ;;  %v23115_v58 = vld [vmem:[#allocation5 + $0x14] ss:$40 sps:$4 sm:$0xff]  }
 0x211   :  { %6354 = vmatprep.subr.bf16.mxu1 %v23040_v59  ;;  %v23118_v59 = vld [vmem:[#allocation5 + $0xa1c] ss:$40 sps:$4 sm:$0xff]  }
 0x213   :  { %5822 = vmatpush1.bf16.msra.mxu0 %v23035_v60  ;;  %v23113_v60 = vld [vmem:[#allocation5 + $0x10] ss:$40 sps:$4 sm:$0xff]  }
 0x214   :  { %6355 = vmatpush1.bf16.msra.mxu1 %v23038_v61  ;;  %5823 = vmatprep.subr.bf16.mxu0 %v23043_v62  ;;  %v23116_v61 = vld [vmem:[#allocation5 + $0xa18] ss:$40 sps:$4 sm:$0xff]   ;;  %v23121_v62 = vld [vmem:[#allocation5 + $0x64] ss:$40 sps:$4 sm:$0xff]  }
 0x215   :  { %6356 = vmatprep.subr.bf16.mxu1 %v23046_v63  ;;  %v23124_v63 = vld [vmem:[#allocation5 + $0xa6c] ss:$40 sps:$4 sm:$0xff]  }
 0x217   :  { %5824 = vmatpush1.bf16.msra.mxu0 %v23041_v0  ;;  %v23119_v0 = vld [vmem:[#allocation5 + $0x60] ss:$40 sps:$4 sm:$0xff]  }
 0x218   :  { %6357 = vmatpush1.bf16.msra.mxu1 %v23044_v1  ;;  %5825 = vmatprep.subr.bf16.mxu0 %v23049_v2  ;;  %v23122_v1 = vld [vmem:[#allocation5 + $0xa68] ss:$40 sps:$4 sm:$0xff]   ;;  %v23127_v2 = vld [vmem:[#allocation5 + $0xb4] ss:$40 sps:$4 sm:$0xff]  }
 0x219   :  { %6358 = vmatprep.subr.bf16.mxu1 %v23052_v3  ;;  %v23130_v3 = vld [vmem:[#allocation5 + $0xabc] ss:$40 sps:$4 sm:$0xff]  }
 0x21b   :  { %5826 = vmatpush1.bf16.msra.mxu0 %v23047_v4  ;;  %v23125_v4 = vld [vmem:[#allocation5 + $0xb0] ss:$40 sps:$4 sm:$0xff]  }
 0x21c   :  { %6359 = vmatpush1.bf16.msra.mxu1 %v23050_v5  ;;  %5827 = vmatprep.subr.bf16.mxu0 %v23055_v6  ;;  %v23128_v5 = vld [vmem:[#allocation5 + $0xab8] ss:$40 sps:$4 sm:$0xff]   ;;  %v23133_v6 = vld [vmem:[#allocation5 + $0x104] ss:$40 sps:$4 sm:$0xff]  }
 0x21d   :  { %6360 = vmatprep.subr.bf16.mxu1 %v23058_v7  ;;  %v23136_v7 = vld [vmem:[#allocation5 + $0xb0c] ss:$40 sps:$4 sm:$0xff]  }
 0x21f   :  { %5828 = vmatpush1.bf16.msra.mxu0 %v23053_v8  ;;  %v23131_v8 = vld [vmem:[#allocation5 + $0x100] ss:$40 sps:$4 sm:$0xff]  }
 0x220   :  { %6361 = vmatpush1.bf16.msra.mxu1 %v23056_v9  ;;  %5829 = vmatprep.subr.bf16.mxu0 %v23061_v12  ;;  %v23134_v9 = vld [vmem:[#allocation5 + $0xb08] ss:$40 sps:$4 sm:$0xff]   ;;  %v23139_v12 = vld [vmem:[#allocation5 + $0x154] ss:$40 sps:$4 sm:$0xff]  }
 0x221   :  { %6362 = vmatprep.subr.bf16.mxu1 %v23064_v13  ;;  %v23142_v13 = vld [vmem:[#allocation5 + $0xb5c] ss:$40 sps:$4 sm:$0xff]  }
 0x223   :  { %5830 = vmatpush1.bf16.msra.mxu0 %v23059_v14  ;;  %v23137_v14 = vld [vmem:[#allocation5 + $0x150] ss:$40 sps:$4 sm:$0xff]  }
 0x224   :  { %6363 = vmatpush1.bf16.msra.mxu1 %v23062_v15  ;;  %5831 = vmatprep.subr.bf16.mxu0 %v23067_v16  ;;  %v23140_v15 = vld [vmem:[#allocation5 + $0xb58] ss:$40 sps:$4 sm:$0xff]   ;;  %v23145_v16 = vld [vmem:[#allocation5 + $0x1a4] ss:$40 sps:$4 sm:$0xff]  }
 0x225   :  { %6364 = vmatprep.subr.bf16.mxu1 %v23070_v18  ;;  %v23148_v18 = vld [vmem:[#allocation5 + $0xbac] ss:$40 sps:$4 sm:$0xff]  }
 0x227   :  { %5832 = vmatpush1.bf16.msra.mxu0 %v23065_v19  ;;  %v23143_v19 = vld [vmem:[#allocation5 + $0x1a0] ss:$40 sps:$4 sm:$0xff]  }
 0x228   :  { %6365 = vmatpush1.bf16.msra.mxu1 %v23068_v20  ;;  %5833 = vmatprep.subr.bf16.mxu0 %v23073_v21  ;;  %v23146_v20 = vld [vmem:[#allocation5 + $0xba8] ss:$40 sps:$4 sm:$0xff]   ;;  %v23151_v21 = vld [vmem:[#allocation5 + $0x1f4] ss:$40 sps:$4 sm:$0xff]  }
 0x229   :  { %6366 = vmatprep.subr.bf16.mxu1 %v23076_v22  ;;  %v23154_v22 = vld [vmem:[#allocation5 + $0xbfc] ss:$40 sps:$4 sm:$0xff]  }
 0x22b   :  { %5834 = vmatpush1.bf16.msra.mxu0 %v23071_v23  ;;  %v23149_v23 = vld [vmem:[#allocation5 + $0x1f0] ss:$40 sps:$4 sm:$0xff]  }
 0x22c   :  { %6367 = vmatpush1.bf16.msra.mxu1 %v23074_v24  ;;  %5835 = vmatprep.subr.bf16.mxu0 %v23079_v25  ;;  %v23152_v24 = vld [vmem:[#allocation5 + $0xbf8] ss:$40 sps:$4 sm:$0xff]   ;;  %v23157_v25 = vld [vmem:[#allocation5 + $0x244] ss:$40 sps:$4 sm:$0xff]  }
 0x22d   :  { %6368 = vmatprep.subr.bf16.mxu1 %v23082_v27  ;;  %v23160_v27 = vld [vmem:[#allocation5 + $0xc4c] ss:$40 sps:$4 sm:$0xff]  }
 0x22f   :  { %5836 = vmatpush1.bf16.msra.mxu0 %v23077_v30  ;;  %v23155_v30 = vld [vmem:[#allocation5 + $0x240] ss:$40 sps:$4 sm:$0xff]  }
 0x230   :  { %6369 = vmatpush1.bf16.msra.mxu1 %v23080_v31  ;;  %5837 = vmatprep.subr.bf16.mxu0 %v23085_v32  ;;  %v23158_v31 = vld [vmem:[#allocation5 + $0xc48] ss:$40 sps:$4 sm:$0xff]   ;;  %v23163_v32 = vld [vmem:[#allocation5 + $0x294] ss:$40 sps:$4 sm:$0xff]  }
 0x231   :  { %6370 = vmatprep.subr.bf16.mxu1 %v23088_v33  ;;  %v23166_v33 = vld [vmem:[#allocation5 + $0xc9c] ss:$40 sps:$4 sm:$0xff]  }
 0x233   :  { %5838 = vmatpush1.bf16.msra.mxu0 %v23083_v35  ;;  %v23161_v35 = vld [vmem:[#allocation5 + $0x290] ss:$40 sps:$4 sm:$0xff]  }
 0x234   :  { %6371 = vmatpush1.bf16.msra.mxu1 %v23086_v36  ;;  %5839 = vmatprep.subr.bf16.mxu0 %v23091_v37  ;;  %v23164_v36 = vld [vmem:[#allocation5 + $0xc98] ss:$40 sps:$4 sm:$0xff]   ;;  %v23169_v37 = vld [vmem:[#allocation5 + $0x2e4] ss:$40 sps:$4 sm:$0xff]  }
 0x235   :  { %6372 = vmatprep.subr.bf16.mxu1 %v23094_v38  ;;  %v23172_v38 = vld [vmem:[#allocation5 + $0xcec] ss:$40 sps:$4 sm:$0xff]  }
 0x237   :  { %5840 = vmatpush1.bf16.msra.mxu0 %v23089_v40  ;;  %v23167_v40 = vld [vmem:[#allocation5 + $0x2e0] ss:$40 sps:$4 sm:$0xff]  }
 0x238   :  { %6373 = vmatpush1.bf16.msra.mxu1 %v23092_v41  ;;  %5841 = vmatprep.subr.bf16.mxu0 %v23097_v43  ;;  %v23170_v41 = vld [vmem:[#allocation5 + $0xce8] ss:$40 sps:$4 sm:$0xff]   ;;  %v23175_v43 = vld [vmem:[#allocation5 + $0x334] ss:$40 sps:$4 sm:$0xff]  }
 0x239   :  { %6374 = vmatprep.subr.bf16.mxu1 %v23100_v44  ;;  %v23178_v44 = vld [vmem:[#allocation5 + $0xd3c] ss:$40 sps:$4 sm:$0xff]  }
 0x23b   :  { %5842 = vmatpush1.bf16.msra.mxu0 %v23095_v45  ;;  %v23173_v45 = vld [vmem:[#allocation5 + $0x330] ss:$40 sps:$4 sm:$0xff]  }
 0x23c   :  { %6375 = vmatpush1.bf16.msra.mxu1 %v23098_v46  ;;  %5843 = vmatprep.subr.bf16.mxu0 %v23103_v47  ;;  %v23176_v46 = vld [vmem:[#allocation5 + $0xd38] ss:$40 sps:$4 sm:$0xff]   ;;  %v23181_v47 = vld [vmem:[#allocation5 + $0x384] ss:$40 sps:$4 sm:$0xff]  }
 0x23d   :  { %6376 = vmatprep.subr.bf16.mxu1 %v23106_v50  ;;  %v23184_v50 = vld [vmem:[#allocation5 + $0xd8c] ss:$40 sps:$4 sm:$0xff]  }
 0x23f   :  { %5844 = vmatpush1.bf16.msra.mxu0 %v23101_v51  ;;  %v23179_v51 = vld [vmem:[#allocation5 + $0x380] ss:$40 sps:$4 sm:$0xff]  }
 0x240   :  { %6377 = vmatpush1.bf16.msra.mxu1 %v23104_v52  ;;  %5845 = vmatprep.subr.bf16.mxu0 %v23109_v54  ;;  %v23182_v52 = vld [vmem:[#allocation5 + $0xd88] ss:$40 sps:$4 sm:$0xff]   ;;  %v23187_v54 = vld [vmem:[#allocation5 + $0x3d4] ss:$40 sps:$4 sm:$0xff]  }
 0x241   :  { %6378 = vmatprep.subr.bf16.mxu1 %v23112_v55  ;;  %v23190_v55 = vld [vmem:[#allocation5 + $0xddc] ss:$40 sps:$4 sm:$0xff]  }
 0x243   :  { %5846 = vmatpush1.bf16.msra.mxu0 %v23107_v56  ;;  %v23185_v56 = vld [vmem:[#allocation5 + $0x3d0] ss:$40 sps:$4 sm:$0xff]  }
 0x244   :  { %6379 = vmatpush1.bf16.msra.mxu1 %v23110_v57  ;;  %6061 = vmatprep.subr.bf16.mxu0 %v23115_v58  ;;  %v23188_v57 = vld [vmem:[#allocation5 + $0xdd8] ss:$40 sps:$4 sm:$0xff]   ;;  %v23193_v58 = vld [vmem:[#allocation5 + $0x424] ss:$40 sps:$4 sm:$0xff]  }
 0x245   :  { %6389 = vmatprep.subr.bf16.mxu1 %v23118_v59  ;;  %v23196_v59 = vld [vmem:[#allocation5 + $0xe2c] ss:$40 sps:$4 sm:$0xff]  }
 0x246   :  { %5848 = vmatmul.mubr.bf16.vlgmr.msra.gmra.mrb[4].mxu0 %v26720_v10 }
 0x247   :  { %6381 = vmatmul.mubr.bf16.vlgmr.msra.gmra.mrb[4].mxu1 %v26722_v11  ;;  %6062 = vmatpush1.bf16.msra.mxu0 %v23113_v60  ;;  %v23191_v60 = vld [vmem:[#allocation5 + $0x420] ss:$40 sps:$4 sm:$0xff]  }
 0x248   :  { %6390 = vmatpush1.bf16.msra.mxu1 %v23116_v61  ;;  %6063 = vmatprep.subr.bf16.mxu0 %v23121_v62  ;;  %v23194_v61 = vld [vmem:[#allocation5 + $0xe28] ss:$40 sps:$4 sm:$0xff]   ;;  %v23199_v62 = vld [vmem:[#allocation5 + $0x474] ss:$40 sps:$4 sm:$0xff]  }
 0x249   :  { %6391 = vmatprep.subr.bf16.mxu1 %v23124_v63  ;;  %6093 = vmatprep.mubr.bf16.mxu0 %v26714_v48  ;;  %v23202_v63 = vld [vmem:[#allocation5 + $0xe7c] ss:$40 sps:$4 sm:$0xff]  }
 0x24a   :  { %6421 = vmatprep.mubr.bf16.mxu1 %v26727_v39 }
 0x24b   :  { %6064 = vmatpush1.bf16.msra.mxu0 %v23119_v0  ;;  %v23197_v0 = vld [vmem:[#allocation5 + $0x470] ss:$40 sps:$4 sm:$0xff]  }
 0x24c   :  { %6392 = vmatpush1.bf16.msra.mxu1 %v23122_v1  ;;  %6065 = vmatprep.subr.bf16.mxu0 %v23127_v2  ;;  %v23200_v1 = vld [vmem:[#allocation5 + $0xe78] ss:$40 sps:$4 sm:$0xff]   ;;  %v23205_v2 = vld [vmem:[#allocation5 + $0x4c4] ss:$40 sps:$4 sm:$0xff]  }
 0x24d   :  { %6393 = vmatprep.subr.bf16.mxu1 %v23130_v3  ;;  %v23208_v3 = vld [vmem:[#allocation5 + $0xecc] ss:$40 sps:$4 sm:$0xff]  }
 0x24f   :  { %6066 = vmatpush1.bf16.msra.mxu0 %v23125_v4  ;;  %v23203_v4 = vld [vmem:[#allocation5 + $0x4c0] ss:$40 sps:$4 sm:$0xff]  }
 0x250   :  { %6394 = vmatpush1.bf16.msra.mxu1 %v23128_v5  ;;  %6067 = vmatprep.subr.bf16.mxu0 %v23133_v6  ;;  %v23206_v5 = vld [vmem:[#allocation5 + $0xec8] ss:$40 sps:$4 sm:$0xff]   ;;  %v23211_v6 = vld [vmem:[#allocation5 + $0x514] ss:$40 sps:$4 sm:$0xff]  }
 0x251   :  { %6395 = vmatprep.subr.bf16.mxu1 %v23136_v7  ;;  %v23214_v7 = vld [vmem:[#allocation5 + $0xf1c] ss:$40 sps:$4 sm:$0xff]  }
 0x253   :  { %6068 = vmatpush1.bf16.msra.mxu0 %v23131_v8  ;;  %v23209_v8 = vld [vmem:[#allocation5 + $0x510] ss:$40 sps:$4 sm:$0xff]  }
 0x254   :  { %6396 = vmatpush1.bf16.msra.mxu1 %v23134_v9  ;;  %6069 = vmatprep.subr.bf16.mxu0 %v23139_v12  ;;  %v23212_v9 = vld [vmem:[#allocation5 + $0xf18] ss:$40 sps:$4 sm:$0xff]   ;;  %v23217_v12 = vld [vmem:[#allocation5 + $0x564] ss:$40 sps:$4 sm:$0xff]  }
 0x255   :  { %6397 = vmatprep.subr.bf16.mxu1 %v23142_v13  ;;  %v23220_v13 = vld [vmem:[#allocation5 + $0xf6c] ss:$40 sps:$4 sm:$0xff]  }
 0x257   :  { %6070 = vmatpush1.bf16.msra.mxu0 %v23137_v14  ;;  %v23215_v14 = vld [vmem:[#allocation5 + $0x560] ss:$40 sps:$4 sm:$0xff]  }
 0x258   :  { %6398 = vmatpush1.bf16.msra.mxu1 %v23140_v15  ;;  %6071 = vmatprep.subr.bf16.mxu0 %v23145_v16  ;;  %v23218_v15 = vld [vmem:[#allocation5 + $0xf68] ss:$40 sps:$4 sm:$0xff]   ;;  %v23223_v16 = vld [vmem:[#allocation5 + $0x5b4] ss:$40 sps:$4 sm:$0xff]  }
 0x259   :  { %6399 = vmatprep.subr.bf16.mxu1 %v23148_v18  ;;  %v23226_v18 = vld [vmem:[#allocation5 + $0xfbc] ss:$40 sps:$4 sm:$0xff]  }
 0x25b   :  { %6072 = vmatpush1.bf16.msra.mxu0 %v23143_v19  ;;  %v23221_v19 = vld [vmem:[#allocation5 + $0x5b0] ss:$40 sps:$4 sm:$0xff]  }
 0x25c   :  { %6400 = vmatpush1.bf16.msra.mxu1 %v23146_v20  ;;  %6073 = vmatprep.subr.bf16.mxu0 %v23151_v21  ;;  %v23224_v20 = vld [vmem:[#allocation5 + $0xfb8] ss:$40 sps:$4 sm:$0xff]   ;;  %v23229_v21 = vld [vmem:[#allocation5 + $0x604] ss:$40 sps:$4 sm:$0xff]  }
 0x25d   :  { %6401 = vmatprep.subr.bf16.mxu1 %v23154_v22  ;;  %v23232_v22 = vld [vmem:[#allocation5 + $0x100c] ss:$40 sps:$4 sm:$0xff]  }
 0x25f   :  { %6074 = vmatpush1.bf16.msra.mxu0 %v23149_v23  ;;  %v23227_v23 = vld [vmem:[#allocation5 + $0x600] ss:$40 sps:$4 sm:$0xff]  }
 0x260   :  { %6402 = vmatpush1.bf16.msra.mxu1 %v23152_v24  ;;  %6075 = vmatprep.subr.bf16.mxu0 %v23157_v25  ;;  %v23230_v24 = vld [vmem:[#allocation5 + $0x1008] ss:$40 sps:$4 sm:$0xff]   ;;  %v23235_v25 = vld [vmem:[#allocation5 + $0x654] ss:$40 sps:$4 sm:$0xff]  }
 0x261   :  { %6403 = vmatprep.subr.bf16.mxu1 %v23160_v27  ;;  %v23238_v27 = vld [vmem:[#allocation5 + $0x105c] ss:$40 sps:$4 sm:$0xff]  }
 0x263   :  { %6076 = vmatpush1.bf16.msra.mxu0 %v23155_v30  ;;  %v23233_v30 = vld [vmem:[#allocation5 + $0x650] ss:$40 sps:$4 sm:$0xff]  }
 0x264   :  { %6404 = vmatpush1.bf16.msra.mxu1 %v23158_v31  ;;  %6077 = vmatprep.subr.bf16.mxu0 %v23163_v32  ;;  %v23236_v31 = vld [vmem:[#allocation5 + $0x1058] ss:$40 sps:$4 sm:$0xff]   ;;  %v23241_v32 = vld [vmem:[#allocation5 + $0x6a4] ss:$40 sps:$4 sm:$0xff]  }
 0x265   :  { %6405 = vmatprep.subr.bf16.mxu1 %v23166_v33  ;;  %v23244_v33 = vld [vmem:[#allocation5 + $0x10ac] ss:$40 sps:$4 sm:$0xff]  }
 0x267   :  { %6078 = vmatpush1.bf16.msra.mxu0 %v23161_v35  ;;  %v23239_v35 = vld [vmem:[#allocation5 + $0x6a0] ss:$40 sps:$4 sm:$0xff]  }
 0x268   :  { %6406 = vmatpush1.bf16.msra.mxu1 %v23164_v36  ;;  %6079 = vmatprep.subr.bf16.mxu0 %v23169_v37  ;;  %v23242_v36 = vld [vmem:[#allocation5 + $0x10a8] ss:$40 sps:$4 sm:$0xff]   ;;  %v23247_v37 = vld [vmem:[#allocation5 + $0x6f4] ss:$40 sps:$4 sm:$0xff]  }
 0x269   :  { %6407 = vmatprep.subr.bf16.mxu1 %v23172_v38  ;;  %v23250_v38 = vld [vmem:[#allocation5 + $0x10fc] ss:$40 sps:$4 sm:$0xff]  }
 0x26b   :  { %6080 = vmatpush1.bf16.msra.mxu0 %v23167_v40  ;;  %v23245_v40 = vld [vmem:[#allocation5 + $0x6f0] ss:$40 sps:$4 sm:$0xff]  }
 0x26c   :  { %6408 = vmatpush1.bf16.msra.mxu1 %v23170_v41  ;;  %6081 = vmatprep.subr.bf16.mxu0 %v23175_v43  ;;  %v23248_v41 = vld [vmem:[#allocation5 + $0x10f8] ss:$40 sps:$4 sm:$0xff]  }
 0x26d   :  { %6409 = vmatprep.subr.bf16.mxu1 %v23178_v44  ;;  %v23253_v44 = vld [vmem:[#allocation5 + $0x744] ss:$40 sps:$4 sm:$0xff]  }
 0x26f   :  { %6082 = vmatpush1.bf16.msra.mxu0 %v23173_v45  ;;  %v23256_v45 = vld [vmem:[#allocation5 + $0x114c] ss:$40 sps:$4 sm:$0xff]  }
 0x270   :  { %6410 = vmatpush1.bf16.msra.mxu1 %v23176_v46  ;;  %6083 = vmatprep.subr.bf16.mxu0 %v23181_v47  ;;  %v23251_v47 = vld [vmem:[#allocation5 + $0x740] ss:$40 sps:$4 sm:$0xff]  }
 0x271   :  { %6411 = vmatprep.subr.bf16.mxu1 %v23184_v50  ;;  %v23254_v50 = vld [vmem:[#allocation5 + $0x1148] ss:$40 sps:$4 sm:$0xff]  }
 0x273   :  { %6084 = vmatpush1.bf16.msra.mxu0 %v23179_v51 }
 0x274   :  { %6412 = vmatpush1.bf16.msra.mxu1 %v23182_v52  ;;  %6085 = vmatprep.subr.bf16.mxu0 %v23187_v54  ;;  %v23259_v54 = vld [vmem:[#allocation5 + $0x794] ss:$40 sps:$4 sm:$0xff]  }
 0x275   :  { %6413 = vmatprep.subr.bf16.mxu1 %v23190_v55  ;;  %v23262_v55 = vld [vmem:[#allocation5 + $0x119c] ss:$40 sps:$4 sm:$0xff]  }
 0x277   :  { %6086 = vmatpush1.bf16.msra.mxu0 %v23185_v56  ;;  %v23257_v56 = vld [vmem:[#allocation5 + $0x790] ss:$40 sps:$4 sm:$0xff]  }
 0x278   :  { %6414 = vmatpush1.bf16.msra.mxu1 %v23188_v57  ;;  %6087 = vmatprep.subr.bf16.mxu0 %v23193_v58  ;;  %v23260_v57 = vld [vmem:[#allocation5 + $0x1198] ss:$40 sps:$4 sm:$0xff]   ;;  %v23265_v58 = vld [vmem:[#allocation5 + $0x7e4] ss:$40 sps:$4 sm:$0xff]  }
 0x279   :  { %6415 = vmatprep.subr.bf16.mxu1 %v23196_v59  ;;  %v23268_v59 = vld [vmem:[#allocation5 + $0x11ec] ss:$40 sps:$4 sm:$0xff]  }
 0x27b   :  { %6088 = vmatpush1.bf16.msra.mxu0 %v23191_v60  ;;  %v23263_v60 = vld [vmem:[#allocation5 + $0x7e0] ss:$40 sps:$4 sm:$0xff]  }
 0x27c   :  { %6416 = vmatpush1.bf16.msra.mxu1 %v23194_v61  ;;  %6089 = vmatprep.subr.bf16.mxu0 %v23199_v62  ;;  %v23266_v61 = vld [vmem:[#allocation5 + $0x11e8] ss:$40 sps:$4 sm:$0xff]   ;;  %v23271_v62 = vld [vmem:[#allocation5 + $0x834] ss:$40 sps:$4 sm:$0xff]  }
 0x27d   :  { %6417 = vmatprep.subr.bf16.mxu1 %v23202_v63  ;;  %v23274_v63 = vld [vmem:[#allocation5 + $0x123c] ss:$40 sps:$4 sm:$0xff]  }
 0x27f   :  { %6090 = vmatpush1.bf16.msra.mxu0 %v23197_v0  ;;  %v23269_v0 = vld [vmem:[#allocation5 + $0x830] ss:$40 sps:$4 sm:$0xff]  }
 0x280   :  { %6418 = vmatpush1.bf16.msra.mxu1 %v23200_v1  ;;  %6091 = vmatprep.subr.bf16.mxu0 %v23205_v2  ;;  %v23272_v1 = vld [vmem:[#allocation5 + $0x1238] ss:$40 sps:$4 sm:$0xff]   ;;  %v23277_v2 = vld [vmem:[#allocation5 + $0x884] ss:$40 sps:$4 sm:$0xff]  }
 0x281   :  { %6419 = vmatprep.subr.bf16.mxu1 %v23208_v3  ;;  %v23280_v3 = vld [vmem:[#allocation5 + $0x128c] ss:$40 sps:$4 sm:$0xff]  }
 0x283   :  { %6092 = vmatpush1.bf16.msra.mxu0 %v23203_v4  ;;  %v23275_v4 = vld [vmem:[#allocation5 + $0x880] ss:$40 sps:$4 sm:$0xff]  }
 0x284   :  { %6420 = vmatpush1.bf16.msra.mxu1 %v23206_v5  ;;  %6102 = vmatprep.subr.bf16.mxu0 %v23211_v6  ;;  %v23278_v5 = vld [vmem:[#allocation5 + $0x1288] ss:$40 sps:$4 sm:$0xff]   ;;  %v23283_v6 = vld [vmem:[#allocation5 + $0x8d4] ss:$40 sps:$4 sm:$0xff]  }
 0x285   :  { %6430 = vmatprep.subr.bf16.mxu1 %v23214_v7  ;;  %v23286_v7 = vld [vmem:[#allocation5 + $0x12dc] ss:$40 sps:$4 sm:$0xff]  }
 0x286   :  { %6094 = vmatmul.mubr.bf16.vlgmr.msra.gmra.mrb[8].mxu0 %v26720_v10 }
 0x287   :  { %6422 = vmatmul.mubr.bf16.vlgmr.msra.gmra.mrb[4].mxu1 %v26730_v17  ;;  %6103 = vmatpush1.bf16.msra.mxu0 %v23209_v8  ;;  %v23281_v8 = vld [vmem:[#allocation5 + $0x8d0] ss:$40 sps:$4 sm:$0xff]  }
 0x288   :  { %6431 = vmatpush1.bf16.msra.mxu1 %v23212_v9  ;;  %6104 = vmatprep.subr.bf16.mxu0 %v23217_v12  ;;  %v23284_v9 = vld [vmem:[#allocation5 + $0x12d8] ss:$40 sps:$4 sm:$0xff]   ;;  %v23289_v12 = vld [vmem:[#allocation5 + $0x924] ss:$40 sps:$4 sm:$0xff]  }
 0x289   :  { %6432 = vmatprep.subr.bf16.mxu1 %v23220_v13  ;;  %6134 = vmatprep.mubr.bf16.mxu0 %v26716_v53  ;;  %v23292_v13 = vld [vmem:[#allocation5 + $0x132c] ss:$40 sps:$4 sm:$0xff]  }
 0x28a   :  { %6462 = vmatprep.mubr.bf16.mxu1 %v26734_v26 }
 0x28b   :  { %6105 = vmatpush1.bf16.msra.mxu0 %v23215_v14  ;;  %v23287_v14 = vld [vmem:[#allocation5 + $0x920] ss:$40 sps:$4 sm:$0xff]  }
 0x28c   :  { %6433 = vmatpush1.bf16.msra.mxu1 %v23218_v15  ;;  %6106 = vmatprep.subr.bf16.mxu0 %v23223_v16  ;;  %v23290_v15 = vld [vmem:[#allocation5 + $0x1328] ss:$40 sps:$4 sm:$0xff]   ;;  %v23295_v16 = vld [vmem:[#allocation5 + $0x974] ss:$40 sps:$4 sm:$0xff]  }
 0x28d   :  { %6434 = vmatprep.subr.bf16.mxu1 %v23226_v18  ;;  %v23298_v18 = vld [vmem:[#allocation5 + $0x137c] ss:$40 sps:$4 sm:$0xff]  }
 0x28f   :  { %6107 = vmatpush1.bf16.msra.mxu0 %v23221_v19  ;;  %v23293_v19 = vld [vmem:[#allocation5 + $0x970] ss:$40 sps:$4 sm:$0xff]  }
 0x290   :  { %6435 = vmatpush1.bf16.msra.mxu1 %v23224_v20  ;;  %6108 = vmatprep.subr.bf16.mxu0 %v23229_v21  ;;  %v23296_v20 = vld [vmem:[#allocation5 + $0x1378] ss:$40 sps:$4 sm:$0xff]   ;;  %v23301_v21 = vld [vmem:[#allocation5 + $0x9c4] ss:$40 sps:$4 sm:$0xff]  }
 0x291   :  { %6436 = vmatprep.subr.bf16.mxu1 %v23232_v22  ;;  %v23304_v22 = vld [vmem:[#allocation5 + $0x13cc] ss:$40 sps:$4 sm:$0xff]  }
 0x293   :  { %6109 = vmatpush1.bf16.msra.mxu0 %v23227_v23  ;;  %v23299_v23 = vld [vmem:[#allocation5 + $0x9c0] ss:$40 sps:$4 sm:$0xff]  }
 0x294   :  { %6437 = vmatpush1.bf16.msra.mxu1 %v23230_v24  ;;  %6110 = vmatprep.subr.bf16.mxu0 %v23235_v25  ;;  %v23302_v24 = vld [vmem:[#allocation5 + $0x13c8] ss:$40 sps:$4 sm:$0xff]   ;;  %v23307_v25 = vld [vmem:[#allocation5 + $0xa14] ss:$40 sps:$4 sm:$0xff]  }
 0x295   :  { %6438 = vmatprep.subr.bf16.mxu1 %v23238_v27  ;;  %v23310_v27 = vld [vmem:[#allocation5 + $0x141c] ss:$40 sps:$4 sm:$0xff]  }
 0x297   :  { %6111 = vmatpush1.bf16.msra.mxu0 %v23233_v30  ;;  %v23305_v30 = vld [vmem:[#allocation5 + $0xa10] ss:$40 sps:$4 sm:$0xff]  }
 0x298   :  { %6439 = vmatpush1.bf16.msra.mxu1 %v23236_v31  ;;  %6112 = vmatprep.subr.bf16.mxu0 %v23241_v32  ;;  %v23308_v31 = vld [vmem:[#allocation5 + $0x1418] ss:$40 sps:$4 sm:$0xff]   ;;  %v23313_v32 = vld [vmem:[#allocation5 + $0xa64] ss:$40 sps:$4 sm:$0xff]  }
 0x299   :  { %6440 = vmatprep.subr.bf16.mxu1 %v23244_v33  ;;  %v23316_v33 = vld [vmem:[#allocation5 + $0x146c] ss:$40 sps:$4 sm:$0xff]  }
 0x29a   :  { %v26778_v43 = vpop.f32.mrb[0].mxu1 }
 0x29b   :  { %6113 = vmatpush1.bf16.msra.mxu0 %v23239_v35  ;;  %v26780_v46 = vpop.f32.mrb[1].mxu1  ;;  %v23311_v35 = vld [vmem:[#allocation5 + $0xa60] ss:$40 sps:$4 sm:$0xff]  }
 0x29c   :  { %6441 = vmatpush1.bf16.msra.mxu1 %v23242_v36  ;;  %6114 = vmatprep.subr.bf16.mxu0 %v23247_v37  ;;  %v6058_v51 = vpop.f32.mrb[2].mxu1  ;;  %v23314_v36 = vld [vmem:[#allocation5 + $0x1468] ss:$40 sps:$4 sm:$0xff]   ;;  %v23319_v37 = vld [vmem:[#allocation5 + $0xab4] ss:$40 sps:$4 sm:$0xff]  }
 0x29d   :  { %6442 = vmatprep.subr.bf16.mxu1 %v23250_v38  ;;  %v6059_v52 = vpop.f32.mrb[3].mxu1  ;;  %v23322_v38 = vld [vmem:[#allocation5 + $0x14bc] ss:$40 sps:$4 sm:$0xff]  }
 0x29e   :  { %v23331_v51 = vld [vmem:[#allocation5 + $0xb54] ss:$40 sps:$4 sm:$0xff]  }
 0x29f   :  { %6115 = vmatpush1.bf16.msra.mxu0 %v23245_v40  ;;  %v23317_v40 = vld [vmem:[#allocation5 + $0xab0] ss:$40 sps:$4 sm:$0xff]   ;;  %v23334_v52 = vld [vmem:[#allocation5 + $0x155c] ss:$40 sps:$4 sm:$0xff]  }
 0x2a0   :  { %6443 = vmatpush1.bf16.msra.mxu1 %v23248_v41  ;;  %6116 = vmatprep.subr.bf16.mxu0 %v23253_v44  ;;  %v23320_v41 = vld [vmem:[#allocation5 + $0x14b8] ss:$40 sps:$4 sm:$0xff]   ;;  %v23325_v44 = vld [vmem:[#allocation5 + $0xb04] ss:$40 sps:$4 sm:$0xff]  }
 0x2a1   :  { %6444 = vmatprep.subr.bf16.mxu1 %v23256_v45  ;;  %v23328_v45 = vld [vmem:[#allocation5 + $0x150c] ss:$40 sps:$4 sm:$0xff]  }
 0x2a3   :  { %6117 = vmatpush1.bf16.msra.mxu0 %v23251_v47  ;;  %v23323_v47 = vld [vmem:[#allocation5 + $0xb00] ss:$40 sps:$4 sm:$0xff]  }
 0x2a4   :  { %6445 = vmatpush1.bf16.msra.mxu1 %v23254_v50  ;;  %6118 = vmatprep.subr.bf16.mxu0 %v23259_v54  ;;  %v23326_v50 = vld [vmem:[#allocation5 + $0x1508] ss:$40 sps:$4 sm:$0xff]  }
 0x2a5   :  { %6446 = vmatprep.subr.bf16.mxu1 %v23262_v55  ;;  %v23329_v54 = vld [vmem:[#allocation5 + $0xb50] ss:$40 sps:$4 sm:$0xff]  }
 0x2a6   :  { %v23332_v55 = vld [vmem:[#allocation5 + $0x1558] ss:$40 sps:$4 sm:$0xff]  }
 0x2a7   :  { %6119 = vmatpush1.bf16.msra.mxu0 %v23257_v56  ;;  %v23337_v56 = vld [vmem:[#allocation5 + $0xba4] ss:$40 sps:$4 sm:$0xff]  }
 0x2a8   :  { %6447 = vmatpush1.bf16.msra.mxu1 %v23260_v57  ;;  %6120 = vmatprep.subr.bf16.mxu0 %v23265_v58  ;;  %v23340_v57 = vld [vmem:[#allocation5 + $0x15ac] ss:$40 sps:$4 sm:$0xff]   ;;  %v23335_v58 = vld [vmem:[#allocation5 + $0xba0] ss:$40 sps:$4 sm:$0xff]  }
 0x2a9   :  { %6448 = vmatprep.subr.bf16.mxu1 %v23268_v59  ;;  %v23338_v59 = vld [vmem:[#allocation5 + $0x15a8] ss:$40 sps:$4 sm:$0xff]  }
 0x2ab   :  { %6121 = vmatpush1.bf16.msra.mxu0 %v23263_v60  ;;  %v23343_v60 = vld [vmem:[#allocation5 + $0xbf4] ss:$40 sps:$4 sm:$0xff]  }
 0x2ac   :  { %6449 = vmatpush1.bf16.msra.mxu1 %v23266_v61  ;;  %6122 = vmatprep.subr.bf16.mxu0 %v23271_v62  ;;  %v23346_v61 = vld [vmem:[#allocation5 + $0x15fc] ss:$40 sps:$4 sm:$0xff]  }
 0x2ad   :  { %6450 = vmatprep.subr.bf16.mxu1 %v23274_v63 }
 0x2af   :  { %6123 = vmatpush1.bf16.msra.mxu0 %v23269_v0 }
 0x2b0   :  { %6451 = vmatpush1.bf16.msra.mxu1 %v23272_v1  ;;  %6124 = vmatprep.subr.bf16.mxu0 %v23277_v2  ;;  %v23341_v1 = vld [vmem:[#allocation5 + $0xbf0] ss:$40 sps:$4 sm:$0xff]  }
 0x2b1   :  { %6452 = vmatprep.subr.bf16.mxu1 %v23280_v3  ;;  %v23344_v2 = vld [vmem:[#allocation5 + $0x15f8] ss:$40 sps:$4 sm:$0xff]  }
 0x2b3   :  { %6125 = vmatpush1.bf16.msra.mxu0 %v23275_v4  ;;  %v23349_v4 = vld [vmem:[#allocation5 + $0xc44] ss:$40 sps:$4 sm:$0xff]  }
 0x2b4   :  { %6453 = vmatpush1.bf16.msra.mxu1 %v23278_v5  ;;  %6126 = vmatprep.subr.bf16.mxu0 %v23283_v6  ;;  %v23352_v5 = vld [vmem:[#allocation5 + $0x164c] ss:$40 sps:$4 sm:$0xff]   ;;  %v23347_v6 = vld [vmem:[#allocation5 + $0xc40] ss:$40 sps:$4 sm:$0xff]  }
 0x2b5   :  { %6454 = vmatprep.subr.bf16.mxu1 %v23286_v7  ;;  %v23350_v7 = vld [vmem:[#allocation5 + $0x1648] ss:$40 sps:$4 sm:$0xff]  }
 0x2b7   :  { %6127 = vmatpush1.bf16.msra.mxu0 %v23281_v8  ;;  %v23355_v8 = vld [vmem:[#allocation5 + $0xc94] ss:$40 sps:$4 sm:$0xff]  }
 0x2b8   :  { %6455 = vmatpush1.bf16.msra.mxu1 %v23284_v9  ;;  %6128 = vmatprep.subr.bf16.mxu0 %v23289_v12  ;;  %v23358_v9 = vld [vmem:[#allocation5 + $0x169c] ss:$40 sps:$4 sm:$0xff]   ;;  %v23353_v12 = vld [vmem:[#allocation5 + $0xc90] ss:$40 sps:$4 sm:$0xff]  }
 0x2b9   :  { %6456 = vmatprep.subr.bf16.mxu1 %v23292_v13  ;;  %v23356_v13 = vld [vmem:[#allocation5 + $0x1698] ss:$40 sps:$4 sm:$0xff]  }
 0x2bb   :  { %6129 = vmatpush1.bf16.msra.mxu0 %v23287_v14  ;;  %v23361_v14 = vld [vmem:[#allocation5 + $0xce4] ss:$40 sps:$4 sm:$0xff]  }
 0x2bc   :  { %6457 = vmatpush1.bf16.msra.mxu1 %v23290_v15  ;;  %6130 = vmatprep.subr.bf16.mxu0 %v23295_v16  ;;  %v23364_v15 = vld [vmem:[#allocation5 + $0x16ec] ss:$40 sps:$4 sm:$0xff]   ;;  %v23359_v16 = vld [vmem:[#allocation5 + $0xce0] ss:$40 sps:$4 sm:$0xff]  }
 0x2bd   :  { %6458 = vmatprep.subr.bf16.mxu1 %v23298_v18  ;;  %v23362_v18 = vld [vmem:[#allocation5 + $0x16e8] ss:$40 sps:$4 sm:$0xff]  }
 0x2bf   :  { %6131 = vmatpush1.bf16.msra.mxu0 %v23293_v19  ;;  %v23367_v19 = vld [vmem:[#allocation5 + $0xd34] ss:$40 sps:$4 sm:$0xff]  }
 0x2c0   :  { %6459 = vmatpush1.bf16.msra.mxu1 %v23296_v20  ;;  %6132 = vmatprep.subr.bf16.mxu0 %v23301_v21  ;;  %v23370_v20 = vld [vmem:[#allocation5 + $0x173c] ss:$40 sps:$4 sm:$0xff]   ;;  %v23365_v21 = vld [vmem:[#allocation5 + $0xd30] ss:$40 sps:$4 sm:$0xff]  }
 0x2c1   :  { %6460 = vmatprep.subr.bf16.mxu1 %v23304_v22  ;;  %v23368_v22 = vld [vmem:[#allocation5 + $0x1738] ss:$40 sps:$4 sm:$0xff]  }
 0x2c3   :  { %6133 = vmatpush1.bf16.msra.mxu0 %v23299_v23  ;;  %v23373_v23 = vld [vmem:[#allocation5 + $0xd84] ss:$40 sps:$4 sm:$0xff]  }
 0x2c4   :  { %6461 = vmatpush1.bf16.msra.mxu1 %v23302_v24  ;;  %6143 = vmatprep.subr.bf16.mxu0 %v23307_v25  ;;  %v23376_v24 = vld [vmem:[#allocation5 + $0x178c] ss:$40 sps:$4 sm:$0xff]   ;;  %v23371_v25 = vld [vmem:[#allocation5 + $0xd80] ss:$40 sps:$4 sm:$0xff]  }
 0x2c5   :  { %6471 = vmatprep.subr.bf16.mxu1 %v23310_v27  ;;  %v23374_v27 = vld [vmem:[#allocation5 + $0x1788] ss:$40 sps:$4 sm:$0xff]  }
 0x2c6   :  { %6135 = vmatmul.mubr.bf16.vlgmr.msra.gmra.mrb[8].mxu0 %v26722_v11 }
 0x2c7   :  { %6463 = vmatmul.mubr.bf16.vlgmr.msra.gmra.mrb[4].mxu1 %v26738_v28  ;;  %6144 = vmatpush1.bf16.msra.mxu0 %v23305_v30  ;;  %v23379_v30 = vld [vmem:[#allocation5 + $0xdd4] ss:$40 sps:$4 sm:$0xff]  }
 0x2c8   :  { %6472 = vmatpush1.bf16.msra.mxu1 %v23308_v31  ;;  %6145 = vmatprep.subr.bf16.mxu0 %v23313_v32  ;;  %v23382_v31 = vld [vmem:[#allocation5 + $0x17dc] ss:$40 sps:$4 sm:$0xff]   ;;  %v23377_v32 = vld [vmem:[#allocation5 + $0xdd0] ss:$40 sps:$4 sm:$0xff]  }
 0x2c9   :  { %6473 = vmatprep.subr.bf16.mxu1 %v23316_v33  ;;  %6175 = vmatprep.mubr.bf16.mxu0 %v26727_v39  ;;  %v23380_v33 = vld [vmem:[#allocation5 + $0x17d8] ss:$40 sps:$4 sm:$0xff]  }
 0x2ca   :  { %6503 = vmatprep.mubr.bf16.mxu1 %v26740_v34 }
 0x2cb   :  { %6146 = vmatpush1.bf16.msra.mxu0 %v23311_v35  ;;  %v23385_v35 = vld [vmem:[#allocation5 + $0xe24] ss:$40 sps:$4 sm:$0xff]  }
 0x2cc   :  { %6474 = vmatpush1.bf16.msra.mxu1 %v23314_v36  ;;  %6147 = vmatprep.subr.bf16.mxu0 %v23319_v37  ;;  %v23388_v36 = vld [vmem:[#allocation5 + $0x182c] ss:$40 sps:$4 sm:$0xff]   ;;  %v23383_v37 = vld [vmem:[#allocation5 + $0xe20] ss:$40 sps:$4 sm:$0xff]  }
 0x2cd   :  { %6475 = vmatprep.subr.bf16.mxu1 %v23322_v38  ;;  %v23386_v38 = vld [vmem:[#allocation5 + $0x1828] ss:$40 sps:$4 sm:$0xff]  }
 0x2cf   :  { %6148 = vmatpush1.bf16.msra.mxu0 %v23317_v40  ;;  %v23391_v40 = vld [vmem:[#allocation5 + $0xe74] ss:$40 sps:$4 sm:$0xff]  }
 0x2d0   :  { %6476 = vmatpush1.bf16.msra.mxu1 %v23320_v41  ;;  %6149 = vmatprep.subr.bf16.mxu0 %v23325_v44  ;;  %v23394_v41 = vld [vmem:[#allocation5 + $0x187c] ss:$40 sps:$4 sm:$0xff]   ;;  %v23389_v44 = vld [vmem:[#allocation5 + $0xe70] ss:$40 sps:$4 sm:$0xff]  }
 0x2d1   :  { %6477 = vmatprep.subr.bf16.mxu1 %v23328_v45  ;;  %v23392_v45 = vld [vmem:[#allocation5 + $0x1878] ss:$40 sps:$4 sm:$0xff]  }
 0x2d3   :  { %6150 = vmatpush1.bf16.msra.mxu0 %v23323_v47  ;;  %v23397_v47 = vld [vmem:[#allocation5 + $0xec4] ss:$40 sps:$4 sm:$0xff]  }
 0x2d4   :  { %6478 = vmatpush1.bf16.msra.mxu1 %v23326_v50  ;;  %6151 = vmatprep.subr.bf16.mxu0 %v23331_v51  ;;  %v23400_v50 = vld [vmem:[#allocation5 + $0x18cc] ss:$40 sps:$4 sm:$0xff]   ;;  %v23395_v51 = vld [vmem:[#allocation5 + $0xec0] ss:$40 sps:$4 sm:$0xff]  }
 0x2d5   :  { %6479 = vmatprep.subr.bf16.mxu1 %v23334_v52  ;;  %v23398_v52 = vld [vmem:[#allocation5 + $0x18c8] ss:$40 sps:$4 sm:$0xff]  }
 0x2d7   :  { %6152 = vmatpush1.bf16.msra.mxu0 %v23329_v54  ;;  %v23403_v54 = vld [vmem:[#allocation5 + $0xf14] ss:$40 sps:$4 sm:$0xff]  }
 0x2d8   :  { %6480 = vmatpush1.bf16.msra.mxu1 %v23332_v55  ;;  %6153 = vmatprep.subr.bf16.mxu0 %v23337_v56  ;;  %v23406_v55 = vld [vmem:[#allocation5 + $0x191c] ss:$40 sps:$4 sm:$0xff]   ;;  %v23401_v56 = vld [vmem:[#allocation5 + $0xf10] ss:$40 sps:$4 sm:$0xff]  }
 0x2d9   :  { %6481 = vmatprep.subr.bf16.mxu1 %v23340_v57  ;;  %v26786_v62 = vpop.f32.mrb[0].mxu0  ;;  %v23404_v57 = vld [vmem:[#allocation5 + $0x1918] ss:$40 sps:$4 sm:$0xff]  }
 0x2da   :  { %v26788_v63 = vpop.f32.mrb[1].mxu0 }
 0x2db   :  { %v5812_v0 = vpop.f32.mrb[2].mxu0  ;;  %6154 = vmatpush1.bf16.msra.mxu0 %v23335_v58  ;;  %v23409_v58 = vld [vmem:[#allocation5 + $0xf64] ss:$40 sps:$4 sm:$0xff]  }
 0x2dc   :  { %6482 = vmatpush1.bf16.msra.mxu1 %v23338_v59  ;;  %v5813_v3 = vpop.f32.mrb[3].mxu0  ;;  %6155 = vmatprep.subr.bf16.mxu0 %v23343_v60  ;;  %v23412_v59 = vld [vmem:[#allocation5 + $0x196c] ss:$40 sps:$4 sm:$0xff]   ;;  %v23407_v60 = vld [vmem:[#allocation5 + $0xf60] ss:$40 sps:$4 sm:$0xff]  }
 0x2dd   :  { %6483 = vmatprep.subr.bf16.mxu1 %v23346_v61  ;;  %v23410_v61 = vld [vmem:[#allocation5 + $0x1968] ss:$40 sps:$4 sm:$0xff]   ;;  %v23415_v0 = vld [vmem:[#allocation5 + $0xfb4] ss:$40 sps:$4 sm:$0xff]   ;;  %v23416_v3 = vld [vmem:[#allocation5 + $0x19b8] ss:$40 sps:$4 sm:$0xff]  }
 0x2df   :  { %6156 = vmatpush1.bf16.msra.mxu0 %v23341_v1  ;;  %v23418_v1 = vld [vmem:[#allocation5 + $0x19bc] ss:$40 sps:$4 sm:$0xff]  }
 0x2e0   :  { %6484 = vmatpush1.bf16.msra.mxu1 %v23344_v2  ;;  %6157 = vmatprep.subr.bf16.mxu0 %v23349_v4  ;;  %v23413_v2 = vld [vmem:[#allocation5 + $0xfb0] ss:$40 sps:$4 sm:$0xff]   ;;  %v1059_v4 = vlaneseq }
 0x2e1   :  { %6485 = vmatprep.subr.bf16.mxu1 %v23352_v5  ;;  %v23421_v5 = vld [vmem:[#allocation5 + $0x1004] ss:$40 sps:$4 sm:$0xff]  }
 0x2e3   :  { %6158 = vmatpush1.bf16.msra.mxu0 %v23347_v6  ;;  %v23424_v6 = vld [vmem:[#allocation5 + $0x1a0c] ss:$40 sps:$4 sm:$0xff]  }
 0x2e4   :  { %6486 = vmatpush1.bf16.msra.mxu1 %v23350_v7  ;;  %6159 = vmatprep.subr.bf16.mxu0 %v23355_v8  ;;  %v23419_v7 = vld [vmem:[#allocation5 + $0x1000] ss:$40 sps:$4 sm:$0xff]  }
 0x2e5   :  { %6487 = vmatprep.subr.bf16.mxu1 %v23358_v9  ;;  %v23422_v8 = vld [vmem:[#allocation5 + $0x1a08] ss:$40 sps:$4 sm:$0xff]   ;;  %v26795_v9 = vshrl.u32 %v1059_v4, 7 }
 0x2e6   :  { %v23460_v4 = vld [vmem:[#allocation5 + $0x1230] ss:$40 sps:$4 sm:$0xff]  }
 0x2e7   :  { %6160 = vmatpush1.bf16.msra.mxu0 %v23353_v12  ;;  %v23427_v12 = vld [vmem:[#allocation5 + $0x1054] ss:$40 sps:$4 sm:$0xff]  }
 0x2e8   :  { %6488 = vmatpush1.bf16.msra.mxu1 %v23356_v13  ;;  %6161 = vmatprep.subr.bf16.mxu0 %v23361_v14  ;;  %v23430_v13 = vld [vmem:[#allocation5 + $0x1a5c] ss:$40 sps:$4 sm:$0xff]   ;;  %v26798_v14 = vsub.s32 2, %v26795_v9 }
 0x2e9   :  { %6489 = vmatprep.subr.bf16.mxu1 %v23364_v15  ;;  %v26800_v15 = vld [vmem:[#allocation7] sm:$0xff] }
 0x2eb   :  { %6162 = vmatpush1.bf16.msra.mxu0 %v23359_v16  ;;  %v23425_v16 = vld [vmem:[#allocation5 + $0x1050] ss:$40 sps:$4 sm:$0xff]  }
 0x2ec   :  { %6490 = vmatpush1.bf16.msra.mxu1 %v23362_v18  ;;  %6163 = vmatprep.subr.bf16.mxu0 %v23367_v19  ;;  %v23428_v18 = vld [vmem:[#allocation5 + $0x1a58] ss:$40 sps:$4 sm:$0xff]   ;;  %v26803_v19 = vsub.s32 3, %v26795_v9 }
 0x2ed   :  { %6491 = vmatprep.subr.bf16.mxu1 %v23370_v20  ;;  %v23433_v20 = vld [vmem:[#allocation5 + $0x10a4] ss:$40 sps:$4 sm:$0xff]  }
 0x2ef   :  { %6164 = vmatpush1.bf16.msra.mxu0 %v23365_v21  ;;  %v23436_v21 = vld [vmem:[#allocation5 + $0x1aac] ss:$40 sps:$4 sm:$0xff]  }
 0x2f0   :  { %6492 = vmatpush1.bf16.msra.mxu1 %v23368_v22  ;;  %6165 = vmatprep.subr.bf16.mxu0 %v23373_v23  ;;  %v1070_v22 = vrot.slane %v26800_v15, %v26798_v14  ;;  %v1074_v23 = vrot.slane %v26800_v15, %v26803_v19 }
 0x2f1   :  { %6493 = vmatprep.subr.bf16.mxu1 %v23376_v24  ;;  %v23431_v24 = vld [vmem:[#allocation5 + $0x10a0] ss:$40 sps:$4 sm:$0xff]  }
 0x2f3   :  { %6166 = vmatpush1.bf16.msra.mxu0 %v23371_v25  ;;  %v23434_v25 = vld [vmem:[#allocation5 + $0x1aa8] ss:$40 sps:$4 sm:$0xff]  }
 0x2f4   :  { %6494 = vmatpush1.bf16.msra.mxu1 %v23374_v27  ;;  %6167 = vmatprep.subr.bf16.mxu0 %v23379_v30  ;;  %v23439_v27 = vld [vmem:[#allocation5 + $0x10f4] ss:$40 sps:$4 sm:$0xff]  }
 0x2f5   :  { %6495 = vmatprep.subr.bf16.mxu1 %v23382_v31  ;;  %v23442_v30 = vld [vmem:[#allocation5 + $0x1afc] ss:$40 sps:$4 sm:$0xff]  }
 0x2f7   :  { %6168 = vmatpush1.bf16.msra.mxu0 %v23377_v32  ;;  %v23437_v32 = vld [vmem:[#allocation5 + $0x10f0] ss:$40 sps:$4 sm:$0xff]  }
 0x2f8   :  { %6496 = vmatpush1.bf16.msra.mxu1 %v23380_v33  ;;  %6169 = vmatprep.subr.bf16.mxu0 %v23385_v35  ;;  %v26810_v33 = vsub.s32 1, %v26795_v9 }
 0x2f9   :  { %6497 = vmatprep.subr.bf16.mxu1 %v23388_v36 }
 0x2fb   :  { %6170 = vmatpush1.bf16.msra.mxu0 %v23383_v37 }
 0x2fc   :  { %6498 = vmatpush1.bf16.msra.mxu1 %v23386_v38  ;;  %6171 = vmatprep.subr.bf16.mxu0 %v23391_v40  ;;  %v23440_v40 = vld [vmem:[#allocation5 + $0x1af8] ss:$40 sps:$4 sm:$0xff]  }
 0x2fd   :  { %6499 = vmatprep.subr.bf16.mxu1 %v23394_v41  ;;  %v23445_v41 = vld [vmem:[#allocation5 + $0x1144] ss:$40 sps:$4 sm:$0xff]  }
 0x2ff   :  { %6172 = vmatpush1.bf16.msra.mxu0 %v23389_v44 }
 0x300   :  { %6500 = vmatpush1.bf16.msra.mxu1 %v23392_v45  ;;  %6173 = vmatprep.subr.bf16.mxu0 %v23397_v47  ;;  %v23448_v47 = vld [vmem:[#allocation5 + $0x1b4c] ss:$40 sps:$4 sm:$0xff]  }
 0x301   :  { %6501 = vmatprep.subr.bf16.mxu1 %v23400_v50  ;;  %v1053_v50 = vld [vmem:[#allocation5 + $0x1b98] sm:$0x33] }
 0x303   :  { %6174 = vmatpush1.bf16.msra.mxu0 %v23395_v51 }
 0x304   :  { %6502 = vmatpush1.bf16.msra.mxu1 %v23398_v52  ;;  %6184 = vmatprep.subr.bf16.mxu0 %v23403_v54  ;;  %v1066_v52 = vrot.slane %v26800_v15, %v26810_v33  ;;  %v23443_v54 = vld [vmem:[#allocation5 + $0x1140] ss:$40 sps:$4 sm:$0xff]  }
 0x305   :  { %6512 = vmatprep.subr.bf16.mxu1 %v23406_v55  ;;  %v23446_v55 = vld [vmem:[#allocation5 + $0x1b48] ss:$40 sps:$4 sm:$0xff]  }
 0x306   :  { %6176 = vmatmul.mubr.bf16.vlgmr.msra.gmra.mrb[8].mxu0 %v26730_v17 }
 0x307   :  { %6504 = vmatmul.mubr.bf16.vlgmr.msra.gmra.mrb[4].mxu1 %v26746_v42  ;;  %6185 = vmatpush1.bf16.msra.mxu0 %v23401_v56  ;;  %v23451_v56 = vld [vmem:[#allocation5 + $0x1194] ss:$40 sps:$4 sm:$0xff]  }
 0x308   :  { %6513 = vmatpush1.bf16.msra.mxu1 %v23404_v57  ;;  %6186 = vmatprep.subr.bf16.mxu0 %v23409_v58  ;;  %v20377_v57 = vcombine.low %v1053_v50, %v1053_v50  ;;  %v22184_v58 = vadd.f32 %v26788_v63, %v1066_v52  ;;  %v23465_v63 = vld [vmem:[#allocation8 + $0x54] ss:$40 sps:$4 sm:$0xff]   ;;  %v23507_v52 = vld [vmem:[#allocation8 + $0x284] ss:$40 sps:$4 sm:$0xff]  }
 0x309   :  { %6514 = vmatprep.subr.bf16.mxu1 %v23412_v59  ;;  %20388 = vmatprep.mubr.msk.bf16.mxu1 %vm5534_vm0, %v26748_v49  ;;  %v23449_v59 = vld [vmem:[#allocation5 + $0x1190] ss:$40 sps:$4 sm:$0xff]  }
 0x30a   :  { %6216 = vmatprep.mubr.bf16.mxu0 %v26734_v26 }
 0x30b   :  { %6187 = vmatpush1.bf16.msra.mxu0 %v23407_v60  ;;  %v23456_v60 = vld [vmem:[#allocation5 + $0x11e4] ss:$40 sps:$4 sm:$0xff]  }
 0x30c   :  { %6515 = vmatpush1.bf16.msra.mxu1 %v23410_v61  ;;  %6188 = vmatprep.subr.bf16.mxu0 %v23415_v0  ;;  %v23459_v61 = vld [vmem:[#allocation8 + $0x4] ss:$40 sps:$4 sm:$0xff]  }
 0x30d   :  { %6516 = vmatprep.subr.bf16.mxu1 %v23418_v1  ;;  %v23454_v0 = vld [vmem:[#allocation5 + $0x11e0] ss:$40 sps:$4 sm:$0xff]   ;;  %v23457_v1 = vld [vmem:[#allocation8] ss:$40 sps:$4 sm:$0xff]  }
 0x30f   :  { %6189 = vmatpush1.bf16.msra.mxu0 %v23413_v2  ;;  %v6800_v2 = vmax.f32 %v22184_v58, 0.0  ;;  %v23511_v58 = vld [vmem:[#allocation8 + $0x2d0] ss:$40 sps:$4 sm:$0xff]  }
 0x310   :  { %6517 = vmatpush1.bf16.msra.mxu1 %v23416_v3  ;;  %6190 = vmatprep.subr.bf16.mxu0 %v23421_v5  ;;  %v23462_v3 = vld [vmem:[#allocation5 + $0x1234] ss:$40 sps:$4 sm:$0xff]  }
 0x311   :  { %6518 = vmatprep.subr.bf16.mxu1 %v23424_v6  ;;  %v26823_v5 = vpack.c.bf16 %v6800_v2, %v6800_v2  ;;  %v23463_v6 = vld [vmem:[#allocation8 + $0x50] ss:$40 sps:$4 sm:$0xff]   ;;  %v23520_v2 = vld [vmem:[#allocation5 + $0x1550] ss:$40 sps:$4 sm:$0xff]  }
 0x313   :  { %6191 = vmatpush1.bf16.msra.mxu0 %v23419_v7  ;;  %v23468_v7 = vld [vmem:[#allocation5 + $0x1284] ss:$40 sps:$4 sm:$0xff]  }
 0x314   :  { %6519 = vmatpush1.bf16.msra.mxu1 %v23422_v8  ;;  %6192 = vmatprep.subr.bf16.mxu0 %v23427_v12  ;;  %v23471_v8 = vld [vmem:[#allocation8 + $0xa4] ss:$40 sps:$4 sm:$0xff]  }
 0x315   :  { %6520 = vmatprep.subr.bf16.mxu1 %v23430_v13  ;;  %v23466_v12 = vld [vmem:[#allocation5 + $0x1280] ss:$40 sps:$4 sm:$0xff]   ;;  %v23469_v13 = vld [vmem:[#allocation8 + $0xa0] ss:$40 sps:$4 sm:$0xff]  }
 0x317   :  { %6193 = vmatpush1.bf16.msra.mxu0 %v23425_v16  ;;  %v23474_v16 = vld [vmem:[#allocation5 + $0x12d4] ss:$40 sps:$4 sm:$0xff]  }
 0x318   :  { %6521 = vmatpush1.bf16.msra.mxu1 %v23428_v18  ;;  %6194 = vmatprep.subr.bf16.mxu0 %v23433_v20  ;;  %v23477_v18 = vld [vmem:[#allocation8 + $0xf4] ss:$40 sps:$4 sm:$0xff]  }
 0x319   :  { %6522 = vmatprep.subr.bf16.mxu1 %v23436_v21  ;;  %v5849_v31 = vpop.f32.mrb[4].mxu0  ;;  %v23472_v20 = vld [vmem:[#allocation5 + $0x12d0] ss:$40 sps:$4 sm:$0xff]   ;;  %v23475_v21 = vld [vmem:[#allocation8 + $0xf0] ss:$40 sps:$4 sm:$0xff]  }
 0x31a   :  { %v5850_v35 = vadd.f32 %v5849_v31, %v1070_v22  ;;  %v5851_v36 = vpop.f32.mrb[5].mxu0  ;;  %v23480_v22 = vld [vmem:[#allocation5 + $0x1324] ss:$40 sps:$4 sm:$0xff]   ;;  %v23484_v31 = vld [vmem:[#allocation5 + $0x1370] ss:$40 sps:$4 sm:$0xff]  }
 0x31b   :  { %v5852_v37 = vadd.f32 %v5851_v36, %v1074_v23  ;;  %v5853_v38 = vpop.f32.mrb[6].mxu0  ;;  %6195 = vmatpush1.bf16.msra.mxu0 %v23431_v24  ;;  %v23483_v23 = vld [vmem:[#allocation8 + $0x144] ss:$40 sps:$4 sm:$0xff]  }
 0x31c   :  { %6523 = vmatpush1.bf16.msra.mxu1 %v23434_v25  ;;  %v26813_v44 = vadd.f32 %v26778_v43, %v5850_v35  ;;  %v5854_v45 = vpop.f32.mrb[7].mxu0  ;;  %6196 = vmatprep.subr.bf16.mxu0 %v23439_v27  ;;  %v20378_v43 = vcombine.high %v1053_v50, %v1053_v50  ;;  %v23478_v24 = vld [vmem:[#allocation5 + $0x1320] ss:$40 sps:$4 sm:$0xff]   ;;  %v23481_v25 = vld [vmem:[#allocation8 + $0x140] ss:$40 sps:$4 sm:$0xff]  }
 0x31d   :  { %6524 = vmatprep.subr.bf16.mxu1 %v23442_v30  ;;  %v26816_v51 = vadd.f32 %v26780_v46, %v5852_v37  ;;  %v5558_v46 = vsel %vm5538_vm1, %v20377_v57, 0  ;;  %v23486_v27 = vld [vmem:[#allocation5 + $0x1374] ss:$40 sps:$4 sm:$0xff]   ;;  %v23489_v30 = vld [vmem:[#allocation8 + $0x194] ss:$40 sps:$4 sm:$0xff]  }
 0x31e   :  { %v23492_v35 = vld [vmem:[#allocation5 + $0x13c4] ss:$40 sps:$4 sm:$0xff]   ;;  %v23495_v36 = vld [vmem:[#allocation8 + $0x1e4] ss:$40 sps:$4 sm:$0xff]   ;;  %v23493_v38 = vld [vmem:[#allocation8 + $0x1e0] ss:$40 sps:$4 sm:$0xff]  }
 0x31f   :  { %6197 = vmatpush1.bf16.msra.mxu0 %v23437_v32  ;;  %v23487_v32 = vld [vmem:[#allocation8 + $0x190] ss:$40 sps:$4 sm:$0xff]   ;;  %v23496_v45 = vld [vmem:[#allocation5 + $0x1410] ss:$40 sps:$4 sm:$0xff]  }
 0x320   :  { %6525 = vmatpush1.bf16.msra.mxu1 %v23440_v40  ;;  %6198 = vmatprep.subr.bf16.mxu0 %v23445_v41  ;;  %v23490_v37 = vld [vmem:[#allocation5 + $0x13c0] ss:$40 sps:$4 sm:$0xff]   ;;  %v23498_v40 = vld [vmem:[#allocation5 + $0x1414] ss:$40 sps:$4 sm:$0xff]   ;;  %v23504_v50 = vld [vmem:[#allocation5 + $0x1464] ss:$40 sps:$4 sm:$0xff]  }
 0x321   :  { %6526 = vmatprep.subr.bf16.mxu1 %v23448_v47  ;;  %v23501_v41 = vld [vmem:[#allocation8 + $0x234] ss:$40 sps:$4 sm:$0xff]   ;;  %v23499_v47 = vld [vmem:[#allocation8 + $0x230] ss:$40 sps:$4 sm:$0xff]  }
 0x322   :  { %v23508_v57 = vld [vmem:[#allocation5 + $0x14b0] ss:$40 sps:$4 sm:$0xff]  }
 0x323   :  { %6199 = vmatpush1.bf16.msra.mxu0 %v23443_v54  ;;  %v23502_v54 = vld [vmem:[#allocation5 + $0x1460] ss:$40 sps:$4 sm:$0xff]  }
 0x324   :  { %6527 = vmatpush1.bf16.msra.mxu1 %v23446_v55  ;;  %6200 = vmatprep.subr.bf16.mxu0 %v23451_v56  ;;  %v23505_v55 = vld [vmem:[#allocation8 + $0x280] ss:$40 sps:$4 sm:$0xff]  }
 0x325   :  { %20387 = vmatprep.subr.msk.bf16.mxu1 %vm5538_vm1, %v20378_v43  ;;  %v23510_v56 = vld [vmem:[#allocation5 + $0x14b4] ss:$40 sps:$4 sm:$0xff]   ;;  %v23513_v43 = vld [vmem:[#allocation8 + $0x2d4] ss:$40 sps:$4 sm:$0xff]  }
 0x327   :  { %6201 = vmatpush1.bf16.msra.mxu0 %v23449_v59  ;;  %v23516_v59 = vld [vmem:[#allocation5 + $0x1504] ss:$40 sps:$4 sm:$0xff]  }
 0x328   :  { %6529 = vmatpush1.bf16.msra.mxu1 %v5558_v46  ;;  %6202 = vmatprep.subr.bf16.mxu0 %v23456_v60  ;;  %v23519_v46 = vld [vmem:[#allocation8 + $0x324] ss:$40 sps:$4 sm:$0xff]  }
 0x329   :  { %11673 = vmatprep.subr.bf16.mxu1 %v23459_v61  ;;  %v23514_v60 = vld [vmem:[#allocation5 + $0x1500] ss:$40 sps:$4 sm:$0xff]   ;;  %v23517_v61 = vld [vmem:[#allocation8 + $0x320] ss:$40 sps:$4 sm:$0xff]  }
 0x32b   :  { %6545 = vmatmul.mubr.bf16.vlgmr.msra.gmra.mrb[4].mxu1 %v26757_v29  ;;  %6203 = vmatpush1.bf16.msra.mxu0 %v23454_v0  ;;  %v23522_v0 = vld [vmem:[#allocation5 + $0x1554] ss:$40 sps:$4 sm:$0xff]  }
 0x32c   :  { %11674 = vmatpush1.bf16.msra.mxu1 %v23457_v1  ;;  %11705 = vmatprep.mubr.bf16.mxu1 %v26823_v5  ;;  %v23525_v1 = vld [vmem:[#allocation8 + $0x374] ss:$40 sps:$4 sm:$0xff]  }
 0x32d   :  { %6204 = vmatprep.subr.bf16.mxu0 %v23462_v3  ;;  %11675 = vmatprep.subr.bf16.mxu1 %v23465_v63  ;;  %v23523_v3 = vld [vmem:[#allocation8 + $0x370] ss:$40 sps:$4 sm:$0xff]   ;;  %v23531_v63 = vld [vmem:[#allocation8 + $0x3c4] ss:$40 sps:$4 sm:$0xff]  }
 0x32f   :  { %6205 = vmatpush1.bf16.msra.mxu0 %v23460_v4  ;;  %v23528_v4 = vld [vmem:[#allocation5 + $0x15a4] ss:$40 sps:$4 sm:$0xff]  }
 0x330   :  { %11676 = vmatpush1.bf16.msra.mxu1 %v23463_v6  ;;  %6206 = vmatprep.subr.bf16.mxu0 %v23468_v7  ;;  %v23526_v6 = vld [vmem:[#allocation5 + $0x15a0] ss:$40 sps:$4 sm:$0xff]   ;;  %v23529_v7 = vld [vmem:[#allocation8 + $0x3c0] ss:$40 sps:$4 sm:$0xff]  }
 0x331   :  { %11677 = vmatprep.subr.bf16.mxu1 %v23471_v8  ;;  %v23534_v8 = vld [vmem:[#allocation5 + $0x15f4] ss:$40 sps:$4 sm:$0xff]  }
 0x333   :  { %6207 = vmatpush1.bf16.msra.mxu0 %v23466_v12  ;;  %v23537_v12 = vld [vmem:[#allocation8 + $0x414] ss:$40 sps:$4 sm:$0xff]  }
 0x334   :  { %11678 = vmatpush1.bf16.msra.mxu1 %v23469_v13  ;;  %6208 = vmatprep.subr.bf16.mxu0 %v23474_v16  ;;  %v26830_v13 = vsub.s32 0, %v26795_v9  ;;  %v23532_v16 = vld [vmem:[#allocation5 + $0x15f0] ss:$40 sps:$4 sm:$0xff]  }
 0x335   :  { %11679 = vmatprep.subr.bf16.mxu1 %v23477_v18  ;;  %v23535_v18 = vld [vmem:[#allocation8 + $0x410] ss:$40 sps:$4 sm:$0xff]  }
 0x337   :  { %6209 = vmatpush1.bf16.msra.mxu0 %v23472_v20  ;;  %v23540_v20 = vld [vmem:[#allocation5 + $0x1644] ss:$40 sps:$4 sm:$0xff]  }
 0x338   :  { %11680 = vmatpush1.bf16.msra.mxu1 %v23475_v21  ;;  %6210 = vmatprep.subr.bf16.mxu0 %v23480_v22  ;;  %v23543_v21 = vld [vmem:[#allocation8 + $0x464] ss:$40 sps:$4 sm:$0xff]   ;;  %v1062_v22 = vrot.slane %v26800_v15, %v26830_v13 }
 0x339   :  { %11681 = vmatprep.subr.bf16.mxu1 %v23483_v23  ;;  %v23538_v23 = vld [vmem:[#allocation5 + $0x1640] ss:$40 sps:$4 sm:$0xff]  }
 0x33a   :  { %v23550_v15 = vld [vmem:[#allocation5 + $0x16e0] ss:$40 sps:$4 sm:$0xff]  }
 0x33b   :  { %6211 = vmatpush1.bf16.msra.mxu0 %v23478_v24  ;;  %v23541_v24 = vld [vmem:[#allocation8 + $0x460] ss:$40 sps:$4 sm:$0xff]  }
 0x33c   :  { %11682 = vmatpush1.bf16.msra.mxu1 %v23481_v25  ;;  %6212 = vmatprep.subr.bf16.mxu0 %v23486_v27  ;;  %v23546_v25 = vld [vmem:[#allocation5 + $0x1694] ss:$40 sps:$4 sm:$0xff]   ;;  %v23549_v27 = vld [vmem:[#allocation8 + $0x4b4] ss:$40 sps:$4 sm:$0xff]  }
 0x33d   :  { %11683 = vmatprep.subr.bf16.mxu1 %v23489_v30  ;;  %v22183_v30 = vadd.f32 %v26786_v62, %v1062_v22  ;;  %v23603_v22 = vld [vmem:[#allocation8 + $0x784] ss:$40 sps:$4 sm:$0xff]  }
 0x33f   :  { %6213 = vmatpush1.bf16.msra.mxu0 %v23484_v31  ;;  %v23544_v31 = vld [vmem:[#allocation5 + $0x1690] ss:$40 sps:$4 sm:$0xff]  }
 0x340   :  { %11684 = vmatpush1.bf16.msra.mxu1 %v23487_v32  ;;  %6214 = vmatprep.subr.bf16.mxu0 %v23492_v35  ;;  %v23547_v32 = vld [vmem:[#allocation8 + $0x4b0] ss:$40 sps:$4 sm:$0xff]  }
 0x341   :  { %11685 = vmatprep.subr.bf16.mxu1 %v23495_v36  ;;  %v23552_v35 = vld [vmem:[#allocation5 + $0x16e4] ss:$40 sps:$4 sm:$0xff]   ;;  %v23555_v36 = vld [vmem:[#allocation8 + $0x504] ss:$40 sps:$4 sm:$0xff]  }
 0x343   :  { %6215 = vmatpush1.bf16.msra.mxu0 %v23490_v37  ;;  %v6799_v37 = vmax.f32 %v22183_v30, 0.0  ;;  %v23604_v30 = vld [vmem:[#allocation5 + $0x19b0] ss:$40 sps:$4 sm:$0xff]  }
 0x344   :  { %11686 = vmatpush1.bf16.msra.mxu1 %v23493_v38  ;;  %6225 = vmatprep.subr.bf16.mxu0 %v23498_v40  ;;  %v23553_v38 = vld [vmem:[#allocation8 + $0x500] ss:$40 sps:$4 sm:$0xff]   ;;  %v6802_v40 = vmax.f32 %v26816_v51, 0.0  ;;  %v23562_v51 = vld [vmem:[#allocation5 + $0x1780] ss:$40 sps:$4 sm:$0xff]  }
 0x345   :  { %11687 = vmatprep.subr.bf16.mxu1 %v23501_v41  ;;  %v23558_v41 = vld [vmem:[#allocation5 + $0x1734] ss:$40 sps:$4 sm:$0xff]   ;;  %v26836_v62 = vpack.c.bf16 %v6799_v37, %v6799_v37 }
 0x346   :  { %6217 = vmatmul.mubr.bf16.vlgmr.msra.gmra.mrb[8].mxu0 %v26738_v28  ;;  %v23613_v37 = vld [vmem:[#allocation8 + $0x820] ss:$40 sps:$4 sm:$0xff]  }
 0x347   :  { %6226 = vmatpush1.bf16.msra.mxu0 %v23496_v45  ;;  %6257 = vmatprep.mubr.bf16.mxu0 %v26740_v34  ;;  %v23561_v45 = vld [vmem:[#allocation8 + $0x554] ss:$40 sps:$4 sm:$0xff]  }
 0x348   :  { %11688 = vmatpush1.bf16.msra.mxu1 %v23499_v47  ;;  %6227 = vmatprep.subr.bf16.mxu0 %v23504_v50  ;;  %v23556_v47 = vld [vmem:[#allocation5 + $0x1730] ss:$40 sps:$4 sm:$0xff]   ;;  %v23559_v50 = vld [vmem:[#allocation8 + $0x550] ss:$40 sps:$4 sm:$0xff]  }
 0x349   :  { %11689 = vmatprep.subr.bf16.mxu1 %v23507_v52  ;;  %v26838_v52 = vpack.c.bf16 %v6802_v40, %v6802_v40  ;;  %v23616_v40 = vld [vmem:[#allocation5 + $0x1a50] ss:$40 sps:$4 sm:$0xff]  }
 0x34b   :  { %6228 = vmatpush1.bf16.msra.mxu0 %v23502_v54  ;;  %v23564_v54 = vld [vmem:[#allocation5 + $0x1784] ss:$40 sps:$4 sm:$0xff]  }
 0x34c   :  { %11690 = vmatpush1.bf16.msra.mxu1 %v23505_v55  ;;  %6229 = vmatprep.subr.bf16.mxu0 %v23510_v56  ;;  %v23567_v55 = vld [vmem:[#allocation8 + $0x5a4] ss:$40 sps:$4 sm:$0xff]   ;;  %v23565_v56 = vld [vmem:[#allocation8 + $0x5a0] ss:$40 sps:$4 sm:$0xff]  }
 0x34d   :  { %11691 = vmatprep.subr.bf16.mxu1 %v23513_v43  ;;  %v23570_v43 = vld [vmem:[#allocation5 + $0x17d4] ss:$40 sps:$4 sm:$0xff]  }
 0x34f   :  { %6230 = vmatpush1.bf16.msra.mxu0 %v23508_v57  ;;  %v23573_v57 = vld [vmem:[#allocation8 + $0x5f4] ss:$40 sps:$4 sm:$0xff]  }
 0x350   :  { %11692 = vmatpush1.bf16.msra.mxu1 %v23511_v58  ;;  %6231 = vmatprep.subr.bf16.mxu0 %v23516_v59  ;;  %v23568_v58 = vld [vmem:[#allocation5 + $0x17d0] ss:$40 sps:$4 sm:$0xff]   ;;  %v23571_v59 = vld [vmem:[#allocation8 + $0x5f0] ss:$40 sps:$4 sm:$0xff]  }
 0x351   :  { %11693 = vmatprep.subr.bf16.mxu1 %v23519_v46  ;;  %v23576_v46 = vld [vmem:[#allocation5 + $0x1824] ss:$40 sps:$4 sm:$0xff]  }
 0x353   :  { %6232 = vmatpush1.bf16.msra.mxu0 %v23514_v60  ;;  %v23579_v60 = vld [vmem:[#allocation8 + $0x644] ss:$40 sps:$4 sm:$0xff]  }
 0x354   :  { %11694 = vmatpush1.bf16.msra.mxu1 %v23517_v61  ;;  %6233 = vmatprep.subr.bf16.mxu0 %v23522_v0  ;;  %v23574_v61 = vld [vmem:[#allocation5 + $0x1820] ss:$40 sps:$4 sm:$0xff]   ;;  %v23577_v0 = vld [vmem:[#allocation8 + $0x640] ss:$40 sps:$4 sm:$0xff]  }
 0x355   :  { %11695 = vmatprep.subr.bf16.mxu1 %v23525_v1  ;;  %v23582_v1 = vld [vmem:[#allocation5 + $0x1874] ss:$40 sps:$4 sm:$0xff]  }
 0x357   :  { %6234 = vmatpush1.bf16.msra.mxu0 %v23520_v2  ;;  %v23585_v2 = vld [vmem:[#allocation8 + $0x694] ss:$40 sps:$4 sm:$0xff]  }
 0x358   :  { %11696 = vmatpush1.bf16.msra.mxu1 %v23523_v3  ;;  %6235 = vmatprep.subr.bf16.mxu0 %v23528_v4  ;;  %v23580_v3 = vld [vmem:[#allocation5 + $0x1870] ss:$40 sps:$4 sm:$0xff]   ;;  %v23583_v4 = vld [vmem:[#allocation8 + $0x690] ss:$40 sps:$4 sm:$0xff]  }
 0x359   :  { %11697 = vmatprep.subr.bf16.mxu1 %v23531_v63  ;;  %v23588_v63 = vld [vmem:[#allocation5 + $0x18c4] ss:$40 sps:$4 sm:$0xff]  }
 0x35b   :  { %6236 = vmatpush1.bf16.msra.mxu0 %v23526_v6  ;;  %v23591_v6 = vld [vmem:[#allocation8 + $0x6e4] ss:$40 sps:$4 sm:$0xff]  }
 0x35c   :  { %11698 = vmatpush1.bf16.msra.mxu1 %v23529_v7  ;;  %6237 = vmatprep.subr.bf16.mxu0 %v23534_v8  ;;  %v23586_v7 = vld [vmem:[#allocation5 + $0x18c0] ss:$40 sps:$4 sm:$0xff]   ;;  %v23589_v8 = vld [vmem:[#allocation8 + $0x6e0] ss:$40 sps:$4 sm:$0xff]  }
 0x35d   :  { %11699 = vmatprep.subr.bf16.mxu1 %v23537_v12  ;;  %v23594_v12 = vld [vmem:[#allocation5 + $0x1914] ss:$40 sps:$4 sm:$0xff]  }
 0x35f   :  { %6238 = vmatpush1.bf16.msra.mxu0 %v23532_v16  ;;  %v23597_v16 = vld [vmem:[#allocation8 + $0x734] ss:$40 sps:$4 sm:$0xff]  }
 0x360   :  { %11700 = vmatpush1.bf16.msra.mxu1 %v23535_v18  ;;  %6239 = vmatprep.subr.bf16.mxu0 %v23540_v20  ;;  %v23592_v18 = vld [vmem:[#allocation5 + $0x1910] ss:$40 sps:$4 sm:$0xff]   ;;  %v23595_v20 = vld [vmem:[#allocation8 + $0x730] ss:$40 sps:$4 sm:$0xff]  }
 0x361   :  { %11701 = vmatprep.subr.bf16.mxu1 %v23543_v21  ;;  %v23600_v21 = vld [vmem:[#allocation5 + $0x1964] ss:$40 sps:$4 sm:$0xff]  }
 0x363   :  { %6240 = vmatpush1.bf16.msra.mxu0 %v23538_v23  ;;  %v23598_v23 = vld [vmem:[#allocation5 + $0x1960] ss:$40 sps:$4 sm:$0xff]  }
 0x364   :  { %11702 = vmatpush1.bf16.msra.mxu1 %v23541_v24  ;;  %6241 = vmatprep.subr.bf16.mxu0 %v23546_v25  ;;  %v23601_v24 = vld [vmem:[#allocation8 + $0x780] ss:$40 sps:$4 sm:$0xff]  }
 0x365   :  { %11703 = vmatprep.subr.bf16.mxu1 %v23549_v27  ;;  %v23606_v25 = vld [vmem:[#allocation5 + $0x19b4] ss:$40 sps:$4 sm:$0xff]   ;;  %v23609_v27 = vld [vmem:[#allocation8 + $0x7d4] ss:$40 sps:$4 sm:$0xff]  }
 0x367   :  { %6242 = vmatpush1.bf16.msra.mxu0 %v23544_v31  ;;  %v23607_v31 = vld [vmem:[#allocation8 + $0x7d0] ss:$40 sps:$4 sm:$0xff]  }
 0x368   :  { %11704 = vmatpush1.bf16.msra.mxu1 %v23547_v32  ;;  %6243 = vmatprep.subr.bf16.mxu0 %v23552_v35  ;;  %v23612_v32 = vld [vmem:[#allocation5 + $0x1a04] ss:$40 sps:$4 sm:$0xff]   ;;  %v23615_v35 = vld [vmem:[#allocation8 + $0x824] ss:$40 sps:$4 sm:$0xff]  }
 0x369   :  { %11714 = vmatprep.subr.bf16.mxu1 %v23555_v36  ;;  %v23610_v36 = vld [vmem:[#allocation5 + $0x1a00] ss:$40 sps:$4 sm:$0xff]  }
 0x36b   :  { %11706 = vmatmul.mubr.bf16.vlgmr.msra.gmra.mrb[8].mxu1 %v26836_v62  ;;  %6244 = vmatpush1.bf16.msra.mxu0 %v23550_v15  ;;  %v23618_v15 = vld [vmem:[#allocation5 + $0x1a54] ss:$40 sps:$4 sm:$0xff]  }
 0x36c   :  { %11715 = vmatpush1.bf16.msra.mxu1 %v23553_v38  ;;  %11746 = vmatprep.mubr.bf16.mxu1 %v26838_v52  ;;  %v23621_v38 = vld [vmem:[#allocation8 + $0x874] ss:$40 sps:$4 sm:$0xff]  }
 0x36d   :  { %6245 = vmatprep.subr.bf16.mxu0 %v23558_v41  ;;  %11716 = vmatprep.subr.bf16.mxu1 %v23561_v45  ;;  %v23619_v41 = vld [vmem:[#allocation8 + $0x870] ss:$40 sps:$4 sm:$0xff]  }
 0x36e   :  { %v23624_v45 = vld [vmem:[#allocation5 + $0x1aa4] ss:$40 sps:$4 sm:$0xff]  }
 0x36f   :  { %6246 = vmatpush1.bf16.msra.mxu0 %v23556_v47  ;;  %v23627_v47 = vld [vmem:[#allocation8 + $0x8c4] ss:$40 sps:$4 sm:$0xff]  }
 0x370   :  { %11717 = vmatpush1.bf16.msra.mxu1 %v23559_v50  ;;  %6247 = vmatprep.subr.bf16.mxu0 %v23564_v54  ;;  %v23622_v50 = vld [vmem:[#allocation5 + $0x1aa0] ss:$40 sps:$4 sm:$0xff]   ;;  %v23625_v54 = vld [vmem:[#allocation8 + $0x8c0] ss:$40 sps:$4 sm:$0xff]  }
 0x371   :  { %11718 = vmatprep.subr.bf16.mxu1 %v23567_v55  ;;  %v23630_v55 = vld [vmem:[#allocation5 + $0x1af4] ss:$40 sps:$4 sm:$0xff]  }
 0x373   :  { %6248 = vmatpush1.bf16.msra.mxu0 %v23562_v51  ;;  %v23633_v51 = vld [vmem:[#allocation8 + $0x914] ss:$40 sps:$4 sm:$0xff]  }
 0x374   :  { %11719 = vmatpush1.bf16.msra.mxu1 %v23565_v56  ;;  %6249 = vmatprep.subr.bf16.mxu0 %v23570_v43  ;;  %v23628_v56 = vld [vmem:[#allocation5 + $0x1af0] ss:$40 sps:$4 sm:$0xff]   ;;  %v23631_v43 = vld [vmem:[#allocation8 + $0x910] ss:$40 sps:$4 sm:$0xff]  }
 0x375   :  { %11720 = vmatprep.subr.bf16.mxu1 %v23573_v57  ;;  %v23636_v57 = vld [vmem:[#allocation5 + $0x1b44] ss:$40 sps:$4 sm:$0xff]  }
 0x377   :  { %6250 = vmatpush1.bf16.msra.mxu0 %v23568_v58  ;;  %v23639_v58 = vld [vmem:[#allocation8 + $0x964] ss:$40 sps:$4 sm:$0xff]  }
 0x378   :  { %11721 = vmatpush1.bf16.msra.mxu1 %v23571_v59  ;;  %6251 = vmatprep.subr.bf16.mxu0 %v23576_v46  ;;  %v1052_v59 = vld [vmem:[#allocation5 + $0x1b90] sm:$0x33]  ;;  %v23634_v46 = vld [vmem:[#allocation5 + $0x1b40] ss:$40 sps:$4 sm:$0xff]  }
 0x379   :  { %11722 = vmatprep.subr.bf16.mxu1 %v23579_v60  ;;  %v23637_v60 = vld [vmem:[#allocation8 + $0x960] ss:$40 sps:$4 sm:$0xff]  }
 0x37b   :  { %6252 = vmatpush1.bf16.msra.mxu0 %v23574_v61  ;;  %v23643_v61 = vld [vmem:[#allocation8 + $0x9b4] ss:$40 sps:$4 sm:$0xff]  }
 0x37c   :  { %11723 = vmatpush1.bf16.msra.mxu1 %v23577_v0  ;;  %6253 = vmatprep.subr.bf16.mxu0 %v23582_v1  ;;  %v20376_v0 = vcombine.high %v1052_v59, %v1052_v59  ;;  %v20375_v1 = vcombine.low %v1052_v59, %v1052_v59  ;;  %v23681_v59 = vld [vmem:[#allocation5 + $0x3e0] ss:$40 sps:$4 sm:$0xff]  }
 0x37d   :  { %11724 = vmatprep.subr.bf16.mxu1 %v23585_v2  ;;  %v23641_v2 = vld [vmem:[#allocation8 + $0x9b0] ss:$40 sps:$4 sm:$0xff]  }
 0x37f   :  { %6254 = vmatpush1.bf16.msra.mxu0 %v23580_v3  ;;  %v23647_v3 = vld [vmem:[#allocation5 + $0x24] ss:$40 sps:$4 sm:$0xff]  }
 0x380   :  { %11725 = vmatpush1.bf16.msra.mxu1 %v23583_v4  ;;  %6255 = vmatprep.subr.bf16.mxu0 %v23588_v63  ;;  %v6801_v4 = vmax.f32 %v26813_v44, 0.0  ;;  %v5552_v63 = vsel %vm5538_vm1, %v20375_v1, 0  ;;  %v23651_v44 = vld [vmem:[#allocation5 + $0xc0] ss:$40 sps:$4 sm:$0xff]   ;;  %v23798_v1 = vld [vmem:[#allocation8 + $0xbe0] ss:$40 sps:$4 sm:$0xff]  }
 0x381   :  { %11726 = vmatprep.subr.bf16.mxu1 %v23591_v6  ;;  %v23645_v6 = vld [vmem:[#allocation5 + $0x20] ss:$40 sps:$4 sm:$0xff]  }
 0x383   :  { %6256 = vmatpush1.bf16.msra.mxu0 %v23586_v7  ;;  %v23650_v7 = vld [vmem:[#allocation5 + $0x74] ss:$40 sps:$4 sm:$0xff]  }
 0x384   :  { %11727 = vmatpush1.bf16.msra.mxu1 %v23589_v8  ;;  %6266 = vmatprep.subr.bf16.mxu0 %v23594_v12  ;;  %v26848_v8 = vpack.c.bf16 %v6801_v4, %v6801_v4  ;;  %v23648_v12 = vld [vmem:[#allocation5 + $0x70] ss:$40 sps:$4 sm:$0xff]   ;;  %v23687_v4 = vld [vmem:[#allocation5 + $0x480] ss:$40 sps:$4 sm:$0xff]  }
 0x385   :  { %11728 = vmatprep.subr.bf16.mxu1 %v23597_v16  ;;  %v23653_v16 = vld [vmem:[#allocation5 + $0xc4] ss:$40 sps:$4 sm:$0xff]  }
 0x386   :  { %6258 = vmatmul.mubr.bf16.vlgmr.msra.gmra.mrb[8].mxu0 %v26746_v42 }
 0x387   :  { %6267 = vmatpush1.bf16.msra.mxu0 %v23592_v18  ;;  %20386 = vmatprep.mubr.msk.bf16.mxu0 %vm5534_vm0, %v26748_v49  ;;  %v23656_v18 = vld [vmem:[#allocation5 + $0x114] ss:$40 sps:$4 sm:$0xff]  }
 0x388   :  { %11729 = vmatpush1.bf16.msra.mxu1 %v23595_v20  ;;  %6268 = vmatprep.subr.bf16.mxu0 %v23600_v21  ;;  %v23654_v20 = vld [vmem:[#allocation5 + $0x110] ss:$40 sps:$4 sm:$0xff]   ;;  %v23659_v21 = vld [vmem:[#allocation5 + $0x164] ss:$40 sps:$4 sm:$0xff]  }
 0x389   :  { %11730 = vmatprep.subr.bf16.mxu1 %v23603_v22  ;;  %v23657_v22 = vld [vmem:[#allocation5 + $0x160] ss:$40 sps:$4 sm:$0xff]  }
 0x38b   :  { %6269 = vmatpush1.bf16.msra.mxu0 %v23598_v23  ;;  %v23662_v23 = vld [vmem:[#allocation5 + $0x1b4] ss:$40 sps:$4 sm:$0xff]  }
 0x38c   :  { %11731 = vmatpush1.bf16.msra.mxu1 %v23601_v24  ;;  %6270 = vmatprep.subr.bf16.mxu0 %v23606_v25  ;;  %v23660_v24 = vld [vmem:[#allocation5 + $0x1b0] ss:$40 sps:$4 sm:$0xff]   ;;  %v23665_v25 = vld [vmem:[#allocation5 + $0x204] ss:$40 sps:$4 sm:$0xff]  }
 0x38d   :  { %11732 = vmatprep.subr.bf16.mxu1 %v23609_v27  ;;  %v23663_v27 = vld [vmem:[#allocation5 + $0x200] ss:$40 sps:$4 sm:$0xff]  }
 0x38f   :  { %6271 = vmatpush1.bf16.msra.mxu0 %v23604_v30  ;;  %v23666_v30 = vld [vmem:[#allocation5 + $0x250] ss:$40 sps:$4 sm:$0xff]  }
 0x390   :  { %11733 = vmatpush1.bf16.msra.mxu1 %v23607_v31  ;;  %6272 = vmatprep.subr.bf16.mxu0 %v23612_v32  ;;  %v23762_v31 = vld [vmem:[#allocation8 + $0xa00] ss:$40 sps:$4 sm:$0xff]   ;;  %v23764_v32 = vld [vmem:[#allocation8 + $0xa04] ss:$40 sps:$4 sm:$0xff]  }
 0x391   :  { %11734 = vmatprep.subr.bf16.mxu1 %v23615_v35  ;;  %v23671_v35 = vld [vmem:[#allocation5 + $0x2a4] ss:$40 sps:$4 sm:$0xff]  }
 0x393   :  { %6273 = vmatpush1.bf16.msra.mxu0 %v23610_v36  ;;  %v23669_v36 = vld [vmem:[#allocation5 + $0x2a0] ss:$40 sps:$4 sm:$0xff]  }
 0x394   :  { %11735 = vmatpush1.bf16.msra.mxu1 %v23613_v37  ;;  %6274 = vmatprep.subr.bf16.mxu0 %v23618_v15  ;;  %v23768_v37 = vld [vmem:[#allocation8 + $0xa50] ss:$40 sps:$4 sm:$0xff]   ;;  %v23770_v15 = vld [vmem:[#allocation8 + $0xa54] ss:$40 sps:$4 sm:$0xff]  }
 0x395   :  { %11736 = vmatprep.subr.bf16.mxu1 %v23621_v38  ;;  %v23674_v38 = vld [vmem:[#allocation5 + $0x2f4] ss:$40 sps:$4 sm:$0xff]  }
 0x397   :  { %6275 = vmatpush1.bf16.msra.mxu0 %v23616_v40  ;;  %v23672_v40 = vld [vmem:[#allocation5 + $0x2f0] ss:$40 sps:$4 sm:$0xff]  }
 0x398   :  { %11737 = vmatpush1.bf16.msra.mxu1 %v23619_v41  ;;  %6276 = vmatprep.subr.bf16.mxu0 %v23624_v45  ;;  %v23774_v41 = vld [vmem:[#allocation8 + $0xaa0] ss:$40 sps:$4 sm:$0xff]   ;;  %v23776_v45 = vld [vmem:[#allocation8 + $0xaa4] ss:$40 sps:$4 sm:$0xff]  }
 0x399   :  { %11738 = vmatprep.subr.bf16.mxu1 %v23627_v47  ;;  %v23677_v47 = vld [vmem:[#allocation5 + $0x344] ss:$40 sps:$4 sm:$0xff]  }
 0x39b   :  { %6277 = vmatpush1.bf16.msra.mxu0 %v23622_v50  ;;  %v23675_v50 = vld [vmem:[#allocation5 + $0x340] ss:$40 sps:$4 sm:$0xff]  }
 0x39c   :  { %11739 = vmatpush1.bf16.msra.mxu1 %v23625_v54  ;;  %6278 = vmatprep.subr.bf16.mxu0 %v23630_v55  ;;  %v23780_v54 = vld [vmem:[#allocation8 + $0xaf0] ss:$40 sps:$4 sm:$0xff]   ;;  %v23782_v55 = vld [vmem:[#allocation8 + $0xaf4] ss:$40 sps:$4 sm:$0xff]  }
 0x39d   :  { %11740 = vmatprep.subr.bf16.mxu1 %v23633_v51  ;;  %v23680_v51 = vld [vmem:[#allocation5 + $0x394] ss:$40 sps:$4 sm:$0xff]  }
 0x39f   :  { %6279 = vmatpush1.bf16.msra.mxu0 %v23628_v56  ;;  %v23678_v56 = vld [vmem:[#allocation5 + $0x390] ss:$40 sps:$4 sm:$0xff]  }
 0x3a0   :  { %11741 = vmatpush1.bf16.msra.mxu1 %v23631_v43  ;;  %6280 = vmatprep.subr.bf16.mxu0 %v23636_v57  ;;  %v23786_v43 = vld [vmem:[#allocation8 + $0xb40] ss:$40 sps:$4 sm:$0xff]   ;;  %v23788_v57 = vld [vmem:[#allocation8 + $0xb44] ss:$40 sps:$4 sm:$0xff]  }
 0x3a1   :  { %11742 = vmatprep.subr.bf16.mxu1 %v23639_v58  ;;  %v23683_v58 = vld [vmem:[#allocation5 + $0x3e4] ss:$40 sps:$4 sm:$0xff]  }
 0x3a3   :  { %6281 = vmatpush1.bf16.msra.mxu0 %v23634_v46  ;;  %v23792_v46 = vld [vmem:[#allocation8 + $0xb90] ss:$40 sps:$4 sm:$0xff]  }
 0x3a4   :  { %11743 = vmatpush1.bf16.msra.mxu1 %v23637_v60  ;;  %20385 = vmatprep.subr.msk.bf16.mxu0 %vm5538_vm1, %v20376_v0  ;;  %v23794_v60 = vld [vmem:[#allocation8 + $0xb94] ss:$40 sps:$4 sm:$0xff]  }
 0x3a5   :  { %11744 = vmatprep.subr.bf16.mxu1 %v23643_v61  ;;  %v23686_v61 = vld [vmem:[#allocation5 + $0x434] ss:$40 sps:$4 sm:$0xff]   ;;  %v23684_v0 = vld [vmem:[#allocation5 + $0x430] ss:$40 sps:$4 sm:$0xff]  }
 0x3a7   :  { %6283 = vmatpush1.bf16.msra.mxu0 %v5552_v63  ;;  %v23804_v63 = vld [vmem:[#allocation8 + $0xc30] ss:$40 sps:$4 sm:$0xff]  }
 0x3a8   :  { %11745 = vmatpush1.bf16.msra.mxu1 %v23641_v2  ;;  %6553 = vmatprep.subr.bf16.mxu0 %v23647_v3  ;;  %v23800_v2 = vld [vmem:[#allocation8 + $0xbe4] ss:$40 sps:$4 sm:$0xff]   ;;  %v23689_v3 = vld [vmem:[#allocation5 + $0x484] ss:$40 sps:$4 sm:$0xff]  }
 0x3a9   :  { %11755 = vmatprep.subr.bf16.mxu1 %v23764_v32  ;;  %v23830_v32 = vld [vmem:[#allocation8 + $0xd74] ss:$40 sps:$4 sm:$0xff]  }
 0x3aa   :  { %6299 = vmatmul.mubr.bf16.vlgmr.msra.gmra.mrb[8].mxu0 %v26757_v29 }
 0x3ab   :  { %11747 = vmatmul.mubr.bf16.vlgmr.msra.gmra.mrb[8].mxu1 %v26848_v8  ;;  %6554 = vmatpush1.bf16.msra.mxu0 %v23645_v6  ;;  %v23806_v6 = vld [vmem:[#allocation8 + $0xc34] ss:$40 sps:$4 sm:$0xff]  }
 0x3ac   :  { %6585 = vmatprep.mubr.bf16.mxu0 %v26714_v48  ;;  %6555 = vmatprep.subr.bf16.mxu0 %v23650_v7  ;;  %v23668_v48 = vld [vmem:[#allocation5 + $0x254] ss:$40 sps:$4 sm:$0xff]  }
 0x3ad   :  { %11756 = vmatpush1.bf16.msra.mxu1 %v23762_v31  ;;  %v23692_v7 = vld [vmem:[#allocation5 + $0x4d4] ss:$40 sps:$4 sm:$0xff]   ;;  %v23828_v31 = vld [vmem:[#allocation8 + $0xd70] ss:$40 sps:$4 sm:$0xff]  }
 0x3ae   :  { %11757 = vmatprep.subr.bf16.mxu1 %v23770_v15  ;;  %v23705_v15 = vld [vmem:[#allocation5 + $0x660] ss:$40 sps:$4 sm:$0xff]  }
 0x3af   :  { %6556 = vmatpush1.bf16.msra.mxu0 %v23648_v12  ;;  %v23690_v12 = vld [vmem:[#allocation5 + $0x4d0] ss:$40 sps:$4 sm:$0xff]  }
 0x3b0   :  { %6557 = vmatprep.subr.bf16.mxu0 %v23653_v16  ;;  %v23810_v16 = vld [vmem:[#allocation8 + $0xc80] ss:$40 sps:$4 sm:$0xff]  }
 0x3b1   :  { %11758 = vmatpush1.bf16.msra.mxu1 %v23768_v37  ;;  %v23836_v37 = vld [vmem:[#allocation8 + $0xdc4] ss:$40 sps:$4 sm:$0xff]  }
 0x3b2   :  { %11759 = vmatprep.subr.bf16.mxu1 %v23776_v45  ;;  %v23708_v45 = vld [vmem:[#allocation5 + $0x6b0] ss:$40 sps:$4 sm:$0xff]  }
 0x3b3   :  { %6558 = vmatpush1.bf16.msra.mxu0 %v23651_v44  ;;  %v23812_v44 = vld [vmem:[#allocation8 + $0xc84] ss:$40 sps:$4 sm:$0xff]  }
 0x3b4   :  { %6559 = vmatprep.subr.bf16.mxu0 %v23656_v18  ;;  %v23695_v18 = vld [vmem:[#allocation5 + $0x524] ss:$40 sps:$4 sm:$0xff]  }
 0x3b5   :  { %11760 = vmatpush1.bf16.msra.mxu1 %v23774_v41  ;;  %v23710_v41 = vld [vmem:[#allocation5 + $0x6b4] ss:$40 sps:$4 sm:$0xff]  }
 0x3b6   :  { %11761 = vmatprep.subr.bf16.mxu1 %v23782_v55 }
 0x3b7   :  { %6560 = vmatpush1.bf16.msra.mxu0 %v23654_v20  ;;  %v23693_v20 = vld [vmem:[#allocation5 + $0x520] ss:$40 sps:$4 sm:$0xff]  }
 0x3b8   :  { %6561 = vmatprep.subr.bf16.mxu0 %v23659_v21  ;;  %v23816_v21 = vld [vmem:[#allocation8 + $0xcd0] ss:$40 sps:$4 sm:$0xff]  }
 0x3b9   :  { %11762 = vmatpush1.bf16.msra.mxu1 %v23780_v54  ;;  %v23711_v54 = vld [vmem:[#allocation5 + $0x700] ss:$40 sps:$4 sm:$0xff]  }
 0x3ba   :  { %11763 = vmatprep.subr.bf16.mxu1 %v23788_v57 }
 0x3bb   :  { %6562 = vmatpush1.bf16.msra.mxu0 %v23657_v22  ;;  %v23818_v22 = vld [vmem:[#allocation8 + $0xcd4] ss:$40 sps:$4 sm:$0xff]  }
 0x3bc   :  { %6563 = vmatprep.subr.bf16.mxu0 %v23662_v23  ;;  %v23698_v23 = vld [vmem:[#allocation5 + $0x574] ss:$40 sps:$4 sm:$0xff]  }
 0x3bd   :  { %11764 = vmatpush1.bf16.msra.mxu1 %v23786_v43 }
 0x3be   :  { %11765 = vmatprep.subr.bf16.mxu1 %v23794_v60  ;;  %v23852_v60 = vld [vmem:[#allocation8 + $0xeb0] ss:$40 sps:$4 sm:$0xff]  }
 0x3bf   :  { %6564 = vmatpush1.bf16.msra.mxu0 %v23660_v24  ;;  %v23696_v24 = vld [vmem:[#allocation5 + $0x570] ss:$40 sps:$4 sm:$0xff]  }
 0x3c0   :  { %6565 = vmatprep.subr.bf16.mxu0 %v23665_v25  ;;  %v23822_v25 = vld [vmem:[#allocation8 + $0xd20] ss:$40 sps:$4 sm:$0xff]  }
 0x3c1   :  { %11766 = vmatpush1.bf16.msra.mxu1 %v23792_v46  ;;  %v23714_v46 = vld [vmem:[#allocation5 + $0x750] ss:$40 sps:$4 sm:$0xff]  }
 0x3c2   :  { %11767 = vmatprep.subr.bf16.mxu1 %v23800_v2  ;;  %v23722_v2 = vld [vmem:[#allocation5 + $0x7f4] ss:$40 sps:$4 sm:$0xff]  }
 0x3c3   :  { %6566 = vmatpush1.bf16.msra.mxu0 %v23663_v27  ;;  %v23824_v27 = vld [vmem:[#allocation8 + $0xd24] ss:$40 sps:$4 sm:$0xff]  }
 0x3c4   :  { %6567 = vmatprep.subr.bf16.mxu0 %v23668_v48  ;;  %v23701_v48 = vld [vmem:[#allocation5 + $0x5c4] ss:$40 sps:$4 sm:$0xff]  }
 0x3c5   :  { %11768 = vmatpush1.bf16.msra.mxu1 %v23798_v1  ;;  %v23717_v1 = vld [vmem:[#allocation5 + $0x7a0] ss:$40 sps:$4 sm:$0xff]  }
 0x3c6   :  { %11769 = vmatprep.subr.bf16.mxu1 %v23806_v6  ;;  %v23728_v6 = vld [vmem:[#allocation5 + $0x894] ss:$40 sps:$4 sm:$0xff]  }
 0x3c7   :  { %6568 = vmatpush1.bf16.msra.mxu0 %v23666_v30  ;;  %v23699_v30 = vld [vmem:[#allocation5 + $0x5c0] ss:$40 sps:$4 sm:$0xff]  }
 0x3c8   :  { %6569 = vmatprep.subr.bf16.mxu0 %v23671_v35  ;;  %v23704_v35 = vld [vmem:[#allocation5 + $0x614] ss:$40 sps:$4 sm:$0xff]  }
 0x3c9   :  { %11770 = vmatpush1.bf16.msra.mxu1 %v23804_v63  ;;  %v23723_v63 = vld [vmem:[#allocation5 + $0x840] ss:$40 sps:$4 sm:$0xff]  }
 0x3ca   :  { %11771 = vmatprep.subr.bf16.mxu1 %v23812_v44  ;;  %v23734_v44 = vld [vmem:[#allocation5 + $0x934] ss:$40 sps:$4 sm:$0xff]  }
 0x3cb   :  { %6570 = vmatpush1.bf16.msra.mxu0 %v23669_v36  ;;  %v23834_v36 = vld [vmem:[#allocation8 + $0xdc0] ss:$40 sps:$4 sm:$0xff]  }
 0x3cc   :  { %6571 = vmatprep.subr.bf16.mxu0 %v23674_v38  ;;  %v23840_v38 = vld [vmem:[#allocation8 + $0xe10] ss:$40 sps:$4 sm:$0xff]  }
 0x3cd   :  { %11772 = vmatpush1.bf16.msra.mxu1 %v23810_v16  ;;  %v23729_v16 = vld [vmem:[#allocation5 + $0x8e0] ss:$40 sps:$4 sm:$0xff]  }
 0x3ce   :  { %11773 = vmatprep.subr.bf16.mxu1 %v23818_v22  ;;  %v23740_v22 = vld [vmem:[#allocation5 + $0x9d4] ss:$40 sps:$4 sm:$0xff]  }
 0x3cf   :  { %6572 = vmatpush1.bf16.msra.mxu0 %v23672_v40  ;;  %v23842_v40 = vld [vmem:[#allocation8 + $0xe14] ss:$40 sps:$4 sm:$0xff]  }
 0x3d0   :  { %6573 = vmatprep.subr.bf16.mxu0 %v23677_v47  ;;  %v23713_v47 = vld [vmem:[#allocation5 + $0x704] ss:$40 sps:$4 sm:$0xff]  }
 0x3d1   :  { %11774 = vmatpush1.bf16.msra.mxu1 %v23816_v21  ;;  %v23735_v21 = vld [vmem:[#allocation5 + $0x980] ss:$40 sps:$4 sm:$0xff]  }
 0x3d2   :  { %11775 = vmatprep.subr.bf16.mxu1 %v23824_v27  ;;  %v23746_v27 = vld [vmem:[#allocation5 + $0xa74] ss:$40 sps:$4 sm:$0xff]  }
 0x3d3   :  { %6574 = vmatpush1.bf16.msra.mxu0 %v23675_v50  ;;  %v23848_v50 = vld [vmem:[#allocation8 + $0xe64] ss:$40 sps:$4 sm:$0xff]  }
 0x3d4   :  { %6575 = vmatprep.subr.bf16.mxu0 %v23680_v51  ;;  %v23846_v51 = vld [vmem:[#allocation8 + $0xe60] ss:$40 sps:$4 sm:$0xff]  }
 0x3d5   :  { %11776 = vmatpush1.bf16.msra.mxu1 %v23822_v25  ;;  %v23741_v25 = vld [vmem:[#allocation5 + $0xa20] ss:$40 sps:$4 sm:$0xff]  }
 0x3d6   :  { %11777 = vmatprep.subr.bf16.mxu1 %v23830_v32  ;;  %v23752_v32 = vld [vmem:[#allocation5 + $0xb14] ss:$40 sps:$4 sm:$0xff]  }
 0x3d7   :  { %6576 = vmatpush1.bf16.msra.mxu0 %v23678_v56  ;;  %v23716_v56 = vld [vmem:[#allocation5 + $0x754] ss:$40 sps:$4 sm:$0xff]  }
 0x3d8   :  { %6577 = vmatprep.subr.bf16.mxu0 %v23683_v58 }
 0x3d9   :  { %11778 = vmatpush1.bf16.msra.mxu1 %v23828_v31  ;;  %v23747_v31 = vld [vmem:[#allocation5 + $0xac0] ss:$40 sps:$4 sm:$0xff]  }
 0x3da   :  { %11779 = vmatprep.subr.bf16.mxu1 %v23836_v37  ;;  %v23758_v37 = vld [vmem:[#allocation5 + $0xbb4] ss:$40 sps:$4 sm:$0xff]  }
 0x3db   :  { %6578 = vmatpush1.bf16.msra.mxu0 %v23681_v59  ;;  %v23854_v59 = vld [vmem:[#allocation8 + $0xeb4] ss:$40 sps:$4 sm:$0xff]  }
 0x3dc   :  { %6579 = vmatprep.subr.bf16.mxu0 %v23686_v61  ;;  %v23719_v61 = vld [vmem:[#allocation5 + $0x7a4] ss:$40 sps:$4 sm:$0xff]  }
 0x3dd   :  { %11780 = vmatpush1.bf16.msra.mxu1 %v23834_v36  ;;  %v23753_v36 = vld [vmem:[#allocation5 + $0xb60] ss:$40 sps:$4 sm:$0xff]  }
 0x3de   :  { %11781 = vmatprep.subr.bf16.mxu1 %v23842_v40  ;;  %v23773_v40 = vld [vmem:[#allocation5 + $0xca4] ss:$40 sps:$4 sm:$0xff]  }
 0x3df   :  { %6580 = vmatpush1.bf16.msra.mxu0 %v23684_v0  ;;  %v23860_v0 = vld [vmem:[#allocation8 + $0xf04] ss:$40 sps:$4 sm:$0xff]  }
 0x3e0   :  { %6581 = vmatprep.subr.bf16.mxu0 %v23689_v3  ;;  %v23720_v3 = vld [vmem:[#allocation5 + $0x7f0] ss:$40 sps:$4 sm:$0xff]  }
 0x3e1   :  { %11782 = vmatpush1.bf16.msra.mxu1 %v23840_v38  ;;  %v23765_v38 = vld [vmem:[#allocation5 + $0xc50] ss:$40 sps:$4 sm:$0xff]  }
 0x3e2   :  { %11783 = vmatprep.subr.bf16.mxu1 %v23848_v50  ;;  %v23785_v50 = vld [vmem:[#allocation5 + $0xd44] ss:$40 sps:$4 sm:$0xff]  }
 0x3e3   :  { %6582 = vmatpush1.bf16.msra.mxu0 %v23687_v4  ;;  %v23725_v4 = vld [vmem:[#allocation5 + $0x844] ss:$40 sps:$4 sm:$0xff]  }
 0x3e4   :  { %6583 = vmatprep.subr.bf16.mxu0 %v23692_v7  ;;  %v23726_v7 = vld [vmem:[#allocation5 + $0x890] ss:$40 sps:$4 sm:$0xff]  }
 0x3e5   :  { %11784 = vmatpush1.bf16.msra.mxu1 %v23846_v51  ;;  %v23791_v51 = vld [vmem:[#allocation5 + $0xd94] ss:$40 sps:$4 sm:$0xff]  }
 0x3e6   :  { %11785 = vmatprep.subr.bf16.mxu1 %v23854_v59  ;;  %v23803_v59 = vld [vmem:[#allocation5 + $0xe34] ss:$40 sps:$4 sm:$0xff]  }
 0x3e7   :  { %6584 = vmatpush1.bf16.msra.mxu0 %v23690_v12  ;;  %v23731_v12 = vld [vmem:[#allocation5 + $0x8e4] ss:$40 sps:$4 sm:$0xff]  }
 0x3e8   :  { %6594 = vmatprep.subr.bf16.mxu0 %v23695_v18  ;;  %v23732_v18 = vld [vmem:[#allocation5 + $0x930] ss:$40 sps:$4 sm:$0xff]  }
 0x3e9   :  { %11786 = vmatpush1.bf16.msra.mxu1 %v23852_v60  ;;  %v23809_v60 = vld [vmem:[#allocation5 + $0xe84] ss:$40 sps:$4 sm:$0xff]  }
 0x3ea   :  { %6586 = vmatmul.mubr.bf16.vlgmr.msra.gmra.mrb[12].mxu0 %v26720_v10  ;;  %v23702_v10 = vld [vmem:[#allocation5 + $0x610] ss:$40 sps:$4 sm:$0xff]   ;;  %11796 = vmatprep.subr.bf16.mxu1 %v23860_v0  ;;  %v23815_v0 = vld [vmem:[#allocation5 + $0xed4] ss:$40 sps:$4 sm:$0xff]  }
 0x3eb   :  { %6595 = vmatpush1.bf16.msra.mxu0 %v23693_v20  ;;  %6626 = vmatprep.mubr.bf16.mxu0 %v26716_v53  ;;  %v23707_v53 = vld [vmem:[#allocation5 + $0x664] ss:$40 sps:$4 sm:$0xff]  }
 0x3ec   :  { %6596 = vmatprep.subr.bf16.mxu0 %v23698_v23  ;;  %v23737_v20 = vld [vmem:[#allocation5 + $0x984] ss:$40 sps:$4 sm:$0xff]   ;;  %v23738_v23 = vld [vmem:[#allocation5 + $0x9d0] ss:$40 sps:$4 sm:$0xff]  }
 0x3ef   :  { %6597 = vmatpush1.bf16.msra.mxu0 %v23696_v24  ;;  %v23743_v24 = vld [vmem:[#allocation5 + $0xa24] ss:$40 sps:$4 sm:$0xff]  }
 0x3f0   :  { %6598 = vmatprep.subr.bf16.mxu0 %v23701_v48  ;;  %v23744_v48 = vld [vmem:[#allocation5 + $0xa70] ss:$40 sps:$4 sm:$0xff]  }
 0x3f3   :  { %6599 = vmatpush1.bf16.msra.mxu0 %v23699_v30  ;;  %v23749_v30 = vld [vmem:[#allocation5 + $0xac4] ss:$40 sps:$4 sm:$0xff]  }
 0x3f4   :  { %6600 = vmatprep.subr.bf16.mxu0 %v23704_v35  ;;  %v23750_v35 = vld [vmem:[#allocation5 + $0xb10] ss:$40 sps:$4 sm:$0xff]  }
 0x3f7   :  { %6601 = vmatpush1.bf16.msra.mxu0 %v23702_v10  ;;  %v23755_v10 = vld [vmem:[#allocation5 + $0xb64] ss:$40 sps:$4 sm:$0xff]  }
 0x3f8   :  { %6602 = vmatprep.subr.bf16.mxu0 %v23707_v53  ;;  %v23761_v53 = vld [vmem:[#allocation5 + $0xc04] ss:$40 sps:$4 sm:$0xff]  }
 0x3fb   :  { %6603 = vmatpush1.bf16.msra.mxu0 %v23705_v15  ;;  %v23767_v15 = vld [vmem:[#allocation5 + $0xc54] ss:$40 sps:$4 sm:$0xff]  }
 0x3fc   :  { %6604 = vmatprep.subr.bf16.mxu0 %v23710_v41  ;;  %v23771_v41 = vld [vmem:[#allocation5 + $0xca0] ss:$40 sps:$4 sm:$0xff]  }
 0x3fe   :  { %v26855_v55 = vpop.f32.mrb[4].mxu1 }
 0x3ff   :  { %v26857_v43 = vpop.f32.mrb[5].mxu1  ;;  %6605 = vmatpush1.bf16.msra.mxu0 %v23708_v45  ;;  %v23779_v45 = vld [vmem:[#allocation5 + $0xcf4] ss:$40 sps:$4 sm:$0xff]  }
 0x400   :  { %v6550_v57 = vpop.f32.mrb[6].mxu1  ;;  %6606 = vmatprep.subr.bf16.mxu0 %v23713_v47  ;;  %v23777_v47 = vld [vmem:[#allocation5 + $0xcf0] ss:$40 sps:$4 sm:$0xff]  }
 0x401   :  { %v6551_v58 = vpop.f32.mrb[7].mxu1  ;;  %v23797_v57 = vld [vmem:[#allocation5 + $0xde4] ss:$40 sps:$4 sm:$0xff]  }
 0x402   :  { %v23795_v58 = vld [vmem:[#allocation5 + $0xde0] ss:$40 sps:$4 sm:$0xff]  }
 0x403   :  { %6607 = vmatpush1.bf16.msra.mxu0 %v23711_v54  ;;  %v23783_v54 = vld [vmem:[#allocation5 + $0xd40] ss:$40 sps:$4 sm:$0xff]  }
 0x404   :  { %6608 = vmatprep.subr.bf16.mxu0 %v23716_v56  ;;  %v23789_v56 = vld [vmem:[#allocation5 + $0xd90] ss:$40 sps:$4 sm:$0xff]  }
 0x407   :  { %6609 = vmatpush1.bf16.msra.mxu0 %v23714_v46  ;;  %v23801_v46 = vld [vmem:[#allocation5 + $0xe30] ss:$40 sps:$4 sm:$0xff]  }
 0x408   :  { %6610 = vmatprep.subr.bf16.mxu0 %v23719_v61  ;;  %v23807_v61 = vld [vmem:[#allocation5 + $0xe80] ss:$40 sps:$4 sm:$0xff]  }
 0x40b   :  { %6611 = vmatpush1.bf16.msra.mxu0 %v23717_v1  ;;  %v23813_v1 = vld [vmem:[#allocation5 + $0xed0] ss:$40 sps:$4 sm:$0xff]  }
 0x40c   :  { %6612 = vmatprep.subr.bf16.mxu0 %v23722_v2  ;;  %v23821_v2 = vld [vmem:[#allocation5 + $0xf24] ss:$40 sps:$4 sm:$0xff]  }
 0x40f   :  { %6613 = vmatpush1.bf16.msra.mxu0 %v23720_v3  ;;  %v23819_v3 = vld [vmem:[#allocation5 + $0xf20] ss:$40 sps:$4 sm:$0xff]  }
 0x410   :  { %6614 = vmatprep.subr.bf16.mxu0 %v23725_v4  ;;  %v23827_v4 = vld [vmem:[#allocation5 + $0xf74] ss:$40 sps:$4 sm:$0xff]  }
 0x413   :  { %6615 = vmatpush1.bf16.msra.mxu0 %v23723_v63  ;;  %v23825_v63 = vld [vmem:[#allocation5 + $0xf70] ss:$40 sps:$4 sm:$0xff]  }
 0x414   :  { %6616 = vmatprep.subr.bf16.mxu0 %v23728_v6  ;;  %v23833_v6 = vld [vmem:[#allocation5 + $0xfc4] ss:$40 sps:$4 sm:$0xff]  }
 0x417   :  { %6617 = vmatpush1.bf16.msra.mxu0 %v23726_v7  ;;  %v23831_v7 = vld [vmem:[#allocation5 + $0xfc0] ss:$40 sps:$4 sm:$0xff]  }
 0x418   :  { %6618 = vmatprep.subr.bf16.mxu0 %v23731_v12  ;;  %v23839_v12 = vld [vmem:[#allocation5 + $0x1014] ss:$40 sps:$4 sm:$0xff]  }
 0x41b   :  { %6619 = vmatpush1.bf16.msra.mxu0 %v23729_v16  ;;  %v23837_v16 = vld [vmem:[#allocation5 + $0x1010] ss:$40 sps:$4 sm:$0xff]  }
 0x41c   :  { %6620 = vmatprep.subr.bf16.mxu0 %v23734_v44  ;;  %v23845_v44 = vld [vmem:[#allocation5 + $0x1064] ss:$40 sps:$4 sm:$0xff]  }
 0x41f   :  { %6621 = vmatpush1.bf16.msra.mxu0 %v23732_v18  ;;  %v26864_v18 = vsub.s32 7, %v26795_v9 }
 0x420   :  { %6622 = vmatprep.subr.bf16.mxu0 %v23737_v20  ;;  %v26867_v20 = vsub.s32 4, %v26795_v9 }
 0x423   :  { %6623 = vmatpush1.bf16.msra.mxu0 %v23735_v21  ;;  %v26870_v21 = vsub.s32 5, %v26795_v9 }
 0x424   :  { %6624 = vmatprep.subr.bf16.mxu0 %v23740_v22  ;;  %v26872_v22 = vld [vmem:[#allocation7] sm:$0xff] }
 0x427   :  { %6625 = vmatpush1.bf16.msra.mxu0 %v23738_v23  ;;  %v1090_v23 = vrot.slane %v26872_v22, %v26864_v18 }
 0x428   :  { %6635 = vmatprep.subr.bf16.mxu0 %v23743_v24  ;;  %v1078_v24 = vrot.slane %v26872_v22, %v26867_v20 }
 0x42a   :  { %6627 = vmatmul.mubr.bf16.vlgmr.msra.gmra.mrb[12].mxu0 %v26722_v11  ;;  %v23756_v11 = vld [vmem:[#allocation5 + $0xbb0] ss:$40 sps:$4 sm:$0xff]  }
 0x42b   :  { %6636 = vmatpush1.bf16.msra.mxu0 %v23741_v25  ;;  %6667 = vmatprep.mubr.bf16.mxu0 %v26727_v39  ;;  %v23759_v39 = vld [vmem:[#allocation5 + $0xc00] ss:$40 sps:$4 sm:$0xff]   ;;  %v1082_v25 = vrot.slane %v26872_v22, %v26870_v21 }
 0x42c   :  { %6637 = vmatprep.subr.bf16.mxu0 %v23746_v27  ;;  %v23849_v27 = vld [vmem:[#allocation5 + $0x10b0] ss:$40 sps:$4 sm:$0xff]  }
 0x42f   :  { %6638 = vmatpush1.bf16.msra.mxu0 %v23744_v48  ;;  %v23857_v48 = vld [vmem:[#allocation5 + $0x1104] ss:$40 sps:$4 sm:$0xff]  }
 0x430   :  { %6639 = vmatprep.subr.bf16.mxu0 %v23749_v30 }
 0x433   :  { %6640 = vmatpush1.bf16.msra.mxu0 %v23747_v31  ;;  %v22192_v31 = vadd.f32 %v26857_v43, %v1090_v23  ;;  %v23897_v23 = vld [vmem:[#allocation5 + $0x1330] ss:$40 sps:$4 sm:$0xff]  }
 0x434   :  { %6641 = vmatprep.subr.bf16.mxu0 %v23752_v32 }
 0x437   :  { %6642 = vmatpush1.bf16.msra.mxu0 %v23750_v35 }
 0x438   :  { %6643 = vmatprep.subr.bf16.mxu0 %v23755_v10 }
 0x43b   :  { %6644 = vmatpush1.bf16.msra.mxu0 %v23753_v36 }
 0x43c   :  { %6645 = vmatprep.subr.bf16.mxu0 %v23758_v37  ;;  %v23855_v37 = vld [vmem:[#allocation5 + $0x1100] ss:$40 sps:$4 sm:$0xff]  }
 0x43f   :  { %6646 = vmatpush1.bf16.msra.mxu0 %v23756_v11  ;;  %v23863_v11 = vld [vmem:[#allocation5 + $0x1154] ss:$40 sps:$4 sm:$0xff]  }
 0x440   :  { %6647 = vmatprep.subr.bf16.mxu0 %v23761_v53 }
 0x443   :  { %6648 = vmatpush1.bf16.msra.mxu0 %v23759_v39 }
 0x444   :  { %6649 = vmatprep.subr.bf16.mxu0 %v23767_v15 }
 0x447   :  { %6650 = vmatpush1.bf16.msra.mxu0 %v23765_v38  ;;  %v23858_v38 = vld [vmem:[#allocation8 + $0xf00] ss:$40 sps:$4 sm:$0xff]  }
 0x448   :  { %6651 = vmatprep.subr.bf16.mxu0 %v23773_v40  ;;  %v23861_v40 = vld [vmem:[#allocation5 + $0x1150] ss:$40 sps:$4 sm:$0xff]  }
 0x44b   :  { %6652 = vmatpush1.bf16.msra.mxu0 %v23771_v41  ;;  %v6806_v41 = vmax.f32 %v22192_v31, 0.0  ;;  %v23911_v31 = vld [vmem:[#allocation5 + $0x13d4] ss:$40 sps:$4 sm:$0xff]  }
 0x44c   :  { %6653 = vmatprep.subr.bf16.mxu0 %v23779_v45 }
 0x44f   :  { %6654 = vmatpush1.bf16.msra.mxu0 %v23777_v47  ;;  %v23866_v47 = vld [vmem:[#allocation8 + $0xf54] ss:$40 sps:$4 sm:$0xff]  }
 0x450   :  { %6655 = vmatprep.subr.bf16.mxu0 %v23785_v50  ;;  %v23869_v50 = vld [vmem:[#allocation5 + $0x11a4] ss:$40 sps:$4 sm:$0xff]  }
 0x453   :  { %6656 = vmatpush1.bf16.msra.mxu0 %v23783_v54  ;;  %v23864_v54 = vld [vmem:[#allocation8 + $0xf50] ss:$40 sps:$4 sm:$0xff]  }
 0x454   :  { %6657 = vmatprep.subr.bf16.mxu0 %v23791_v51  ;;  %v23867_v51 = vld [vmem:[#allocation5 + $0x11a0] ss:$40 sps:$4 sm:$0xff]  }
 0x457   :  { %6658 = vmatpush1.bf16.msra.mxu0 %v23789_v56  ;;  %v26886_v56 = vpack.c.bf16 %v6806_v41, %v6806_v41  ;;  %v23929_v41 = vld [vmem:[#allocation5 + $0x14c4] ss:$40 sps:$4 sm:$0xff]  }
 0x458   :  { %6659 = vmatprep.subr.bf16.mxu0 %v23797_v57  ;;  %v23872_v57 = vld [vmem:[#allocation8 + $0xfa4] ss:$40 sps:$4 sm:$0xff]  }
 0x45b   :  { %6660 = vmatpush1.bf16.msra.mxu0 %v23795_v58  ;;  %v23875_v58 = vld [vmem:[#allocation5 + $0x11f4] ss:$40 sps:$4 sm:$0xff]  }
 0x45c   :  { %6661 = vmatprep.subr.bf16.mxu0 %v23803_v59  ;;  %v23870_v59 = vld [vmem:[#allocation8 + $0xfa0] ss:$40 sps:$4 sm:$0xff]  }
 0x45f   :  { %6662 = vmatpush1.bf16.msra.mxu0 %v23801_v46  ;;  %v23873_v46 = vld [vmem:[#allocation5 + $0x11f0] ss:$40 sps:$4 sm:$0xff]  }
 0x460   :  { %6663 = vmatprep.subr.bf16.mxu0 %v23809_v60  ;;  %v23878_v60 = vld [vmem:[#allocation8 + $0xff4] ss:$40 sps:$4 sm:$0xff]  }
 0x463   :  { %6664 = vmatpush1.bf16.msra.mxu0 %v23807_v61  ;;  %v23881_v61 = vld [vmem:[#allocation5 + $0x1244] ss:$40 sps:$4 sm:$0xff]  }
 0x464   :  { %6665 = vmatprep.subr.bf16.mxu0 %v23815_v0  ;;  %v23876_v0 = vld [vmem:[#allocation8 + $0xff0] ss:$40 sps:$4 sm:$0xff]  }
 0x467   :  { %6666 = vmatpush1.bf16.msra.mxu0 %v23813_v1  ;;  %v23879_v1 = vld [vmem:[#allocation5 + $0x1240] ss:$40 sps:$4 sm:$0xff]  }
 0x468   :  { %6676 = vmatprep.subr.bf16.mxu0 %v23821_v2  ;;  %v23884_v2 = vld [vmem:[#allocation8 + $0x1044] ss:$40 sps:$4 sm:$0xff]  }
 0x46a   :  { %6668 = vmatmul.mubr.bf16.vlgmr.msra.gmra.mrb[12].mxu0 %v26730_v17  ;;  %v23843_v17 = vld [vmem:[#allocation5 + $0x1060] ss:$40 sps:$4 sm:$0xff]  }
 0x46b   :  { %6677 = vmatpush1.bf16.msra.mxu0 %v23819_v3  ;;  %6708 = vmatprep.mubr.bf16.mxu0 %v26734_v26  ;;  %v23851_v26 = vld [vmem:[#allocation5 + $0x10b4] ss:$40 sps:$4 sm:$0xff]  }
 0x46c   :  { %6678 = vmatprep.subr.bf16.mxu0 %v23827_v4  ;;  %v23887_v3 = vld [vmem:[#allocation5 + $0x1294] ss:$40 sps:$4 sm:$0xff]  }
 0x46d   :  { %v23882_v4 = vld [vmem:[#allocation8 + $0x1040] ss:$40 sps:$4 sm:$0xff]  }
 0x46f   :  { %6679 = vmatpush1.bf16.msra.mxu0 %v23825_v63  ;;  %v23885_v63 = vld [vmem:[#allocation5 + $0x1290] ss:$40 sps:$4 sm:$0xff]  }
 0x470   :  { %6680 = vmatprep.subr.bf16.mxu0 %v23833_v6  ;;  %v23890_v6 = vld [vmem:[#allocation8 + $0x1094] ss:$40 sps:$4 sm:$0xff]  }
 0x473   :  { %6681 = vmatpush1.bf16.msra.mxu0 %v23831_v7  ;;  %v23893_v7 = vld [vmem:[#allocation5 + $0x12e4] ss:$40 sps:$4 sm:$0xff]  }
 0x474   :  { %6682 = vmatprep.subr.bf16.mxu0 %v23839_v12  ;;  %v23888_v12 = vld [vmem:[#allocation8 + $0x1090] ss:$40 sps:$4 sm:$0xff]  }
 0x477   :  { %6683 = vmatpush1.bf16.msra.mxu0 %v23837_v16  ;;  %v23891_v16 = vld [vmem:[#allocation5 + $0x12e0] ss:$40 sps:$4 sm:$0xff]  }
 0x478   :  { %6684 = vmatprep.subr.bf16.mxu0 %v23845_v44  ;;  %v23896_v44 = vld [vmem:[#allocation8 + $0x10e4] ss:$40 sps:$4 sm:$0xff]  }
 0x47b   :  { %6685 = vmatpush1.bf16.msra.mxu0 %v23843_v17  ;;  %v23899_v17 = vld [vmem:[#allocation5 + $0x1334] ss:$40 sps:$4 sm:$0xff]  }
 0x47c   :  { %6686 = vmatprep.subr.bf16.mxu0 %v23851_v26  ;;  %v23894_v26 = vld [vmem:[#allocation8 + $0x10e0] ss:$40 sps:$4 sm:$0xff]  }
 0x47d   :  { %v6300_v30 = vpop.f32.mrb[8].mxu0 }
 0x47e   :  { %v22189_v32 = vadd.f32 %v6300_v30, %v1078_v24  ;;  %v6302_v35 = vpop.f32.mrb[9].mxu0  ;;  %v23902_v24 = vld [vmem:[#allocation8 + $0x1134] ss:$40 sps:$4 sm:$0xff]   ;;  %v23908_v30 = vld [vmem:[#allocation8 + $0x1184] ss:$40 sps:$4 sm:$0xff]  }
 0x47f   :  { %v22190_v10 = vadd.f32 %v6302_v35, %v1082_v25  ;;  %v6304_v36 = vpop.f32.mrb[10].mxu0  ;;  %6687 = vmatpush1.bf16.msra.mxu0 %v23849_v27  ;;  %v23905_v25 = vld [vmem:[#allocation5 + $0x1384] ss:$40 sps:$4 sm:$0xff]   ;;  %v23909_v35 = vld [vmem:[#allocation5 + $0x13d0] ss:$40 sps:$4 sm:$0xff]  }
 0x480   :  { %v6803_v53 = vmax.f32 %v22189_v32, 0.0  ;;  %v6305_v39 = vpop.f32.mrb[11].mxu0  ;;  %6688 = vmatprep.subr.bf16.mxu0 %v23857_v48  ;;  %v23900_v27 = vld [vmem:[#allocation8 + $0x1130] ss:$40 sps:$4 sm:$0xff]   ;;  %v23906_v32 = vld [vmem:[#allocation8 + $0x1180] ss:$40 sps:$4 sm:$0xff]  }
 0x481   :  { %v6804_v15 = vmax.f32 %v22190_v10, 0.0  ;;  %v23903_v48 = vld [vmem:[#allocation5 + $0x1380] ss:$40 sps:$4 sm:$0xff]   ;;  %v23917_v36 = vld [vmem:[#allocation5 + $0x1424] ss:$40 sps:$4 sm:$0xff]  }
 0x482   :  { %v26883_v43 = vpack.c.bf16 %v6803_v53, %v6803_v53  ;;  %v23914_v10 = vld [vmem:[#allocation8 + $0x11d4] ss:$40 sps:$4 sm:$0xff]   ;;  %v23920_v53 = vld [vmem:[#allocation8 + $0x1224] ss:$40 sps:$4 sm:$0xff]  }
 0x483   :  { %v26881_v45 = vpack.c.bf16 %v6804_v15, %v6804_v15  ;;  %6689 = vmatpush1.bf16.msra.mxu0 %v23855_v37  ;;  %v23912_v37 = vld [vmem:[#allocation8 + $0x11d0] ss:$40 sps:$4 sm:$0xff]   ;;  %v23923_v39 = vld [vmem:[#allocation5 + $0x1474] ss:$40 sps:$4 sm:$0xff]  }
 0x484   :  { %6690 = vmatprep.subr.bf16.mxu0 %v23863_v11  ;;  %v23915_v11 = vld [vmem:[#allocation5 + $0x1420] ss:$40 sps:$4 sm:$0xff]   ;;  %v23918_v15 = vld [vmem:[#allocation8 + $0x1220] ss:$40 sps:$4 sm:$0xff]  }
 0x485   :  { %11787 = vmatprep.mubr.bf16.mxu1 %v26881_v45 }
 0x486   :  { %11788 = vmatmul.mubr.bf16.vlgmr.msra.gmra.mrb[8].mxu1 %v26883_v43 }
 0x487   :  { %11797 = vmatpush1.bf16.msra.mxu1 %v23858_v38  ;;  %6691 = vmatpush1.bf16.msra.mxu0 %v23861_v40  ;;  %v23921_v38 = vld [vmem:[#allocation5 + $0x1470] ss:$40 sps:$4 sm:$0xff]  }
 0x488   :  { %11828 = vmatprep.mubr.bf16.mxu1 %v26886_v56  ;;  %11798 = vmatprep.subr.bf16.mxu1 %v23866_v47  ;;  %v23926_v40 = vld [vmem:[#allocation8 + $0x1274] ss:$40 sps:$4 sm:$0xff]   ;;  %v23924_v47 = vld [vmem:[#allocation8 + $0x1270] ss:$40 sps:$4 sm:$0xff]  }
 0x489   :  { %6692 = vmatprep.subr.bf16.mxu0 %v23869_v50  ;;  %v23927_v50 = vld [vmem:[#allocation5 + $0x14c0] ss:$40 sps:$4 sm:$0xff]  }
 0x48b   :  { %11799 = vmatpush1.bf16.msra.mxu1 %v23864_v54  ;;  %6693 = vmatpush1.bf16.msra.mxu0 %v23867_v51  ;;  %v23932_v54 = vld [vmem:[#allocation8 + $0x12c4] ss:$40 sps:$4 sm:$0xff]  }
 0x48c   :  { %11800 = vmatprep.subr.bf16.mxu1 %v23872_v57  ;;  %6694 = vmatprep.subr.bf16.mxu0 %v23875_v58  ;;  %v23935_v51 = vld [vmem:[#allocation5 + $0x1514] ss:$40 sps:$4 sm:$0xff]   ;;  %v23933_v58 = vld [vmem:[#allocation5 + $0x1510] ss:$40 sps:$4 sm:$0xff]  }
 0x48d   :  { %v23930_v57 = vld [vmem:[#allocation8 + $0x12c0] ss:$40 sps:$4 sm:$0xff]  }
 0x48f   :  { %11801 = vmatpush1.bf16.msra.mxu1 %v23870_v59  ;;  %6695 = vmatpush1.bf16.msra.mxu0 %v23873_v46  ;;  %v23941_v59 = vld [vmem:[#allocation5 + $0x1564] ss:$40 sps:$4 sm:$0xff]   ;;  %v26893_v46 = vsub.s32 6, %v26795_v9 }
 0x490   :  { %11802 = vmatprep.subr.bf16.mxu1 %v23878_v60  ;;  %6696 = vmatprep.subr.bf16.mxu0 %v23881_v61  ;;  %v23936_v60 = vld [vmem:[#allocation8 + $0x1310] ss:$40 sps:$4 sm:$0xff]  }
 0x491   :  { %v23939_v61 = vld [vmem:[#allocation5 + $0x1560] ss:$40 sps:$4 sm:$0xff]   ;;  %v23953_v9 = vld [vmem:[#allocation5 + $0x1604] ss:$40 sps:$4 sm:$0xff]  }
 0x493   :  { %11803 = vmatpush1.bf16.msra.mxu1 %v23876_v0  ;;  %6697 = vmatpush1.bf16.msra.mxu0 %v23879_v1  ;;  %v23947_v0 = vld [vmem:[#allocation5 + $0x15b4] ss:$40 sps:$4 sm:$0xff]   ;;  %v1086_v1 = vrot.slane %v26872_v22, %v26893_v46  ;;  %v23954_v22 = vld [vmem:[#allocation5 + $0x1650] ss:$40 sps:$4 sm:$0xff]  }
 0x494   :  { %11804 = vmatprep.subr.bf16.mxu1 %v23884_v2  ;;  %6698 = vmatprep.subr.bf16.mxu0 %v23887_v3  ;;  %v23942_v2 = vld [vmem:[#allocation8 + $0x1360] ss:$40 sps:$4 sm:$0xff]  }
 0x495   :  { %v23945_v3 = vld [vmem:[#allocation5 + $0x15b0] ss:$40 sps:$4 sm:$0xff]  }
 0x497   :  { %11805 = vmatpush1.bf16.msra.mxu1 %v23882_v4  ;;  %6699 = vmatpush1.bf16.msra.mxu0 %v23885_v63  ;;  %v23950_v4 = vld [vmem:[#allocation8 + $0x13b4] ss:$40 sps:$4 sm:$0xff]   ;;  %v22191_v63 = vadd.f32 %v26855_v55, %v1086_v1 }
 0x498   :  { %11806 = vmatprep.subr.bf16.mxu1 %v23890_v6  ;;  %6700 = vmatprep.subr.bf16.mxu0 %v23893_v7  ;;  %v23948_v6 = vld [vmem:[#allocation8 + $0x13b0] ss:$40 sps:$4 sm:$0xff]  }
 0x499   :  { %v23951_v7 = vld [vmem:[#allocation5 + $0x1600] ss:$40 sps:$4 sm:$0xff]  }
 0x49a   :  { %v23957_v55 = vld [vmem:[#allocation5 + $0x16a0] ss:$40 sps:$4 sm:$0xff]  }
 0x49b   :  { %11807 = vmatpush1.bf16.msra.mxu1 %v23888_v12  ;;  %6701 = vmatpush1.bf16.msra.mxu0 %v23891_v16  ;;  %v23956_v12 = vld [vmem:[#allocation5 + $0x1654] ss:$40 sps:$4 sm:$0xff]   ;;  %v6805_v16 = vmax.f32 %v22191_v63, 0.0  ;;  %v24013_v63 = vld [vmem:[#allocation8 + $0xb0] ss:$40 sps:$4 sm:$0xff]  }
 0x49c   :  { %11808 = vmatprep.subr.bf16.mxu1 %v23896_v44  ;;  %6702 = vmatprep.subr.bf16.mxu0 %v23899_v17  ;;  %v23959_v44 = vld [vmem:[#allocation5 + $0x16a4] ss:$40 sps:$4 sm:$0xff]  }
 0x49d   :  { %v26898_v17 = vpack.c.bf16 %v6805_v16, %v6805_v16  ;;  %v24019_v16 = vld [vmem:[#allocation8 + $0x150] ss:$40 sps:$4 sm:$0xff]  }
 0x49f   :  { %11809 = vmatpush1.bf16.msra.mxu1 %v23894_v26  ;;  %6703 = vmatpush1.bf16.msra.mxu0 %v23897_v23  ;;  %v23962_v26 = vld [vmem:[#allocation5 + $0x16f4] ss:$40 sps:$4 sm:$0xff]   ;;  %v23960_v23 = vld [vmem:[#allocation5 + $0x16f0] ss:$40 sps:$4 sm:$0xff]  }
 0x4a0   :  { %11810 = vmatprep.subr.bf16.mxu1 %v23902_v24  ;;  %6704 = vmatprep.subr.bf16.mxu0 %v23905_v25  ;;  %v23965_v24 = vld [vmem:[#allocation5 + $0x1744] ss:$40 sps:$4 sm:$0xff]   ;;  %v23963_v25 = vld [vmem:[#allocation5 + $0x1740] ss:$40 sps:$4 sm:$0xff]  }
 0x4a3   :  { %11811 = vmatpush1.bf16.msra.mxu1 %v23900_v27  ;;  %6705 = vmatpush1.bf16.msra.mxu0 %v23903_v48  ;;  %v23968_v27 = vld [vmem:[#allocation5 + $0x1794] ss:$40 sps:$4 sm:$0xff]   ;;  %v23966_v48 = vld [vmem:[#allocation5 + $0x1790] ss:$40 sps:$4 sm:$0xff]  }
 0x4a4   :  { %11812 = vmatprep.subr.bf16.mxu1 %v23908_v30  ;;  %6706 = vmatprep.subr.bf16.mxu0 %v23911_v31  ;;  %v23971_v30 = vld [vmem:[#allocation5 + $0x17e4] ss:$40 sps:$4 sm:$0xff]   ;;  %v23969_v31 = vld [vmem:[#allocation5 + $0x17e0] ss:$40 sps:$4 sm:$0xff]  }
 0x4a7   :  { %11813 = vmatpush1.bf16.msra.mxu1 %v23906_v32  ;;  %6707 = vmatpush1.bf16.msra.mxu0 %v23909_v35  ;;  %v23974_v32 = vld [vmem:[#allocation5 + $0x1834] ss:$40 sps:$4 sm:$0xff]   ;;  %v23972_v35 = vld [vmem:[#allocation5 + $0x1830] ss:$40 sps:$4 sm:$0xff]  }
 0x4a8   :  { %11814 = vmatprep.subr.bf16.mxu1 %v23914_v10  ;;  %6717 = vmatprep.subr.bf16.mxu0 %v23917_v36  ;;  %v23977_v10 = vld [vmem:[#allocation5 + $0x1884] ss:$40 sps:$4 sm:$0xff]   ;;  %v23975_v36 = vld [vmem:[#allocation5 + $0x1880] ss:$40 sps:$4 sm:$0xff]  }
 0x4aa   :  { %6709 = vmatmul.mubr.bf16.vlgmr.msra.gmra.mrb[12].mxu0 %v26738_v28  ;;  %v23938_v28 = vld [vmem:[#allocation8 + $0x1314] ss:$40 sps:$4 sm:$0xff]  }
 0x4ab   :  { %11815 = vmatpush1.bf16.msra.mxu1 %v23912_v37  ;;  %6718 = vmatpush1.bf16.msra.mxu0 %v23915_v11  ;;  %v23980_v37 = vld [vmem:[#allocation5 + $0x18d4] ss:$40 sps:$4 sm:$0xff]   ;;  %v23978_v11 = vld [vmem:[#allocation5 + $0x18d0] ss:$40 sps:$4 sm:$0xff]  }
 0x4ac   :  { %11816 = vmatprep.subr.bf16.mxu1 %v23920_v53  ;;  %6719 = vmatprep.subr.bf16.mxu0 %v23923_v39  ;;  %v23983_v53 = vld [vmem:[#allocation5 + $0x1924] ss:$40 sps:$4 sm:$0xff]   ;;  %v23981_v39 = vld [vmem:[#allocation5 + $0x1920] ss:$40 sps:$4 sm:$0xff]  }
 0x4ad   :  { %6749 = vmatprep.mubr.bf16.mxu0 %v26740_v34  ;;  %v23944_v34 = vld [vmem:[#allocation8 + $0x1364] ss:$40 sps:$4 sm:$0xff]  }
 0x4af   :  { %11817 = vmatpush1.bf16.msra.mxu1 %v23918_v15  ;;  %6720 = vmatpush1.bf16.msra.mxu0 %v23921_v38  ;;  %v23986_v15 = vld [vmem:[#allocation5 + $0x1974] ss:$40 sps:$4 sm:$0xff]   ;;  %v23984_v38 = vld [vmem:[#allocation5 + $0x1970] ss:$40 sps:$4 sm:$0xff]  }
 0x4b0   :  { %11818 = vmatprep.subr.bf16.mxu1 %v23926_v40  ;;  %6721 = vmatprep.subr.bf16.mxu0 %v23929_v41  ;;  %v23989_v40 = vld [vmem:[#allocation5 + $0x19c4] ss:$40 sps:$4 sm:$0xff]   ;;  %v23987_v41 = vld [vmem:[#allocation5 + $0x19c0] ss:$40 sps:$4 sm:$0xff]  }
 0x4b3   :  { %11819 = vmatpush1.bf16.msra.mxu1 %v23924_v47  ;;  %6722 = vmatpush1.bf16.msra.mxu0 %v23927_v50  ;;  %v23992_v47 = vld [vmem:[#allocation5 + $0x1a14] ss:$40 sps:$4 sm:$0xff]   ;;  %v23990_v50 = vld [vmem:[#allocation5 + $0x1a10] ss:$40 sps:$4 sm:$0xff]  }
 0x4b4   :  { %11820 = vmatprep.subr.bf16.mxu1 %v23932_v54  ;;  %6723 = vmatprep.subr.bf16.mxu0 %v23935_v51  ;;  %v23995_v54 = vld [vmem:[#allocation5 + $0x1a64] ss:$40 sps:$4 sm:$0xff]   ;;  %v23993_v51 = vld [vmem:[#allocation5 + $0x1a60] ss:$40 sps:$4 sm:$0xff]  }
 0x4b7   :  { %11821 = vmatpush1.bf16.msra.mxu1 %v23930_v57  ;;  %6724 = vmatpush1.bf16.msra.mxu0 %v23933_v58  ;;  %v23998_v57 = vld [vmem:[#allocation5 + $0x1ab4] ss:$40 sps:$4 sm:$0xff]   ;;  %v24001_v58 = vld [vmem:[#allocation5 + $0x1b04] ss:$40 sps:$4 sm:$0xff]  }
 0x4b8   :  { %11822 = vmatprep.subr.bf16.mxu1 %v23938_v28  ;;  %6725 = vmatprep.subr.bf16.mxu0 %v23941_v59  ;;  %v23999_v28 = vld [vmem:[#allocation5 + $0x1b00] ss:$40 sps:$4 sm:$0xff]  }
 0x4b9   :  { %v1054_v59 = vld [vmem:[#allocation5 + $0x1ba0] sm:$0x33] }
 0x4bb   :  { %11823 = vmatpush1.bf16.msra.mxu1 %v23936_v60  ;;  %6726 = vmatpush1.bf16.msra.mxu0 %v23939_v61  ;;  %v24002_v60 = vld [vmem:[#allocation5 + $0x1b50] ss:$40 sps:$4 sm:$0xff]   ;;  %v20380_v61 = vcombine.high %v1054_v59, %v1054_v59 }
 0x4bc   :  { %11824 = vmatprep.subr.bf16.mxu1 %v23944_v34  ;;  %6727 = vmatprep.subr.bf16.mxu0 %v23947_v0  ;;  %v20379_v34 = vcombine.low %v1054_v59, %v1054_v59  ;;  %v24009_v0 = vld [vmem:[#allocation8 + $0x14] ss:$40 sps:$4 sm:$0xff]   ;;  %v24049_v59 = vld [vmem:[#allocation8 + $0x470] ss:$40 sps:$4 sm:$0xff]  }
 0x4be   :  { %v5564_v1 = vsel %vm5538_vm1, %v20379_v34, 0  ;;  %v24054_v34 = vld [vmem:[#allocation8 + $0x4c4] ss:$40 sps:$4 sm:$0xff]  }
 0x4bf   :  { %11825 = vmatpush1.bf16.msra.mxu1 %v23942_v2  ;;  %6728 = vmatpush1.bf16.msra.mxu0 %v23945_v3  ;;  %v24007_v2 = vld [vmem:[#allocation8 + $0x10] ss:$40 sps:$4 sm:$0xff]   ;;  %v24012_v3 = vld [vmem:[#allocation8 + $0x64] ss:$40 sps:$4 sm:$0xff]  }
 0x4c0   :  { %11826 = vmatprep.subr.bf16.mxu1 %v23950_v4  ;;  %6729 = vmatprep.subr.bf16.mxu0 %v23953_v9  ;;  %v24010_v4 = vld [vmem:[#allocation8 + $0x60] ss:$40 sps:$4 sm:$0xff]   ;;  %v24015_v9 = vld [vmem:[#allocation8 + $0xb4] ss:$40 sps:$4 sm:$0xff]  }
 0x4c3   :  { %11827 = vmatpush1.bf16.msra.mxu1 %v23948_v6  ;;  %6730 = vmatpush1.bf16.msra.mxu0 %v23951_v7  ;;  %v24018_v6 = vld [vmem:[#allocation8 + $0x104] ss:$40 sps:$4 sm:$0xff]   ;;  %v24016_v7 = vld [vmem:[#allocation8 + $0x100] ss:$40 sps:$4 sm:$0xff]  }
 0x4c4   :  { %6731 = vmatprep.subr.bf16.mxu0 %v23956_v12  ;;  %v24021_v12 = vld [vmem:[#allocation8 + $0x154] ss:$40 sps:$4 sm:$0xff]  }
 0x4c6   :  { %11829 = vmatmul.mubr.bf16.vlgmr.msra.gmra.mrb[8].mxu1 %v26898_v17 }
 0x4c7   :  { %6732 = vmatpush1.bf16.msra.mxu0 %v23954_v22  ;;  %v24024_v22 = vld [vmem:[#allocation8 + $0x1a4] ss:$40 sps:$4 sm:$0xff]  }
 0x4c8   :  { %6733 = vmatprep.subr.bf16.mxu0 %v23959_v44  ;;  %v24027_v44 = vld [vmem:[#allocation8 + $0x1f4] ss:$40 sps:$4 sm:$0xff]  }
 0x4cb   :  { %6734 = vmatpush1.bf16.msra.mxu0 %v23957_v55  ;;  %v24025_v55 = vld [vmem:[#allocation8 + $0x1f0] ss:$40 sps:$4 sm:$0xff]  }
 0x4cc   :  { %6735 = vmatprep.subr.bf16.mxu0 %v23962_v26  ;;  %v24030_v26 = vld [vmem:[#allocation8 + $0x244] ss:$40 sps:$4 sm:$0xff]  }
 0x4cf   :  { %6736 = vmatpush1.bf16.msra.mxu0 %v23960_v23  ;;  %v24028_v23 = vld [vmem:[#allocation8 + $0x240] ss:$40 sps:$4 sm:$0xff]  }
 0x4d0   :  { %6737 = vmatprep.subr.bf16.mxu0 %v23965_v24  ;;  %v24124_v24 = vld [vmem:[#allocation8 + $0x1400] ss:$40 sps:$4 sm:$0xff]  }
 0x4d3   :  { %6738 = vmatpush1.bf16.msra.mxu0 %v23963_v25  ;;  %v24126_v25 = vld [vmem:[#allocation8 + $0x1404] ss:$40 sps:$4 sm:$0xff]  }
 0x4d4   :  { %6739 = vmatprep.subr.bf16.mxu0 %v23968_v27  ;;  %v24033_v27 = vld [vmem:[#allocation8 + $0x294] ss:$40 sps:$4 sm:$0xff]   ;;  %11837 = vmatprep.subr.bf16.mxu1 %v24126_v25  ;;  %v24198_v25 = vld [vmem:[#allocation8 + $0x17c4] ss:$40 sps:$4 sm:$0xff]  }
 0x4d5   :  { %11838 = vmatpush1.bf16.msra.mxu1 %v24124_v24  ;;  %v24196_v24 = vld [vmem:[#allocation8 + $0x17c0] ss:$40 sps:$4 sm:$0xff]  }
 0x4d7   :  { %6740 = vmatpush1.bf16.msra.mxu0 %v23966_v48  ;;  %v24031_v48 = vld [vmem:[#allocation8 + $0x290] ss:$40 sps:$4 sm:$0xff]  }
 0x4d8   :  { %6741 = vmatprep.subr.bf16.mxu0 %v23971_v30  ;;  %v24130_v30 = vld [vmem:[#allocation8 + $0x1450] ss:$40 sps:$4 sm:$0xff]  }
 0x4db   :  { %6742 = vmatpush1.bf16.msra.mxu0 %v23969_v31  ;;  %v24132_v31 = vld [vmem:[#allocation8 + $0x1454] ss:$40 sps:$4 sm:$0xff]  }
 0x4dc   :  { %6743 = vmatprep.subr.bf16.mxu0 %v23974_v32  ;;  %v24036_v32 = vld [vmem:[#allocation8 + $0x2e4] ss:$40 sps:$4 sm:$0xff]   ;;  %11839 = vmatprep.subr.bf16.mxu1 %v24132_v31  ;;  %v24204_v31 = vld [vmem:[#allocation8 + $0x1814] ss:$40 sps:$4 sm:$0xff]  }
 0x4dd   :  { %11840 = vmatpush1.bf16.msra.mxu1 %v24130_v30  ;;  %v24202_v30 = vld [vmem:[#allocation8 + $0x1810] ss:$40 sps:$4 sm:$0xff]  }
 0x4df   :  { %6744 = vmatpush1.bf16.msra.mxu0 %v23972_v35  ;;  %v24034_v35 = vld [vmem:[#allocation8 + $0x2e0] ss:$40 sps:$4 sm:$0xff]  }
 0x4e0   :  { %6745 = vmatprep.subr.bf16.mxu0 %v23977_v10  ;;  %v24136_v10 = vld [vmem:[#allocation8 + $0x14a0] ss:$40 sps:$4 sm:$0xff]  }
 0x4e3   :  { %6746 = vmatpush1.bf16.msra.mxu0 %v23975_v36  ;;  %v24138_v36 = vld [vmem:[#allocation8 + $0x14a4] ss:$40 sps:$4 sm:$0xff]  }
 0x4e4   :  { %6747 = vmatprep.subr.bf16.mxu0 %v23980_v37  ;;  %v24039_v37 = vld [vmem:[#allocation8 + $0x334] ss:$40 sps:$4 sm:$0xff]   ;;  %11841 = vmatprep.subr.bf16.mxu1 %v24138_v36  ;;  %v24210_v36 = vld [vmem:[#allocation8 + $0x1864] ss:$40 sps:$4 sm:$0xff]  }
 0x4e5   :  { %11842 = vmatpush1.bf16.msra.mxu1 %v24136_v10  ;;  %v24075_v10 = vld [vmem:[#allocation8 + $0x6f4] ss:$40 sps:$4 sm:$0xff]  }
 0x4e7   :  { %6748 = vmatpush1.bf16.msra.mxu0 %v23978_v11  ;;  %v24037_v11 = vld [vmem:[#allocation8 + $0x330] ss:$40 sps:$4 sm:$0xff]  }
 0x4e8   :  { %6758 = vmatprep.subr.bf16.mxu0 %v23983_v53  ;;  %v24142_v53 = vld [vmem:[#allocation8 + $0x14f0] ss:$40 sps:$4 sm:$0xff]  }
 0x4ea   :  { %6750 = vmatmul.mubr.bf16.vlgmr.msra.gmra.mrb[12].mxu0 %v26746_v42  ;;  %v23996_v42 = vld [vmem:[#allocation5 + $0x1ab0] ss:$40 sps:$4 sm:$0xff]  }
 0x4eb   :  { %6759 = vmatpush1.bf16.msra.mxu0 %v23981_v39  ;;  %20390 = vmatprep.mubr.msk.bf16.mxu0 %vm5534_vm0, %v26748_v49  ;;  %v24004_v49 = vld [vmem:[#allocation5 + $0x1b54] ss:$40 sps:$4 sm:$0xff]   ;;  %v24144_v39 = vld [vmem:[#allocation8 + $0x14f4] ss:$40 sps:$4 sm:$0xff]  }
 0x4ec   :  { %6760 = vmatprep.subr.bf16.mxu0 %v23986_v15  ;;  %v24042_v15 = vld [vmem:[#allocation8 + $0x384] ss:$40 sps:$4 sm:$0xff]   ;;  %11843 = vmatprep.subr.bf16.mxu1 %v24144_v39  ;;  %v24216_v39 = vld [vmem:[#allocation8 + $0x18b4] ss:$40 sps:$4 sm:$0xff]  }
 0x4ed   :  { %11844 = vmatpush1.bf16.msra.mxu1 %v24142_v53  ;;  %v24078_v53 = vld [vmem:[#allocation8 + $0x744] ss:$40 sps:$4 sm:$0xff]  }
 0x4ef   :  { %6761 = vmatpush1.bf16.msra.mxu0 %v23984_v38  ;;  %v24040_v38 = vld [vmem:[#allocation8 + $0x380] ss:$40 sps:$4 sm:$0xff]  }
 0x4f0   :  { %6762 = vmatprep.subr.bf16.mxu0 %v23989_v40  ;;  %v24148_v40 = vld [vmem:[#allocation8 + $0x1540] ss:$40 sps:$4 sm:$0xff]  }
 0x4f3   :  { %6763 = vmatpush1.bf16.msra.mxu0 %v23987_v41  ;;  %v24150_v41 = vld [vmem:[#allocation8 + $0x1544] ss:$40 sps:$4 sm:$0xff]  }
 0x4f4   :  { %6764 = vmatprep.subr.bf16.mxu0 %v23992_v47  ;;  %v24045_v47 = vld [vmem:[#allocation8 + $0x3d4] ss:$40 sps:$4 sm:$0xff]   ;;  %11845 = vmatprep.subr.bf16.mxu1 %v24150_v41 }
 0x4f5   :  { %11846 = vmatpush1.bf16.msra.mxu1 %v24148_v40  ;;  %v24081_v40 = vld [vmem:[#allocation8 + $0x794] ss:$40 sps:$4 sm:$0xff]  }
 0x4f6   :  { %v24222_v41 = vld [vmem:[#allocation8 + $0xc] ss:$40 sps:$4 sm:$0xff]  }
 0x4f7   :  { %6765 = vmatpush1.bf16.msra.mxu0 %v23990_v50  ;;  %v24043_v50 = vld [vmem:[#allocation8 + $0x3d0] ss:$40 sps:$4 sm:$0xff]  }
 0x4f8   :  { %6766 = vmatprep.subr.bf16.mxu0 %v23995_v54  ;;  %v24154_v54 = vld [vmem:[#allocation8 + $0x1590] ss:$40 sps:$4 sm:$0xff]  }
 0x4fb   :  { %6767 = vmatpush1.bf16.msra.mxu0 %v23993_v51  ;;  %v24156_v51 = vld [vmem:[#allocation8 + $0x1594] ss:$40 sps:$4 sm:$0xff]  }
 0x4fc   :  { %6768 = vmatprep.subr.bf16.mxu0 %v23998_v57  ;;  %v24048_v57 = vld [vmem:[#allocation8 + $0x424] ss:$40 sps:$4 sm:$0xff]   ;;  %11847 = vmatprep.subr.bf16.mxu1 %v24156_v51  ;;  %v24087_v51 = vld [vmem:[#allocation8 + $0x834] ss:$40 sps:$4 sm:$0xff]  }
 0x4fd   :  { %11848 = vmatpush1.bf16.msra.mxu1 %v24154_v54  ;;  %v24082_v54 = vld [vmem:[#allocation8 + $0x7e0] ss:$40 sps:$4 sm:$0xff]  }
 0x4ff   :  { %6769 = vmatpush1.bf16.msra.mxu0 %v23996_v42  ;;  %v24046_v42 = vld [vmem:[#allocation8 + $0x420] ss:$40 sps:$4 sm:$0xff]  }
 0x500   :  { %6770 = vmatprep.subr.bf16.mxu0 %v24001_v58  ;;  %v24160_v58 = vld [vmem:[#allocation8 + $0x15e0] ss:$40 sps:$4 sm:$0xff]  }
 0x503   :  { %6771 = vmatpush1.bf16.msra.mxu0 %v23999_v28  ;;  %v24162_v28 = vld [vmem:[#allocation8 + $0x15e4] ss:$40 sps:$4 sm:$0xff]  }
 0x504   :  { %6772 = vmatprep.subr.bf16.mxu0 %v24004_v49  ;;  %v24051_v49 = vld [vmem:[#allocation8 + $0x474] ss:$40 sps:$4 sm:$0xff]   ;;  %11849 = vmatprep.subr.bf16.mxu1 %v24162_v28 }
 0x505   :  { %11850 = vmatpush1.bf16.msra.mxu1 %v24160_v58  ;;  %v24088_v58 = vld [vmem:[#allocation8 + $0x880] ss:$40 sps:$4 sm:$0xff]   ;;  %v24093_v28 = vld [vmem:[#allocation8 + $0x8d4] ss:$40 sps:$4 sm:$0xff]  }
 0x507   :  { %6773 = vmatpush1.bf16.msra.mxu0 %v24002_v60  ;;  %v24166_v60 = vld [vmem:[#allocation8 + $0x1630] ss:$40 sps:$4 sm:$0xff]  }
 0x508   :  { %20389 = vmatprep.subr.msk.bf16.mxu0 %vm5538_vm1, %v20380_v61  ;;  %v24168_v61 = vld [vmem:[#allocation8 + $0x1634] ss:$40 sps:$4 sm:$0xff]  }
 0x509   :  { %11851 = vmatprep.subr.bf16.mxu1 %v24168_v61  ;;  %v24099_v61 = vld [vmem:[#allocation8 + $0x974] ss:$40 sps:$4 sm:$0xff]  }
 0x50a   :  { %11852 = vmatpush1.bf16.msra.mxu1 %v24166_v60  ;;  %v24094_v60 = vld [vmem:[#allocation8 + $0x920] ss:$40 sps:$4 sm:$0xff]  }
 0x50b   :  { %6775 = vmatpush1.bf16.msra.mxu0 %v5564_v1  ;;  %v24172_v1 = vld [vmem:[#allocation8 + $0x1680] ss:$40 sps:$4 sm:$0xff]  }
 0x50c   :  { %12083 = vmatprep.subr.bf16.mxu0 %v24009_v0  ;;  %v24052_v0 = vld [vmem:[#allocation8 + $0x4c0] ss:$40 sps:$4 sm:$0xff]  }
 0x50e   :  { %6791 = vmatmul.mubr.bf16.vlgmr.msra.gmra.mrb[12].mxu0 %v26757_v29  ;;  %v24022_v29 = vld [vmem:[#allocation8 + $0x1a0] ss:$40 sps:$4 sm:$0xff]  }
 0x50f   :  { %12084 = vmatpush1.bf16.msra.mxu0 %v24007_v2  ;;  %12115 = vmatprep.mubr.bf16.mxu0 %v26823_v5  ;;  %v24174_v2 = vld [vmem:[#allocation8 + $0x1684] ss:$40 sps:$4 sm:$0xff]  }
 0x510   :  { %12085 = vmatprep.subr.bf16.mxu0 %v24012_v3  ;;  %v24057_v3 = vld [vmem:[#allocation8 + $0x514] ss:$40 sps:$4 sm:$0xff]   ;;  %11853 = vmatprep.subr.bf16.mxu1 %v24174_v2 }
 0x511   :  { %11854 = vmatpush1.bf16.msra.mxu1 %v24172_v1  ;;  %v24100_v1 = vld [vmem:[#allocation8 + $0x9c0] ss:$40 sps:$4 sm:$0xff]   ;;  %v24105_v2 = vld [vmem:[#allocation8 + $0xa14] ss:$40 sps:$4 sm:$0xff]  }
 0x513   :  { %12086 = vmatpush1.bf16.msra.mxu0 %v24010_v4  ;;  %v24055_v4 = vld [vmem:[#allocation8 + $0x510] ss:$40 sps:$4 sm:$0xff]  }
 0x514   :  { %12087 = vmatprep.subr.bf16.mxu0 %v24015_v9  ;;  %v24060_v9 = vld [vmem:[#allocation8 + $0x564] ss:$40 sps:$4 sm:$0xff]  }
 0x517   :  { %12088 = vmatpush1.bf16.msra.mxu0 %v24013_v63  ;;  %v24178_v63 = vld [vmem:[#allocation8 + $0x16d0] ss:$40 sps:$4 sm:$0xff]  }
 0x518   :  { %12089 = vmatprep.subr.bf16.mxu0 %v24018_v6  ;;  %v24180_v6 = vld [vmem:[#allocation8 + $0x16d4] ss:$40 sps:$4 sm:$0xff]  }
 0x519   :  { %11855 = vmatprep.subr.bf16.mxu1 %v24180_v6  ;;  %v24109_v6 = vld [vmem:[#allocation8 + $0xab0] ss:$40 sps:$4 sm:$0xff]  }
 0x51a   :  { %11856 = vmatpush1.bf16.msra.mxu1 %v24178_v63  ;;  %v24111_v63 = vld [vmem:[#allocation8 + $0xab4] ss:$40 sps:$4 sm:$0xff]  }
 0x51b   :  { %12090 = vmatpush1.bf16.msra.mxu0 %v24016_v7  ;;  %v24058_v7 = vld [vmem:[#allocation8 + $0x560] ss:$40 sps:$4 sm:$0xff]  }
 0x51c   :  { %12091 = vmatprep.subr.bf16.mxu0 %v24021_v12  ;;  %v24184_v12 = vld [vmem:[#allocation8 + $0x1720] ss:$40 sps:$4 sm:$0xff]  }
 0x51f   :  { %12092 = vmatpush1.bf16.msra.mxu0 %v24019_v16  ;;  %v24186_v16 = vld [vmem:[#allocation8 + $0x1724] ss:$40 sps:$4 sm:$0xff]  }
 0x520   :  { %12093 = vmatprep.subr.bf16.mxu0 %v24024_v22  ;;  %v24063_v22 = vld [vmem:[#allocation8 + $0x5b4] ss:$40 sps:$4 sm:$0xff]   ;;  %11857 = vmatprep.subr.bf16.mxu1 %v24186_v16 }
 0x521   :  { %11858 = vmatpush1.bf16.msra.mxu1 %v24184_v12  ;;  %v24112_v12 = vld [vmem:[#allocation8 + $0xb00] ss:$40 sps:$4 sm:$0xff]   ;;  %v24117_v16 = vld [vmem:[#allocation8 + $0xb54] ss:$40 sps:$4 sm:$0xff]  }
 0x523   :  { %12094 = vmatpush1.bf16.msra.mxu0 %v24022_v29  ;;  %v24061_v29 = vld [vmem:[#allocation8 + $0x5b0] ss:$40 sps:$4 sm:$0xff]  }
 0x524   :  { %12095 = vmatprep.subr.bf16.mxu0 %v24027_v44  ;;  %v24190_v44 = vld [vmem:[#allocation8 + $0x1770] ss:$40 sps:$4 sm:$0xff]  }
 0x527   :  { %12096 = vmatpush1.bf16.msra.mxu0 %v24025_v55  ;;  %v24192_v55 = vld [vmem:[#allocation8 + $0x1774] ss:$40 sps:$4 sm:$0xff]  }
 0x528   :  { %12097 = vmatprep.subr.bf16.mxu0 %v24030_v26  ;;  %v24066_v26 = vld [vmem:[#allocation8 + $0x604] ss:$40 sps:$4 sm:$0xff]   ;;  %11859 = vmatprep.subr.bf16.mxu1 %v24192_v55  ;;  %v24123_v55 = vld [vmem:[#allocation8 + $0xbf4] ss:$40 sps:$4 sm:$0xff]  }
 0x529   :  { %11860 = vmatpush1.bf16.msra.mxu1 %v24190_v44  ;;  %v24118_v44 = vld [vmem:[#allocation8 + $0xba0] ss:$40 sps:$4 sm:$0xff]  }
 0x52a   :  { %11861 = vmatprep.subr.bf16.mxu1 %v24198_v25  ;;  %v24135_v25 = vld [vmem:[#allocation8 + $0xc94] ss:$40 sps:$4 sm:$0xff]  }
 0x52b   :  { %12098 = vmatpush1.bf16.msra.mxu0 %v24028_v23  ;;  %v24064_v23 = vld [vmem:[#allocation8 + $0x600] ss:$40 sps:$4 sm:$0xff]  }
 0x52c   :  { %12099 = vmatprep.subr.bf16.mxu0 %v24033_v27  ;;  %v24069_v27 = vld [vmem:[#allocation8 + $0x654] ss:$40 sps:$4 sm:$0xff]  }
 0x52d   :  { %11862 = vmatpush1.bf16.msra.mxu1 %v24196_v24  ;;  %v24127_v24 = vld [vmem:[#allocation8 + $0xc40] ss:$40 sps:$4 sm:$0xff]  }
 0x52e   :  { %11863 = vmatprep.subr.bf16.mxu1 %v24204_v31  ;;  %v24147_v31 = vld [vmem:[#allocation8 + $0xd34] ss:$40 sps:$4 sm:$0xff]  }
 0x52f   :  { %12100 = vmatpush1.bf16.msra.mxu0 %v24031_v48  ;;  %v24067_v48 = vld [vmem:[#allocation8 + $0x650] ss:$40 sps:$4 sm:$0xff]  }
 0x530   :  { %12101 = vmatprep.subr.bf16.mxu0 %v24036_v32  ;;  %v24072_v32 = vld [vmem:[#allocation8 + $0x6a4] ss:$40 sps:$4 sm:$0xff]  }
 0x531   :  { %11864 = vmatpush1.bf16.msra.mxu1 %v24202_v30  ;;  %v24139_v30 = vld [vmem:[#allocation8 + $0xce0] ss:$40 sps:$4 sm:$0xff]  }
 0x532   :  { %11865 = vmatprep.subr.bf16.mxu1 %v24210_v36  ;;  %v24159_v36 = vld [vmem:[#allocation8 + $0xdd4] ss:$40 sps:$4 sm:$0xff]  }
 0x533   :  { %12102 = vmatpush1.bf16.msra.mxu0 %v24034_v35  ;;  %v24070_v35 = vld [vmem:[#allocation8 + $0x6a0] ss:$40 sps:$4 sm:$0xff]  }
 0x534   :  { %12103 = vmatprep.subr.bf16.mxu0 %v24039_v37  ;;  %v24073_v37 = vld [vmem:[#allocation8 + $0x6f0] ss:$40 sps:$4 sm:$0xff]  }
 0x537   :  { %12104 = vmatpush1.bf16.msra.mxu0 %v24037_v11  ;;  %v24208_v11 = vld [vmem:[#allocation8 + $0x1860] ss:$40 sps:$4 sm:$0xff]  }
 0x538   :  { %12105 = vmatprep.subr.bf16.mxu0 %v24042_v15  ;;  %11866 = vmatpush1.bf16.msra.mxu1 %v24208_v11  ;;  %v24076_v15 = vld [vmem:[#allocation8 + $0x740] ss:$40 sps:$4 sm:$0xff]   ;;  %v24165_v11 = vld [vmem:[#allocation8 + $0xe24] ss:$40 sps:$4 sm:$0xff]  }
 0x539   :  { %11867 = vmatprep.subr.bf16.mxu1 %v24216_v39  ;;  %v24171_v39 = vld [vmem:[#allocation8 + $0xe74] ss:$40 sps:$4 sm:$0xff]  }
 0x53b   :  { %12106 = vmatpush1.bf16.msra.mxu0 %v24040_v38  ;;  %v24214_v38 = vld [vmem:[#allocation8 + $0x18b0] ss:$40 sps:$4 sm:$0xff]  }
 0x53c   :  { %12107 = vmatprep.subr.bf16.mxu0 %v24045_v47  ;;  %11868 = vmatpush1.bf16.msra.mxu1 %v24214_v38  ;;  %v24079_v47 = vld [vmem:[#allocation8 + $0x790] ss:$40 sps:$4 sm:$0xff]   ;;  %v24177_v38 = vld [vmem:[#allocation8 + $0xec4] ss:$40 sps:$4 sm:$0xff]  }
 0x53d   :  { %11878 = vmatprep.subr.bf16.mxu1 %v24222_v41  ;;  %v24183_v41 = vld [vmem:[#allocation8 + $0xf14] ss:$40 sps:$4 sm:$0xff]  }
 0x53f   :  { %12108 = vmatpush1.bf16.msra.mxu0 %v24043_v50  ;;  %v24084_v50 = vld [vmem:[#allocation8 + $0x7e4] ss:$40 sps:$4 sm:$0xff]  }
 0x540   :  { %12109 = vmatprep.subr.bf16.mxu0 %v24048_v57  ;;  %v24085_v57 = vld [vmem:[#allocation8 + $0x830] ss:$40 sps:$4 sm:$0xff]  }
 0x543   :  { %12110 = vmatpush1.bf16.msra.mxu0 %v24046_v42  ;;  %v24090_v42 = vld [vmem:[#allocation8 + $0x884] ss:$40 sps:$4 sm:$0xff]  }
 0x544   :  { %12111 = vmatprep.subr.bf16.mxu0 %v24051_v49  ;;  %v24091_v49 = vld [vmem:[#allocation8 + $0x8d0] ss:$40 sps:$4 sm:$0xff]  }
 0x547   :  { %12112 = vmatpush1.bf16.msra.mxu0 %v24049_v59  ;;  %v24096_v59 = vld [vmem:[#allocation8 + $0x924] ss:$40 sps:$4 sm:$0xff]  }
 0x548   :  { %12113 = vmatprep.subr.bf16.mxu0 %v24054_v34  ;;  %v24097_v34 = vld [vmem:[#allocation8 + $0x970] ss:$40 sps:$4 sm:$0xff]  }
 0x54b   :  { %12114 = vmatpush1.bf16.msra.mxu0 %v24052_v0  ;;  %v24102_v0 = vld [vmem:[#allocation8 + $0x9c4] ss:$40 sps:$4 sm:$0xff]  }
 0x54c   :  { %12124 = vmatprep.subr.bf16.mxu0 %v24057_v3  ;;  %v24103_v3 = vld [vmem:[#allocation8 + $0xa10] ss:$40 sps:$4 sm:$0xff]  }
 0x54e   :  { %12116 = vmatmul.mubr.bf16.vlgmr.msra.gmra.mrb[16].mxu0 %v26836_v62 }
 0x54f   :  { %12125 = vmatpush1.bf16.msra.mxu0 %v24055_v4  ;;  %12156 = vmatprep.mubr.bf16.mxu0 %v26838_v52  ;;  %v24108_v4 = vld [vmem:[#allocation8 + $0xa64] ss:$40 sps:$4 sm:$0xff]  }
 0x550   :  { %12126 = vmatprep.subr.bf16.mxu0 %v24060_v9  ;;  %v24106_v9 = vld [vmem:[#allocation8 + $0xa60] ss:$40 sps:$4 sm:$0xff]  }
 0x553   :  { %12127 = vmatpush1.bf16.msra.mxu0 %v24058_v7  ;;  %v24114_v7 = vld [vmem:[#allocation8 + $0xb04] ss:$40 sps:$4 sm:$0xff]  }
 0x554   :  { %12128 = vmatprep.subr.bf16.mxu0 %v24063_v22  ;;  %v24115_v22 = vld [vmem:[#allocation8 + $0xb50] ss:$40 sps:$4 sm:$0xff]  }
 0x557   :  { %12129 = vmatpush1.bf16.msra.mxu0 %v24061_v29  ;;  %v24120_v29 = vld [vmem:[#allocation8 + $0xba4] ss:$40 sps:$4 sm:$0xff]  }
 0x558   :  { %12130 = vmatprep.subr.bf16.mxu0 %v24066_v26  ;;  %v24121_v26 = vld [vmem:[#allocation8 + $0xbf0] ss:$40 sps:$4 sm:$0xff]  }
 0x55b   :  { %12131 = vmatpush1.bf16.msra.mxu0 %v24064_v23  ;;  %v24129_v23 = vld [vmem:[#allocation8 + $0xc44] ss:$40 sps:$4 sm:$0xff]  }
 0x55c   :  { %12132 = vmatprep.subr.bf16.mxu0 %v24069_v27  ;;  %v24133_v27 = vld [vmem:[#allocation8 + $0xc90] ss:$40 sps:$4 sm:$0xff]  }
 0x55f   :  { %12133 = vmatpush1.bf16.msra.mxu0 %v24067_v48  ;;  %v24141_v48 = vld [vmem:[#allocation8 + $0xce4] ss:$40 sps:$4 sm:$0xff]  }
 0x560   :  { %12134 = vmatprep.subr.bf16.mxu0 %v24072_v32  ;;  %v24145_v32 = vld [vmem:[#allocation8 + $0xd30] ss:$40 sps:$4 sm:$0xff]  }
 0x563   :  { %12135 = vmatpush1.bf16.msra.mxu0 %v24070_v35  ;;  %v24153_v35 = vld [vmem:[#allocation8 + $0xd84] ss:$40 sps:$4 sm:$0xff]  }
 0x564   :  { %12136 = vmatprep.subr.bf16.mxu0 %v24075_v10  ;;  %v24151_v10 = vld [vmem:[#allocation8 + $0xd80] ss:$40 sps:$4 sm:$0xff]  }
 0x567   :  { %12137 = vmatpush1.bf16.msra.mxu0 %v24073_v37  ;;  %v24157_v37 = vld [vmem:[#allocation8 + $0xdd0] ss:$40 sps:$4 sm:$0xff]  }
 0x568   :  { %12138 = vmatprep.subr.bf16.mxu0 %v24078_v53  ;;  %v24163_v53 = vld [vmem:[#allocation8 + $0xe20] ss:$40 sps:$4 sm:$0xff]  }
 0x56b   :  { %12139 = vmatpush1.bf16.msra.mxu0 %v24076_v15  ;;  %v24169_v15 = vld [vmem:[#allocation8 + $0xe70] ss:$40 sps:$4 sm:$0xff]  }
 0x56c   :  { %12140 = vmatprep.subr.bf16.mxu0 %v24081_v40  ;;  %v24175_v40 = vld [vmem:[#allocation8 + $0xec0] ss:$40 sps:$4 sm:$0xff]  }
 0x56f   :  { %12141 = vmatpush1.bf16.msra.mxu0 %v24079_v47  ;;  %v24181_v47 = vld [vmem:[#allocation8 + $0xf10] ss:$40 sps:$4 sm:$0xff]  }
 0x570   :  { %12142 = vmatprep.subr.bf16.mxu0 %v24084_v50  ;;  %v24189_v50 = vld [vmem:[#allocation8 + $0xf64] ss:$40 sps:$4 sm:$0xff]  }
 0x573   :  { %12143 = vmatpush1.bf16.msra.mxu0 %v24082_v54  ;;  %v24187_v54 = vld [vmem:[#allocation8 + $0xf60] ss:$40 sps:$4 sm:$0xff]  }
 0x574   :  { %12144 = vmatprep.subr.bf16.mxu0 %v24087_v51  ;;  %v24195_v51 = vld [vmem:[#allocation8 + $0xfb4] ss:$40 sps:$4 sm:$0xff]  }
 0x577   :  { %12145 = vmatpush1.bf16.msra.mxu0 %v24085_v57  ;;  %v24193_v57 = vld [vmem:[#allocation8 + $0xfb0] ss:$40 sps:$4 sm:$0xff]  }
 0x578   :  { %12146 = vmatprep.subr.bf16.mxu0 %v24090_v42  ;;  %v24201_v42 = vld [vmem:[#allocation8 + $0x1004] ss:$40 sps:$4 sm:$0xff]  }
 0x57b   :  { %12147 = vmatpush1.bf16.msra.mxu0 %v24088_v58  ;;  %v24199_v58 = vld [vmem:[#allocation8 + $0x1000] ss:$40 sps:$4 sm:$0xff]  }
 0x57c   :  { %12148 = vmatprep.subr.bf16.mxu0 %v24093_v28  ;;  %v24207_v28 = vld [vmem:[#allocation8 + $0x1054] ss:$40 sps:$4 sm:$0xff]  }
 0x57f   :  { %12149 = vmatpush1.bf16.msra.mxu0 %v24091_v49  ;;  %v24205_v49 = vld [vmem:[#allocation8 + $0x1050] ss:$40 sps:$4 sm:$0xff]  }
 0x580   :  { %12150 = vmatprep.subr.bf16.mxu0 %v24096_v59  ;;  %v1056_v59 = vld [vmem:[#allocation7 + $0x8] sm:$0x3] }
 0x583   :  { %12151 = vmatpush1.bf16.msra.mxu0 %v24094_v60  ;;  %v24213_v60 = vld [vmem:[#allocation8 + $0x10a4] ss:$40 sps:$4 sm:$0xff]  }
 0x584   :  { %12152 = vmatprep.subr.bf16.mxu0 %v24099_v61  ;;  %v1094_v61 = vrot.slane %v1056_v59, %v26830_v13 }
 0x587   :  { %12153 = vmatpush1.bf16.msra.mxu0 %v24097_v34  ;;  %v1098_v34 = vrot.slane %v1056_v59, %v26810_v33  ;;  %v24270_v59 = vld [vmem:[#allocation8 + $0x28c] ss:$40 sps:$4 sm:$0xff]  }
 0x588   :  { %12154 = vmatprep.subr.bf16.mxu0 %v24102_v0  ;;  %v24211_v0 = vld [vmem:[#allocation8 + $0x10a0] ss:$40 sps:$4 sm:$0xff]  }
 0x58b   :  { %12155 = vmatpush1.bf16.msra.mxu0 %v24100_v1  ;;  %v24219_v1 = vld [vmem:[#allocation8 + $0x10f4] ss:$40 sps:$4 sm:$0xff]  }
 0x58c   :  { %12165 = vmatprep.subr.bf16.mxu0 %v24105_v2 }
 0x58e   :  { %12157 = vmatmul.mubr.bf16.vlgmr.msra.gmra.mrb[16].mxu0 %v26848_v8 }
 0x58f   :  { %12166 = vmatpush1.bf16.msra.mxu0 %v24103_v3  ;;  %12197 = vmatprep.mubr.bf16.mxu0 %v26881_v45 }
 0x590   :  { %12167 = vmatprep.subr.bf16.mxu0 %v24108_v4 }
 0x593   :  { %12168 = vmatpush1.bf16.msra.mxu0 %v24106_v9 }
 0x594   :  { %12169 = vmatprep.subr.bf16.mxu0 %v24111_v63 }
 0x597   :  { %12170 = vmatpush1.bf16.msra.mxu0 %v24109_v6  ;;  %v24217_v6 = vld [vmem:[#allocation8 + $0x10f0] ss:$40 sps:$4 sm:$0xff]  }
 0x598   :  { %12171 = vmatprep.subr.bf16.mxu0 %v24114_v7 }
 0x59b   :  { %12172 = vmatpush1.bf16.msra.mxu0 %v24112_v12 }
 0x59c   :  { %12173 = vmatprep.subr.bf16.mxu0 %v24117_v16  ;;  %v24225_v16 = vld [vmem:[#allocation8 + $0x1144] ss:$40 sps:$4 sm:$0xff]  }
 0x59f   :  { %12174 = vmatpush1.bf16.msra.mxu0 %v24115_v22 }
 0x5a0   :  { %12175 = vmatprep.subr.bf16.mxu0 %v24120_v29 }
 0x5a3   :  { %12176 = vmatpush1.bf16.msra.mxu0 %v24118_v44  ;;  %v24220_v44 = vld [vmem:[#allocation8 + $0x8] ss:$40 sps:$4 sm:$0xff]  }
 0x5a4   :  { %12177 = vmatprep.subr.bf16.mxu0 %v24123_v55 }
 0x5a7   :  { %12178 = vmatpush1.bf16.msra.mxu0 %v24121_v26  ;;  %v24223_v26 = vld [vmem:[#allocation8 + $0x1140] ss:$40 sps:$4 sm:$0xff]  }
 0x5a8   :  { %12179 = vmatprep.subr.bf16.mxu0 %v24129_v23  ;;  %v24228_v23 = vld [vmem:[#allocation8 + $0x5c] ss:$40 sps:$4 sm:$0xff]  }
 0x5ab   :  { %12180 = vmatpush1.bf16.msra.mxu0 %v24127_v24  ;;  %v24231_v24 = vld [vmem:[#allocation8 + $0x1194] ss:$40 sps:$4 sm:$0xff]  }
 0x5ac   :  { %12181 = vmatprep.subr.bf16.mxu0 %v24135_v25  ;;  %v24226_v25 = vld [vmem:[#allocation8 + $0x58] ss:$40 sps:$4 sm:$0xff]  }
 0x5af   :  { %12182 = vmatpush1.bf16.msra.mxu0 %v24133_v27  ;;  %v24229_v27 = vld [vmem:[#allocation8 + $0x1190] ss:$40 sps:$4 sm:$0xff]  }
 0x5b0   :  { %12183 = vmatprep.subr.bf16.mxu0 %v24141_v48  ;;  %v24234_v48 = vld [vmem:[#allocation8 + $0xac] ss:$40 sps:$4 sm:$0xff]  }
 0x5b3   :  { %12184 = vmatpush1.bf16.msra.mxu0 %v24139_v30  ;;  %v24237_v30 = vld [vmem:[#allocation8 + $0x11e4] ss:$40 sps:$4 sm:$0xff]  }
 0x5b4   :  { %12185 = vmatprep.subr.bf16.mxu0 %v24147_v31  ;;  %v24232_v31 = vld [vmem:[#allocation8 + $0xa8] ss:$40 sps:$4 sm:$0xff]  }
 0x5b7   :  { %12186 = vmatpush1.bf16.msra.mxu0 %v24145_v32  ;;  %v24235_v32 = vld [vmem:[#allocation8 + $0x11e0] ss:$40 sps:$4 sm:$0xff]  }
 0x5b8   :  { %12187 = vmatprep.subr.bf16.mxu0 %v24153_v35  ;;  %v24240_v35 = vld [vmem:[#allocation8 + $0xfc] ss:$40 sps:$4 sm:$0xff]  }
 0x5bb   :  { %12188 = vmatpush1.bf16.msra.mxu0 %v24151_v10  ;;  %v24243_v10 = vld [vmem:[#allocation8 + $0x1234] ss:$40 sps:$4 sm:$0xff]  }
 0x5bc   :  { %12189 = vmatprep.subr.bf16.mxu0 %v24159_v36  ;;  %v24238_v36 = vld [vmem:[#allocation8 + $0xf8] ss:$40 sps:$4 sm:$0xff]  }
 0x5bf   :  { %12190 = vmatpush1.bf16.msra.mxu0 %v24157_v37  ;;  %v24241_v37 = vld [vmem:[#allocation8 + $0x1230] ss:$40 sps:$4 sm:$0xff]  }
 0x5c0   :  { %12191 = vmatprep.subr.bf16.mxu0 %v24165_v11  ;;  %v24246_v11 = vld [vmem:[#allocation8 + $0x14c] ss:$40 sps:$4 sm:$0xff]  }
 0x5c3   :  { %12192 = vmatpush1.bf16.msra.mxu0 %v24163_v53  ;;  %v24249_v53 = vld [vmem:[#allocation8 + $0x1284] ss:$40 sps:$4 sm:$0xff]  }
 0x5c4   :  { %12193 = vmatprep.subr.bf16.mxu0 %v24171_v39  ;;  %v24244_v39 = vld [vmem:[#allocation8 + $0x148] ss:$40 sps:$4 sm:$0xff]  }
 0x5c7   :  { %12194 = vmatpush1.bf16.msra.mxu0 %v24169_v15  ;;  %v24247_v15 = vld [vmem:[#allocation8 + $0x1280] ss:$40 sps:$4 sm:$0xff]  }
 0x5c8   :  { %12195 = vmatprep.subr.bf16.mxu0 %v24177_v38  ;;  %v24252_v38 = vld [vmem:[#allocation8 + $0x19c] ss:$40 sps:$4 sm:$0xff]  }
 0x5cb   :  { %12196 = vmatpush1.bf16.msra.mxu0 %v24175_v40  ;;  %v24255_v40 = vld [vmem:[#allocation8 + $0x12d4] ss:$40 sps:$4 sm:$0xff]  }
 0x5cc   :  { %12206 = vmatprep.subr.bf16.mxu0 %v24183_v41  ;;  %v24250_v41 = vld [vmem:[#allocation8 + $0x198] ss:$40 sps:$4 sm:$0xff]  }
 0x5ce   :  { %12198 = vmatmul.mubr.bf16.vlgmr.msra.gmra.mrb[16].mxu0 %v26883_v43 }
 0x5cf   :  { %12207 = vmatpush1.bf16.msra.mxu0 %v24181_v47  ;;  %12238 = vmatprep.mubr.bf16.mxu0 %v26886_v56  ;;  %v24253_v47 = vld [vmem:[#allocation8 + $0x12d0] ss:$40 sps:$4 sm:$0xff]  }
 0x5d0   :  { %12208 = vmatprep.subr.bf16.mxu0 %v24189_v50  ;;  %v24258_v50 = vld [vmem:[#allocation8 + $0x1ec] ss:$40 sps:$4 sm:$0xff]  }
 0x5d3   :  { %12209 = vmatpush1.bf16.msra.mxu0 %v24187_v54  ;;  %v24261_v54 = vld [vmem:[#allocation8 + $0x1324] ss:$40 sps:$4 sm:$0xff]  }
 0x5d4   :  { %12210 = vmatprep.subr.bf16.mxu0 %v24195_v51  ;;  %v24256_v51 = vld [vmem:[#allocation8 + $0x1e8] ss:$40 sps:$4 sm:$0xff]  }
 0x5d7   :  { %12211 = vmatpush1.bf16.msra.mxu0 %v24193_v57  ;;  %v24259_v57 = vld [vmem:[#allocation8 + $0x1320] ss:$40 sps:$4 sm:$0xff]  }
 0x5d8   :  { %12212 = vmatprep.subr.bf16.mxu0 %v24201_v42  ;;  %v24264_v42 = vld [vmem:[#allocation8 + $0x23c] ss:$40 sps:$4 sm:$0xff]  }
 0x5db   :  { %12213 = vmatpush1.bf16.msra.mxu0 %v24199_v58  ;;  %v24267_v58 = vld [vmem:[#allocation8 + $0x1374] ss:$40 sps:$4 sm:$0xff]  }
 0x5dc   :  { %12214 = vmatprep.subr.bf16.mxu0 %v24207_v28  ;;  %v24262_v28 = vld [vmem:[#allocation8 + $0x238] ss:$40 sps:$4 sm:$0xff]  }
 0x5df   :  { %12215 = vmatpush1.bf16.msra.mxu0 %v24205_v49  ;;  %v24265_v49 = vld [vmem:[#allocation8 + $0x1370] ss:$40 sps:$4 sm:$0xff]  }
 0x5e0   :  { %12216 = vmatprep.subr.bf16.mxu0 %v24213_v60  ;;  %v24273_v60 = vld [vmem:[#allocation8 + $0x13c4] ss:$40 sps:$4 sm:$0xff]  }
 0x5e1   :  { %v6792_v2 = vpop.f32.mrb[12].mxu0 }
 0x5e2   :  { %v22193_v3 = vadd.f32 %v6792_v2, %v1094_v61  ;;  %v6794_v4 = vpop.f32.mrb[13].mxu0  ;;  %v24268_v61 = vld [vmem:[#allocation8 + $0x288] ss:$40 sps:$4 sm:$0xff]   ;;  %v24274_v2 = vld [vmem:[#allocation8 + $0x2d8] ss:$40 sps:$4 sm:$0xff]  }
 0x5e3   :  { %v22194_v9 = vadd.f32 %v6794_v4, %v1098_v34  ;;  %v6796_v63 = vpop.f32.mrb[14].mxu0  ;;  %12217 = vmatpush1.bf16.msra.mxu0 %v24211_v0  ;;  %v24271_v34 = vld [vmem:[#allocation8 + $0x13c0] ss:$40 sps:$4 sm:$0xff]   ;;  %v24276_v0 = vld [vmem:[#allocation8 + $0x2dc] ss:$40 sps:$4 sm:$0xff]  }
 0x5e4   :  { %v6807_v7 = vmax.f32 %v22193_v3, 0.0  ;;  %v6797_v12 = vpop.f32.mrb[15].mxu0  ;;  %12218 = vmatprep.subr.bf16.mxu0 %v24219_v1  ;;  %v24279_v1 = vld [vmem:[#allocation8 + $0x1414] ss:$40 sps:$4 sm:$0xff]   ;;  %v24277_v3 = vld [vmem:[#allocation8 + $0x1410] ss:$40 sps:$4 sm:$0xff]  }
 0x5e5   :  { %v6808_v22 = vmax.f32 %v22194_v9, 0.0  ;;  %v24282_v4 = vld [vmem:[#allocation8 + $0x32c] ss:$40 sps:$4 sm:$0xff]   ;;  %v24280_v63 = vld [vmem:[#allocation8 + $0x328] ss:$40 sps:$4 sm:$0xff]  }
 0x5e6   :  { %v26918_v55 = vpack.c.bf16 %v6807_v7, %v6807_v7  ;;  %v24285_v9 = vld [vmem:[#allocation8 + $0x1464] ss:$40 sps:$4 sm:$0xff]   ;;  %v24291_v12 = vld [vmem:[#allocation8 + $0x14b4] ss:$40 sps:$4 sm:$0xff]  }
 0x5e7   :  { %v26916_v29 = vpack.c.bf16 %v6808_v22, %v6808_v22  ;;  %12219 = vmatpush1.bf16.msra.mxu0 %v24217_v6  ;;  %v24283_v6 = vld [vmem:[#allocation8 + $0x1460] ss:$40 sps:$4 sm:$0xff]   ;;  %v24288_v7 = vld [vmem:[#allocation8 + $0x37c] ss:$40 sps:$4 sm:$0xff]   ;;  %v24289_v22 = vld [vmem:[#allocation8 + $0x14b0] ss:$40 sps:$4 sm:$0xff]  }
 0x5e8   :  { %12220 = vmatprep.subr.bf16.mxu0 %v24225_v16  ;;  %v24286_v16 = vld [vmem:[#allocation8 + $0x378] ss:$40 sps:$4 sm:$0xff]  }
 0x5e9   :  { %11869 = vmatprep.mubr.bf16.mxu1 %v26916_v29 }
 0x5ea   :  { %11870 = vmatmul.mubr.bf16.vlgmr.msra.gmra.mrb[8].mxu1 %v26918_v55 }
 0x5eb   :  { %11879 = vmatpush1.bf16.msra.mxu1 %v24220_v44  ;;  %11910 = vmatprep.mubr.bf16.mxu1 %v26823_v5  ;;  %v24294_v44 = vld [vmem:[#allocation8 + $0x3cc] ss:$40 sps:$4 sm:$0xff]  }
 0x5ec   :  { %12221 = vmatpush1.bf16.msra.mxu0 %v24223_v26  ;;  %11880 = vmatprep.subr.bf16.mxu1 %v24228_v23  ;;  %v24297_v26 = vld [vmem:[#allocation8 + $0x1504] ss:$40 sps:$4 sm:$0xff]   ;;  %v24292_v23 = vld [vmem:[#allocation8 + $0x3c8] ss:$40 sps:$4 sm:$0xff]  }
 0x5ed   :  { %12222 = vmatprep.subr.bf16.mxu0 %v24231_v24  ;;  %v24295_v24 = vld [vmem:[#allocation8 + $0x1500] ss:$40 sps:$4 sm:$0xff]  }
 0x5ef   :  { %11881 = vmatpush1.bf16.msra.mxu1 %v24226_v25  ;;  %v24300_v25 = vld [vmem:[#allocation8 + $0x41c] ss:$40 sps:$4 sm:$0xff]  }
 0x5f0   :  { %12223 = vmatpush1.bf16.msra.mxu0 %v24229_v27  ;;  %11882 = vmatprep.subr.bf16.mxu1 %v24234_v48  ;;  %v24303_v27 = vld [vmem:[#allocation8 + $0x1554] ss:$40 sps:$4 sm:$0xff]   ;;  %v24298_v48 = vld [vmem:[#allocation8 + $0x418] ss:$40 sps:$4 sm:$0xff]  }
 0x5f1   :  { %12224 = vmatprep.subr.bf16.mxu0 %v24237_v30  ;;  %v24301_v30 = vld [vmem:[#allocation8 + $0x1550] ss:$40 sps:$4 sm:$0xff]  }
 0x5f3   :  { %11883 = vmatpush1.bf16.msra.mxu1 %v24232_v31  ;;  %v24306_v31 = vld [vmem:[#allocation8 + $0x46c] ss:$40 sps:$4 sm:$0xff]  }
 0x5f4   :  { %12225 = vmatpush1.bf16.msra.mxu0 %v24235_v32  ;;  %11884 = vmatprep.subr.bf16.mxu1 %v24240_v35  ;;  %v24309_v32 = vld [vmem:[#allocation8 + $0x15a4] ss:$40 sps:$4 sm:$0xff]   ;;  %v24304_v35 = vld [vmem:[#allocation8 + $0x468] ss:$40 sps:$4 sm:$0xff]  }
 0x5f5   :  { %12226 = vmatprep.subr.bf16.mxu0 %v24243_v10  ;;  %v24307_v10 = vld [vmem:[#allocation8 + $0x15a0] ss:$40 sps:$4 sm:$0xff]  }
 0x5f7   :  { %11885 = vmatpush1.bf16.msra.mxu1 %v24238_v36  ;;  %v24312_v36 = vld [vmem:[#allocation8 + $0x4bc] ss:$40 sps:$4 sm:$0xff]  }
 0x5f8   :  { %12227 = vmatpush1.bf16.msra.mxu0 %v24241_v37  ;;  %11886 = vmatprep.subr.bf16.mxu1 %v24246_v11  ;;  %v24315_v37 = vld [vmem:[#allocation8 + $0x15f4] ss:$40 sps:$4 sm:$0xff]   ;;  %v24310_v11 = vld [vmem:[#allocation8 + $0x4b8] ss:$40 sps:$4 sm:$0xff]  }
 0x5f9   :  { %12228 = vmatprep.subr.bf16.mxu0 %v24249_v53  ;;  %v24313_v53 = vld [vmem:[#allocation8 + $0x15f0] ss:$40 sps:$4 sm:$0xff]  }
 0x5fb   :  { %11887 = vmatpush1.bf16.msra.mxu1 %v24244_v39  ;;  %v24318_v39 = vld [vmem:[#allocation8 + $0x50c] ss:$40 sps:$4 sm:$0xff]  }
 0x5fc   :  { %12229 = vmatpush1.bf16.msra.mxu0 %v24247_v15  ;;  %11888 = vmatprep.subr.bf16.mxu1 %v24252_v38  ;;  %v24321_v15 = vld [vmem:[#allocation8 + $0x1644] ss:$40 sps:$4 sm:$0xff]   ;;  %v24316_v38 = vld [vmem:[#allocation8 + $0x508] ss:$40 sps:$4 sm:$0xff]  }
 0x5fd   :  { %12230 = vmatprep.subr.bf16.mxu0 %v24255_v40  ;;  %v24319_v40 = vld [vmem:[#allocation8 + $0x1640] ss:$40 sps:$4 sm:$0xff]  }
 0x5ff   :  { %11889 = vmatpush1.bf16.msra.mxu1 %v24250_v41  ;;  %v24324_v41 = vld [vmem:[#allocation8 + $0x55c] ss:$40 sps:$4 sm:$0xff]  }
 0x600   :  { %12231 = vmatpush1.bf16.msra.mxu0 %v24253_v47  ;;  %11890 = vmatprep.subr.bf16.mxu1 %v24258_v50  ;;  %v24327_v47 = vld [vmem:[#allocation8 + $0x1694] ss:$40 sps:$4 sm:$0xff]   ;;  %v24322_v50 = vld [vmem:[#allocation8 + $0x558] ss:$40 sps:$4 sm:$0xff]  }
 0x601   :  { %12232 = vmatprep.subr.bf16.mxu0 %v24261_v54  ;;  %v24325_v54 = vld [vmem:[#allocation8 + $0x1690] ss:$40 sps:$4 sm:$0xff]  }
 0x603   :  { %11891 = vmatpush1.bf16.msra.mxu1 %v24256_v51  ;;  %v24330_v51 = vld [vmem:[#allocation8 + $0x5ac] ss:$40 sps:$4 sm:$0xff]  }
 0x604   :  { %12233 = vmatpush1.bf16.msra.mxu0 %v24259_v57  ;;  %11892 = vmatprep.subr.bf16.mxu1 %v24264_v42  ;;  %v24333_v57 = vld [vmem:[#allocation8 + $0x16e4] ss:$40 sps:$4 sm:$0xff]   ;;  %v24328_v42 = vld [vmem:[#allocation8 + $0x5a8] ss:$40 sps:$4 sm:$0xff]  }
 0x605   :  { %12234 = vmatprep.subr.bf16.mxu0 %v24267_v58  ;;  %v24331_v58 = vld [vmem:[#allocation8 + $0x16e0] ss:$40 sps:$4 sm:$0xff]  }
 0x607   :  { %11893 = vmatpush1.bf16.msra.mxu1 %v24262_v28  ;;  %v24336_v28 = vld [vmem:[#allocation8 + $0x5fc] ss:$40 sps:$4 sm:$0xff]  }
 0x608   :  { %12235 = vmatpush1.bf16.msra.mxu0 %v24265_v49  ;;  %11894 = vmatprep.subr.bf16.mxu1 %v24270_v59  ;;  %v24339_v49 = vld [vmem:[#allocation8 + $0x1734] ss:$40 sps:$4 sm:$0xff]   ;;  %v24334_v59 = vld [vmem:[#allocation8 + $0x5f8] ss:$40 sps:$4 sm:$0xff]  }
 0x609   :  { %12236 = vmatprep.subr.bf16.mxu0 %v24273_v60  ;;  %v24337_v60 = vld [vmem:[#allocation8 + $0x1730] ss:$40 sps:$4 sm:$0xff]  }
 0x60b   :  { %11895 = vmatpush1.bf16.msra.mxu1 %v24268_v61  ;;  %v24342_v61 = vld [vmem:[#allocation8 + $0x64c] ss:$40 sps:$4 sm:$0xff]  }
 0x60c   :  { %12237 = vmatpush1.bf16.msra.mxu0 %v24271_v34  ;;  %11896 = vmatprep.subr.bf16.mxu1 %v24276_v0  ;;  %v24345_v34 = vld [vmem:[#allocation8 + $0x1784] ss:$40 sps:$4 sm:$0xff]   ;;  %v24340_v0 = vld [vmem:[#allocation8 + $0x648] ss:$40 sps:$4 sm:$0xff]  }
 0x60d   :  { %12247 = vmatprep.subr.bf16.mxu0 %v24279_v1  ;;  %v24343_v1 = vld [vmem:[#allocation8 + $0x1780] ss:$40 sps:$4 sm:$0xff]  }
 0x60f   :  { %11897 = vmatpush1.bf16.msra.mxu1 %v24274_v2  ;;  %12239 = vmatmul.mubr.bf16.vlgmr.msra.gmra.mrb[16].mxu0 %v26898_v17  ;;  %v24348_v2 = vld [vmem:[#allocation8 + $0x69c] ss:$40 sps:$4 sm:$0xff]  }
 0x610   :  { %12248 = vmatpush1.bf16.msra.mxu0 %v24277_v3  ;;  %12279 = vmatprep.mubr.bf16.mxu0 %v26916_v29  ;;  %v24351_v3 = vld [vmem:[#allocation8 + $0x17d4] ss:$40 sps:$4 sm:$0xff]  }
 0x611   :  { %11898 = vmatprep.subr.bf16.mxu1 %v24282_v4  ;;  %12249 = vmatprep.subr.bf16.mxu0 %v24285_v9  ;;  %v24346_v4 = vld [vmem:[#allocation8 + $0x698] ss:$40 sps:$4 sm:$0xff]  }
 0x612   :  { %v24349_v9 = vld [vmem:[#allocation8 + $0x17d0] ss:$40 sps:$4 sm:$0xff]  }
 0x613   :  { %11899 = vmatpush1.bf16.msra.mxu1 %v24280_v63  ;;  %v24354_v63 = vld [vmem:[#allocation8 + $0x6ec] ss:$40 sps:$4 sm:$0xff]  }
 0x614   :  { %12250 = vmatpush1.bf16.msra.mxu0 %v24283_v6  ;;  %11900 = vmatprep.subr.bf16.mxu1 %v24288_v7  ;;  %v24357_v6 = vld [vmem:[#allocation8 + $0x1824] ss:$40 sps:$4 sm:$0xff]   ;;  %v24352_v7 = vld [vmem:[#allocation8 + $0x6e8] ss:$40 sps:$4 sm:$0xff]  }
 0x615   :  { %12251 = vmatprep.subr.bf16.mxu0 %v24291_v12  ;;  %v24355_v12 = vld [vmem:[#allocation8 + $0x1820] ss:$40 sps:$4 sm:$0xff]  }
 0x617   :  { %11901 = vmatpush1.bf16.msra.mxu1 %v24286_v16  ;;  %v24360_v16 = vld [vmem:[#allocation8 + $0x73c] ss:$40 sps:$4 sm:$0xff]  }
 0x618   :  { %12252 = vmatpush1.bf16.msra.mxu0 %v24289_v22  ;;  %11902 = vmatprep.subr.bf16.mxu1 %v24294_v44  ;;  %v24363_v22 = vld [vmem:[#allocation8 + $0x1874] ss:$40 sps:$4 sm:$0xff]   ;;  %v24358_v44 = vld [vmem:[#allocation8 + $0x738] ss:$40 sps:$4 sm:$0xff]  }
 0x619   :  { %12253 = vmatprep.subr.bf16.mxu0 %v24297_v26  ;;  %v24361_v26 = vld [vmem:[#allocation8 + $0x1870] ss:$40 sps:$4 sm:$0xff]  }
 0x61b   :  { %11903 = vmatpush1.bf16.msra.mxu1 %v24292_v23  ;;  %v24366_v23 = vld [vmem:[#allocation8 + $0x78c] ss:$40 sps:$4 sm:$0xff]  }
 0x61c   :  { %12254 = vmatpush1.bf16.msra.mxu0 %v24295_v24  ;;  %11904 = vmatprep.subr.bf16.mxu1 %v24300_v25  ;;  %v24369_v24 = vld [vmem:[#allocation8 + $0x18c4] ss:$40 sps:$4 sm:$0xff]   ;;  %v24364_v25 = vld [vmem:[#allocation8 + $0x788] ss:$40 sps:$4 sm:$0xff]  }
 0x61d   :  { %12255 = vmatprep.subr.bf16.mxu0 %v24303_v27  ;;  %v24367_v27 = vld [vmem:[#allocation8 + $0x18c0] ss:$40 sps:$4 sm:$0xff]  }
 0x61f   :  { %11905 = vmatpush1.bf16.msra.mxu1 %v24298_v48  ;;  %v24372_v48 = vld [vmem:[#allocation8 + $0x7dc] ss:$40 sps:$4 sm:$0xff]  }
 0x620   :  { %12256 = vmatpush1.bf16.msra.mxu0 %v24301_v30  ;;  %11906 = vmatprep.subr.bf16.mxu1 %v24306_v31  ;;  %v24375_v30 = vld [vmem:[#allocation8 + $0x24] ss:$40 sps:$4 sm:$0xff]   ;;  %v24370_v31 = vld [vmem:[#allocation8 + $0x7d8] ss:$40 sps:$4 sm:$0xff]  }
 0x621   :  { %12257 = vmatprep.subr.bf16.mxu0 %v24309_v32  ;;  %v24373_v32 = vld [vmem:[#allocation8 + $0x20] ss:$40 sps:$4 sm:$0xff]  }
 0x623   :  { %11907 = vmatpush1.bf16.msra.mxu1 %v24304_v35  ;;  %v24378_v35 = vld [vmem:[#allocation8 + $0x82c] ss:$40 sps:$4 sm:$0xff]  }
 0x624   :  { %12258 = vmatpush1.bf16.msra.mxu0 %v24307_v10  ;;  %11908 = vmatprep.subr.bf16.mxu1 %v24312_v36  ;;  %v24381_v10 = vld [vmem:[#allocation8 + $0x74] ss:$40 sps:$4 sm:$0xff]   ;;  %v24376_v36 = vld [vmem:[#allocation8 + $0x828] ss:$40 sps:$4 sm:$0xff]  }
 0x625   :  { %12259 = vmatprep.subr.bf16.mxu0 %v24315_v37  ;;  %v24379_v37 = vld [vmem:[#allocation8 + $0x70] ss:$40 sps:$4 sm:$0xff]  }
 0x627   :  { %11909 = vmatpush1.bf16.msra.mxu1 %v24310_v11  ;;  %v24384_v11 = vld [vmem:[#allocation8 + $0x87c] ss:$40 sps:$4 sm:$0xff]  }
 0x628   :  { %12260 = vmatpush1.bf16.msra.mxu0 %v24313_v53  ;;  %11919 = vmatprep.subr.bf16.mxu1 %v24318_v39  ;;  %v24387_v53 = vld [vmem:[#allocation8 + $0xc4] ss:$40 sps:$4 sm:$0xff]   ;;  %v24382_v39 = vld [vmem:[#allocation8 + $0x878] ss:$40 sps:$4 sm:$0xff]  }
 0x629   :  { %12261 = vmatprep.subr.bf16.mxu0 %v24321_v15  ;;  %v24385_v15 = vld [vmem:[#allocation8 + $0xc0] ss:$40 sps:$4 sm:$0xff]  }
 0x62a   :  { %11911 = vmatmul.mubr.bf16.vlgmr.msra.gmra.mrb[12].mxu1 %v26836_v62 }
 0x62b   :  { %11920 = vmatpush1.bf16.msra.mxu1 %v24316_v38  ;;  %11951 = vmatprep.mubr.bf16.mxu1 %v26838_v52  ;;  %v24390_v38 = vld [vmem:[#allocation8 + $0x8cc] ss:$40 sps:$4 sm:$0xff]  }
 0x62c   :  { %12262 = vmatpush1.bf16.msra.mxu0 %v24319_v40  ;;  %11921 = vmatprep.subr.bf16.mxu1 %v24324_v41  ;;  %v24393_v40 = vld [vmem:[#allocation8 + $0x114] ss:$40 sps:$4 sm:$0xff]   ;;  %v24388_v41 = vld [vmem:[#allocation8 + $0x8c8] ss:$40 sps:$4 sm:$0xff]  }
 0x62d   :  { %12263 = vmatprep.subr.bf16.mxu0 %v24327_v47  ;;  %v24391_v47 = vld [vmem:[#allocation8 + $0x110] ss:$40 sps:$4 sm:$0xff]  }
 0x62f   :  { %11922 = vmatpush1.bf16.msra.mxu1 %v24322_v50  ;;  %v24396_v50 = vld [vmem:[#allocation8 + $0x91c] ss:$40 sps:$4 sm:$0xff]  }
 0x630   :  { %12264 = vmatpush1.bf16.msra.mxu0 %v24325_v54  ;;  %11923 = vmatprep.subr.bf16.mxu1 %v24330_v51  ;;  %v24399_v54 = vld [vmem:[#allocation8 + $0x164] ss:$40 sps:$4 sm:$0xff]   ;;  %v24394_v51 = vld [vmem:[#allocation8 + $0x918] ss:$40 sps:$4 sm:$0xff]  }
 0x631   :  { %12265 = vmatprep.subr.bf16.mxu0 %v24333_v57  ;;  %v24397_v57 = vld [vmem:[#allocation8 + $0x160] ss:$40 sps:$4 sm:$0xff]  }
 0x633   :  { %11924 = vmatpush1.bf16.msra.mxu1 %v24328_v42  ;;  %v24402_v42 = vld [vmem:[#allocation8 + $0x96c] ss:$40 sps:$4 sm:$0xff]  }
 0x634   :  { %12266 = vmatpush1.bf16.msra.mxu0 %v24331_v58  ;;  %11925 = vmatprep.subr.bf16.mxu1 %v24336_v28  ;;  %v24405_v58 = vld [vmem:[#allocation8 + $0x1b4] ss:$40 sps:$4 sm:$0xff]   ;;  %v24400_v28 = vld [vmem:[#allocation8 + $0x968] ss:$40 sps:$4 sm:$0xff]  }
 0x635   :  { %12267 = vmatprep.subr.bf16.mxu0 %v24339_v49  ;;  %v24403_v49 = vld [vmem:[#allocation8 + $0x1b0] ss:$40 sps:$4 sm:$0xff]  }
 0x637   :  { %11926 = vmatpush1.bf16.msra.mxu1 %v24334_v59  ;;  %v24408_v59 = vld [vmem:[#allocation8 + $0x9bc] ss:$40 sps:$4 sm:$0xff]  }
 0x638   :  { %12268 = vmatpush1.bf16.msra.mxu0 %v24337_v60  ;;  %11927 = vmatprep.subr.bf16.mxu1 %v24342_v61  ;;  %v24411_v60 = vld [vmem:[#allocation8 + $0x204] ss:$40 sps:$4 sm:$0xff]   ;;  %v24406_v61 = vld [vmem:[#allocation8 + $0x9b8] ss:$40 sps:$4 sm:$0xff]  }
 0x639   :  { %12269 = vmatprep.subr.bf16.mxu0 %v24345_v34  ;;  %v24409_v34 = vld [vmem:[#allocation8 + $0x200] ss:$40 sps:$4 sm:$0xff]  }
 0x63b   :  { %11928 = vmatpush1.bf16.msra.mxu1 %v24340_v0  ;;  %v24414_v0 = vld [vmem:[#allocation8 + $0xa0c] ss:$40 sps:$4 sm:$0xff]  }
 0x63c   :  { %12270 = vmatpush1.bf16.msra.mxu0 %v24343_v1  ;;  %11929 = vmatprep.subr.bf16.mxu1 %v24348_v2  ;;  %v24417_v1 = vld [vmem:[#allocation8 + $0x254] ss:$40 sps:$4 sm:$0xff]   ;;  %v24412_v2 = vld [vmem:[#allocation8 + $0xa08] ss:$40 sps:$4 sm:$0xff]  }
 0x63d   :  { %12271 = vmatprep.subr.bf16.mxu0 %v24351_v3  ;;  %v24415_v3 = vld [vmem:[#allocation8 + $0x250] ss:$40 sps:$4 sm:$0xff]  }
 0x63f   :  { %11930 = vmatpush1.bf16.msra.mxu1 %v24346_v4  ;;  %v24420_v4 = vld [vmem:[#allocation8 + $0xa5c] ss:$40 sps:$4 sm:$0xff]  }
 0x640   :  { %12272 = vmatpush1.bf16.msra.mxu0 %v24349_v9  ;;  %11931 = vmatprep.subr.bf16.mxu1 %v24354_v63  ;;  %v24423_v9 = vld [vmem:[#allocation8 + $0x2a4] ss:$40 sps:$4 sm:$0xff]   ;;  %v24418_v63 = vld [vmem:[#allocation8 + $0xa58] ss:$40 sps:$4 sm:$0xff]  }
 0x641   :  { %12273 = vmatprep.subr.bf16.mxu0 %v24357_v6  ;;  %v24421_v6 = vld [vmem:[#allocation8 + $0x2a0] ss:$40 sps:$4 sm:$0xff]  }
 0x643   :  { %11932 = vmatpush1.bf16.msra.mxu1 %v24352_v7  ;;  %v24426_v7 = vld [vmem:[#allocation8 + $0xaac] ss:$40 sps:$4 sm:$0xff]  }
 0x644   :  { %12274 = vmatpush1.bf16.msra.mxu0 %v24355_v12  ;;  %11933 = vmatprep.subr.bf16.mxu1 %v24360_v16  ;;  %v24429_v12 = vld [vmem:[#allocation8 + $0x2f4] ss:$40 sps:$4 sm:$0xff]   ;;  %v24424_v16 = vld [vmem:[#allocation8 + $0xaa8] ss:$40 sps:$4 sm:$0xff]  }
 0x645   :  { %12275 = vmatprep.subr.bf16.mxu0 %v24363_v22  ;;  %v24427_v22 = vld [vmem:[#allocation8 + $0x2f0] ss:$40 sps:$4 sm:$0xff]  }
 0x647   :  { %11934 = vmatpush1.bf16.msra.mxu1 %v24358_v44  ;;  %v24432_v44 = vld [vmem:[#allocation8 + $0xafc] ss:$40 sps:$4 sm:$0xff]  }
 0x648   :  { %12276 = vmatpush1.bf16.msra.mxu0 %v24361_v26  ;;  %11935 = vmatprep.subr.bf16.mxu1 %v24366_v23  ;;  %v24435_v26 = vld [vmem:[#allocation8 + $0x344] ss:$40 sps:$4 sm:$0xff]   ;;  %v24430_v23 = vld [vmem:[#allocation8 + $0xaf8] ss:$40 sps:$4 sm:$0xff]  }
 0x649   :  { %12277 = vmatprep.subr.bf16.mxu0 %v24369_v24  ;;  %v24433_v24 = vld [vmem:[#allocation8 + $0x340] ss:$40 sps:$4 sm:$0xff]  }
 0x64b   :  { %11936 = vmatpush1.bf16.msra.mxu1 %v24364_v25  ;;  %v24438_v25 = vld [vmem:[#allocation8 + $0xb4c] ss:$40 sps:$4 sm:$0xff]  }
 0x64c   :  { %12278 = vmatpush1.bf16.msra.mxu0 %v24367_v27  ;;  %11937 = vmatprep.subr.bf16.mxu1 %v24372_v48  ;;  %v24441_v27 = vld [vmem:[#allocation8 + $0x394] ss:$40 sps:$4 sm:$0xff]   ;;  %v24436_v48 = vld [vmem:[#allocation8 + $0xb48] ss:$40 sps:$4 sm:$0xff]  }
 0x64d   :  { %12493 = vmatprep.subr.bf16.mxu0 %v24375_v30  ;;  %v24439_v30 = vld [vmem:[#allocation8 + $0x390] ss:$40 sps:$4 sm:$0xff]  }
 0x64f   :  { %11938 = vmatpush1.bf16.msra.mxu1 %v24370_v31  ;;  %12280 = vmatmul.mubr.bf16.vlgmr.msra.gmra.mrb[16].mxu0 %v26918_v55  ;;  %v24444_v31 = vld [vmem:[#allocation8 + $0xb9c] ss:$40 sps:$4 sm:$0xff]  }
 0x650   :  { %12494 = vmatpush1.bf16.msra.mxu0 %v24373_v32  ;;  %12525 = vmatprep.mubr.bf16.mxu0 %v26823_v5  ;;  %v24447_v32 = vld [vmem:[#allocation8 + $0x3e4] ss:$40 sps:$4 sm:$0xff]  }
 0x651   :  { %11939 = vmatprep.subr.bf16.mxu1 %v24378_v35  ;;  %12495 = vmatprep.subr.bf16.mxu0 %v24381_v10  ;;  %v24442_v35 = vld [vmem:[#allocation8 + $0xb98] ss:$40 sps:$4 sm:$0xff]  }
 0x652   :  { %v24445_v10 = vld [vmem:[#allocation8 + $0x3e0] ss:$40 sps:$4 sm:$0xff]  }
 0x653   :  { %11940 = vmatpush1.bf16.msra.mxu1 %v24376_v36  ;;  %v24450_v36 = vld [vmem:[#allocation8 + $0xbec] ss:$40 sps:$4 sm:$0xff]  }
 0x654   :  { %12496 = vmatpush1.bf16.msra.mxu0 %v24379_v37  ;;  %11941 = vmatprep.subr.bf16.mxu1 %v24384_v11  ;;  %v24453_v37 = vld [vmem:[#allocation8 + $0x434] ss:$40 sps:$4 sm:$0xff]   ;;  %v24448_v11 = vld [vmem:[#allocation8 + $0xbe8] ss:$40 sps:$4 sm:$0xff]  }
 0x655   :  { %12497 = vmatprep.subr.bf16.mxu0 %v24387_v53  ;;  %v24451_v53 = vld [vmem:[#allocation8 + $0x430] ss:$40 sps:$4 sm:$0xff]  }
 0x657   :  { %11942 = vmatpush1.bf16.msra.mxu1 %v24382_v39  ;;  %v24456_v39 = vld [vmem:[#allocation8 + $0xc3c] ss:$40 sps:$4 sm:$0xff]  }
 0x658   :  { %12498 = vmatpush1.bf16.msra.mxu0 %v24385_v15  ;;  %11943 = vmatprep.subr.bf16.mxu1 %v24390_v38  ;;  %v24459_v15 = vld [vmem:[#allocation8 + $0x484] ss:$40 sps:$4 sm:$0xff]   ;;  %v24454_v38 = vld [vmem:[#allocation8 + $0xc38] ss:$40 sps:$4 sm:$0xff]  }
 0x659   :  { %12499 = vmatprep.subr.bf16.mxu0 %v24393_v40  ;;  %v24457_v40 = vld [vmem:[#allocation8 + $0x480] ss:$40 sps:$4 sm:$0xff]  }
 0x65b   :  { %11944 = vmatpush1.bf16.msra.mxu1 %v24388_v41  ;;  %v24462_v41 = vld [vmem:[#allocation8 + $0xc8c] ss:$40 sps:$4 sm:$0xff]  }
 0x65c   :  { %12500 = vmatpush1.bf16.msra.mxu0 %v24391_v47  ;;  %11945 = vmatprep.subr.bf16.mxu1 %v24396_v50  ;;  %v24465_v47 = vld [vmem:[#allocation8 + $0x4d4] ss:$40 sps:$4 sm:$0xff]   ;;  %v24460_v50 = vld [vmem:[#allocation8 + $0xc88] ss:$40 sps:$4 sm:$0xff]  }
 0x65d   :  { %12501 = vmatprep.subr.bf16.mxu0 %v24399_v54  ;;  %v24463_v54 = vld [vmem:[#allocation8 + $0x4d0] ss:$40 sps:$4 sm:$0xff]  }
 0x65f   :  { %11946 = vmatpush1.bf16.msra.mxu1 %v24394_v51  ;;  %v24468_v51 = vld [vmem:[#allocation8 + $0xcdc] ss:$40 sps:$4 sm:$0xff]  }
 0x660   :  { %12502 = vmatpush1.bf16.msra.mxu0 %v24397_v57  ;;  %11947 = vmatprep.subr.bf16.mxu1 %v24402_v42  ;;  %v24471_v57 = vld [vmem:[#allocation8 + $0x524] ss:$40 sps:$4 sm:$0xff]   ;;  %v24466_v42 = vld [vmem:[#allocation8 + $0xcd8] ss:$40 sps:$4 sm:$0xff]  }
 0x661   :  { %12503 = vmatprep.subr.bf16.mxu0 %v24405_v58  ;;  %v24469_v58 = vld [vmem:[#allocation8 + $0x520] ss:$40 sps:$4 sm:$0xff]  }
 0x663   :  { %11948 = vmatpush1.bf16.msra.mxu1 %v24400_v28  ;;  %v24474_v28 = vld [vmem:[#allocation8 + $0xd2c] ss:$40 sps:$4 sm:$0xff]  }
 0x664   :  { %12504 = vmatpush1.bf16.msra.mxu0 %v24403_v49  ;;  %11949 = vmatprep.subr.bf16.mxu1 %v24408_v59  ;;  %v24477_v49 = vld [vmem:[#allocation8 + $0x574] ss:$40 sps:$4 sm:$0xff]   ;;  %v24472_v59 = vld [vmem:[#allocation8 + $0xd28] ss:$40 sps:$4 sm:$0xff]  }
 0x665   :  { %12505 = vmatprep.subr.bf16.mxu0 %v24411_v60  ;;  %v24475_v60 = vld [vmem:[#allocation8 + $0x570] ss:$40 sps:$4 sm:$0xff]  }
 0x667   :  { %11950 = vmatpush1.bf16.msra.mxu1 %v24406_v61  ;;  %v24480_v61 = vld [vmem:[#allocation8 + $0xd7c] ss:$40 sps:$4 sm:$0xff]  }
 0x668   :  { %12506 = vmatpush1.bf16.msra.mxu0 %v24409_v34  ;;  %11960 = vmatprep.subr.bf16.mxu1 %v24414_v0  ;;  %v24483_v34 = vld [vmem:[#allocation8 + $0x5c4] ss:$40 sps:$4 sm:$0xff]   ;;  %v24478_v0 = vld [vmem:[#allocation8 + $0xd78] ss:$40 sps:$4 sm:$0xff]  }
 0x669   :  { %12507 = vmatprep.subr.bf16.mxu0 %v24417_v1  ;;  %v24481_v1 = vld [vmem:[#allocation8 + $0x5c0] ss:$40 sps:$4 sm:$0xff]  }
 0x66a   :  { %11952 = vmatmul.mubr.bf16.vlgmr.msra.gmra.mrb[12].mxu1 %v26848_v8 }
 0x66b   :  { %11961 = vmatpush1.bf16.msra.mxu1 %v24412_v2  ;;  %11992 = vmatprep.mubr.bf16.mxu1 %v26881_v45  ;;  %v24486_v2 = vld [vmem:[#allocation8 + $0xdcc] ss:$40 sps:$4 sm:$0xff]  }
 0x66c   :  { %12508 = vmatpush1.bf16.msra.mxu0 %v24415_v3  ;;  %11962 = vmatprep.subr.bf16.mxu1 %v24420_v4  ;;  %v24489_v3 = vld [vmem:[#allocation8 + $0x614] ss:$40 sps:$4 sm:$0xff]   ;;  %v24484_v4 = vld [vmem:[#allocation8 + $0xdc8] ss:$40 sps:$4 sm:$0xff]  }
 0x66d   :  { %12509 = vmatprep.subr.bf16.mxu0 %v24423_v9  ;;  %v24487_v9 = vld [vmem:[#allocation8 + $0x610] ss:$40 sps:$4 sm:$0xff]  }
 0x66f   :  { %11963 = vmatpush1.bf16.msra.mxu1 %v24418_v63  ;;  %v24492_v63 = vld [vmem:[#allocation8 + $0xe1c] ss:$40 sps:$4 sm:$0xff]  }
 0x670   :  { %12510 = vmatpush1.bf16.msra.mxu0 %v24421_v6  ;;  %11964 = vmatprep.subr.bf16.mxu1 %v24426_v7  ;;  %v24495_v6 = vld [vmem:[#allocation8 + $0x664] ss:$40 sps:$4 sm:$0xff]   ;;  %v24490_v7 = vld [vmem:[#allocation8 + $0xe18] ss:$40 sps:$4 sm:$0xff]  }
 0x671   :  { %12511 = vmatprep.subr.bf16.mxu0 %v24429_v12  ;;  %v24493_v12 = vld [vmem:[#allocation8 + $0x660] ss:$40 sps:$4 sm:$0xff]  }
 0x673   :  { %11965 = vmatpush1.bf16.msra.mxu1 %v24424_v16  ;;  %v24498_v16 = vld [vmem:[#allocation8 + $0xe6c] ss:$40 sps:$4 sm:$0xff]  }
 0x674   :  { %12512 = vmatpush1.bf16.msra.mxu0 %v24427_v22  ;;  %11966 = vmatprep.subr.bf16.mxu1 %v24432_v44  ;;  %v24501_v22 = vld [vmem:[#allocation8 + $0x6b4] ss:$40 sps:$4 sm:$0xff]   ;;  %v24496_v44 = vld [vmem:[#allocation8 + $0xe68] ss:$40 sps:$4 sm:$0xff]  }
 0x675   :  { %12513 = vmatprep.subr.bf16.mxu0 %v24435_v26  ;;  %v24499_v26 = vld [vmem:[#allocation8 + $0x6b0] ss:$40 sps:$4 sm:$0xff]  }
 0x677   :  { %11967 = vmatpush1.bf16.msra.mxu1 %v24430_v23  ;;  %v24504_v23 = vld [vmem:[#allocation8 + $0xebc] ss:$40 sps:$4 sm:$0xff]  }
 0x678   :  { %12514 = vmatpush1.bf16.msra.mxu0 %v24433_v24  ;;  %11968 = vmatprep.subr.bf16.mxu1 %v24438_v25  ;;  %v24507_v24 = vld [vmem:[#allocation8 + $0x704] ss:$40 sps:$4 sm:$0xff]   ;;  %v24502_v25 = vld [vmem:[#allocation8 + $0xeb8] ss:$40 sps:$4 sm:$0xff]  }
 0x679   :  { %12515 = vmatprep.subr.bf16.mxu0 %v24441_v27  ;;  %v24505_v27 = vld [vmem:[#allocation8 + $0x700] ss:$40 sps:$4 sm:$0xff]  }
 0x67b   :  { %11969 = vmatpush1.bf16.msra.mxu1 %v24436_v48  ;;  %v24510_v48 = vld [vmem:[#allocation8 + $0xf0c] ss:$40 sps:$4 sm:$0xff]  }
 0x67c   :  { %12516 = vmatpush1.bf16.msra.mxu0 %v24439_v30  ;;  %11970 = vmatprep.subr.bf16.mxu1 %v24444_v31  ;;  %v24513_v30 = vld [vmem:[#allocation8 + $0x754] ss:$40 sps:$4 sm:$0xff]   ;;  %v24508_v31 = vld [vmem:[#allocation8 + $0xf08] ss:$40 sps:$4 sm:$0xff]  }
 0x67d   :  { %12517 = vmatprep.subr.bf16.mxu0 %v24447_v32  ;;  %v24511_v32 = vld [vmem:[#allocation8 + $0x750] ss:$40 sps:$4 sm:$0xff]  }
 0x67f   :  { %11971 = vmatpush1.bf16.msra.mxu1 %v24442_v35  ;;  %v24516_v35 = vld [vmem:[#allocation8 + $0xf5c] ss:$40 sps:$4 sm:$0xff]  }
 0x680   :  { %12518 = vmatpush1.bf16.msra.mxu0 %v24445_v10  ;;  %11972 = vmatprep.subr.bf16.mxu1 %v24450_v36  ;;  %v24519_v10 = vld [vmem:[#allocation8 + $0x7a4] ss:$40 sps:$4 sm:$0xff]   ;;  %v24514_v36 = vld [vmem:[#allocation8 + $0xf58] ss:$40 sps:$4 sm:$0xff]  }
 0x681   :  { %12519 = vmatprep.subr.bf16.mxu0 %v24453_v37  ;;  %v24517_v37 = vld [vmem:[#allocation8 + $0x7a0] ss:$40 sps:$4 sm:$0xff]  }
 0x683   :  { %11973 = vmatpush1.bf16.msra.mxu1 %v24448_v11  ;;  %v24522_v11 = vld [vmem:[#allocation8 + $0xfac] ss:$40 sps:$4 sm:$0xff]  }
 0x684   :  { %12520 = vmatpush1.bf16.msra.mxu0 %v24451_v53  ;;  %11974 = vmatprep.subr.bf16.mxu1 %v24456_v39  ;;  %v24525_v53 = vld [vmem:[#allocation8 + $0x7f4] ss:$40 sps:$4 sm:$0xff]   ;;  %v24520_v39 = vld [vmem:[#allocation8 + $0xfa8] ss:$40 sps:$4 sm:$0xff]  }
 0x685   :  { %12521 = vmatprep.subr.bf16.mxu0 %v24459_v15  ;;  %v24523_v15 = vld [vmem:[#allocation8 + $0x7f0] ss:$40 sps:$4 sm:$0xff]  }
 0x687   :  { %11975 = vmatpush1.bf16.msra.mxu1 %v24454_v38  ;;  %v24528_v38 = vld [vmem:[#allocation8 + $0xffc] ss:$40 sps:$4 sm:$0xff]  }
 0x688   :  { %12522 = vmatpush1.bf16.msra.mxu0 %v24457_v40  ;;  %11976 = vmatprep.subr.bf16.mxu1 %v24462_v41  ;;  %v24531_v40 = vld [vmem:[#allocation8 + $0x844] ss:$40 sps:$4 sm:$0xff]   ;;  %v24526_v41 = vld [vmem:[#allocation8 + $0xff8] ss:$40 sps:$4 sm:$0xff]  }
 0x689   :  { %12523 = vmatprep.subr.bf16.mxu0 %v24465_v47  ;;  %v24529_v47 = vld [vmem:[#allocation8 + $0x840] ss:$40 sps:$4 sm:$0xff]  }
 0x68b   :  { %11977 = vmatpush1.bf16.msra.mxu1 %v24460_v50  ;;  %v24534_v50 = vld [vmem:[#allocation8 + $0x104c] ss:$40 sps:$4 sm:$0xff]  }
 0x68c   :  { %12524 = vmatpush1.bf16.msra.mxu0 %v24463_v54  ;;  %11978 = vmatprep.subr.bf16.mxu1 %v24468_v51  ;;  %v24537_v54 = vld [vmem:[#allocation8 + $0x894] ss:$40 sps:$4 sm:$0xff]   ;;  %v24532_v51 = vld [vmem:[#allocation8 + $0x1048] ss:$40 sps:$4 sm:$0xff]  }
 0x68d   :  { %12534 = vmatprep.subr.bf16.mxu0 %v24471_v57  ;;  %v24535_v57 = vld [vmem:[#allocation8 + $0x890] ss:$40 sps:$4 sm:$0xff]  }
 0x68f   :  { %11979 = vmatpush1.bf16.msra.mxu1 %v24466_v42  ;;  %12526 = vmatmul.mubr.bf16.vlgmr.msra.gmra.mrb[20].mxu0 %v26836_v62  ;;  %v24540_v42 = vld [vmem:[#allocation8 + $0x109c] ss:$40 sps:$4 sm:$0xff]  }
 0x690   :  { %12535 = vmatpush1.bf16.msra.mxu0 %v24469_v58  ;;  %12566 = vmatprep.mubr.bf16.mxu0 %v26838_v52  ;;  %v24543_v58 = vld [vmem:[#allocation8 + $0x8e4] ss:$40 sps:$4 sm:$0xff]  }
 0x691   :  { %11980 = vmatprep.subr.bf16.mxu1 %v24474_v28  ;;  %12536 = vmatprep.subr.bf16.mxu0 %v24477_v49  ;;  %v24538_v28 = vld [vmem:[#allocation8 + $0x1098] ss:$40 sps:$4 sm:$0xff]  }
 0x692   :  { %v24541_v49 = vld [vmem:[#allocation8 + $0x8e0] ss:$40 sps:$4 sm:$0xff]  }
 0x693   :  { %11981 = vmatpush1.bf16.msra.mxu1 %v24472_v59  ;;  %v24546_v59 = vld [vmem:[#allocation8 + $0x10ec] ss:$40 sps:$4 sm:$0xff]  }
 0x694   :  { %12537 = vmatpush1.bf16.msra.mxu0 %v24475_v60  ;;  %11982 = vmatprep.subr.bf16.mxu1 %v24480_v61  ;;  %v24549_v61 = vld [vmem:[#allocation8 + $0x934] ss:$40 sps:$4 sm:$0xff]  }
 0x695   :  { %12538 = vmatprep.subr.bf16.mxu0 %v24483_v34 }
 0x697   :  { %11983 = vmatpush1.bf16.msra.mxu1 %v24478_v0 }
 0x698   :  { %12539 = vmatpush1.bf16.msra.mxu0 %v24481_v1  ;;  %11984 = vmatprep.subr.bf16.mxu1 %v24486_v2  ;;  %v24544_v1 = vld [vmem:[#allocation8 + $0x10e8] ss:$40 sps:$4 sm:$0xff]  }
 0x699   :  { %12540 = vmatprep.subr.bf16.mxu0 %v24489_v3  ;;  %v24547_v3 = vld [vmem:[#allocation8 + $0x930] ss:$40 sps:$4 sm:$0xff]  }
 0x69b   :  { %11985 = vmatpush1.bf16.msra.mxu1 %v24484_v4  ;;  %v24552_v4 = vld [vmem:[#allocation8 + $0x113c] ss:$40 sps:$4 sm:$0xff]  }
 0x69c   :  { %12541 = vmatpush1.bf16.msra.mxu0 %v24487_v9  ;;  %11986 = vmatprep.subr.bf16.mxu1 %v24492_v63  ;;  %v24555_v9 = vld [vmem:[#allocation8 + $0x984] ss:$40 sps:$4 sm:$0xff]   ;;  %v24550_v63 = vld [vmem:[#allocation8 + $0x1138] ss:$40 sps:$4 sm:$0xff]  }
 0x69d   :  { %12542 = vmatprep.subr.bf16.mxu0 %v24495_v6  ;;  %v24553_v6 = vld [vmem:[#allocation8 + $0x980] ss:$40 sps:$4 sm:$0xff]  }
 0x69f   :  { %11987 = vmatpush1.bf16.msra.mxu1 %v24490_v7  ;;  %v24558_v7 = vld [vmem:[#allocation8 + $0x118c] ss:$40 sps:$4 sm:$0xff]  }
 0x6a0   :  { %12543 = vmatpush1.bf16.msra.mxu0 %v24493_v12  ;;  %11988 = vmatprep.subr.bf16.mxu1 %v24498_v16  ;;  %v24561_v12 = vld [vmem:[#allocation8 + $0x9d4] ss:$40 sps:$4 sm:$0xff]   ;;  %v24556_v16 = vld [vmem:[#allocation8 + $0x1188] ss:$40 sps:$4 sm:$0xff]  }
 0x6a1   :  { %12544 = vmatprep.subr.bf16.mxu0 %v24501_v22  ;;  %v24559_v22 = vld [vmem:[#allocation8 + $0x9d0] ss:$40 sps:$4 sm:$0xff]  }
 0x6a3   :  { %11989 = vmatpush1.bf16.msra.mxu1 %v24496_v44  ;;  %v24564_v44 = vld [vmem:[#allocation8 + $0x11dc] ss:$40 sps:$4 sm:$0xff]  }
 0x6a4   :  { %12545 = vmatpush1.bf16.msra.mxu0 %v24499_v26  ;;  %11990 = vmatprep.subr.bf16.mxu1 %v24504_v23  ;;  %v24567_v26 = vld [vmem:[#allocation8 + $0xa24] ss:$40 sps:$4 sm:$0xff]   ;;  %v24562_v23 = vld [vmem:[#allocation8 + $0x11d8] ss:$40 sps:$4 sm:$0xff]  }
 0x6a5   :  { %12546 = vmatprep.subr.bf16.mxu0 %v24507_v24  ;;  %v24565_v24 = vld [vmem:[#allocation8 + $0xa20] ss:$40 sps:$4 sm:$0xff]  }
 0x6a7   :  { %11991 = vmatpush1.bf16.msra.mxu1 %v24502_v25  ;;  %v24570_v25 = vld [vmem:[#allocation8 + $0x122c] ss:$40 sps:$4 sm:$0xff]  }
 0x6a8   :  { %12547 = vmatpush1.bf16.msra.mxu0 %v24505_v27  ;;  %12001 = vmatprep.subr.bf16.mxu1 %v24510_v48  ;;  %v24573_v27 = vld [vmem:[#allocation8 + $0xa74] ss:$40 sps:$4 sm:$0xff]   ;;  %v24568_v48 = vld [vmem:[#allocation8 + $0x1228] ss:$40 sps:$4 sm:$0xff]  }
 0x6a9   :  { %12548 = vmatprep.subr.bf16.mxu0 %v24513_v30  ;;  %v24571_v30 = vld [vmem:[#allocation8 + $0xa70] ss:$40 sps:$4 sm:$0xff]  }
 0x6aa   :  { %11993 = vmatmul.mubr.bf16.vlgmr.msra.gmra.mrb[12].mxu1 %v26883_v43 }
 0x6ab   :  { %12002 = vmatpush1.bf16.msra.mxu1 %v24508_v31  ;;  %12033 = vmatprep.mubr.bf16.mxu1 %v26886_v56  ;;  %v24576_v31 = vld [vmem:[#allocation8 + $0x127c] ss:$40 sps:$4 sm:$0xff]  }
 0x6ac   :  { %12549 = vmatpush1.bf16.msra.mxu0 %v24511_v32  ;;  %12003 = vmatprep.subr.bf16.mxu1 %v24516_v35  ;;  %v24579_v32 = vld [vmem:[#allocation8 + $0xac4] ss:$40 sps:$4 sm:$0xff]   ;;  %v24574_v35 = vld [vmem:[#allocation8 + $0x1278] ss:$40 sps:$4 sm:$0xff]  }
 0x6ad   :  { %12550 = vmatprep.subr.bf16.mxu0 %v24519_v10  ;;  %v24577_v10 = vld [vmem:[#allocation8 + $0xac0] ss:$40 sps:$4 sm:$0xff]  }
 0x6af   :  { %12004 = vmatpush1.bf16.msra.mxu1 %v24514_v36  ;;  %v24582_v36 = vld [vmem:[#allocation8 + $0x12cc] ss:$40 sps:$4 sm:$0xff]  }
 0x6b0   :  { %12551 = vmatpush1.bf16.msra.mxu0 %v24517_v37  ;;  %12005 = vmatprep.subr.bf16.mxu1 %v24522_v11  ;;  %v24585_v37 = vld [vmem:[#allocation8 + $0xb14] ss:$40 sps:$4 sm:$0xff]   ;;  %v24580_v11 = vld [vmem:[#allocation8 + $0x12c8] ss:$40 sps:$4 sm:$0xff]  }
 0x6b1   :  { %12552 = vmatprep.subr.bf16.mxu0 %v24525_v53  ;;  %v24583_v53 = vld [vmem:[#allocation8 + $0xb10] ss:$40 sps:$4 sm:$0xff]  }
 0x6b3   :  { %12006 = vmatpush1.bf16.msra.mxu1 %v24520_v39  ;;  %v24588_v39 = vld [vmem:[#allocation8 + $0x131c] ss:$40 sps:$4 sm:$0xff]  }
 0x6b4   :  { %12553 = vmatpush1.bf16.msra.mxu0 %v24523_v15  ;;  %12007 = vmatprep.subr.bf16.mxu1 %v24528_v38  ;;  %v24591_v15 = vld [vmem:[#allocation8 + $0xb64] ss:$40 sps:$4 sm:$0xff]   ;;  %v24586_v38 = vld [vmem:[#allocation8 + $0x1318] ss:$40 sps:$4 sm:$0xff]  }
 0x6b5   :  { %12554 = vmatprep.subr.bf16.mxu0 %v24531_v40  ;;  %v24589_v40 = vld [vmem:[#allocation8 + $0xb60] ss:$40 sps:$4 sm:$0xff]  }
 0x6b7   :  { %12008 = vmatpush1.bf16.msra.mxu1 %v24526_v41  ;;  %v24594_v41 = vld [vmem:[#allocation8 + $0x136c] ss:$40 sps:$4 sm:$0xff]  }
 0x6b8   :  { %12555 = vmatpush1.bf16.msra.mxu0 %v24529_v47  ;;  %12009 = vmatprep.subr.bf16.mxu1 %v24534_v50  ;;  %v24597_v47 = vld [vmem:[#allocation8 + $0xbb4] ss:$40 sps:$4 sm:$0xff]   ;;  %v24592_v50 = vld [vmem:[#allocation8 + $0x1368] ss:$40 sps:$4 sm:$0xff]  }
 0x6b9   :  { %12556 = vmatprep.subr.bf16.mxu0 %v24537_v54  ;;  %v24595_v54 = vld [vmem:[#allocation8 + $0xbb0] ss:$40 sps:$4 sm:$0xff]  }
 0x6bb   :  { %12010 = vmatpush1.bf16.msra.mxu1 %v24532_v51  ;;  %v24600_v51 = vld [vmem:[#allocation8 + $0x13bc] ss:$40 sps:$4 sm:$0xff]  }
 0x6bc   :  { %12557 = vmatpush1.bf16.msra.mxu0 %v24535_v57  ;;  %12011 = vmatprep.subr.bf16.mxu1 %v24540_v42  ;;  %v24603_v57 = vld [vmem:[#allocation8 + $0xc04] ss:$40 sps:$4 sm:$0xff]   ;;  %v24598_v42 = vld [vmem:[#allocation8 + $0x13b8] ss:$40 sps:$4 sm:$0xff]  }
 0x6bd   :  { %v26935_v60 = vpop.f32.mrb[8].mxu1  ;;  %12558 = vmatprep.subr.bf16.mxu0 %v24543_v58  ;;  %v24601_v58 = vld [vmem:[#allocation8 + $0xc00] ss:$40 sps:$4 sm:$0xff]  }
 0x6be   :  { %v26937_v34 = vpop.f32.mrb[9].mxu1 }
 0x6bf   :  { %12012 = vmatpush1.bf16.msra.mxu1 %v24538_v28  ;;  %v11875_v0 = vpop.f32.mrb[10].mxu1  ;;  %v24606_v28 = vld [vmem:[#allocation8 + $0x140c] ss:$40 sps:$4 sm:$0xff]  }
 0x6c0   :  { %12559 = vmatpush1.bf16.msra.mxu0 %v24541_v49  ;;  %v11876_v2 = vpop.f32.mrb[11].mxu1  ;;  %12013 = vmatprep.subr.bf16.mxu1 %v24546_v59  ;;  %v24609_v49 = vld [vmem:[#allocation8 + $0xc54] ss:$40 sps:$4 sm:$0xff]   ;;  %v24604_v59 = vld [vmem:[#allocation8 + $0x1408] ss:$40 sps:$4 sm:$0xff]  }
 0x6c1   :  { %12560 = vmatprep.subr.bf16.mxu0 %v24549_v61  ;;  %v24607_v61 = vld [vmem:[#allocation8 + $0xc50] ss:$40 sps:$4 sm:$0xff]   ;;  %v24612_v0 = vld [vmem:[#allocation8 + $0x145c] ss:$40 sps:$4 sm:$0xff]  }
 0x6c2   :  { %v24610_v2 = vld [vmem:[#allocation8 + $0x1458] ss:$40 sps:$4 sm:$0xff]  }
 0x6c3   :  { %12014 = vmatpush1.bf16.msra.mxu1 %v24544_v1  ;;  %v24615_v1 = vld [vmem:[#allocation8 + $0xca4] ss:$40 sps:$4 sm:$0xff]  }
 0x6c4   :  { %12561 = vmatpush1.bf16.msra.mxu0 %v24547_v3  ;;  %12015 = vmatprep.subr.bf16.mxu1 %v24552_v4  ;;  %v24613_v3 = vld [vmem:[#allocation8 + $0xca0] ss:$40 sps:$4 sm:$0xff]   ;;  %v24618_v4 = vld [vmem:[#allocation8 + $0x14ac] ss:$40 sps:$4 sm:$0xff]  }
 0x6c5   :  { %12562 = vmatprep.subr.bf16.mxu0 %v24555_v9  ;;  %v24621_v9 = vld [vmem:[#allocation8 + $0xcf4] ss:$40 sps:$4 sm:$0xff]  }
 0x6c7   :  { %12016 = vmatpush1.bf16.msra.mxu1 %v24550_v63  ;;  %v24616_v63 = vld [vmem:[#allocation8 + $0x14a8] ss:$40 sps:$4 sm:$0xff]  }
 0x6c8   :  { %12563 = vmatpush1.bf16.msra.mxu0 %v24553_v6  ;;  %12017 = vmatprep.subr.bf16.mxu1 %v24558_v7  ;;  %v24619_v6 = vld [vmem:[#allocation8 + $0xcf0] ss:$40 sps:$4 sm:$0xff]   ;;  %v24624_v7 = vld [vmem:[#allocation8 + $0x14fc] ss:$40 sps:$4 sm:$0xff]  }
 0x6c9   :  { %12564 = vmatprep.subr.bf16.mxu0 %v24561_v12  ;;  %v24627_v12 = vld [vmem:[#allocation8 + $0xd44] ss:$40 sps:$4 sm:$0xff]  }
 0x6cb   :  { %12018 = vmatpush1.bf16.msra.mxu1 %v24556_v16  ;;  %v24622_v16 = vld [vmem:[#allocation8 + $0x14f8] ss:$40 sps:$4 sm:$0xff]  }
 0x6cc   :  { %12565 = vmatpush1.bf16.msra.mxu0 %v24559_v22  ;;  %12019 = vmatprep.subr.bf16.mxu1 %v24564_v44  ;;  %v24625_v22 = vld [vmem:[#allocation8 + $0xd40] ss:$40 sps:$4 sm:$0xff]   ;;  %v24630_v44 = vld [vmem:[#allocation8 + $0x154c] ss:$40 sps:$4 sm:$0xff]  }
 0x6cd   :  { %12575 = vmatprep.subr.bf16.mxu0 %v24567_v26  ;;  %v24633_v26 = vld [vmem:[#allocation8 + $0xd94] ss:$40 sps:$4 sm:$0xff]  }
 0x6cf   :  { %12020 = vmatpush1.bf16.msra.mxu1 %v24562_v23  ;;  %12567 = vmatmul.mubr.bf16.vlgmr.msra.gmra.mrb[20].mxu0 %v26848_v8  ;;  %v24628_v23 = vld [vmem:[#allocation8 + $0x1548] ss:$40 sps:$4 sm:$0xff]  }
 0x6d0   :  { %12576 = vmatpush1.bf16.msra.mxu0 %v24565_v24  ;;  %12607 = vmatprep.mubr.bf16.mxu0 %v26881_v45  ;;  %v24631_v24 = vld [vmem:[#allocation8 + $0xd90] ss:$40 sps:$4 sm:$0xff]  }
 0x6d1   :  { %12021 = vmatprep.subr.bf16.mxu1 %v24570_v25  ;;  %12577 = vmatprep.subr.bf16.mxu0 %v24573_v27  ;;  %v24636_v25 = vld [vmem:[#allocation8 + $0x159c] ss:$40 sps:$4 sm:$0xff]  }
 0x6d2   :  { %v24639_v27 = vld [vmem:[#allocation8 + $0xde4] ss:$40 sps:$4 sm:$0xff]  }
 0x6d3   :  { %12022 = vmatpush1.bf16.msra.mxu1 %v24568_v48  ;;  %v24634_v48 = vld [vmem:[#allocation8 + $0x1598] ss:$40 sps:$4 sm:$0xff]  }
 0x6d4   :  { %12578 = vmatpush1.bf16.msra.mxu0 %v24571_v30  ;;  %12023 = vmatprep.subr.bf16.mxu1 %v24576_v31  ;;  %v24637_v30 = vld [vmem:[#allocation8 + $0xde0] ss:$40 sps:$4 sm:$0xff]   ;;  %v24642_v31 = vld [vmem:[#allocation8 + $0x15ec] ss:$40 sps:$4 sm:$0xff]  }
 0x6d5   :  { %12579 = vmatprep.subr.bf16.mxu0 %v24579_v32  ;;  %v24645_v32 = vld [vmem:[#allocation8 + $0xe34] ss:$40 sps:$4 sm:$0xff]  }
 0x6d7   :  { %12024 = vmatpush1.bf16.msra.mxu1 %v24574_v35  ;;  %v24640_v35 = vld [vmem:[#allocation8 + $0x15e8] ss:$40 sps:$4 sm:$0xff]  }
 0x6d8   :  { %12580 = vmatpush1.bf16.msra.mxu0 %v24577_v10  ;;  %12025 = vmatprep.subr.bf16.mxu1 %v24582_v36  ;;  %v24643_v10 = vld [vmem:[#allocation8 + $0xe30] ss:$40 sps:$4 sm:$0xff]   ;;  %v24648_v36 = vld [vmem:[#allocation8 + $0x163c] ss:$40 sps:$4 sm:$0xff]  }
 0x6d9   :  { %12581 = vmatprep.subr.bf16.mxu0 %v24585_v37  ;;  %v24651_v37 = vld [vmem:[#allocation8 + $0xe84] ss:$40 sps:$4 sm:$0xff]  }
 0x6db   :  { %12026 = vmatpush1.bf16.msra.mxu1 %v24580_v11  ;;  %v24646_v11 = vld [vmem:[#allocation8 + $0x1638] ss:$40 sps:$4 sm:$0xff]  }
 0x6dc   :  { %12582 = vmatpush1.bf16.msra.mxu0 %v24583_v53  ;;  %12027 = vmatprep.subr.bf16.mxu1 %v24588_v39  ;;  %v24649_v53 = vld [vmem:[#allocation8 + $0xe80] ss:$40 sps:$4 sm:$0xff]   ;;  %v24654_v39 = vld [vmem:[#allocation8 + $0x168c] ss:$40 sps:$4 sm:$0xff]  }
 0x6dd   :  { %12583 = vmatprep.subr.bf16.mxu0 %v24591_v15  ;;  %v24657_v15 = vld [vmem:[#allocation8 + $0xed4] ss:$40 sps:$4 sm:$0xff]  }
 0x6df   :  { %12028 = vmatpush1.bf16.msra.mxu1 %v24586_v38  ;;  %v24652_v38 = vld [vmem:[#allocation8 + $0x1688] ss:$40 sps:$4 sm:$0xff]  }
 0x6e0   :  { %12584 = vmatpush1.bf16.msra.mxu0 %v24589_v40  ;;  %12029 = vmatprep.subr.bf16.mxu1 %v24594_v41  ;;  %v24655_v40 = vld [vmem:[#allocation8 + $0xed0] ss:$40 sps:$4 sm:$0xff]   ;;  %v24660_v41 = vld [vmem:[#allocation8 + $0x16dc] ss:$40 sps:$4 sm:$0xff]  }
 0x6e1   :  { %12585 = vmatprep.subr.bf16.mxu0 %v24597_v47  ;;  %v24663_v47 = vld [vmem:[#allocation8 + $0xf24] ss:$40 sps:$4 sm:$0xff]  }
 0x6e3   :  { %12030 = vmatpush1.bf16.msra.mxu1 %v24592_v50  ;;  %v24658_v50 = vld [vmem:[#allocation8 + $0x16d8] ss:$40 sps:$4 sm:$0xff]  }
 0x6e4   :  { %12586 = vmatpush1.bf16.msra.mxu0 %v24595_v54  ;;  %12031 = vmatprep.subr.bf16.mxu1 %v24600_v51  ;;  %v24661_v54 = vld [vmem:[#allocation8 + $0xf20] ss:$40 sps:$4 sm:$0xff]   ;;  %v24666_v51 = vld [vmem:[#allocation8 + $0x172c] ss:$40 sps:$4 sm:$0xff]  }
 0x6e5   :  { %12587 = vmatprep.subr.bf16.mxu0 %v24603_v57  ;;  %v24669_v57 = vld [vmem:[#allocation8 + $0xf74] ss:$40 sps:$4 sm:$0xff]  }
 0x6e7   :  { %12032 = vmatpush1.bf16.msra.mxu1 %v24598_v42  ;;  %v24664_v42 = vld [vmem:[#allocation8 + $0x1728] ss:$40 sps:$4 sm:$0xff]  }
 0x6e8   :  { %12588 = vmatpush1.bf16.msra.mxu0 %v24601_v58  ;;  %12042 = vmatprep.subr.bf16.mxu1 %v24606_v28  ;;  %v24667_v58 = vld [vmem:[#allocation8 + $0xf70] ss:$40 sps:$4 sm:$0xff]   ;;  %v24672_v28 = vld [vmem:[#allocation8 + $0x177c] ss:$40 sps:$4 sm:$0xff]  }
 0x6e9   :  { %12589 = vmatprep.subr.bf16.mxu0 %v24609_v49  ;;  %v24675_v49 = vld [vmem:[#allocation8 + $0xfc4] ss:$40 sps:$4 sm:$0xff]  }
 0x6ea   :  { %12034 = vmatmul.mubr.bf16.vlgmr.msra.gmra.mrb[12].mxu1 %v26898_v17 }
 0x6eb   :  { %12043 = vmatpush1.bf16.msra.mxu1 %v24604_v59  ;;  %12074 = vmatprep.mubr.bf16.mxu1 %v26916_v29  ;;  %v24670_v59 = vld [vmem:[#allocation8 + $0x1778] ss:$40 sps:$4 sm:$0xff]  }
 0x6ec   :  { %12590 = vmatpush1.bf16.msra.mxu0 %v24607_v61  ;;  %12044 = vmatprep.subr.bf16.mxu1 %v24612_v0  ;;  %v24673_v61 = vld [vmem:[#allocation8 + $0xfc0] ss:$40 sps:$4 sm:$0xff]   ;;  %v24678_v0 = vld [vmem:[#allocation8 + $0x17cc] ss:$40 sps:$4 sm:$0xff]  }
 0x6ed   :  { %12591 = vmatprep.subr.bf16.mxu0 %v24615_v1  ;;  %v24681_v1 = vld [vmem:[#allocation8 + $0x1014] ss:$40 sps:$4 sm:$0xff]  }
 0x6ef   :  { %12045 = vmatpush1.bf16.msra.mxu1 %v24610_v2  ;;  %v24676_v2 = vld [vmem:[#allocation8 + $0x17c8] ss:$40 sps:$4 sm:$0xff]  }
 0x6f0   :  { %12592 = vmatpush1.bf16.msra.mxu0 %v24613_v3  ;;  %12046 = vmatprep.subr.bf16.mxu1 %v24618_v4  ;;  %v24679_v3 = vld [vmem:[#allocation8 + $0x1010] ss:$40 sps:$4 sm:$0xff]   ;;  %v24684_v4 = vld [vmem:[#allocation8 + $0x181c] ss:$40 sps:$4 sm:$0xff]  }
 0x6f1   :  { %12593 = vmatprep.subr.bf16.mxu0 %v24621_v9  ;;  %v24687_v9 = vld [vmem:[#allocation8 + $0x1064] ss:$40 sps:$4 sm:$0xff]  }
 0x6f3   :  { %12047 = vmatpush1.bf16.msra.mxu1 %v24616_v63  ;;  %v24682_v63 = vld [vmem:[#allocation8 + $0x1818] ss:$40 sps:$4 sm:$0xff]  }
 0x6f4   :  { %12594 = vmatpush1.bf16.msra.mxu0 %v24619_v6  ;;  %12048 = vmatprep.subr.bf16.mxu1 %v24624_v7  ;;  %v24685_v6 = vld [vmem:[#allocation8 + $0x1060] ss:$40 sps:$4 sm:$0xff]   ;;  %v24690_v7 = vld [vmem:[#allocation8 + $0x186c] ss:$40 sps:$4 sm:$0xff]  }
 0x6f5   :  { %12595 = vmatprep.subr.bf16.mxu0 %v24627_v12  ;;  %v24693_v12 = vld [vmem:[#allocation8 + $0x10b4] ss:$40 sps:$4 sm:$0xff]  }
 0x6f7   :  { %12049 = vmatpush1.bf16.msra.mxu1 %v24622_v16  ;;  %v24688_v16 = vld [vmem:[#allocation8 + $0x1868] ss:$40 sps:$4 sm:$0xff]  }
 0x6f8   :  { %12596 = vmatpush1.bf16.msra.mxu0 %v24625_v22  ;;  %12050 = vmatprep.subr.bf16.mxu1 %v24630_v44  ;;  %v24691_v22 = vld [vmem:[#allocation8 + $0x10b0] ss:$40 sps:$4 sm:$0xff]   ;;  %v24696_v44 = vld [vmem:[#allocation8 + $0x18bc] ss:$40 sps:$4 sm:$0xff]  }
 0x6f9   :  { %12597 = vmatprep.subr.bf16.mxu0 %v24633_v26  ;;  %v24699_v26 = vld [vmem:[#allocation8 + $0x1104] ss:$40 sps:$4 sm:$0xff]  }
 0x6fb   :  { %12051 = vmatpush1.bf16.msra.mxu1 %v24628_v23 }
 0x6fc   :  { %12598 = vmatpush1.bf16.msra.mxu0 %v24631_v24  ;;  %12052 = vmatprep.subr.bf16.mxu1 %v24636_v25  ;;  %v24694_v25 = vld [vmem:[#allocation8 + $0x18b8] ss:$40 sps:$4 sm:$0xff]  }
 0x6fd   :  { %12599 = vmatprep.subr.bf16.mxu0 %v24639_v27 }
 0x6ff   :  { %12053 = vmatpush1.bf16.msra.mxu1 %v24634_v48  ;;  %v24697_v48 = vld [vmem:[#allocation8 + $0x1100] ss:$40 sps:$4 sm:$0xff]  }
 0x700   :  { %12600 = vmatpush1.bf16.msra.mxu0 %v24637_v30  ;;  %12054 = vmatprep.subr.bf16.mxu1 %v24642_v31  ;;  %v24702_v30 = vld [vmem:[#allocation8 + $0x1c] ss:$40 sps:$4 sm:$0xff]  }
 0x701   :  { %12601 = vmatprep.subr.bf16.mxu0 %v24645_v32  ;;  %v24705_v32 = vld [vmem:[#allocation8 + $0x1154] ss:$40 sps:$4 sm:$0xff]  }
 0x703   :  { %12055 = vmatpush1.bf16.msra.mxu1 %v24640_v35  ;;  %v24700_v35 = vld [vmem:[#allocation8 + $0x18] ss:$40 sps:$4 sm:$0xff]  }
 0x704   :  { %12602 = vmatpush1.bf16.msra.mxu0 %v24643_v10  ;;  %12056 = vmatprep.subr.bf16.mxu1 %v24648_v36  ;;  %v24703_v10 = vld [vmem:[#allocation8 + $0x1150] ss:$40 sps:$4 sm:$0xff]   ;;  %v24708_v36 = vld [vmem:[#allocation8 + $0x6c] ss:$40 sps:$4 sm:$0xff]  }
 0x705   :  { %12603 = vmatprep.subr.bf16.mxu0 %v24651_v37  ;;  %v24711_v37 = vld [vmem:[#allocation8 + $0x11a4] ss:$40 sps:$4 sm:$0xff]  }
 0x707   :  { %12057 = vmatpush1.bf16.msra.mxu1 %v24646_v11  ;;  %v24706_v11 = vld [vmem:[#allocation8 + $0x68] ss:$40 sps:$4 sm:$0xff]  }
 0x708   :  { %12604 = vmatpush1.bf16.msra.mxu0 %v24649_v53  ;;  %12058 = vmatprep.subr.bf16.mxu1 %v24654_v39  ;;  %v24709_v53 = vld [vmem:[#allocation8 + $0x11a0] ss:$40 sps:$4 sm:$0xff]   ;;  %v24714_v39 = vld [vmem:[#allocation8 + $0xbc] ss:$40 sps:$4 sm:$0xff]  }
 0x709   :  { %12605 = vmatprep.subr.bf16.mxu0 %v24657_v15  ;;  %v24717_v15 = vld [vmem:[#allocation8 + $0x11f4] ss:$40 sps:$4 sm:$0xff]  }
 0x70b   :  { %12059 = vmatpush1.bf16.msra.mxu1 %v24652_v38  ;;  %v24712_v38 = vld [vmem:[#allocation8 + $0xb8] ss:$40 sps:$4 sm:$0xff]  }
 0x70c   :  { %12606 = vmatpush1.bf16.msra.mxu0 %v24655_v40  ;;  %12060 = vmatprep.subr.bf16.mxu1 %v24660_v41  ;;  %v24715_v40 = vld [vmem:[#allocation8 + $0x11f0] ss:$40 sps:$4 sm:$0xff]   ;;  %v24720_v41 = vld [vmem:[#allocation8 + $0x10c] ss:$40 sps:$4 sm:$0xff]  }
 0x70d   :  { %12616 = vmatprep.subr.bf16.mxu0 %v24663_v47  ;;  %v24723_v47 = vld [vmem:[#allocation8 + $0x1244] ss:$40 sps:$4 sm:$0xff]  }
 0x70f   :  { %12061 = vmatpush1.bf16.msra.mxu1 %v24658_v50  ;;  %12608 = vmatmul.mubr.bf16.vlgmr.msra.gmra.mrb[20].mxu0 %v26883_v43  ;;  %v24718_v50 = vld [vmem:[#allocation8 + $0x108] ss:$40 sps:$4 sm:$0xff]  }
 0x710   :  { %12617 = vmatpush1.bf16.msra.mxu0 %v24661_v54  ;;  %12648 = vmatprep.mubr.bf16.mxu0 %v26886_v56  ;;  %v24726_v54 = vld [vmem:[#allocation8 + $0x15c] ss:$40 sps:$4 sm:$0xff]  }
 0x711   :  { %12062 = vmatprep.subr.bf16.mxu1 %v24666_v51  ;;  %12618 = vmatprep.subr.bf16.mxu0 %v24669_v57  ;;  %v24729_v51 = vld [vmem:[#allocation8 + $0x1294] ss:$40 sps:$4 sm:$0xff]   ;;  %v24724_v57 = vld [vmem:[#allocation8 + $0x158] ss:$40 sps:$4 sm:$0xff]  }
 0x713   :  { %12063 = vmatpush1.bf16.msra.mxu1 %v24664_v42  ;;  %v24727_v42 = vld [vmem:[#allocation8 + $0x1290] ss:$40 sps:$4 sm:$0xff]  }
 0x714   :  { %12619 = vmatpush1.bf16.msra.mxu0 %v24667_v58  ;;  %12064 = vmatprep.subr.bf16.mxu1 %v24672_v28  ;;  %v24732_v58 = vld [vmem:[#allocation8 + $0x1ac] ss:$40 sps:$4 sm:$0xff]  }
 0x715   :  { %12620 = vmatprep.subr.bf16.mxu0 %v24675_v49  ;;  %v24735_v28 = vld [vmem:[#allocation8 + $0x12e4] ss:$40 sps:$4 sm:$0xff]   ;;  %v24730_v49 = vld [vmem:[#allocation8 + $0x1a8] ss:$40 sps:$4 sm:$0xff]  }
 0x717   :  { %12065 = vmatpush1.bf16.msra.mxu1 %v24670_v59  ;;  %v24733_v59 = vld [vmem:[#allocation8 + $0x12e0] ss:$40 sps:$4 sm:$0xff]  }
 0x718   :  { %12621 = vmatpush1.bf16.msra.mxu0 %v24673_v61  ;;  %12066 = vmatprep.subr.bf16.mxu1 %v24678_v0  ;;  %v24738_v61 = vld [vmem:[#allocation8 + $0x1fc] ss:$40 sps:$4 sm:$0xff]  }
 0x719   :  { %12622 = vmatprep.subr.bf16.mxu0 %v24681_v1  ;;  %v24741_v0 = vld [vmem:[#allocation8 + $0x1334] ss:$40 sps:$4 sm:$0xff]   ;;  %v24736_v1 = vld [vmem:[#allocation8 + $0x1f8] ss:$40 sps:$4 sm:$0xff]  }
 0x71b   :  { %12067 = vmatpush1.bf16.msra.mxu1 %v24676_v2  ;;  %v24739_v2 = vld [vmem:[#allocation8 + $0x1330] ss:$40 sps:$4 sm:$0xff]  }
 0x71c   :  { %12623 = vmatpush1.bf16.msra.mxu0 %v24679_v3  ;;  %12068 = vmatprep.subr.bf16.mxu1 %v24684_v4  ;;  %v24744_v3 = vld [vmem:[#allocation8 + $0x24c] ss:$40 sps:$4 sm:$0xff]  }
 0x71d   :  { %12624 = vmatprep.subr.bf16.mxu0 %v24687_v9  ;;  %v24747_v4 = vld [vmem:[#allocation8 + $0x1384] ss:$40 sps:$4 sm:$0xff]   ;;  %v24742_v9 = vld [vmem:[#allocation8 + $0x248] ss:$40 sps:$4 sm:$0xff]  }
 0x71f   :  { %12069 = vmatpush1.bf16.msra.mxu1 %v24682_v63  ;;  %v24745_v63 = vld [vmem:[#allocation8 + $0x1380] ss:$40 sps:$4 sm:$0xff]  }
 0x720   :  { %12625 = vmatpush1.bf16.msra.mxu0 %v24685_v6  ;;  %12070 = vmatprep.subr.bf16.mxu1 %v24690_v7  ;;  %v24750_v6 = vld [vmem:[#allocation8 + $0x29c] ss:$40 sps:$4 sm:$0xff]  }
 0x721   :  { %12626 = vmatprep.subr.bf16.mxu0 %v24693_v12  ;;  %v24753_v7 = vld [vmem:[#allocation8 + $0x13d4] ss:$40 sps:$4 sm:$0xff]   ;;  %v24748_v12 = vld [vmem:[#allocation8 + $0x298] ss:$40 sps:$4 sm:$0xff]  }
 0x722   :  { %v26945_v23 = vpop.f32.mrb[16].mxu0 }
 0x723   :  { %12071 = vmatpush1.bf16.msra.mxu1 %v24688_v16  ;;  %v26947_v24 = vpop.f32.mrb[17].mxu0  ;;  %v24751_v16 = vld [vmem:[#allocation8 + $0x13d0] ss:$40 sps:$4 sm:$0xff]  }
 0x724   :  { %v12285_v27 = vpop.f32.mrb[18].mxu0  ;;  %12627 = vmatpush1.bf16.msra.mxu0 %v24691_v22  ;;  %12072 = vmatprep.subr.bf16.mxu1 %v24696_v44  ;;  %v24756_v22 = vld [vmem:[#allocation8 + $0x2ec] ss:$40 sps:$4 sm:$0xff]  }
 0x725   :  { %v12286_v31 = vpop.f32.mrb[19].mxu0  ;;  %12628 = vmatprep.subr.bf16.mxu0 %v24699_v26  ;;  %v24759_v44 = vld [vmem:[#allocation8 + $0x1424] ss:$40 sps:$4 sm:$0xff]   ;;  %v24754_v26 = vld [vmem:[#allocation8 + $0x2e8] ss:$40 sps:$4 sm:$0xff]  }
 0x726   :  { %v24762_v27 = vld [vmem:[#allocation8 + $0x33c] ss:$40 sps:$4 sm:$0xff]   ;;  %v24763_v31 = vld [vmem:[#allocation8 + $0x1470] ss:$40 sps:$4 sm:$0xff]  }
 0x727   :  { %12073 = vmatpush1.bf16.msra.mxu1 %v24694_v25  ;;  %v24757_v25 = vld [vmem:[#allocation8 + $0x1420] ss:$40 sps:$4 sm:$0xff]  }
 0x728   :  { %12629 = vmatpush1.bf16.msra.mxu0 %v24697_v48  ;;  %12288 = vmatprep.subr.bf16.mxu1 %v24702_v30  ;;  %v24765_v48 = vld [vmem:[#allocation8 + $0x1474] ss:$40 sps:$4 sm:$0xff]   ;;  %v24760_v30 = vld [vmem:[#allocation8 + $0x338] ss:$40 sps:$4 sm:$0xff]  }
 0x729   :  { %12630 = vmatprep.subr.bf16.mxu0 %v24705_v32  ;;  %v24768_v32 = vld [vmem:[#allocation8 + $0x38c] ss:$40 sps:$4 sm:$0xff]  }
 0x72a   :  { %12075 = vmatmul.mubr.bf16.vlgmr.msra.gmra.mrb[12].mxu1 %v26918_v55 }
 0x72b   :  { %12289 = vmatpush1.bf16.msra.mxu1 %v24700_v35  ;;  %12320 = vmatprep.mubr.bf16.mxu1 %v26823_v5  ;;  %v24721_v5 = vld [vmem:[#allocation8 + $0x1240] ss:$40 sps:$4 sm:$0xff]   ;;  %v24771_v35 = vld [vmem:[#allocation8 + $0x14c4] ss:$40 sps:$4 sm:$0xff]  }
 0x72c   :  { %12631 = vmatpush1.bf16.msra.mxu0 %v24703_v10  ;;  %12290 = vmatprep.subr.bf16.mxu1 %v24708_v36  ;;  %v24766_v10 = vld [vmem:[#allocation8 + $0x388] ss:$40 sps:$4 sm:$0xff]  }
 0x72d   :  { %12632 = vmatprep.subr.bf16.mxu0 %v24711_v37  ;;  %v24769_v36 = vld [vmem:[#allocation8 + $0x14c0] ss:$40 sps:$4 sm:$0xff]   ;;  %v24774_v37 = vld [vmem:[#allocation8 + $0x3dc] ss:$40 sps:$4 sm:$0xff]  }
 0x72f   :  { %12291 = vmatpush1.bf16.msra.mxu1 %v24706_v11  ;;  %v24777_v11 = vld [vmem:[#allocation8 + $0x1514] ss:$40 sps:$4 sm:$0xff]  }
 0x730   :  { %12633 = vmatpush1.bf16.msra.mxu0 %v24709_v53  ;;  %12292 = vmatprep.subr.bf16.mxu1 %v24714_v39  ;;  %v24772_v53 = vld [vmem:[#allocation8 + $0x3d8] ss:$40 sps:$4 sm:$0xff]  }
 0x731   :  { %12634 = vmatprep.subr.bf16.mxu0 %v24717_v15  ;;  %v24775_v39 = vld [vmem:[#allocation8 + $0x1510] ss:$40 sps:$4 sm:$0xff]   ;;  %v24780_v15 = vld [vmem:[#allocation8 + $0x42c] ss:$40 sps:$4 sm:$0xff]  }
 0x733   :  { %12293 = vmatpush1.bf16.msra.mxu1 %v24712_v38  ;;  %v24783_v38 = vld [vmem:[#allocation8 + $0x1564] ss:$40 sps:$4 sm:$0xff]  }
 0x734   :  { %12635 = vmatpush1.bf16.msra.mxu0 %v24715_v40  ;;  %12294 = vmatprep.subr.bf16.mxu1 %v24720_v41  ;;  %v24778_v40 = vld [vmem:[#allocation8 + $0x428] ss:$40 sps:$4 sm:$0xff]  }
 0x735   :  { %12636 = vmatprep.subr.bf16.mxu0 %v24723_v47  ;;  %v24781_v41 = vld [vmem:[#allocation8 + $0x1560] ss:$40 sps:$4 sm:$0xff]   ;;  %v24786_v47 = vld [vmem:[#allocation8 + $0x47c] ss:$40 sps:$4 sm:$0xff]  }
 0x737   :  { %12295 = vmatpush1.bf16.msra.mxu1 %v24718_v50  ;;  %v24789_v50 = vld [vmem:[#allocation8 + $0x15b4] ss:$40 sps:$4 sm:$0xff]  }
 0x738   :  { %12637 = vmatpush1.bf16.msra.mxu0 %v24721_v5  ;;  %12296 = vmatprep.subr.bf16.mxu1 %v24726_v54  ;;  %v24784_v5 = vld [vmem:[#allocation8 + $0x478] ss:$40 sps:$4 sm:$0xff]  }
 0x739   :  { %12638 = vmatprep.subr.bf16.mxu0 %v24729_v51  ;;  %v24787_v54 = vld [vmem:[#allocation8 + $0x15b0] ss:$40 sps:$4 sm:$0xff]   ;;  %v24792_v51 = vld [vmem:[#allocation8 + $0x4cc] ss:$40 sps:$4 sm:$0xff]  }
 0x73b   :  { %12297 = vmatpush1.bf16.msra.mxu1 %v24724_v57  ;;  %v24795_v57 = vld [vmem:[#allocation8 + $0x1604] ss:$40 sps:$4 sm:$0xff]  }
 0x73c   :  { %12639 = vmatpush1.bf16.msra.mxu0 %v24727_v42  ;;  %12298 = vmatprep.subr.bf16.mxu1 %v24732_v58  ;;  %v24790_v42 = vld [vmem:[#allocation8 + $0x4c8] ss:$40 sps:$4 sm:$0xff]  }
 0x73d   :  { %12640 = vmatprep.subr.bf16.mxu0 %v24735_v28  ;;  %v24793_v58 = vld [vmem:[#allocation8 + $0x1600] ss:$40 sps:$4 sm:$0xff]   ;;  %v24798_v28 = vld [vmem:[#allocation8 + $0x51c] ss:$40 sps:$4 sm:$0xff]  }
 0x73f   :  { %12299 = vmatpush1.bf16.msra.mxu1 %v24730_v49  ;;  %v24801_v49 = vld [vmem:[#allocation8 + $0x1654] ss:$40 sps:$4 sm:$0xff]  }
 0x740   :  { %12641 = vmatpush1.bf16.msra.mxu0 %v24733_v59  ;;  %12300 = vmatprep.subr.bf16.mxu1 %v24738_v61  ;;  %v24796_v59 = vld [vmem:[#allocation8 + $0x518] ss:$40 sps:$4 sm:$0xff]  }
 0x741   :  { %12642 = vmatprep.subr.bf16.mxu0 %v24741_v0  ;;  %v24799_v61 = vld [vmem:[#allocation8 + $0x1650] ss:$40 sps:$4 sm:$0xff]   ;;  %v24804_v0 = vld [vmem:[#allocation8 + $0x56c] ss:$40 sps:$4 sm:$0xff]  }
 0x743   :  { %12301 = vmatpush1.bf16.msra.mxu1 %v24736_v1  ;;  %v24807_v1 = vld [vmem:[#allocation8 + $0x16a4] ss:$40 sps:$4 sm:$0xff]  }
 0x744   :  { %12643 = vmatpush1.bf16.msra.mxu0 %v24739_v2  ;;  %12302 = vmatprep.subr.bf16.mxu1 %v24744_v3  ;;  %v24802_v2 = vld [vmem:[#allocation8 + $0x568] ss:$40 sps:$4 sm:$0xff]  }
 0x745   :  { %12644 = vmatprep.subr.bf16.mxu0 %v24747_v4  ;;  %v24805_v3 = vld [vmem:[#allocation8 + $0x16a0] ss:$40 sps:$4 sm:$0xff]   ;;  %v24810_v4 = vld [vmem:[#allocation8 + $0x5bc] ss:$40 sps:$4 sm:$0xff]  }
 0x747   :  { %12303 = vmatpush1.bf16.msra.mxu1 %v24742_v9  ;;  %v24813_v9 = vld [vmem:[#allocation8 + $0x16f4] ss:$40 sps:$4 sm:$0xff]  }
 0x748   :  { %12645 = vmatpush1.bf16.msra.mxu0 %v24745_v63  ;;  %12304 = vmatprep.subr.bf16.mxu1 %v24750_v6  ;;  %v24808_v63 = vld [vmem:[#allocation8 + $0x5b8] ss:$40 sps:$4 sm:$0xff]  }
 0x749   :  { %12646 = vmatprep.subr.bf16.mxu0 %v24753_v7  ;;  %v24811_v6 = vld [vmem:[#allocation8 + $0x16f0] ss:$40 sps:$4 sm:$0xff]   ;;  %v24816_v7 = vld [vmem:[#allocation8 + $0x60c] ss:$40 sps:$4 sm:$0xff]  }
 0x74b   :  { %12305 = vmatpush1.bf16.msra.mxu1 %v24748_v12  ;;  %v24819_v12 = vld [vmem:[#allocation8 + $0x1744] ss:$40 sps:$4 sm:$0xff]  }
 0x74c   :  { %12647 = vmatpush1.bf16.msra.mxu0 %v24751_v16  ;;  %12306 = vmatprep.subr.bf16.mxu1 %v24756_v22  ;;  %v24822_v16 = vld [vmem:[#allocation8 + $0x65c] ss:$40 sps:$4 sm:$0xff]  }
 0x74d   :  { %12657 = vmatprep.subr.bf16.mxu0 %v24759_v44  ;;  %v24825_v22 = vld [vmem:[#allocation8 + $0x1794] ss:$40 sps:$4 sm:$0xff]   ;;  %v24820_v44 = vld [vmem:[#allocation8 + $0x658] ss:$40 sps:$4 sm:$0xff]  }
 0x74f   :  { %12307 = vmatpush1.bf16.msra.mxu1 %v24754_v26  ;;  %12649 = vmatmul.mubr.bf16.vlgmr.msra.gmra.mrb[20].mxu0 %v26898_v17  ;;  %v24823_v26 = vld [vmem:[#allocation8 + $0x1790] ss:$40 sps:$4 sm:$0xff]  }
 0x750   :  { %12658 = vmatpush1.bf16.msra.mxu0 %v24757_v25  ;;  %12689 = vmatprep.mubr.bf16.mxu0 %v26916_v29  ;;  %v24828_v25 = vld [vmem:[#allocation8 + $0x6ac] ss:$40 sps:$4 sm:$0xff]  }
 0x751   :  { %12308 = vmatprep.subr.bf16.mxu1 %v24762_v27  ;;  %12659 = vmatprep.subr.bf16.mxu0 %v24765_v48  ;;  %v24831_v27 = vld [vmem:[#allocation8 + $0x17e4] ss:$40 sps:$4 sm:$0xff]   ;;  %v24826_v48 = vld [vmem:[#allocation8 + $0x6a8] ss:$40 sps:$4 sm:$0xff]  }
 0x753   :  { %12309 = vmatpush1.bf16.msra.mxu1 %v24760_v30  ;;  %v24829_v30 = vld [vmem:[#allocation8 + $0x17e0] ss:$40 sps:$4 sm:$0xff]  }
 0x754   :  { %12660 = vmatpush1.bf16.msra.mxu0 %v24763_v31  ;;  %12310 = vmatprep.subr.bf16.mxu1 %v24768_v32  ;;  %v24834_v31 = vld [vmem:[#allocation8 + $0x6fc] ss:$40 sps:$4 sm:$0xff]  }
 0x755   :  { %12661 = vmatprep.subr.bf16.mxu0 %v24771_v35  ;;  %v24837_v32 = vld [vmem:[#allocation8 + $0x1834] ss:$40 sps:$4 sm:$0xff]   ;;  %v26955_v35 = vld [vmem:[#allocation10] sm:$0xff] }
 0x757   :  { %12311 = vmatpush1.bf16.msra.mxu1 %v24766_v10  ;;  %v24832_v10 = vld [vmem:[#allocation8 + $0x6f8] ss:$40 sps:$4 sm:$0xff]  }
 0x758   :  { %12662 = vmatpush1.bf16.msra.mxu0 %v24769_v36  ;;  %12312 = vmatprep.subr.bf16.mxu1 %v24774_v37  ;;  %v24835_v36 = vld [vmem:[#allocation8 + $0x1830] ss:$40 sps:$4 sm:$0xff]   ;;  %v24840_v37 = vld [vmem:[#allocation8 + $0x74c] ss:$40 sps:$4 sm:$0xff]  }
 0x759   :  { %12663 = vmatprep.subr.bf16.mxu0 %v24777_v11  ;;  %v24843_v11 = vld [vmem:[#allocation8 + $0x1884] ss:$40 sps:$4 sm:$0xff]  }
 0x75b   :  { %12313 = vmatpush1.bf16.msra.mxu1 %v24772_v53  ;;  %v7630_v53 = vrot.slane %v26955_v35, %v26810_v33 }
 0x75c   :  { %12664 = vmatpush1.bf16.msra.mxu0 %v24775_v39  ;;  %12314 = vmatprep.subr.bf16.mxu1 %v24780_v15  ;;  %v24838_v39 = vld [vmem:[#allocation8 + $0x748] ss:$40 sps:$4 sm:$0xff]  }
 0x75d   :  { %12665 = vmatprep.subr.bf16.mxu0 %v24783_v38  ;;  %v24841_v15 = vld [vmem:[#allocation8 + $0x1880] ss:$40 sps:$4 sm:$0xff]   ;;  %v24846_v38 = vld [vmem:[#allocation8 + $0x79c] ss:$40 sps:$4 sm:$0xff]  }
 0x75f   :  { %12315 = vmatpush1.bf16.msra.mxu1 %v24778_v40  ;;  %v24849_v40 = vld [vmem:[#allocation8 + $0x18d4] ss:$40 sps:$4 sm:$0xff]  }
 0x760   :  { %12666 = vmatpush1.bf16.msra.mxu0 %v24781_v41  ;;  %12316 = vmatprep.subr.bf16.mxu1 %v24786_v47  ;;  %v22196_v41 = vadd.f32 %v26937_v34, %v7630_v53  ;;  %v24844_v47 = vld [vmem:[#allocation8 + $0x798] ss:$40 sps:$4 sm:$0xff]  }
 0x761   :  { %12667 = vmatprep.subr.bf16.mxu0 %v24789_v50  ;;  %v24847_v50 = vld [vmem:[#allocation8 + $0x18d0] ss:$40 sps:$4 sm:$0xff]  }
 0x762   :  { %v24856_v34 = vld [vmem:[#allocation8 + $0x838] ss:$40 sps:$4 sm:$0xff]  }
 0x763   :  { %12317 = vmatpush1.bf16.msra.mxu1 %v24784_v5  ;;  %v24852_v5 = vld [vmem:[#allocation8 + $0x7ec] ss:$40 sps:$4 sm:$0xff]  }
 0x764   :  { %12668 = vmatpush1.bf16.msra.mxu0 %v24787_v54  ;;  %12318 = vmatprep.subr.bf16.mxu1 %v24792_v51  ;;  %v24855_v54 = vld [vmem:[#allocation11 + $0xc] ss:$40 sps:$4 sm:$0xff]   ;;  %v12699_v51 = vmax.f32 %v22196_v41, 0.0  ;;  %v24901_v53 = vld [vmem:[#allocation11 + $0x288] ss:$40 sps:$4 sm:$0xff]  }
 0x765   :  { %12669 = vmatprep.subr.bf16.mxu0 %v24795_v57  ;;  %v24850_v57 = vld [vmem:[#allocation8 + $0x7e8] ss:$40 sps:$4 sm:$0xff]   ;;  %v24912_v41 = vld [vmem:[#allocation8 + $0xb0c] ss:$40 sps:$4 sm:$0xff]  }
 0x767   :  { %12319 = vmatpush1.bf16.msra.mxu1 %v24790_v42  ;;  %v24853_v42 = vld [vmem:[#allocation11 + $0x8] ss:$40 sps:$4 sm:$0xff]  }
 0x768   :  { %12670 = vmatpush1.bf16.msra.mxu0 %v24793_v58  ;;  %12329 = vmatprep.subr.bf16.mxu1 %v24798_v28  ;;  %v24858_v58 = vld [vmem:[#allocation8 + $0x83c] ss:$40 sps:$4 sm:$0xff]  }
 0x769   :  { %12671 = vmatprep.subr.bf16.mxu0 %v24801_v49  ;;  %v24861_v28 = vld [vmem:[#allocation11 + $0x5c] ss:$40 sps:$4 sm:$0xff]   ;;  %v26960_v49 = vpack.c.bf16 %v12699_v51, %v12699_v51  ;;  %v24919_v51 = vld [vmem:[#allocation11 + $0x378] ss:$40 sps:$4 sm:$0xff]  }
 0x76a   :  { %12321 = vmatmul.mubr.bf16.vlgmr.msra.gmra.mrb[16].mxu1 %v26836_v62  ;;  %v24814_v62 = vld [vmem:[#allocation8 + $0x608] ss:$40 sps:$4 sm:$0xff]  }
 0x76b   :  { %12330 = vmatpush1.bf16.msra.mxu1 %v24796_v59  ;;  %12361 = vmatprep.mubr.bf16.mxu1 %v26838_v52  ;;  %v24817_v52 = vld [vmem:[#allocation8 + $0x1740] ss:$40 sps:$4 sm:$0xff]  }
 0x76c   :  { %12672 = vmatpush1.bf16.msra.mxu0 %v24799_v61  ;;  %12331 = vmatprep.subr.bf16.mxu1 %v24804_v0  ;;  %v24859_v59 = vld [vmem:[#allocation11 + $0x58] ss:$40 sps:$4 sm:$0xff]   ;;  %v24867_v0 = vld [vmem:[#allocation11 + $0xac] ss:$40 sps:$4 sm:$0xff]  }
 0x76d   :  { %12673 = vmatprep.subr.bf16.mxu0 %v24807_v1  ;;  %v24864_v61 = vld [vmem:[#allocation8 + $0x88c] ss:$40 sps:$4 sm:$0xff]   ;;  %v24862_v1 = vld [vmem:[#allocation8 + $0x888] ss:$40 sps:$4 sm:$0xff]  }
 0x76f   :  { %12332 = vmatpush1.bf16.msra.mxu1 %v24802_v2  ;;  %v24865_v2 = vld [vmem:[#allocation11 + $0xa8] ss:$40 sps:$4 sm:$0xff]  }
 0x770   :  { %12674 = vmatpush1.bf16.msra.mxu0 %v24805_v3  ;;  %12333 = vmatprep.subr.bf16.mxu1 %v24810_v4  ;;  %v24870_v3 = vld [vmem:[#allocation8 + $0x8dc] ss:$40 sps:$4 sm:$0xff]  }
 0x771   :  { %12675 = vmatprep.subr.bf16.mxu0 %v24813_v9  ;;  %v24873_v4 = vld [vmem:[#allocation11 + $0xfc] ss:$40 sps:$4 sm:$0xff]   ;;  %v24868_v9 = vld [vmem:[#allocation8 + $0x8d8] ss:$40 sps:$4 sm:$0xff]  }
 0x773   :  { %12334 = vmatpush1.bf16.msra.mxu1 %v24808_v63  ;;  %v24871_v63 = vld [vmem:[#allocation11 + $0xf8] ss:$40 sps:$4 sm:$0xff]  }
 0x774   :  { %12676 = vmatpush1.bf16.msra.mxu0 %v24811_v6  ;;  %12335 = vmatprep.subr.bf16.mxu1 %v24816_v7  ;;  %v24876_v6 = vld [vmem:[#allocation8 + $0x92c] ss:$40 sps:$4 sm:$0xff]  }
 0x775   :  { %12677 = vmatprep.subr.bf16.mxu0 %v24819_v12  ;;  %v24879_v7 = vld [vmem:[#allocation11 + $0x14c] ss:$40 sps:$4 sm:$0xff]   ;;  %v24874_v12 = vld [vmem:[#allocation8 + $0x928] ss:$40 sps:$4 sm:$0xff]  }
 0x777   :  { %12336 = vmatpush1.bf16.msra.mxu1 %v24814_v62  ;;  %v24877_v62 = vld [vmem:[#allocation11 + $0x148] ss:$40 sps:$4 sm:$0xff]  }
 0x778   :  { %12678 = vmatpush1.bf16.msra.mxu0 %v24817_v52  ;;  %12337 = vmatprep.subr.bf16.mxu1 %v24822_v16  ;;  %v24882_v52 = vld [vmem:[#allocation8 + $0x97c] ss:$40 sps:$4 sm:$0xff]  }
 0x779   :  { %12679 = vmatprep.subr.bf16.mxu0 %v24825_v22  ;;  %v24885_v16 = vld [vmem:[#allocation11 + $0x19c] ss:$40 sps:$4 sm:$0xff]   ;;  %v24880_v22 = vld [vmem:[#allocation8 + $0x978] ss:$40 sps:$4 sm:$0xff]  }
 0x77b   :  { %12338 = vmatpush1.bf16.msra.mxu1 %v24820_v44  ;;  %v24883_v44 = vld [vmem:[#allocation11 + $0x198] ss:$40 sps:$4 sm:$0xff]  }
 0x77c   :  { %12680 = vmatpush1.bf16.msra.mxu0 %v24823_v26  ;;  %12339 = vmatprep.subr.bf16.mxu1 %v24828_v25  ;;  %v24888_v26 = vld [vmem:[#allocation8 + $0x9cc] ss:$40 sps:$4 sm:$0xff]  }
 0x77d   :  { %12681 = vmatprep.subr.bf16.mxu0 %v24831_v27  ;;  %v24891_v25 = vld [vmem:[#allocation11 + $0x1ec] ss:$40 sps:$4 sm:$0xff]   ;;  %v24886_v27 = vld [vmem:[#allocation8 + $0x9c8] ss:$40 sps:$4 sm:$0xff]  }
 0x77f   :  { %12340 = vmatpush1.bf16.msra.mxu1 %v24826_v48  ;;  %v24889_v48 = vld [vmem:[#allocation11 + $0x1e8] ss:$40 sps:$4 sm:$0xff]  }
 0x780   :  { %12682 = vmatpush1.bf16.msra.mxu0 %v24829_v30  ;;  %12341 = vmatprep.subr.bf16.mxu1 %v24834_v31  ;;  %v24894_v30 = vld [vmem:[#allocation8 + $0xa1c] ss:$40 sps:$4 sm:$0xff]  }
 0x781   :  { %12683 = vmatprep.subr.bf16.mxu0 %v24837_v32  ;;  %v24897_v31 = vld [vmem:[#allocation11 + $0x23c] ss:$40 sps:$4 sm:$0xff]   ;;  %v24892_v32 = vld [vmem:[#allocation8 + $0xa18] ss:$40 sps:$4 sm:$0xff]  }
 0x783   :  { %12342 = vmatpush1.bf16.msra.mxu1 %v24832_v10  ;;  %v24895_v10 = vld [vmem:[#allocation11 + $0x238] ss:$40 sps:$4 sm:$0xff]  }
 0x784   :  { %12684 = vmatpush1.bf16.msra.mxu0 %v24835_v36  ;;  %12343 = vmatprep.subr.bf16.mxu1 %v24840_v37  ;;  %v24900_v36 = vld [vmem:[#allocation8 + $0xa6c] ss:$40 sps:$4 sm:$0xff]  }
 0x785   :  { %12685 = vmatprep.subr.bf16.mxu0 %v24843_v11  ;;  %v24903_v37 = vld [vmem:[#allocation11 + $0x28c] ss:$40 sps:$4 sm:$0xff]   ;;  %v24898_v11 = vld [vmem:[#allocation8 + $0xa68] ss:$40 sps:$4 sm:$0xff]  }
 0x787   :  { %12344 = vmatpush1.bf16.msra.mxu1 %v24838_v39  ;;  %v24906_v39 = vld [vmem:[#allocation8 + $0xabc] ss:$40 sps:$4 sm:$0xff]  }
 0x788   :  { %12686 = vmatpush1.bf16.msra.mxu0 %v24841_v15  ;;  %12345 = vmatprep.subr.bf16.mxu1 %v24846_v38  ;;  %v24909_v15 = vld [vmem:[#allocation11 + $0x2dc] ss:$40 sps:$4 sm:$0xff]   ;;  %v24904_v38 = vld [vmem:[#allocation8 + $0xab8] ss:$40 sps:$4 sm:$0xff]  }
 0x789   :  { %12687 = vmatprep.subr.bf16.mxu0 %v24849_v40  ;;  %v24907_v40 = vld [vmem:[#allocation11 + $0x2d8] ss:$40 sps:$4 sm:$0xff]  }
 0x78b   :  { %12346 = vmatpush1.bf16.msra.mxu1 %v24844_v47  ;;  %v24915_v47 = vld [vmem:[#allocation11 + $0x32c] ss:$40 sps:$4 sm:$0xff]  }
 0x78c   :  { %12688 = vmatpush1.bf16.msra.mxu0 %v24847_v50  ;;  %12347 = vmatprep.subr.bf16.mxu1 %v24852_v5  ;;  %v24918_v50 = vld [vmem:[#allocation8 + $0xb5c] ss:$40 sps:$4 sm:$0xff]  }
 0x78d   :  { %17777 = vmatprep.subr.bf16.mxu0 %v24855_v54  ;;  %v24921_v5 = vld [vmem:[#allocation11 + $0x37c] ss:$40 sps:$4 sm:$0xff]   ;;  %v24916_v54 = vld [vmem:[#allocation8 + $0xb58] ss:$40 sps:$4 sm:$0xff]  }
 0x78f   :  { %12348 = vmatpush1.bf16.msra.mxu1 %v24850_v57  ;;  %12690 = vmatmul.mubr.bf16.vlgmr.msra.gmra.mrb[20].mxu0 %v26918_v55  ;;  %v24924_v57 = vld [vmem:[#allocation8 + $0xbac] ss:$40 sps:$4 sm:$0xff]  }
 0x790   :  { %17778 = vmatpush1.bf16.msra.mxu0 %v24853_v42  ;;  %17809 = vmatprep.mubr.bf16.mxu0 %v26960_v49  ;;  %v24927_v42 = vld [vmem:[#allocation11 + $0x3cc] ss:$40 sps:$4 sm:$0xff]  }
 0x791   :  { %12349 = vmatprep.subr.bf16.mxu1 %v24858_v58  ;;  %17779 = vmatprep.subr.bf16.mxu0 %v24861_v28  ;;  %v24922_v58 = vld [vmem:[#allocation8 + $0xba8] ss:$40 sps:$4 sm:$0xff]  }
 0x792   :  { %v24925_v28 = vld [vmem:[#allocation11 + $0x3c8] ss:$40 sps:$4 sm:$0xff]  }
 0x793   :  { %12350 = vmatpush1.bf16.msra.mxu1 %v24856_v34  ;;  %v24930_v34 = vld [vmem:[#allocation8 + $0xbfc] ss:$40 sps:$4 sm:$0xff]  }
 0x794   :  { %17780 = vmatpush1.bf16.msra.mxu0 %v24859_v59  ;;  %12351 = vmatprep.subr.bf16.mxu1 %v24864_v61  ;;  %v24933_v59 = vld [vmem:[#allocation11 + $0x41c] ss:$40 sps:$4 sm:$0xff]   ;;  %v24928_v61 = vld [vmem:[#allocation8 + $0xbf8] ss:$40 sps:$4 sm:$0xff]  }
 0x795   :  { %17781 = vmatprep.subr.bf16.mxu0 %v24867_v0  ;;  %v24931_v0 = vld [vmem:[#allocation11 + $0x418] ss:$40 sps:$4 sm:$0xff]  }
 0x797   :  { %12352 = vmatpush1.bf16.msra.mxu1 %v24862_v1  ;;  %v24936_v1 = vld [vmem:[#allocation8 + $0xc4c] ss:$40 sps:$4 sm:$0xff]  }
 0x798   :  { %17782 = vmatpush1.bf16.msra.mxu0 %v24865_v2  ;;  %12353 = vmatprep.subr.bf16.mxu1 %v24870_v3  ;;  %v7626_v2 = vrot.slane %v26955_v35, %v26830_v13  ;;  %v24939_v3 = vld [vmem:[#allocation11 + $0x46c] ss:$40 sps:$4 sm:$0xff]  }
 0x799   :  { %17783 = vmatprep.subr.bf16.mxu0 %v24873_v4  ;;  %v24934_v4 = vld [vmem:[#allocation8 + $0xc48] ss:$40 sps:$4 sm:$0xff]  }
 0x79b   :  { %12354 = vmatpush1.bf16.msra.mxu1 %v24868_v9  ;;  %v24937_v9 = vld [vmem:[#allocation11 + $0x468] ss:$40 sps:$4 sm:$0xff]  }
 0x79c   :  { %17784 = vmatpush1.bf16.msra.mxu0 %v24871_v63  ;;  %12355 = vmatprep.subr.bf16.mxu1 %v24876_v6  ;;  %v24942_v63 = vld [vmem:[#allocation8 + $0xc9c] ss:$40 sps:$4 sm:$0xff]   ;;  %v22195_v6 = vadd.f32 %v26935_v60, %v7626_v2 }
 0x79d   :  { %17785 = vmatprep.subr.bf16.mxu0 %v24879_v7  ;;  %v24945_v7 = vld [vmem:[#allocation11 + $0x4bc] ss:$40 sps:$4 sm:$0xff]  }
 0x79e   :  { %v24957_v60 = vld [vmem:[#allocation11 + $0x55c] ss:$40 sps:$4 sm:$0xff]  }
 0x79f   :  { %12356 = vmatpush1.bf16.msra.mxu1 %v24874_v12  ;;  %v24940_v12 = vld [vmem:[#allocation8 + $0xc98] ss:$40 sps:$4 sm:$0xff]   ;;  %v25002_v2 = vld [vmem:[#allocation8 + $0xfbc] ss:$40 sps:$4 sm:$0xff]  }
 0x7a0   :  { %17786 = vmatpush1.bf16.msra.mxu0 %v24877_v62  ;;  %12357 = vmatprep.subr.bf16.mxu1 %v24882_v52  ;;  %v24943_v62 = vld [vmem:[#allocation11 + $0x4b8] ss:$40 sps:$4 sm:$0xff]  }
 0x7a1   :  { %17787 = vmatprep.subr.bf16.mxu0 %v24885_v16  ;;  %v24948_v52 = vld [vmem:[#allocation8 + $0xcec] ss:$40 sps:$4 sm:$0xff]   ;;  %v12698_v16 = vmax.f32 %v22195_v6, 0.0 }
 0x7a2   :  { %v25011_v6 = vld [vmem:[#allocation11 + $0x82c] ss:$40 sps:$4 sm:$0xff]  }
 0x7a3   :  { %12358 = vmatpush1.bf16.msra.mxu1 %v24880_v22  ;;  %v24951_v22 = vld [vmem:[#allocation11 + $0x50c] ss:$40 sps:$4 sm:$0xff]  }
 0x7a4   :  { %17788 = vmatpush1.bf16.msra.mxu0 %v24883_v44  ;;  %12359 = vmatprep.subr.bf16.mxu1 %v24888_v26  ;;  %v24946_v44 = vld [vmem:[#allocation8 + $0xce8] ss:$40 sps:$4 sm:$0xff]  }
 0x7a5   :  { %17789 = vmatprep.subr.bf16.mxu0 %v24891_v25  ;;  %v24949_v26 = vld [vmem:[#allocation11 + $0x508] ss:$40 sps:$4 sm:$0xff]  }
 0x7a6   :  { %v24954_v25 = vld [vmem:[#allocation8 + $0xd3c] ss:$40 sps:$4 sm:$0xff]  }
 0x7a7   :  { %12360 = vmatpush1.bf16.msra.mxu1 %v24886_v27  ;;  %v26969_v27 = vpack.c.bf16 %v12698_v16, %v12698_v16  ;;  %v25020_v16 = vld [vmem:[#allocation8 + $0x10ac] ss:$40 sps:$4 sm:$0xff]  }
 0x7a8   :  { %17790 = vmatpush1.bf16.msra.mxu0 %v24889_v48  ;;  %12370 = vmatprep.subr.bf16.mxu1 %v24894_v30  ;;  %v24952_v48 = vld [vmem:[#allocation8 + $0xd38] ss:$40 sps:$4 sm:$0xff]  }
 0x7a9   :  { %17791 = vmatprep.subr.bf16.mxu0 %v24897_v31  ;;  %v24955_v30 = vld [vmem:[#allocation11 + $0x558] ss:$40 sps:$4 sm:$0xff]  }
 0x7aa   :  { %12362 = vmatmul.mubr.bf16.vlgmr.msra.gmra.mrb[16].mxu1 %v26848_v8  ;;  %v24910_v8 = vld [vmem:[#allocation8 + $0xb08] ss:$40 sps:$4 sm:$0xff]   ;;  %v24960_v31 = vld [vmem:[#allocation8 + $0xd8c] ss:$40 sps:$4 sm:$0xff]  }
 0x7ab   :  { %12371 = vmatpush1.bf16.msra.mxu1 %v24892_v32  ;;  %12402 = vmatprep.mubr.bf16.mxu1 %v26881_v45  ;;  %v24913_v45 = vld [vmem:[#allocation11 + $0x328] ss:$40 sps:$4 sm:$0xff]   ;;  %v24963_v32 = vld [vmem:[#allocation11 + $0x5ac] ss:$40 sps:$4 sm:$0xff]  }
 0x7ac   :  { %17792 = vmatpush1.bf16.msra.mxu0 %v24895_v10  ;;  %12372 = vmatprep.subr.bf16.mxu1 %v24900_v36  ;;  %v24958_v10 = vld [vmem:[#allocation8 + $0xd88] ss:$40 sps:$4 sm:$0xff]  }
 0x7ad   :  { %17793 = vmatprep.subr.bf16.mxu0 %v24903_v37  ;;  %v24961_v36 = vld [vmem:[#allocation11 + $0x5a8] ss:$40 sps:$4 sm:$0xff]  }
 0x7ae   :  { %v24966_v37 = vld [vmem:[#allocation8 + $0xddc] ss:$40 sps:$4 sm:$0xff]  }
 0x7af   :  { %12373 = vmatpush1.bf16.msra.mxu1 %v24898_v11  ;;  %v24969_v11 = vld [vmem:[#allocation11 + $0x5fc] ss:$40 sps:$4 sm:$0xff]  }
 0x7b0   :  { %17794 = vmatpush1.bf16.msra.mxu0 %v24901_v53  ;;  %12374 = vmatprep.subr.bf16.mxu1 %v24906_v39  ;;  %v24964_v53 = vld [vmem:[#allocation8 + $0xdd8] ss:$40 sps:$4 sm:$0xff]  }
 0x7b1   :  { %17795 = vmatprep.subr.bf16.mxu0 %v24909_v15  ;;  %v24967_v39 = vld [vmem:[#allocation11 + $0x5f8] ss:$40 sps:$4 sm:$0xff]  }
 0x7b2   :  { %v24972_v15 = vld [vmem:[#allocation8 + $0xe2c] ss:$40 sps:$4 sm:$0xff]  }
 0x7b3   :  { %12375 = vmatpush1.bf16.msra.mxu1 %v24904_v38  ;;  %v24975_v38 = vld [vmem:[#allocation11 + $0x64c] ss:$40 sps:$4 sm:$0xff]  }
 0x7b4   :  { %17796 = vmatpush1.bf16.msra.mxu0 %v24907_v40  ;;  %12376 = vmatprep.subr.bf16.mxu1 %v24912_v41  ;;  %v24970_v40 = vld [vmem:[#allocation8 + $0xe28] ss:$40 sps:$4 sm:$0xff]  }
 0x7b5   :  { %17797 = vmatprep.subr.bf16.mxu0 %v24915_v47  ;;  %v24973_v41 = vld [vmem:[#allocation11 + $0x648] ss:$40 sps:$4 sm:$0xff]  }
 0x7b6   :  { %v24978_v47 = vld [vmem:[#allocation8 + $0xe7c] ss:$40 sps:$4 sm:$0xff]  }
 0x7b7   :  { %12377 = vmatpush1.bf16.msra.mxu1 %v24910_v8  ;;  %v24981_v8 = vld [vmem:[#allocation11 + $0x69c] ss:$40 sps:$4 sm:$0xff]  }
 0x7b8   :  { %17798 = vmatpush1.bf16.msra.mxu0 %v24913_v45  ;;  %12378 = vmatprep.subr.bf16.mxu1 %v24918_v50  ;;  %v24976_v45 = vld [vmem:[#allocation8 + $0xe78] ss:$40 sps:$4 sm:$0xff]  }
 0x7b9   :  { %17799 = vmatprep.subr.bf16.mxu0 %v24921_v5  ;;  %v24979_v50 = vld [vmem:[#allocation11 + $0x698] ss:$40 sps:$4 sm:$0xff]  }
 0x7ba   :  { %v24984_v5 = vld [vmem:[#allocation8 + $0xecc] ss:$40 sps:$4 sm:$0xff]  }
 0x7bb   :  { %12379 = vmatpush1.bf16.msra.mxu1 %v24916_v54  ;;  %v24987_v54 = vld [vmem:[#allocation11 + $0x6ec] ss:$40 sps:$4 sm:$0xff]  }
 0x7bc   :  { %17800 = vmatpush1.bf16.msra.mxu0 %v24919_v51  ;;  %12380 = vmatprep.subr.bf16.mxu1 %v24924_v57  ;;  %v24982_v51 = vld [vmem:[#allocation8 + $0xec8] ss:$40 sps:$4 sm:$0xff]  }
 0x7bd   :  { %17801 = vmatprep.subr.bf16.mxu0 %v24927_v42  ;;  %v24985_v57 = vld [vmem:[#allocation11 + $0x6e8] ss:$40 sps:$4 sm:$0xff]  }
 0x7be   :  { %v24990_v42 = vld [vmem:[#allocation8 + $0xf1c] ss:$40 sps:$4 sm:$0xff]  }
 0x7bf   :  { %12381 = vmatpush1.bf16.msra.mxu1 %v24922_v58  ;;  %v24993_v58 = vld [vmem:[#allocation11 + $0x73c] ss:$40 sps:$4 sm:$0xff]  }
 0x7c0   :  { %17802 = vmatpush1.bf16.msra.mxu0 %v24925_v28  ;;  %12382 = vmatprep.subr.bf16.mxu1 %v24930_v34  ;;  %v24988_v28 = vld [vmem:[#allocation8 + $0xf18] ss:$40 sps:$4 sm:$0xff]  }
 0x7c1   :  { %17803 = vmatprep.subr.bf16.mxu0 %v24933_v59  ;;  %v24991_v34 = vld [vmem:[#allocation11 + $0x738] ss:$40 sps:$4 sm:$0xff]  }
 0x7c2   :  { %v24996_v59 = vld [vmem:[#allocation8 + $0xf6c] ss:$40 sps:$4 sm:$0xff]  }
 0x7c3   :  { %12383 = vmatpush1.bf16.msra.mxu1 %v24928_v61  ;;  %v24999_v61 = vld [vmem:[#allocation11 + $0x78c] ss:$40 sps:$4 sm:$0xff]  }
 0x7c4   :  { %17804 = vmatpush1.bf16.msra.mxu0 %v24931_v0  ;;  %12384 = vmatprep.subr.bf16.mxu1 %v24936_v1  ;;  %v24994_v0 = vld [vmem:[#allocation8 + $0xf68] ss:$40 sps:$4 sm:$0xff]  }
 0x7c5   :  { %17805 = vmatprep.subr.bf16.mxu0 %v24939_v3  ;;  %v24997_v1 = vld [vmem:[#allocation11 + $0x788] ss:$40 sps:$4 sm:$0xff]   ;;  %v25005_v3 = vld [vmem:[#allocation11 + $0x7dc] ss:$40 sps:$4 sm:$0xff]  }
 0x7c7   :  { %12385 = vmatpush1.bf16.msra.mxu1 %v24934_v4  ;;  %v25000_v4 = vld [vmem:[#allocation8 + $0xfb8] ss:$40 sps:$4 sm:$0xff]  }
 0x7c8   :  { %17806 = vmatpush1.bf16.msra.mxu0 %v24937_v9  ;;  %12386 = vmatprep.subr.bf16.mxu1 %v24942_v63  ;;  %v25003_v9 = vld [vmem:[#allocation11 + $0x7d8] ss:$40 sps:$4 sm:$0xff]  }
 0x7c9   :  { %17807 = vmatprep.subr.bf16.mxu0 %v24945_v7  ;;  %v25008_v63 = vld [vmem:[#allocation8 + $0x100c] ss:$40 sps:$4 sm:$0xff]   ;;  %v25014_v7 = vld [vmem:[#allocation8 + $0x105c] ss:$40 sps:$4 sm:$0xff]  }
 0x7cb   :  { %12387 = vmatpush1.bf16.msra.mxu1 %v24940_v12  ;;  %v25017_v12 = vld [vmem:[#allocation11 + $0x87c] ss:$40 sps:$4 sm:$0xff]  }
 0x7cc   :  { %17808 = vmatpush1.bf16.msra.mxu0 %v24943_v62  ;;  %12388 = vmatprep.subr.bf16.mxu1 %v24948_v52  ;;  %v25012_v62 = vld [vmem:[#allocation8 + $0x1058] ss:$40 sps:$4 sm:$0xff]  }
 0x7cd   :  { %17818 = vmatprep.subr.bf16.mxu0 %v24951_v22  ;;  %v25015_v52 = vld [vmem:[#allocation11 + $0x878] ss:$40 sps:$4 sm:$0xff]   ;;  %v25023_v22 = vld [vmem:[#allocation11 + $0x8cc] ss:$40 sps:$4 sm:$0xff]  }
 0x7cf   :  { %12389 = vmatpush1.bf16.msra.mxu1 %v24946_v44  ;;  %17810 = vmatmul.mubr.bf16.vlgmr.msra.gmra.mrb[24].mxu0 %v26969_v27  ;;  %v7638_v44 = vrot.slane %v26955_v35, %v26803_v19 }
 0x7d0   :  { %17819 = vmatpush1.bf16.msra.mxu0 %v24949_v26  ;;  %12390 = vmatprep.subr.bf16.mxu1 %v24954_v25  ;;  %v25018_v26 = vld [vmem:[#allocation8 + $0x10a8] ss:$40 sps:$4 sm:$0xff]  }
 0x7d1   :  { %17820 = vmatprep.subr.bf16.mxu0 %v24957_v60  ;;  %v25021_v25 = vld [vmem:[#allocation11 + $0x8c8] ss:$40 sps:$4 sm:$0xff]  }
 0x7d2   :  { %v25026_v60 = vld [vmem:[#allocation8 + $0x10fc] ss:$40 sps:$4 sm:$0xff]  }
 0x7d3   :  { %12391 = vmatpush1.bf16.msra.mxu1 %v24952_v48 }
 0x7d4   :  { %17821 = vmatpush1.bf16.msra.mxu0 %v24955_v30  ;;  %12392 = vmatprep.subr.bf16.mxu1 %v24960_v31  ;;  %v25029_v30 = vld [vmem:[#allocation11 + $0x91c] ss:$40 sps:$4 sm:$0xff]  }
 0x7d5   :  { %17822 = vmatprep.subr.bf16.mxu0 %v24963_v32 }
 0x7d7   :  { %12393 = vmatpush1.bf16.msra.mxu1 %v24958_v10 }
 0x7d8   :  { %17823 = vmatpush1.bf16.msra.mxu0 %v24961_v36  ;;  %12394 = vmatprep.subr.bf16.mxu1 %v24966_v37  ;;  %v25024_v36 = vld [vmem:[#allocation8 + $0x10f8] ss:$40 sps:$4 sm:$0xff]  }
 0x7d9   :  { %17824 = vmatprep.subr.bf16.mxu0 %v24969_v11  ;;  %v25027_v11 = vld [vmem:[#allocation11 + $0x918] ss:$40 sps:$4 sm:$0xff]  }
 0x7db   :  { %12395 = vmatpush1.bf16.msra.mxu1 %v24964_v53  ;;  %v25032_v53 = vld [vmem:[#allocation8 + $0x114c] ss:$40 sps:$4 sm:$0xff]  }
 0x7dc   :  { %17825 = vmatpush1.bf16.msra.mxu0 %v24967_v39  ;;  %12396 = vmatprep.subr.bf16.mxu1 %v24972_v15  ;;  %v7634_v39 = vrot.slane %v26955_v35, %v26798_v14 }
 0x7dd   :  { %17826 = vmatprep.subr.bf16.mxu0 %v24975_v38  ;;  %v25035_v38 = vld [vmem:[#allocation11 + $0x96c] ss:$40 sps:$4 sm:$0xff]  }
 0x7df   :  { %12397 = vmatpush1.bf16.msra.mxu1 %v24970_v40  ;;  %v7646_v40 = vrot.slane %v26955_v35, %v26870_v21 }
 0x7e0   :  { %17827 = vmatpush1.bf16.msra.mxu0 %v24973_v41  ;;  %12398 = vmatprep.subr.bf16.mxu1 %v24978_v47  ;;  %v25030_v47 = vld [vmem:[#allocation8 + $0x1148] ss:$40 sps:$4 sm:$0xff]  }
 0x7e1   :  { %17828 = vmatprep.subr.bf16.mxu0 %v24981_v8  ;;  %v25033_v8 = vld [vmem:[#allocation11 + $0x968] ss:$40 sps:$4 sm:$0xff]  }
 0x7e3   :  { %12399 = vmatpush1.bf16.msra.mxu1 %v24976_v45  ;;  %v25038_v45 = vld [vmem:[#allocation8 + $0x119c] ss:$40 sps:$4 sm:$0xff]  }
 0x7e4   :  { %17829 = vmatpush1.bf16.msra.mxu0 %v24979_v50  ;;  %12400 = vmatprep.subr.bf16.mxu1 %v24984_v5  ;;  %v25041_v5 = vld [vmem:[#allocation11 + $0x9bc] ss:$40 sps:$4 sm:$0xff]  }
 0x7e5   :  { %17830 = vmatprep.subr.bf16.mxu0 %v24987_v54  ;;  %v22200_v54 = vadd.f32 %v26947_v24, %v7646_v40  ;;  %v25053_v24 = vld [vmem:[#allocation11 + $0xa5c] ss:$40 sps:$4 sm:$0xff]   ;;  %v25093_v40 = vld [vmem:[#allocation11 + $0xc88] ss:$40 sps:$4 sm:$0xff]  }
 0x7e7   :  { %12401 = vmatpush1.bf16.msra.mxu1 %v24982_v51  ;;  %v25036_v51 = vld [vmem:[#allocation8 + $0x1198] ss:$40 sps:$4 sm:$0xff]  }
 0x7e8   :  { %17831 = vmatpush1.bf16.msra.mxu0 %v24985_v57  ;;  %12411 = vmatprep.subr.bf16.mxu1 %v24990_v42  ;;  %v25039_v57 = vld [vmem:[#allocation11 + $0x9b8] ss:$40 sps:$4 sm:$0xff]  }
 0x7e9   :  { %17832 = vmatprep.subr.bf16.mxu0 %v24993_v58  ;;  %v25044_v42 = vld [vmem:[#allocation8 + $0x11ec] ss:$40 sps:$4 sm:$0xff]  }
 0x7ea   :  { %12403 = vmatmul.mubr.bf16.vlgmr.msra.gmra.mrb[16].mxu1 %v26883_v43  ;;  %v25006_v43 = vld [vmem:[#allocation8 + $0x1008] ss:$40 sps:$4 sm:$0xff]  }
 0x7eb   :  { %12412 = vmatpush1.bf16.msra.mxu1 %v24988_v28  ;;  %12443 = vmatprep.mubr.bf16.mxu1 %v26886_v56  ;;  %v25009_v56 = vld [vmem:[#allocation11 + $0x828] ss:$40 sps:$4 sm:$0xff]   ;;  %v25047_v28 = vld [vmem:[#allocation11 + $0xa0c] ss:$40 sps:$4 sm:$0xff]  }
 0x7ec   :  { %17833 = vmatpush1.bf16.msra.mxu0 %v24991_v34  ;;  %12413 = vmatprep.subr.bf16.mxu1 %v24996_v59  ;;  %v12703_v34 = vmax.f32 %v22200_v54, 0.0  ;;  %v25042_v59 = vld [vmem:[#allocation8 + $0x11e8] ss:$40 sps:$4 sm:$0xff]   ;;  %v25107_v54 = vld [vmem:[#allocation11 + $0xd2c] ss:$40 sps:$4 sm:$0xff]  }
 0x7ed   :  { %17834 = vmatprep.subr.bf16.mxu0 %v24999_v61  ;;  %v25045_v61 = vld [vmem:[#allocation11 + $0xa08] ss:$40 sps:$4 sm:$0xff]  }
 0x7ef   :  { %12414 = vmatpush1.bf16.msra.mxu1 %v24994_v0 }
 0x7f0   :  { %17835 = vmatpush1.bf16.msra.mxu0 %v24997_v1  ;;  %12415 = vmatprep.subr.bf16.mxu1 %v25002_v2  ;;  %v25050_v1 = vld [vmem:[#allocation8 + $0x123c] ss:$40 sps:$4 sm:$0xff]   ;;  %v26986_v2 = vpack.c.bf16 %v12703_v34, %v12703_v34 }
 0x7f1   :  { %17836 = vmatprep.subr.bf16.mxu0 %v25005_v3  ;;  %v25048_v3 = vld [vmem:[#allocation8 + $0x1238] ss:$40 sps:$4 sm:$0xff]  }
 0x7f2   :  { %v25119_v34 = vld [vmem:[#allocation11 + $0xdcc] ss:$40 sps:$4 sm:$0xff]  }
 0x7f3   :  { %12416 = vmatpush1.bf16.msra.mxu1 %v25000_v4  ;;  %v25051_v4 = vld [vmem:[#allocation11 + $0xa58] ss:$40 sps:$4 sm:$0xff]  }
 0x7f4   :  { %17837 = vmatpush1.bf16.msra.mxu0 %v25003_v9  ;;  %12417 = vmatprep.subr.bf16.mxu1 %v25008_v63  ;;  %v25056_v9 = vld [vmem:[#allocation8 + $0x128c] ss:$40 sps:$4 sm:$0xff]  }
 0x7f5   :  { %17838 = vmatprep.subr.bf16.mxu0 %v25011_v6  ;;  %v25059_v63 = vld [vmem:[#allocation11 + $0xaac] ss:$40 sps:$4 sm:$0xff]   ;;  %v25054_v6 = vld [vmem:[#allocation8 + $0x1288] ss:$40 sps:$4 sm:$0xff]  }
 0x7f7   :  { %12418 = vmatpush1.bf16.msra.mxu1 %v25006_v43  ;;  %v25057_v43 = vld [vmem:[#allocation11 + $0xaa8] ss:$40 sps:$4 sm:$0xff]  }
 0x7f8   :  { %17839 = vmatpush1.bf16.msra.mxu0 %v25009_v56  ;;  %12419 = vmatprep.subr.bf16.mxu1 %v25014_v7  ;;  %v25062_v56 = vld [vmem:[#allocation8 + $0x12dc] ss:$40 sps:$4 sm:$0xff]  }
 0x7f9   :  { %17840 = vmatprep.subr.bf16.mxu0 %v25017_v12  ;;  %v25065_v7 = vld [vmem:[#allocation11 + $0xafc] ss:$40 sps:$4 sm:$0xff]   ;;  %v25060_v12 = vld [vmem:[#allocation8 + $0x12d8] ss:$40 sps:$4 sm:$0xff]  }
 0x7fb   :  { %12420 = vmatpush1.bf16.msra.mxu1 %v25012_v62  ;;  %v25063_v62 = vld [vmem:[#allocation11 + $0xaf8] ss:$40 sps:$4 sm:$0xff]  }
 0x7fc   :  { %17841 = vmatpush1.bf16.msra.mxu0 %v25015_v52  ;;  %12421 = vmatprep.subr.bf16.mxu1 %v25020_v16  ;;  %v25068_v52 = vld [vmem:[#allocation8 + $0x132c] ss:$40 sps:$4 sm:$0xff]  }
 0x7fd   :  { %v12076_v48 = vpop.f32.mrb[12].mxu1  ;;  %17842 = vmatprep.subr.bf16.mxu0 %v25023_v22  ;;  %v25071_v16 = vld [vmem:[#allocation11 + $0xb4c] ss:$40 sps:$4 sm:$0xff]   ;;  %v25066_v22 = vld [vmem:[#allocation8 + $0x1328] ss:$40 sps:$4 sm:$0xff]  }
 0x7fe   :  { %v12078_v31 = vpop.f32.mrb[13].mxu1  ;;  %v22197_v50 = vadd.f32 %v12076_v48, %v7634_v39  ;;  %v25075_v48 = vld [vmem:[#allocation11 + $0xb98] ss:$40 sps:$4 sm:$0xff]  }
 0x7ff   :  { %v22198_v32 = vadd.f32 %v12078_v31, %v7638_v44  ;;  %v12080_v10 = vpop.f32.mrb[14].mxu1  ;;  %12422 = vmatpush1.bf16.msra.mxu1 %v25018_v26  ;;  %v25069_v44 = vld [vmem:[#allocation11 + $0xb48] ss:$40 sps:$4 sm:$0xff]   ;;  %v25083_v31 = vld [vmem:[#allocation11 + $0xbec] ss:$40 sps:$4 sm:$0xff]  }
 0x800   :  { %v12081_v37 = vpop.f32.mrb[15].mxu1  ;;  %17843 = vmatpush1.bf16.msra.mxu0 %v25021_v25  ;;  %12423 = vmatprep.subr.bf16.mxu1 %v25026_v60  ;;  %v12700_v58 = vmax.f32 %v22197_v50, 0.0  ;;  %v25074_v26 = vld [vmem:[#allocation8 + $0x137c] ss:$40 sps:$4 sm:$0xff]   ;;  %v25072_v60 = vld [vmem:[#allocation8 + $0x1378] ss:$40 sps:$4 sm:$0xff]  }
 0x801   :  { %v12701_v15 = vmax.f32 %v22198_v32, 0.0  ;;  %17844 = vmatprep.subr.bf16.mxu0 %v25029_v30  ;;  %v25077_v25 = vld [vmem:[#allocation11 + $0xb9c] ss:$40 sps:$4 sm:$0xff]   ;;  %v25081_v10 = vld [vmem:[#allocation11 + $0xbe8] ss:$40 sps:$4 sm:$0xff]  }
 0x802   :  { %v26984_v0 = vpack.c.bf16 %v12700_v58, %v12700_v58  ;;  %v25080_v30 = vld [vmem:[#allocation8 + $0x13cc] ss:$40 sps:$4 sm:$0xff]   ;;  %v25078_v32 = vld [vmem:[#allocation8 + $0x13c8] ss:$40 sps:$4 sm:$0xff]  }
 0x803   :  { %v26980_v41 = vpack.c.bf16 %v12701_v15, %v12701_v15  ;;  %12424 = vmatpush1.bf16.msra.mxu1 %v25024_v36  ;;  %v25086_v36 = vld [vmem:[#allocation8 + $0x141c] ss:$40 sps:$4 sm:$0xff]   ;;  %v25092_v39 = vld [vmem:[#allocation8 + $0x146c] ss:$40 sps:$4 sm:$0xff]  }
 0x804   :  { %17845 = vmatpush1.bf16.msra.mxu0 %v25027_v11  ;;  %12425 = vmatprep.subr.bf16.mxu1 %v25032_v53  ;;  %v25089_v37 = vld [vmem:[#allocation11 + $0xc3c] ss:$40 sps:$4 sm:$0xff]   ;;  %v25084_v11 = vld [vmem:[#allocation8 + $0x1418] ss:$40 sps:$4 sm:$0xff]  }
 0x805   :  { %17850 = vmatprep.mubr.bf16.mxu0 %v26980_v41  ;;  %17846 = vmatprep.subr.bf16.mxu0 %v25035_v38  ;;  %v25087_v53 = vld [vmem:[#allocation11 + $0xc38] ss:$40 sps:$4 sm:$0xff]   ;;  %v25095_v15 = vld [vmem:[#allocation11 + $0xc8c] ss:$40 sps:$4 sm:$0xff]  }
 0x806   :  { %v25090_v38 = vld [vmem:[#allocation8 + $0x1468] ss:$40 sps:$4 sm:$0xff]  }
 0x807   :  { %12426 = vmatpush1.bf16.msra.mxu1 %v25030_v47  ;;  %v25098_v47 = vld [vmem:[#allocation8 + $0x14bc] ss:$40 sps:$4 sm:$0xff]  }
 0x808   :  { %17847 = vmatpush1.bf16.msra.mxu0 %v25033_v8  ;;  %12427 = vmatprep.subr.bf16.mxu1 %v25038_v45  ;;  %v25101_v8 = vld [vmem:[#allocation11 + $0xcdc] ss:$40 sps:$4 sm:$0xff]   ;;  %v25096_v45 = vld [vmem:[#allocation8 + $0x14b8] ss:$40 sps:$4 sm:$0xff]  }
 0x809   :  { %17848 = vmatprep.subr.bf16.mxu0 %v25041_v5  ;;  %v25099_v50 = vld [vmem:[#allocation11 + $0xcd8] ss:$40 sps:$4 sm:$0xff]  }
 0x80a   :  { %v25104_v5 = vld [vmem:[#allocation8 + $0x150c] ss:$40 sps:$4 sm:$0xff]  }
 0x80b   :  { %12428 = vmatpush1.bf16.msra.mxu1 %v25036_v51  ;;  %v25110_v51 = vld [vmem:[#allocation8 + $0x155c] ss:$40 sps:$4 sm:$0xff]  }
 0x80c   :  { %17849 = vmatpush1.bf16.msra.mxu0 %v25039_v57  ;;  %12429 = vmatprep.subr.bf16.mxu1 %v25044_v42  ;;  %v25113_v57 = vld [vmem:[#allocation11 + $0xd7c] ss:$40 sps:$4 sm:$0xff]   ;;  %v25108_v42 = vld [vmem:[#allocation8 + $0x1558] ss:$40 sps:$4 sm:$0xff]  }
 0x80d   :  { %17859 = vmatprep.subr.bf16.mxu0 %v25047_v28  ;;  %v25111_v58 = vld [vmem:[#allocation11 + $0xd78] ss:$40 sps:$4 sm:$0xff]  }
 0x80e   :  { %v25116_v28 = vld [vmem:[#allocation8 + $0x15ac] ss:$40 sps:$4 sm:$0xff]  }
 0x80f   :  { %12430 = vmatpush1.bf16.msra.mxu1 %v25042_v59  ;;  %17851 = vmatmul.mubr.bf16.vlgmr.msra.gmra.mrb[24].mxu0 %v26984_v0  ;;  %v25114_v59 = vld [vmem:[#allocation8 + $0x15a8] ss:$40 sps:$4 sm:$0xff]  }
 0x810   :  { %17860 = vmatpush1.bf16.msra.mxu0 %v25045_v61  ;;  %17891 = vmatprep.mubr.bf16.mxu0 %v26986_v2  ;;  %v25117_v61 = vld [vmem:[#allocation11 + $0xdc8] ss:$40 sps:$4 sm:$0xff]  }
 0x811   :  { %12431 = vmatprep.subr.bf16.mxu1 %v25050_v1  ;;  %17861 = vmatprep.subr.bf16.mxu0 %v25053_v24  ;;  %v25122_v1 = vld [vmem:[#allocation8 + $0x15fc] ss:$40 sps:$4 sm:$0xff]  }
 0x812   :  { %v25125_v24 = vld [vmem:[#allocation11 + $0xe1c] ss:$40 sps:$4 sm:$0xff]  }
 0x813   :  { %12432 = vmatpush1.bf16.msra.mxu1 %v25048_v3  ;;  %v25120_v3 = vld [vmem:[#allocation8 + $0x15f8] ss:$40 sps:$4 sm:$0xff]  }
 0x814   :  { %17862 = vmatpush1.bf16.msra.mxu0 %v25051_v4  ;;  %12433 = vmatprep.subr.bf16.mxu1 %v25056_v9  ;;  %v25123_v4 = vld [vmem:[#allocation11 + $0xe18] ss:$40 sps:$4 sm:$0xff]  }
 0x815   :  { %17863 = vmatprep.subr.bf16.mxu0 %v25059_v63  ;;  %v25128_v9 = vld [vmem:[#allocation8 + $0x164c] ss:$40 sps:$4 sm:$0xff]   ;;  %v7642_v63 = vrot.slane %v26955_v35, %v26867_v20  ;;  %v25138_v35 = vld [vmem:[#allocation8 + $0x16e8] ss:$40 sps:$4 sm:$0xff]  }
 0x817   :  { %12434 = vmatpush1.bf16.msra.mxu1 %v25054_v6  ;;  %v25131_v6 = vld [vmem:[#allocation11 + $0xe6c] ss:$40 sps:$4 sm:$0xff]  }
 0x818   :  { %17864 = vmatpush1.bf16.msra.mxu0 %v25057_v43  ;;  %12435 = vmatprep.subr.bf16.mxu1 %v25062_v56  ;;  %v25126_v43 = vld [vmem:[#allocation8 + $0x1648] ss:$40 sps:$4 sm:$0xff]  }
 0x819   :  { %17865 = vmatprep.subr.bf16.mxu0 %v25065_v7  ;;  %v25129_v56 = vld [vmem:[#allocation11 + $0xe68] ss:$40 sps:$4 sm:$0xff]  }
 0x81a   :  { %v25134_v7 = vld [vmem:[#allocation8 + $0x169c] ss:$40 sps:$4 sm:$0xff]  }
 0x81b   :  { %12436 = vmatpush1.bf16.msra.mxu1 %v25060_v12  ;;  %v22199_v12 = vadd.f32 %v26945_v23, %v7642_v63  ;;  %v25141_v23 = vld [vmem:[#allocation8 + $0x1738] ss:$40 sps:$4 sm:$0xff]  }
 0x81c   :  { %17866 = vmatpush1.bf16.msra.mxu0 %v25063_v62  ;;  %12437 = vmatprep.subr.bf16.mxu1 %v25068_v52  ;;  %v25137_v62 = vld [vmem:[#allocation11 + $0xebc] ss:$40 sps:$4 sm:$0xff]   ;;  %v25132_v52 = vld [vmem:[#allocation8 + $0x1698] ss:$40 sps:$4 sm:$0xff]  }
 0x81d   :  { %17867 = vmatprep.subr.bf16.mxu0 %v25071_v16  ;;  %v25135_v16 = vld [vmem:[#allocation11 + $0xeb8] ss:$40 sps:$4 sm:$0xff]   ;;  %v25188_v63 = vld [vmem:[#allocation11 + $0x2d4] ss:$40 sps:$4 sm:$0xff]  }
 0x81f   :  { %12438 = vmatpush1.bf16.msra.mxu1 %v25066_v22  ;;  %v25140_v22 = vld [vmem:[#allocation8 + $0x16ec] ss:$40 sps:$4 sm:$0xff]  }
 0x820   :  { %17868 = vmatpush1.bf16.msra.mxu0 %v25069_v44  ;;  %12439 = vmatprep.subr.bf16.mxu1 %v25074_v26  ;;  %v12702_v44 = vmax.f32 %v22199_v12, 0.0  ;;  %v25143_v26 = vld [vmem:[#allocation8 + $0x173c] ss:$40 sps:$4 sm:$0xff]   ;;  %v25189_v12 = vld [vmem:[#allocation11 + $0x320] ss:$40 sps:$4 sm:$0xff]  }
 0x821   :  { %17869 = vmatprep.subr.bf16.mxu0 %v25077_v25 }
 0x822   :  { %v26995_v25 = vpack.c.bf16 %v12702_v44, %v12702_v44  ;;  %v25300_v44 = vld [vmem:[#allocation11 + $0x1048] ss:$40 sps:$4 sm:$0xff]  }
 0x823   :  { %12440 = vmatpush1.bf16.msra.mxu1 %v25072_v60  ;;  %v25146_v60 = vld [vmem:[#allocation8 + $0x178c] ss:$40 sps:$4 sm:$0xff]  }
 0x824   :  { %17870 = vmatpush1.bf16.msra.mxu0 %v25075_v48  ;;  %12441 = vmatprep.subr.bf16.mxu1 %v25080_v30  ;;  %v25144_v48 = vld [vmem:[#allocation8 + $0x1788] ss:$40 sps:$4 sm:$0xff]   ;;  %v25149_v30 = vld [vmem:[#allocation8 + $0x17dc] ss:$40 sps:$4 sm:$0xff]  }
 0x825   :  { %17871 = vmatprep.subr.bf16.mxu0 %v25083_v31  ;;  %v25147_v31 = vld [vmem:[#allocation8 + $0x17d8] ss:$40 sps:$4 sm:$0xff]  }
 0x827   :  { %12442 = vmatpush1.bf16.msra.mxu1 %v25078_v32  ;;  %v25152_v32 = vld [vmem:[#allocation8 + $0x182c] ss:$40 sps:$4 sm:$0xff]  }
 0x828   :  { %17872 = vmatpush1.bf16.msra.mxu0 %v25081_v10  ;;  %12452 = vmatprep.subr.bf16.mxu1 %v25086_v36  ;;  %v25150_v10 = vld [vmem:[#allocation8 + $0x1828] ss:$40 sps:$4 sm:$0xff]   ;;  %v25155_v36 = vld [vmem:[#allocation8 + $0x187c] ss:$40 sps:$4 sm:$0xff]  }
 0x829   :  { %17873 = vmatprep.subr.bf16.mxu0 %v25089_v37  ;;  %v25153_v37 = vld [vmem:[#allocation8 + $0x1878] ss:$40 sps:$4 sm:$0xff]  }
 0x82a   :  { %12444 = vmatmul.mubr.bf16.vlgmr.msra.gmra.mrb[16].mxu1 %v26898_v17  ;;  %v25102_v17 = vld [vmem:[#allocation8 + $0x1508] ss:$40 sps:$4 sm:$0xff]  }
 0x82b   :  { %12453 = vmatpush1.bf16.msra.mxu1 %v25084_v11  ;;  %12484 = vmatprep.mubr.bf16.mxu1 %v26916_v29  ;;  %v25105_v29 = vld [vmem:[#allocation11 + $0xd28] ss:$40 sps:$4 sm:$0xff]  }
 0x82c   :  { %17874 = vmatpush1.bf16.msra.mxu0 %v25087_v53  ;;  %12454 = vmatprep.subr.bf16.mxu1 %v25092_v39  ;;  %v25158_v11 = vld [vmem:[#allocation8 + $0x18cc] ss:$40 sps:$4 sm:$0xff]  }
 0x82d   :  { %17875 = vmatprep.subr.bf16.mxu0 %v25095_v15  ;;  %v25156_v15 = vld [vmem:[#allocation8 + $0x18c8] ss:$40 sps:$4 sm:$0xff]  }
 0x82f   :  { %12455 = vmatpush1.bf16.msra.mxu1 %v25090_v38 }
 0x830   :  { %17876 = vmatpush1.bf16.msra.mxu0 %v25093_v40  ;;  %12456 = vmatprep.subr.bf16.mxu1 %v25098_v47  ;;  %v25161_v40 = vld [vmem:[#allocation11 + $0x4] ss:$40 sps:$4 sm:$0xff]  }
 0x831   :  { %17877 = vmatprep.subr.bf16.mxu0 %v25101_v8  ;;  %v25159_v8 = vld [vmem:[#allocation11] ss:$40 sps:$4 sm:$0xff]  }
 0x833   :  { %12457 = vmatpush1.bf16.msra.mxu1 %v25096_v45  ;;  %v25164_v45 = vld [vmem:[#allocation11 + $0x54] ss:$40 sps:$4 sm:$0xff]  }
 0x834   :  { %17878 = vmatpush1.bf16.msra.mxu0 %v25099_v50  ;;  %12458 = vmatprep.subr.bf16.mxu1 %v25104_v5  ;;  %v25162_v50 = vld [vmem:[#allocation11 + $0x50] ss:$40 sps:$4 sm:$0xff]   ;;  %v25167_v5 = vld [vmem:[#allocation11 + $0xa4] ss:$40 sps:$4 sm:$0xff]  }
 0x835   :  { %17879 = vmatprep.subr.bf16.mxu0 %v25107_v54  ;;  %v25165_v54 = vld [vmem:[#allocation11 + $0xa0] ss:$40 sps:$4 sm:$0xff]  }
 0x837   :  { %12459 = vmatpush1.bf16.msra.mxu1 %v25102_v17  ;;  %v25170_v17 = vld [vmem:[#allocation11 + $0xf4] ss:$40 sps:$4 sm:$0xff]  }
 0x838   :  { %17880 = vmatpush1.bf16.msra.mxu0 %v25105_v29  ;;  %12460 = vmatprep.subr.bf16.mxu1 %v25110_v51  ;;  %v25168_v29 = vld [vmem:[#allocation11 + $0xf0] ss:$40 sps:$4 sm:$0xff]   ;;  %v25173_v51 = vld [vmem:[#allocation11 + $0x144] ss:$40 sps:$4 sm:$0xff]  }
 0x839   :  { %17881 = vmatprep.subr.bf16.mxu0 %v25113_v57  ;;  %v25171_v57 = vld [vmem:[#allocation11 + $0x140] ss:$40 sps:$4 sm:$0xff]  }
 0x83b   :  { %12461 = vmatpush1.bf16.msra.mxu1 %v25108_v42  ;;  %v25176_v42 = vld [vmem:[#allocation11 + $0x194] ss:$40 sps:$4 sm:$0xff]  }
 0x83c   :  { %17882 = vmatpush1.bf16.msra.mxu0 %v25111_v58  ;;  %12462 = vmatprep.subr.bf16.mxu1 %v25116_v28  ;;  %v25179_v58 = vld [vmem:[#allocation11 + $0x1e4] ss:$40 sps:$4 sm:$0xff]   ;;  %v25177_v28 = vld [vmem:[#allocation11 + $0x1e0] ss:$40 sps:$4 sm:$0xff]  }
 0x83d   :  { %17883 = vmatprep.subr.bf16.mxu0 %v25119_v34  ;;  %v25182_v34 = vld [vmem:[#allocation11 + $0x234] ss:$40 sps:$4 sm:$0xff]  }
 0x83f   :  { %12463 = vmatpush1.bf16.msra.mxu1 %v25114_v59  ;;  %v25180_v59 = vld [vmem:[#allocation11 + $0x230] ss:$40 sps:$4 sm:$0xff]  }
 0x840   :  { %17884 = vmatpush1.bf16.msra.mxu0 %v25117_v61  ;;  %12464 = vmatprep.subr.bf16.mxu1 %v25122_v1  ;;  %v25276_v61 = vld [vmem:[#allocation11 + $0xf08] ss:$40 sps:$4 sm:$0xff]   ;;  %v25278_v1 = vld [vmem:[#allocation11 + $0xf0c] ss:$40 sps:$4 sm:$0xff]  }
 0x841   :  { %17885 = vmatprep.subr.bf16.mxu0 %v25125_v24  ;;  %v25185_v24 = vld [vmem:[#allocation11 + $0x284] ss:$40 sps:$4 sm:$0xff]  }
 0x843   :  { %12465 = vmatpush1.bf16.msra.mxu1 %v25120_v3  ;;  %v25183_v3 = vld [vmem:[#allocation11 + $0x280] ss:$40 sps:$4 sm:$0xff]  }
 0x844   :  { %17886 = vmatpush1.bf16.msra.mxu0 %v25123_v4  ;;  %12466 = vmatprep.subr.bf16.mxu1 %v25128_v9  ;;  %v25282_v4 = vld [vmem:[#allocation11 + $0xf58] ss:$40 sps:$4 sm:$0xff]   ;;  %v25284_v9 = vld [vmem:[#allocation11 + $0xf5c] ss:$40 sps:$4 sm:$0xff]  }
 0x845   :  { %17887 = vmatprep.subr.bf16.mxu0 %v25131_v6  ;;  %v25186_v6 = vld [vmem:[#allocation11 + $0x2d0] ss:$40 sps:$4 sm:$0xff]  }
 0x847   :  { %12467 = vmatpush1.bf16.msra.mxu1 %v25126_v43  ;;  %v25288_v43 = vld [vmem:[#allocation11 + $0xfa8] ss:$40 sps:$4 sm:$0xff]  }
 0x848   :  { %17888 = vmatpush1.bf16.msra.mxu0 %v25129_v56  ;;  %12468 = vmatprep.subr.bf16.mxu1 %v25134_v7  ;;  %v25290_v56 = vld [vmem:[#allocation11 + $0xfac] ss:$40 sps:$4 sm:$0xff]  }
 0x849   :  { %17889 = vmatprep.subr.bf16.mxu0 %v25137_v62  ;;  %v25191_v7 = vld [vmem:[#allocation11 + $0x324] ss:$40 sps:$4 sm:$0xff]   ;;  %v25294_v62 = vld [vmem:[#allocation11 + $0xff8] ss:$40 sps:$4 sm:$0xff]  }
 0x84b   :  { %12469 = vmatpush1.bf16.msra.mxu1 %v25132_v52  ;;  %v25296_v52 = vld [vmem:[#allocation11 + $0xffc] ss:$40 sps:$4 sm:$0xff]  }
 0x84c   :  { %17890 = vmatpush1.bf16.msra.mxu0 %v25135_v16  ;;  %12470 = vmatprep.subr.bf16.mxu1 %v25140_v22  ;;  %v25194_v16 = vld [vmem:[#allocation11 + $0x374] ss:$40 sps:$4 sm:$0xff]   ;;  %v25192_v22 = vld [vmem:[#allocation11 + $0x370] ss:$40 sps:$4 sm:$0xff]  }
 0x84d   :  { %17900 = vmatprep.subr.bf16.mxu0 %v25278_v1  ;;  %v25350_v1 = vld [vmem:[#allocation11 + $0x12cc] ss:$40 sps:$4 sm:$0xff]  }
 0x84f   :  { %12471 = vmatpush1.bf16.msra.mxu1 %v25138_v35  ;;  %17892 = vmatmul.mubr.bf16.vlgmr.msra.gmra.mrb[24].mxu0 %v26995_v25  ;;  %v25302_v35 = vld [vmem:[#allocation11 + $0x104c] ss:$40 sps:$4 sm:$0xff]  }
 0x850   :  { %12472 = vmatprep.subr.bf16.mxu1 %v25143_v26  ;;  %17901 = vmatpush1.bf16.msra.mxu0 %v25276_v61  ;;  %v25197_v26 = vld [vmem:[#allocation11 + $0x3c4] ss:$40 sps:$4 sm:$0xff]   ;;  %v25348_v61 = vld [vmem:[#allocation11 + $0x12c8] ss:$40 sps:$4 sm:$0xff]  }
 0x851   :  { %17902 = vmatprep.subr.bf16.mxu0 %v25284_v9  ;;  %v25356_v9 = vld [vmem:[#allocation11 + $0x131c] ss:$40 sps:$4 sm:$0xff]  }
 0x853   :  { %12473 = vmatpush1.bf16.msra.mxu1 %v25141_v23  ;;  %v25195_v23 = vld [vmem:[#allocation11 + $0x3c0] ss:$40 sps:$4 sm:$0xff]  }
 0x854   :  { %12474 = vmatprep.subr.bf16.mxu1 %v25146_v60  ;;  %17903 = vmatpush1.bf16.msra.mxu0 %v25282_v4  ;;  %v25306_v60 = vld [vmem:[#allocation11 + $0x1098] ss:$40 sps:$4 sm:$0xff]  }
 0x855   :  { %17904 = vmatprep.subr.bf16.mxu0 %v25290_v56  ;;  %v25354_v4 = vld [vmem:[#allocation11 + $0x1318] ss:$40 sps:$4 sm:$0xff]   ;;  %v25227_v56 = vld [vmem:[#allocation11 + $0x6e4] ss:$40 sps:$4 sm:$0xff]  }
 0x857   :  { %12475 = vmatpush1.bf16.msra.mxu1 %v25144_v48  ;;  %v25308_v48 = vld [vmem:[#allocation11 + $0x109c] ss:$40 sps:$4 sm:$0xff]  }
 0x858   :  { %12476 = vmatprep.subr.bf16.mxu1 %v25149_v30  ;;  %17905 = vmatpush1.bf16.msra.mxu0 %v25288_v43  ;;  %v25200_v30 = vld [vmem:[#allocation11 + $0x414] ss:$40 sps:$4 sm:$0xff]  }
 0x859   :  { %17906 = vmatprep.subr.bf16.mxu0 %v25296_v52  ;;  %v25362_v43 = vld [vmem:[#allocation11 + $0x136c] ss:$40 sps:$4 sm:$0xff]  }
 0x85a   :  { %v25230_v52 = vld [vmem:[#allocation11 + $0x734] ss:$40 sps:$4 sm:$0xff]  }
 0x85b   :  { %12477 = vmatpush1.bf16.msra.mxu1 %v25147_v31  ;;  %v25198_v31 = vld [vmem:[#allocation11 + $0x410] ss:$40 sps:$4 sm:$0xff]  }
 0x85c   :  { %12478 = vmatprep.subr.bf16.mxu1 %v25152_v32  ;;  %17907 = vmatpush1.bf16.msra.mxu0 %v25294_v62  ;;  %v25312_v32 = vld [vmem:[#allocation11 + $0x10e8] ss:$40 sps:$4 sm:$0xff]   ;;  %v25368_v62 = vld [vmem:[#allocation11 + $0x13bc] ss:$40 sps:$4 sm:$0xff]  }
 0x85d   :  { %17908 = vmatprep.subr.bf16.mxu0 %v25302_v35  ;;  %v25233_v35 = vld [vmem:[#allocation11 + $0x784] ss:$40 sps:$4 sm:$0xff]  }
 0x85f   :  { %12479 = vmatpush1.bf16.msra.mxu1 %v25150_v10  ;;  %v25314_v10 = vld [vmem:[#allocation11 + $0x10ec] ss:$40 sps:$4 sm:$0xff]  }
 0x860   :  { %12480 = vmatprep.subr.bf16.mxu1 %v25155_v36  ;;  %17909 = vmatpush1.bf16.msra.mxu0 %v25300_v44  ;;  %v25203_v36 = vld [vmem:[#allocation11 + $0x464] ss:$40 sps:$4 sm:$0xff]  }
 0x861   :  { %17910 = vmatprep.subr.bf16.mxu0 %v25308_v48  ;;  %v25374_v44 = vld [vmem:[#allocation11 + $0x140c] ss:$40 sps:$4 sm:$0xff]  }
 0x862   :  { %v26998_v53 = vpop.f32.mrb[20].mxu0  ;;  %v25239_v48 = vld [vmem:[#allocation11 + $0x824] ss:$40 sps:$4 sm:$0xff]  }
 0x863   :  { %12481 = vmatpush1.bf16.msra.mxu1 %v25153_v37  ;;  %v27000_v39 = vpop.f32.mrb[21].mxu0  ;;  %v25201_v37 = vld [vmem:[#allocation11 + $0x460] ss:$40 sps:$4 sm:$0xff]  }
 0x864   :  { %v12695_v38 = vpop.f32.mrb[22].mxu0  ;;  %12482 = vmatprep.subr.bf16.mxu1 %v25158_v11  ;;  %17911 = vmatpush1.bf16.msra.mxu0 %v25306_v60  ;;  %v25318_v11 = vld [vmem:[#allocation11 + $0x1138] ss:$40 sps:$4 sm:$0xff]  }
 0x865   :  { %v12696_v47 = vpop.f32.mrb[23].mxu0  ;;  %17912 = vmatprep.subr.bf16.mxu0 %v25314_v10  ;;  %v25206_v38 = vld [vmem:[#allocation11 + $0x4b4] ss:$40 sps:$4 sm:$0xff]   ;;  %v25234_v60 = vld [vmem:[#allocation11 + $0x7d0] ss:$40 sps:$4 sm:$0xff]  }
 0x866   :  { %v25324_v47 = vld [vmem:[#allocation11 + $0x1188] ss:$40 sps:$4 sm:$0xff]   ;;  %v25245_v10 = vld [vmem:[#allocation11 + $0x8c4] ss:$40 sps:$4 sm:$0xff]  }
 0x867   :  { %12483 = vmatpush1.bf16.msra.mxu1 %v25156_v15  ;;  %v25320_v15 = vld [vmem:[#allocation11 + $0x113c] ss:$40 sps:$4 sm:$0xff]  }
 0x868   :  { %17572 = vmatprep.subr.bf16.mxu1 %v25161_v40  ;;  %17913 = vmatpush1.bf16.msra.mxu0 %v25312_v32  ;;  %v25204_v40 = vld [vmem:[#allocation11 + $0x4b0] ss:$40 sps:$4 sm:$0xff]  }
 0x869   :  { %17914 = vmatprep.subr.bf16.mxu0 %v25320_v15  ;;  %v25240_v32 = vld [vmem:[#allocation11 + $0x870] ss:$40 sps:$4 sm:$0xff]   ;;  %v25251_v15 = vld [vmem:[#allocation11 + $0x964] ss:$40 sps:$4 sm:$0xff]  }
 0x86a   :  { %12485 = vmatmul.mubr.bf16.vlgmr.msra.gmra.mrb[16].mxu1 %v26918_v55  ;;  %v25174_v55 = vld [vmem:[#allocation11 + $0x190] ss:$40 sps:$4 sm:$0xff]  }
 0x86b   :  { %17573 = vmatpush1.bf16.msra.mxu1 %v25159_v8  ;;  %17604 = vmatprep.mubr.bf16.mxu1 %v26960_v49  ;;  %v25326_v8 = vld [vmem:[#allocation11 + $0x118c] ss:$40 sps:$4 sm:$0xff]  }
 0x86c   :  { %17574 = vmatprep.subr.bf16.mxu1 %v25164_v45  ;;  %17915 = vmatpush1.bf16.msra.mxu0 %v25318_v11  ;;  %v25209_v45 = vld [vmem:[#allocation11 + $0x504] ss:$40 sps:$4 sm:$0xff]   ;;  %v25246_v11 = vld [vmem:[#allocation11 + $0x910] ss:$40 sps:$4 sm:$0xff]  }
 0x86d   :  { %17916 = vmatprep.subr.bf16.mxu0 %v25326_v8  ;;  %v25257_v8 = vld [vmem:[#allocation11 + $0xa04] ss:$40 sps:$4 sm:$0xff]  }
 0x86f   :  { %17575 = vmatpush1.bf16.msra.mxu1 %v25162_v50  ;;  %v25207_v50 = vld [vmem:[#allocation11 + $0x500] ss:$40 sps:$4 sm:$0xff]  }
 0x870   :  { %17576 = vmatprep.subr.bf16.mxu1 %v25167_v5  ;;  %17917 = vmatpush1.bf16.msra.mxu0 %v25324_v47  ;;  %v25330_v5 = vld [vmem:[#allocation11 + $0x11d8] ss:$40 sps:$4 sm:$0xff]  }
 0x871   :  { %v25252_v47 = vld [vmem:[#allocation11 + $0x9b0] ss:$40 sps:$4 sm:$0xff]  }
 0x873   :  { %17577 = vmatpush1.bf16.msra.mxu1 %v25165_v54  ;;  %v25332_v54 = vld [vmem:[#allocation11 + $0x11dc] ss:$40 sps:$4 sm:$0xff]  }
 0x874   :  { %17578 = vmatprep.subr.bf16.mxu1 %v25170_v17  ;;  %v25212_v17 = vld [vmem:[#allocation11 + $0x554] ss:$40 sps:$4 sm:$0xff]   ;;  %17918 = vmatprep.subr.bf16.mxu0 %v25332_v54  ;;  %v25263_v54 = vld [vmem:[#allocation11 + $0xaa4] ss:$40 sps:$4 sm:$0xff]  }
 0x875   :  { %17919 = vmatpush1.bf16.msra.mxu0 %v25330_v5  ;;  %v25258_v5 = vld [vmem:[#allocation11 + $0xa50] ss:$40 sps:$4 sm:$0xff]  }
 0x877   :  { %17579 = vmatpush1.bf16.msra.mxu1 %v25168_v29  ;;  %v25210_v29 = vld [vmem:[#allocation11 + $0x550] ss:$40 sps:$4 sm:$0xff]  }
 0x878   :  { %17580 = vmatprep.subr.bf16.mxu1 %v25173_v51  ;;  %v25336_v51 = vld [vmem:[#allocation11 + $0x1228] ss:$40 sps:$4 sm:$0xff]  }
 0x87b   :  { %17581 = vmatpush1.bf16.msra.mxu1 %v25171_v57  ;;  %v25338_v57 = vld [vmem:[#allocation11 + $0x122c] ss:$40 sps:$4 sm:$0xff]  }
 0x87c   :  { %17582 = vmatprep.subr.bf16.mxu1 %v25176_v42  ;;  %v25215_v42 = vld [vmem:[#allocation11 + $0x5a4] ss:$40 sps:$4 sm:$0xff]   ;;  %17920 = vmatprep.subr.bf16.mxu0 %v25338_v57 }
 0x87d   :  { %17921 = vmatpush1.bf16.msra.mxu0 %v25336_v51  ;;  %v25264_v51 = vld [vmem:[#allocation11 + $0xaf0] ss:$40 sps:$4 sm:$0xff]   ;;  %v25269_v57 = vld [vmem:[#allocation11 + $0xb44] ss:$40 sps:$4 sm:$0xff]  }
 0x87f   :  { %17583 = vmatpush1.bf16.msra.mxu1 %v25174_v55  ;;  %v25213_v55 = vld [vmem:[#allocation11 + $0x5a0] ss:$40 sps:$4 sm:$0xff]  }
 0x880   :  { %17584 = vmatprep.subr.bf16.mxu1 %v25179_v58  ;;  %v25342_v58 = vld [vmem:[#allocation11 + $0x1278] ss:$40 sps:$4 sm:$0xff]  }
 0x883   :  { %17585 = vmatpush1.bf16.msra.mxu1 %v25177_v28  ;;  %v25344_v28 = vld [vmem:[#allocation11 + $0x127c] ss:$40 sps:$4 sm:$0xff]  }
 0x884   :  { %17586 = vmatprep.subr.bf16.mxu1 %v25182_v34  ;;  %v25218_v34 = vld [vmem:[#allocation11 + $0x5f4] ss:$40 sps:$4 sm:$0xff]   ;;  %17922 = vmatprep.subr.bf16.mxu0 %v25344_v28  ;;  %v25275_v28 = vld [vmem:[#allocation11 + $0xbe4] ss:$40 sps:$4 sm:$0xff]  }
 0x885   :  { %17923 = vmatpush1.bf16.msra.mxu0 %v25342_v58  ;;  %v25270_v58 = vld [vmem:[#allocation11 + $0xb90] ss:$40 sps:$4 sm:$0xff]  }
 0x886   :  { %17924 = vmatprep.subr.bf16.mxu0 %v25350_v1  ;;  %v25287_v1 = vld [vmem:[#allocation11 + $0xc84] ss:$40 sps:$4 sm:$0xff]  }
 0x887   :  { %17587 = vmatpush1.bf16.msra.mxu1 %v25180_v59  ;;  %v25216_v59 = vld [vmem:[#allocation11 + $0x5f0] ss:$40 sps:$4 sm:$0xff]  }
 0x888   :  { %17588 = vmatprep.subr.bf16.mxu1 %v25185_v24  ;;  %v25221_v24 = vld [vmem:[#allocation11 + $0x644] ss:$40 sps:$4 sm:$0xff]  }
 0x889   :  { %17925 = vmatpush1.bf16.msra.mxu0 %v25348_v61  ;;  %v25279_v61 = vld [vmem:[#allocation11 + $0xc30] ss:$40 sps:$4 sm:$0xff]  }
 0x88a   :  { %17926 = vmatprep.subr.bf16.mxu0 %v25356_v9  ;;  %v25299_v9 = vld [vmem:[#allocation11 + $0xd24] ss:$40 sps:$4 sm:$0xff]  }
 0x88b   :  { %17589 = vmatpush1.bf16.msra.mxu1 %v25183_v3  ;;  %v25219_v3 = vld [vmem:[#allocation11 + $0x640] ss:$40 sps:$4 sm:$0xff]  }
 0x88c   :  { %17590 = vmatprep.subr.bf16.mxu1 %v25188_v63  ;;  %v25224_v63 = vld [vmem:[#allocation11 + $0x694] ss:$40 sps:$4 sm:$0xff]  }
 0x88d   :  { %17927 = vmatpush1.bf16.msra.mxu0 %v25354_v4  ;;  %v25291_v4 = vld [vmem:[#allocation11 + $0xcd0] ss:$40 sps:$4 sm:$0xff]  }
 0x88e   :  { %17928 = vmatprep.subr.bf16.mxu0 %v25362_v43  ;;  %v25303_v43 = vld [vmem:[#allocation11 + $0xd70] ss:$40 sps:$4 sm:$0xff]  }
 0x88f   :  { %17591 = vmatpush1.bf16.msra.mxu1 %v25186_v6  ;;  %v25222_v6 = vld [vmem:[#allocation11 + $0x690] ss:$40 sps:$4 sm:$0xff]  }
 0x890   :  { %17592 = vmatprep.subr.bf16.mxu1 %v25191_v7  ;;  %v25360_v7 = vld [vmem:[#allocation11 + $0x1368] ss:$40 sps:$4 sm:$0xff]  }
 0x891   :  { %17929 = vmatpush1.bf16.msra.mxu0 %v25360_v7  ;;  %v25309_v7 = vld [vmem:[#allocation11 + $0xdc0] ss:$40 sps:$4 sm:$0xff]  }
 0x892   :  { %17930 = vmatprep.subr.bf16.mxu0 %v25368_v62  ;;  %v25315_v62 = vld [vmem:[#allocation11 + $0xe10] ss:$40 sps:$4 sm:$0xff]  }
 0x893   :  { %17593 = vmatpush1.bf16.msra.mxu1 %v25189_v12  ;;  %v25225_v12 = vld [vmem:[#allocation11 + $0x6e0] ss:$40 sps:$4 sm:$0xff]  }
 0x894   :  { %17594 = vmatprep.subr.bf16.mxu1 %v25194_v16  ;;  %v25366_v16 = vld [vmem:[#allocation11 + $0x13b8] ss:$40 sps:$4 sm:$0xff]  }
 0x895   :  { %17931 = vmatpush1.bf16.msra.mxu0 %v25366_v16  ;;  %v25321_v16 = vld [vmem:[#allocation11 + $0xe60] ss:$40 sps:$4 sm:$0xff]  }
 0x896   :  { %17941 = vmatprep.subr.bf16.mxu0 %v25374_v44  ;;  %v25327_v44 = vld [vmem:[#allocation11 + $0xeb0] ss:$40 sps:$4 sm:$0xff]  }
 0x897   :  { %17595 = vmatpush1.bf16.msra.mxu1 %v25192_v22  ;;  %v25228_v22 = vld [vmem:[#allocation11 + $0x730] ss:$40 sps:$4 sm:$0xff]  }
 0x898   :  { %17596 = vmatprep.subr.bf16.mxu1 %v25197_v26  ;;  %v25231_v26 = vld [vmem:[#allocation11 + $0x780] ss:$40 sps:$4 sm:$0xff]  }
 0x89b   :  { %17597 = vmatpush1.bf16.msra.mxu1 %v25195_v23  ;;  %v25236_v23 = vld [vmem:[#allocation11 + $0x7d4] ss:$40 sps:$4 sm:$0xff]  }
 0x89c   :  { %17598 = vmatprep.subr.bf16.mxu1 %v25200_v30  ;;  %v25237_v30 = vld [vmem:[#allocation11 + $0x820] ss:$40 sps:$4 sm:$0xff]  }
 0x89f   :  { %17599 = vmatpush1.bf16.msra.mxu1 %v25198_v31  ;;  %v25242_v31 = vld [vmem:[#allocation11 + $0x874] ss:$40 sps:$4 sm:$0xff]  }
 0x8a0   :  { %17600 = vmatprep.subr.bf16.mxu1 %v25203_v36  ;;  %v25243_v36 = vld [vmem:[#allocation11 + $0x8c0] ss:$40 sps:$4 sm:$0xff]  }
 0x8a3   :  { %17601 = vmatpush1.bf16.msra.mxu1 %v25201_v37  ;;  %v25248_v37 = vld [vmem:[#allocation11 + $0x914] ss:$40 sps:$4 sm:$0xff]  }
 0x8a4   :  { %17602 = vmatprep.subr.bf16.mxu1 %v25206_v38  ;;  %v25249_v38 = vld [vmem:[#allocation11 + $0x960] ss:$40 sps:$4 sm:$0xff]  }
 0x8a7   :  { %17603 = vmatpush1.bf16.msra.mxu1 %v25204_v40  ;;  %v25254_v40 = vld [vmem:[#allocation11 + $0x9b4] ss:$40 sps:$4 sm:$0xff]  }
 0x8a8   :  { %17613 = vmatprep.subr.bf16.mxu1 %v25209_v45  ;;  %v25255_v45 = vld [vmem:[#allocation11 + $0xa00] ss:$40 sps:$4 sm:$0xff]  }
 0x8aa   :  { %17605 = vmatmul.mubr.bf16.vlgmr.msra.gmra.mrb[20].mxu1 %v26969_v27 }
 0x8ab   :  { %17614 = vmatpush1.bf16.msra.mxu1 %v25207_v50  ;;  %17645 = vmatprep.mubr.bf16.mxu1 %v26980_v41  ;;  %v25260_v50 = vld [vmem:[#allocation11 + $0xa54] ss:$40 sps:$4 sm:$0xff]  }
 0x8ac   :  { %17615 = vmatprep.subr.bf16.mxu1 %v25212_v17  ;;  %v25261_v17 = vld [vmem:[#allocation11 + $0xaa0] ss:$40 sps:$4 sm:$0xff]  }
 0x8af   :  { %17616 = vmatpush1.bf16.msra.mxu1 %v25210_v29  ;;  %v25266_v29 = vld [vmem:[#allocation11 + $0xaf4] ss:$40 sps:$4 sm:$0xff]  }
 0x8b0   :  { %17617 = vmatprep.subr.bf16.mxu1 %v25215_v42  ;;  %v25267_v42 = vld [vmem:[#allocation11 + $0xb40] ss:$40 sps:$4 sm:$0xff]  }
 0x8b3   :  { %17618 = vmatpush1.bf16.msra.mxu1 %v25213_v55  ;;  %v25272_v55 = vld [vmem:[#allocation11 + $0xb94] ss:$40 sps:$4 sm:$0xff]  }
 0x8b4   :  { %17619 = vmatprep.subr.bf16.mxu1 %v25218_v34  ;;  %v25273_v34 = vld [vmem:[#allocation11 + $0xbe0] ss:$40 sps:$4 sm:$0xff]  }
 0x8b7   :  { %17620 = vmatpush1.bf16.msra.mxu1 %v25216_v59  ;;  %v25281_v59 = vld [vmem:[#allocation11 + $0xc34] ss:$40 sps:$4 sm:$0xff]  }
 0x8b8   :  { %17621 = vmatprep.subr.bf16.mxu1 %v25221_v24  ;;  %v25285_v24 = vld [vmem:[#allocation11 + $0xc80] ss:$40 sps:$4 sm:$0xff]  }
 0x8bb   :  { %17622 = vmatpush1.bf16.msra.mxu1 %v25219_v3  ;;  %v25293_v3 = vld [vmem:[#allocation11 + $0xcd4] ss:$40 sps:$4 sm:$0xff]  }
 0x8bc   :  { %17623 = vmatprep.subr.bf16.mxu1 %v25224_v63  ;;  %v25297_v63 = vld [vmem:[#allocation11 + $0xd20] ss:$40 sps:$4 sm:$0xff]  }
 0x8bf   :  { %17624 = vmatpush1.bf16.msra.mxu1 %v25222_v6  ;;  %v25305_v6 = vld [vmem:[#allocation11 + $0xd74] ss:$40 sps:$4 sm:$0xff]  }
 0x8c0   :  { %17625 = vmatprep.subr.bf16.mxu1 %v25227_v56  ;;  %v25311_v56 = vld [vmem:[#allocation11 + $0xdc4] ss:$40 sps:$4 sm:$0xff]  }
 0x8c3   :  { %17626 = vmatpush1.bf16.msra.mxu1 %v25225_v12  ;;  %v25317_v12 = vld [vmem:[#allocation11 + $0xe14] ss:$40 sps:$4 sm:$0xff]  }
 0x8c4   :  { %17627 = vmatprep.subr.bf16.mxu1 %v25230_v52  ;;  %v25323_v52 = vld [vmem:[#allocation11 + $0xe64] ss:$40 sps:$4 sm:$0xff]  }
 0x8c7   :  { %17628 = vmatpush1.bf16.msra.mxu1 %v25228_v22  ;;  %v25329_v22 = vld [vmem:[#allocation11 + $0xeb4] ss:$40 sps:$4 sm:$0xff]  }
 0x8c8   :  { %17629 = vmatprep.subr.bf16.mxu1 %v25233_v35  ;;  %v25335_v35 = vld [vmem:[#allocation11 + $0xf04] ss:$40 sps:$4 sm:$0xff]  }
 0x8cb   :  { %17630 = vmatpush1.bf16.msra.mxu1 %v25231_v26  ;;  %v25333_v26 = vld [vmem:[#allocation11 + $0xf00] ss:$40 sps:$4 sm:$0xff]  }
 0x8cc   :  { %17631 = vmatprep.subr.bf16.mxu1 %v25236_v23  ;;  %v25341_v23 = vld [vmem:[#allocation11 + $0xf54] ss:$40 sps:$4 sm:$0xff]  }
 0x8cf   :  { %17632 = vmatpush1.bf16.msra.mxu1 %v25234_v60  ;;  %v25339_v60 = vld [vmem:[#allocation11 + $0xf50] ss:$40 sps:$4 sm:$0xff]  }
 0x8d0   :  { %17633 = vmatprep.subr.bf16.mxu1 %v25239_v48  ;;  %v25347_v48 = vld [vmem:[#allocation11 + $0xfa4] ss:$40 sps:$4 sm:$0xff]  }
 0x8d3   :  { %17634 = vmatpush1.bf16.msra.mxu1 %v25237_v30  ;;  %v25345_v30 = vld [vmem:[#allocation11 + $0xfa0] ss:$40 sps:$4 sm:$0xff]  }
 0x8d4   :  { %17635 = vmatprep.subr.bf16.mxu1 %v25242_v31  ;;  %v25353_v31 = vld [vmem:[#allocation11 + $0xff4] ss:$40 sps:$4 sm:$0xff]  }
 0x8d7   :  { %17636 = vmatpush1.bf16.msra.mxu1 %v25240_v32  ;;  %v25351_v32 = vld [vmem:[#allocation11 + $0xff0] ss:$40 sps:$4 sm:$0xff]  }
 0x8d8   :  { %17637 = vmatprep.subr.bf16.mxu1 %v25245_v10  ;;  %v25359_v10 = vld [vmem:[#allocation11 + $0x1044] ss:$40 sps:$4 sm:$0xff]  }
 0x8db   :  { %17638 = vmatpush1.bf16.msra.mxu1 %v25243_v36  ;;  %v27009_v36 = vld [vmem:[#allocation10 + $0x8] sm:$0x3] }
 0x8dc   :  { %17639 = vmatprep.subr.bf16.mxu1 %v25248_v37  ;;  %v25357_v37 = vld [vmem:[#allocation11 + $0x1040] ss:$40 sps:$4 sm:$0xff]  }
 0x8df   :  { %17640 = vmatpush1.bf16.msra.mxu1 %v25246_v11  ;;  %v25365_v11 = vld [vmem:[#allocation11 + $0x1094] ss:$40 sps:$4 sm:$0xff]  }
 0x8e0   :  { %17641 = vmatprep.subr.bf16.mxu1 %v25251_v15  ;;  %v7662_v15 = vrot.slane %v27009_v36, %v26810_v33 }
 0x8e3   :  { %17642 = vmatpush1.bf16.msra.mxu1 %v25249_v38  ;;  %v26300_v38 = vld [vmem:[#allocation10] sm:$0xff] }
 0x8e4   :  { %17643 = vmatprep.subr.bf16.mxu1 %v25254_v40  ;;  %v7650_v40 = vrot.slane %v26300_v38, %v26893_v46 }
 0x8e7   :  { %17644 = vmatpush1.bf16.msra.mxu1 %v25252_v47  ;;  %v7654_v47 = vrot.slane %v26300_v38, %v26864_v18  ;;  %v25414_v38 = vld [vmem:[#allocation11 + $0x1638] ss:$40 sps:$4 sm:$0xff]  }
 0x8e8   :  { %17654 = vmatprep.subr.bf16.mxu1 %v25257_v8  ;;  %v25363_v8 = vld [vmem:[#allocation11 + $0x1090] ss:$40 sps:$4 sm:$0xff]  }
 0x8ea   :  { %17646 = vmatmul.mubr.bf16.vlgmr.msra.gmra.mrb[20].mxu1 %v26984_v0 }
 0x8eb   :  { %17655 = vmatpush1.bf16.msra.mxu1 %v25255_v45  ;;  %17686 = vmatprep.mubr.bf16.mxu1 %v26986_v2  ;;  %v25371_v45 = vld [vmem:[#allocation11 + $0x10e4] ss:$40 sps:$4 sm:$0xff]  }
 0x8ec   :  { %17656 = vmatprep.subr.bf16.mxu1 %v25260_v50 }
 0x8ef   :  { %17657 = vmatpush1.bf16.msra.mxu1 %v25258_v5  ;;  %v22204_v5 = vadd.f32 %v27000_v39, %v7662_v15  ;;  %v25380_v39 = vld [vmem:[#allocation11 + $0x145c] ss:$40 sps:$4 sm:$0xff]  }
 0x8f0   :  { %17658 = vmatprep.subr.bf16.mxu1 %v25263_v54  ;;  %v25419_v15 = vld [vmem:[#allocation11 + $0x1364] ss:$40 sps:$4 sm:$0xff]  }
 0x8f3   :  { %17659 = vmatpush1.bf16.msra.mxu1 %v25261_v17 }
 0x8f4   :  { %17660 = vmatprep.subr.bf16.mxu1 %v25266_v29 }
 0x8f7   :  { %17661 = vmatpush1.bf16.msra.mxu1 %v25264_v51 }
 0x8f8   :  { %17662 = vmatprep.subr.bf16.mxu1 %v25269_v57  ;;  %v25369_v57 = vld [vmem:[#allocation11 + $0x10e0] ss:$40 sps:$4 sm:$0xff]  }
 0x8fb   :  { %17663 = vmatpush1.bf16.msra.mxu1 %v25267_v42 }
 0x8fc   :  { %17664 = vmatprep.subr.bf16.mxu1 %v25272_v55 }
 0x8ff   :  { %17665 = vmatpush1.bf16.msra.mxu1 %v25270_v58  ;;  %v25377_v58 = vld [vmem:[#allocation11 + $0x1134] ss:$40 sps:$4 sm:$0xff]  }
 0x900   :  { %17666 = vmatprep.subr.bf16.mxu1 %v25275_v28 }
 0x903   :  { %17667 = vmatpush1.bf16.msra.mxu1 %v25273_v34  ;;  %v12707_v34 = vmax.f32 %v22204_v5, 0.0  ;;  %v25428_v5 = vld [vmem:[#allocation11 + $0x16dc] ss:$40 sps:$4 sm:$0xff]  }
 0x904   :  { %17668 = vmatprep.subr.bf16.mxu1 %v25281_v59 }
 0x907   :  { %17669 = vmatpush1.bf16.msra.mxu1 %v25279_v61  ;;  %v25372_v61 = vld [vmem:[#allocation11 + $0x1408] ss:$40 sps:$4 sm:$0xff]  }
 0x908   :  { %17670 = vmatprep.subr.bf16.mxu1 %v25287_v1  ;;  %v25375_v1 = vld [vmem:[#allocation11 + $0x1130] ss:$40 sps:$4 sm:$0xff]  }
 0x90b   :  { %17671 = vmatpush1.bf16.msra.mxu1 %v25285_v24 }
 0x90c   :  { %17672 = vmatprep.subr.bf16.mxu1 %v25293_v3  ;;  %v25383_v3 = vld [vmem:[#allocation11 + $0x1184] ss:$40 sps:$4 sm:$0xff]  }
 0x90f   :  { %17673 = vmatpush1.bf16.msra.mxu1 %v25291_v4  ;;  %v27022_v4 = vpack.c.bf16 %v12707_v34, %v12707_v34  ;;  %v25438_v34 = vld [vmem:[#allocation11 + $0x1778] ss:$40 sps:$4 sm:$0xff]  }
 0x910   :  { %17674 = vmatprep.subr.bf16.mxu1 %v25299_v9  ;;  %v25378_v9 = vld [vmem:[#allocation11 + $0x1458] ss:$40 sps:$4 sm:$0xff]  }
 0x913   :  { %17675 = vmatpush1.bf16.msra.mxu1 %v25297_v63  ;;  %v25381_v63 = vld [vmem:[#allocation11 + $0x1180] ss:$40 sps:$4 sm:$0xff]  }
 0x914   :  { %17676 = vmatprep.subr.bf16.mxu1 %v25305_v6  ;;  %v25386_v6 = vld [vmem:[#allocation11 + $0x14ac] ss:$40 sps:$4 sm:$0xff]  }
 0x917   :  { %17677 = vmatpush1.bf16.msra.mxu1 %v25303_v43  ;;  %v25389_v43 = vld [vmem:[#allocation11 + $0x11d4] ss:$40 sps:$4 sm:$0xff]  }
 0x918   :  { %17678 = vmatprep.subr.bf16.mxu1 %v25311_v56  ;;  %v25384_v56 = vld [vmem:[#allocation11 + $0x14a8] ss:$40 sps:$4 sm:$0xff]  }
 0x91b   :  { %17679 = vmatpush1.bf16.msra.mxu1 %v25309_v7  ;;  %v25387_v7 = vld [vmem:[#allocation11 + $0x11d0] ss:$40 sps:$4 sm:$0xff]  }
 0x91c   :  { %17680 = vmatprep.subr.bf16.mxu1 %v25317_v12  ;;  %v25392_v12 = vld [vmem:[#allocation11 + $0x14fc] ss:$40 sps:$4 sm:$0xff]  }
 0x91f   :  { %17681 = vmatpush1.bf16.msra.mxu1 %v25315_v62  ;;  %v25395_v62 = vld [vmem:[#allocation11 + $0x1224] ss:$40 sps:$4 sm:$0xff]  }
 0x920   :  { %17682 = vmatprep.subr.bf16.mxu1 %v25323_v52  ;;  %v25390_v52 = vld [vmem:[#allocation11 + $0x14f8] ss:$40 sps:$4 sm:$0xff]  }
 0x923   :  { %17683 = vmatpush1.bf16.msra.mxu1 %v25321_v16  ;;  %v25393_v16 = vld [vmem:[#allocation11 + $0x1220] ss:$40 sps:$4 sm:$0xff]  }
 0x924   :  { %17684 = vmatprep.subr.bf16.mxu1 %v25329_v22  ;;  %v25398_v22 = vld [vmem:[#allocation11 + $0x154c] ss:$40 sps:$4 sm:$0xff]  }
 0x927   :  { %17685 = vmatpush1.bf16.msra.mxu1 %v25327_v44  ;;  %v25401_v44 = vld [vmem:[#allocation11 + $0x1274] ss:$40 sps:$4 sm:$0xff]  }
 0x928   :  { %17695 = vmatprep.subr.bf16.mxu1 %v25335_v35  ;;  %v25396_v35 = vld [vmem:[#allocation11 + $0x1548] ss:$40 sps:$4 sm:$0xff]  }
 0x92a   :  { %17687 = vmatmul.mubr.bf16.vlgmr.msra.gmra.mrb[20].mxu1 %v26995_v25 }
 0x92b   :  { %17696 = vmatpush1.bf16.msra.mxu1 %v25333_v26  ;;  %v25399_v26 = vld [vmem:[#allocation11 + $0x1270] ss:$40 sps:$4 sm:$0xff]  }
 0x92c   :  { %17697 = vmatprep.subr.bf16.mxu1 %v25341_v23  ;;  %v25404_v23 = vld [vmem:[#allocation11 + $0x159c] ss:$40 sps:$4 sm:$0xff]  }
 0x92f   :  { %17698 = vmatpush1.bf16.msra.mxu1 %v25339_v60  ;;  %v25407_v60 = vld [vmem:[#allocation11 + $0x12c4] ss:$40 sps:$4 sm:$0xff]  }
 0x930   :  { %17699 = vmatprep.subr.bf16.mxu1 %v25347_v48  ;;  %v25402_v48 = vld [vmem:[#allocation11 + $0x1598] ss:$40 sps:$4 sm:$0xff]  }
 0x933   :  { %17700 = vmatpush1.bf16.msra.mxu1 %v25345_v30  ;;  %v25405_v30 = vld [vmem:[#allocation11 + $0x12c0] ss:$40 sps:$4 sm:$0xff]  }
 0x934   :  { %17701 = vmatprep.subr.bf16.mxu1 %v25353_v31  ;;  %v25410_v31 = vld [vmem:[#allocation11 + $0x15ec] ss:$40 sps:$4 sm:$0xff]  }
 0x937   :  { %17702 = vmatpush1.bf16.msra.mxu1 %v25351_v32  ;;  %v25413_v32 = vld [vmem:[#allocation11 + $0x1314] ss:$40 sps:$4 sm:$0xff]  }
 0x938   :  { %17703 = vmatprep.subr.bf16.mxu1 %v25359_v10  ;;  %v25408_v10 = vld [vmem:[#allocation11 + $0x15e8] ss:$40 sps:$4 sm:$0xff]  }
 0x93b   :  { %17704 = vmatpush1.bf16.msra.mxu1 %v25357_v37  ;;  %v25411_v37 = vld [vmem:[#allocation11 + $0x1310] ss:$40 sps:$4 sm:$0xff]  }
 0x93c   :  { %17705 = vmatprep.subr.bf16.mxu1 %v25365_v11  ;;  %v25416_v11 = vld [vmem:[#allocation11 + $0x163c] ss:$40 sps:$4 sm:$0xff]  }
 0x93d   :  { %v12486_v50 = vpop.f32.mrb[16].mxu1 }
 0x93e   :  { %v22201_v54 = vadd.f32 %v12486_v50, %v7650_v40  ;;  %v12488_v17 = vpop.f32.mrb[17].mxu1  ;;  %v25417_v40 = vld [vmem:[#allocation11 + $0x1360] ss:$40 sps:$4 sm:$0xff]   ;;  %v25423_v50 = vld [vmem:[#allocation11 + $0x13b0] ss:$40 sps:$4 sm:$0xff]  }
 0x93f   :  { %v22202_v29 = vadd.f32 %v12488_v17, %v7654_v47  ;;  %v12490_v51 = vpop.f32.mrb[18].mxu1  ;;  %17706 = vmatpush1.bf16.msra.mxu1 %v25363_v8  ;;  %v25422_v47 = vld [vmem:[#allocation11 + $0x168c] ss:$40 sps:$4 sm:$0xff]   ;;  %v25426_v17 = vld [vmem:[#allocation11 + $0x16d8] ss:$40 sps:$4 sm:$0xff]  }
 0x940   :  { %v12704_v42 = vmax.f32 %v22201_v54, 0.0  ;;  %v12491_v55 = vpop.f32.mrb[19].mxu1  ;;  %17707 = vmatprep.subr.bf16.mxu1 %v25371_v45  ;;  %v25425_v8 = vld [vmem:[#allocation11 + $0x13b4] ss:$40 sps:$4 sm:$0xff]   ;;  %v25420_v45 = vld [vmem:[#allocation11 + $0x1688] ss:$40 sps:$4 sm:$0xff]  }
 0x941   :  { %v12705_v28 = vmax.f32 %v22202_v29, 0.0  ;;  %v25431_v54 = vld [vmem:[#allocation11 + $0x1404] ss:$40 sps:$4 sm:$0xff]   ;;  %v25429_v29 = vld [vmem:[#allocation11 + $0x1400] ss:$40 sps:$4 sm:$0xff]  }
 0x942   :  { %v27018_v24 = vpack.c.bf16 %v12704_v42, %v12704_v42  ;;  %v25434_v51 = vld [vmem:[#allocation11 + $0x172c] ss:$40 sps:$4 sm:$0xff]   ;;  %v25432_v42 = vld [vmem:[#allocation11 + $0x1728] ss:$40 sps:$4 sm:$0xff]  }
 0x943   :  { %v27016_v59 = vpack.c.bf16 %v12705_v28, %v12705_v28  ;;  %17708 = vmatpush1.bf16.msra.mxu1 %v25369_v57  ;;  %v25437_v57 = vld [vmem:[#allocation11 + $0x1454] ss:$40 sps:$4 sm:$0xff]   ;;  %v25435_v55 = vld [vmem:[#allocation11 + $0x1450] ss:$40 sps:$4 sm:$0xff]   ;;  %v25443_v28 = vld [vmem:[#allocation11 + $0x14a4] ss:$40 sps:$4 sm:$0xff]  }
 0x944   :  { %17709 = vmatprep.subr.bf16.mxu1 %v25377_v58  ;;  %v25440_v58 = vld [vmem:[#allocation11 + $0x177c] ss:$40 sps:$4 sm:$0xff]  }
 0x945   :  { %17727 = vmatprep.mubr.bf16.mxu1 %v27016_v59  ;;  %17932 = vmatprep.mubr.bf16.mxu0 %v27016_v59 }
 0x946   :  { %17933 = vmatmul.mubr.bf16.vlgmr.msra.gmra.mrb[24].mxu0 %v27018_v24 }
 0x947   :  { %17942 = vmatpush1.bf16.msra.mxu0 %v25372_v61  ;;  %17710 = vmatpush1.bf16.msra.mxu1 %v25375_v1  ;;  %v25441_v61 = vld [vmem:[#allocation11 + $0x14a0] ss:$40 sps:$4 sm:$0xff]   ;;  %v25446_v1 = vld [vmem:[#allocation11 + $0x17cc] ss:$40 sps:$4 sm:$0xff]  }
 0x948   :  { %17973 = vmatprep.mubr.bf16.mxu0 %v27022_v4  ;;  %17943 = vmatprep.subr.bf16.mxu0 %v25380_v39  ;;  %v25449_v39 = vld [vmem:[#allocation11 + $0x14f4] ss:$40 sps:$4 sm:$0xff]  }
 0x949   :  { %17711 = vmatprep.subr.bf16.mxu1 %v25383_v3  ;;  %v25444_v3 = vld [vmem:[#allocation11 + $0x17c8] ss:$40 sps:$4 sm:$0xff]  }
 0x94b   :  { %17944 = vmatpush1.bf16.msra.mxu0 %v25378_v9  ;;  %17712 = vmatpush1.bf16.msra.mxu1 %v25381_v63  ;;  %v25447_v9 = vld [vmem:[#allocation11 + $0x14f0] ss:$40 sps:$4 sm:$0xff]   ;;  %v25452_v63 = vld [vmem:[#allocation11 + $0x181c] ss:$40 sps:$4 sm:$0xff]  }
 0x94c   :  { %17945 = vmatprep.subr.bf16.mxu0 %v25386_v6  ;;  %17713 = vmatprep.subr.bf16.mxu1 %v25389_v43  ;;  %v25455_v6 = vld [vmem:[#allocation11 + $0x1544] ss:$40 sps:$4 sm:$0xff]   ;;  %v25450_v43 = vld [vmem:[#allocation11 + $0x1818] ss:$40 sps:$4 sm:$0xff]  }
 0x94f   :  { %17946 = vmatpush1.bf16.msra.mxu0 %v25384_v56  ;;  %17714 = vmatpush1.bf16.msra.mxu1 %v25387_v7  ;;  %v25453_v56 = vld [vmem:[#allocation11 + $0x1540] ss:$40 sps:$4 sm:$0xff]   ;;  %v7658_v7 = vrot.slane %v27009_v36, %v26830_v13  ;;  %v25470_v36 = vld [vmem:[#allocation11 + $0x1c] ss:$40 sps:$4 sm:$0xff]  }
 0x950   :  { %17947 = vmatprep.subr.bf16.mxu0 %v25392_v12  ;;  %17715 = vmatprep.subr.bf16.mxu1 %v25395_v62  ;;  %v25458_v12 = vld [vmem:[#allocation11 + $0x186c] ss:$40 sps:$4 sm:$0xff]  }
 0x951   :  { %v25461_v62 = vld [vmem:[#allocation11 + $0x1594] ss:$40 sps:$4 sm:$0xff]  }
 0x953   :  { %17948 = vmatpush1.bf16.msra.mxu0 %v25390_v52  ;;  %17716 = vmatpush1.bf16.msra.mxu1 %v25393_v16  ;;  %v25456_v52 = vld [vmem:[#allocation11 + $0x1868] ss:$40 sps:$4 sm:$0xff]  }
 0x954   :  { %17949 = vmatprep.subr.bf16.mxu0 %v25398_v22  ;;  %17717 = vmatprep.subr.bf16.mxu1 %v25401_v44  ;;  %v25459_v16 = vld [vmem:[#allocation11 + $0x1590] ss:$40 sps:$4 sm:$0xff]   ;;  %v22203_v22 = vadd.f32 %v26998_v53, %v7658_v7  ;;  %v25464_v44 = vld [vmem:[#allocation11 + $0x18bc] ss:$40 sps:$4 sm:$0xff]  }
 0x955   :  { %v25471_v53 = vld [vmem:[#allocation11 + $0x1630] ss:$40 sps:$4 sm:$0xff]  }
 0x956   :  { %v25519_v7 = vld [vmem:[#allocation11 + $0x18b0] ss:$40 sps:$4 sm:$0xff]  }
 0x957   :  { %17950 = vmatpush1.bf16.msra.mxu0 %v25396_v35  ;;  %17718 = vmatpush1.bf16.msra.mxu1 %v25399_v26  ;;  %v25467_v35 = vld [vmem:[#allocation11 + $0x15e4] ss:$40 sps:$4 sm:$0xff]   ;;  %v25462_v26 = vld [vmem:[#allocation11 + $0x18b8] ss:$40 sps:$4 sm:$0xff]  }
 0x958   :  { %17951 = vmatprep.subr.bf16.mxu0 %v25404_v23  ;;  %17719 = vmatprep.subr.bf16.mxu1 %v25407_v60  ;;  %v25465_v23 = vld [vmem:[#allocation11 + $0x15e0] ss:$40 sps:$4 sm:$0xff]   ;;  %v12706_v60 = vmax.f32 %v22203_v22, 0.0  ;;  %v25530_v22 = vld [vmem:[#allocation11 + $0x33c] ss:$40 sps:$4 sm:$0xff]  }
 0x95b   :  { %17952 = vmatpush1.bf16.msra.mxu0 %v25402_v48  ;;  %17720 = vmatpush1.bf16.msra.mxu1 %v25405_v30  ;;  %v25473_v48 = vld [vmem:[#allocation11 + $0x1634] ss:$40 sps:$4 sm:$0xff]   ;;  %v25468_v30 = vld [vmem:[#allocation11 + $0x18] ss:$40 sps:$4 sm:$0xff]  }
 0x95c   :  { %17953 = vmatprep.subr.bf16.mxu0 %v25410_v31  ;;  %17721 = vmatprep.subr.bf16.mxu1 %v25413_v32  ;;  %v27031_v31 = vpack.c.bf16 %v12706_v60, %v12706_v60  ;;  %v25476_v32 = vld [vmem:[#allocation11 + $0x6c] ss:$40 sps:$4 sm:$0xff]  }
 0x95d   :  { %v25539_v60 = vld [vmem:[#allocation11 + $0xb4] ss:$40 sps:$4 sm:$0xff]  }
 0x95f   :  { %17954 = vmatpush1.bf16.msra.mxu0 %v25408_v10  ;;  %17722 = vmatpush1.bf16.msra.mxu1 %v25411_v37  ;;  %v25479_v10 = vld [vmem:[#allocation11 + $0x1684] ss:$40 sps:$4 sm:$0xff]   ;;  %v25474_v37 = vld [vmem:[#allocation11 + $0x68] ss:$40 sps:$4 sm:$0xff]  }
 0x960   :  { %17955 = vmatprep.subr.bf16.mxu0 %v25416_v11  ;;  %17723 = vmatprep.subr.bf16.mxu1 %v25419_v15  ;;  %v25477_v11 = vld [vmem:[#allocation11 + $0x1680] ss:$40 sps:$4 sm:$0xff]   ;;  %v25482_v15 = vld [vmem:[#allocation11 + $0xbc] ss:$40 sps:$4 sm:$0xff]  }
 0x963   :  { %17956 = vmatpush1.bf16.msra.mxu0 %v25414_v38  ;;  %17724 = vmatpush1.bf16.msra.mxu1 %v25417_v40  ;;  %v25485_v38 = vld [vmem:[#allocation11 + $0x16d4] ss:$40 sps:$4 sm:$0xff]   ;;  %v25480_v40 = vld [vmem:[#allocation11 + $0xb8] ss:$40 sps:$4 sm:$0xff]  }
 0x964   :  { %17957 = vmatprep.subr.bf16.mxu0 %v25422_v47  ;;  %17725 = vmatprep.subr.bf16.mxu1 %v25425_v8  ;;  %v25483_v47 = vld [vmem:[#allocation11 + $0x16d0] ss:$40 sps:$4 sm:$0xff]   ;;  %v25488_v8 = vld [vmem:[#allocation11 + $0x10c] ss:$40 sps:$4 sm:$0xff]  }
 0x967   :  { %17958 = vmatpush1.bf16.msra.mxu0 %v25420_v45  ;;  %17726 = vmatpush1.bf16.msra.mxu1 %v25423_v50  ;;  %v25491_v45 = vld [vmem:[#allocation11 + $0x1724] ss:$40 sps:$4 sm:$0xff]   ;;  %v25486_v50 = vld [vmem:[#allocation11 + $0x108] ss:$40 sps:$4 sm:$0xff]  }
 0x968   :  { %17959 = vmatprep.subr.bf16.mxu0 %v25428_v5  ;;  %17736 = vmatprep.subr.bf16.mxu1 %v25431_v54  ;;  %v25489_v5 = vld [vmem:[#allocation11 + $0x1720] ss:$40 sps:$4 sm:$0xff]   ;;  %v25494_v54 = vld [vmem:[#allocation11 + $0x15c] ss:$40 sps:$4 sm:$0xff]  }
 0x96a   :  { %17728 = vmatmul.mubr.bf16.vlgmr.msra.gmra.mrb[20].mxu1 %v27018_v24 }
 0x96b   :  { %17960 = vmatpush1.bf16.msra.mxu0 %v25426_v17  ;;  %17737 = vmatpush1.bf16.msra.mxu1 %v25429_v29  ;;  %v25497_v17 = vld [vmem:[#allocation11 + $0x1774] ss:$40 sps:$4 sm:$0xff]   ;;  %v25492_v29 = vld [vmem:[#allocation11 + $0x158] ss:$40 sps:$4 sm:$0xff]  }
 0x96c   :  { %17768 = vmatprep.mubr.bf16.mxu1 %v27022_v4  ;;  %17961 = vmatprep.subr.bf16.mxu0 %v25434_v51  ;;  %v25495_v51 = vld [vmem:[#allocation11 + $0x1770] ss:$40 sps:$4 sm:$0xff]  }
 0x96d   :  { %17738 = vmatprep.subr.bf16.mxu1 %v25437_v57  ;;  %v25500_v57 = vld [vmem:[#allocation11 + $0x1ac] ss:$40 sps:$4 sm:$0xff]  }
 0x96f   :  { %17962 = vmatpush1.bf16.msra.mxu0 %v25432_v42  ;;  %17739 = vmatpush1.bf16.msra.mxu1 %v25435_v55  ;;  %v25503_v42 = vld [vmem:[#allocation11 + $0x17c4] ss:$40 sps:$4 sm:$0xff]   ;;  %v25498_v55 = vld [vmem:[#allocation11 + $0x1a8] ss:$40 sps:$4 sm:$0xff]  }
 0x970   :  { %17963 = vmatprep.subr.bf16.mxu0 %v25440_v58  ;;  %17740 = vmatprep.subr.bf16.mxu1 %v25443_v28  ;;  %v25501_v58 = vld [vmem:[#allocation11 + $0x17c0] ss:$40 sps:$4 sm:$0xff]   ;;  %v25506_v28 = vld [vmem:[#allocation11 + $0x1fc] ss:$40 sps:$4 sm:$0xff]  }
 0x973   :  { %17964 = vmatpush1.bf16.msra.mxu0 %v25438_v34  ;;  %17741 = vmatpush1.bf16.msra.mxu1 %v25441_v61  ;;  %v25509_v34 = vld [vmem:[#allocation11 + $0x1814] ss:$40 sps:$4 sm:$0xff]   ;;  %v25504_v61 = vld [vmem:[#allocation11 + $0x1f8] ss:$40 sps:$4 sm:$0xff]  }
 0x974   :  { %17965 = vmatprep.subr.bf16.mxu0 %v25446_v1  ;;  %17742 = vmatprep.subr.bf16.mxu1 %v25449_v39  ;;  %v25507_v1 = vld [vmem:[#allocation11 + $0x1810] ss:$40 sps:$4 sm:$0xff]   ;;  %v25512_v39 = vld [vmem:[#allocation11 + $0x24c] ss:$40 sps:$4 sm:$0xff]  }
 0x977   :  { %17966 = vmatpush1.bf16.msra.mxu0 %v25444_v3  ;;  %17743 = vmatpush1.bf16.msra.mxu1 %v25447_v9  ;;  %v25515_v3 = vld [vmem:[#allocation11 + $0x1864] ss:$40 sps:$4 sm:$0xff]   ;;  %v25510_v9 = vld [vmem:[#allocation11 + $0x248] ss:$40 sps:$4 sm:$0xff]  }
 0x978   :  { %17967 = vmatprep.subr.bf16.mxu0 %v25452_v63  ;;  %17744 = vmatprep.subr.bf16.mxu1 %v25455_v6  ;;  %v25513_v63 = vld [vmem:[#allocation11 + $0x1860] ss:$40 sps:$4 sm:$0xff]   ;;  %v25518_v6 = vld [vmem:[#allocation11 + $0x29c] ss:$40 sps:$4 sm:$0xff]  }
 0x97b   :  { %17968 = vmatpush1.bf16.msra.mxu0 %v25450_v43  ;;  %17745 = vmatpush1.bf16.msra.mxu1 %v25453_v56  ;;  %v25521_v43 = vld [vmem:[#allocation11 + $0x18b4] ss:$40 sps:$4 sm:$0xff]   ;;  %v25516_v56 = vld [vmem:[#allocation11 + $0x298] ss:$40 sps:$4 sm:$0xff]  }
 0x97c   :  { %17969 = vmatprep.subr.bf16.mxu0 %v25458_v12  ;;  %17746 = vmatprep.subr.bf16.mxu1 %v25461_v62  ;;  %v25524_v12 = vld [vmem:[#allocation11 + $0x2ec] ss:$40 sps:$4 sm:$0xff]  }
 0x97d   :  { %v25527_v62 = vld [vmem:[#allocation11 + $0x14] ss:$40 sps:$4 sm:$0xff]  }
 0x97f   :  { %17970 = vmatpush1.bf16.msra.mxu0 %v25456_v52  ;;  %17747 = vmatpush1.bf16.msra.mxu1 %v25459_v16  ;;  %v25522_v52 = vld [vmem:[#allocation11 + $0x2e8] ss:$40 sps:$4 sm:$0xff]  }
 0x980   :  { %17971 = vmatprep.subr.bf16.mxu0 %v25464_v44  ;;  %17748 = vmatprep.subr.bf16.mxu1 %v25467_v35  ;;  %v25525_v16 = vld [vmem:[#allocation11 + $0x10] ss:$40 sps:$4 sm:$0xff]   ;;  %v25533_v44 = vld [vmem:[#allocation11 + $0x64] ss:$40 sps:$4 sm:$0xff]  }
 0x981   :  { %v25528_v35 = vld [vmem:[#allocation11 + $0x338] ss:$40 sps:$4 sm:$0xff]  }
 0x983   :  { %17972 = vmatpush1.bf16.msra.mxu0 %v25462_v26  ;;  %17749 = vmatpush1.bf16.msra.mxu1 %v25465_v23  ;;  %v25531_v26 = vld [vmem:[#allocation11 + $0x60] ss:$40 sps:$4 sm:$0xff]   ;;  %v25536_v23 = vld [vmem:[#allocation11 + $0x38c] ss:$40 sps:$4 sm:$0xff]  }
 0x984   :  { %18187 = vmatprep.subr.bf16.mxu0 %v25470_v36  ;;  %17750 = vmatprep.subr.bf16.mxu1 %v25473_v48  ;;  %v25534_v36 = vld [vmem:[#allocation11 + $0x388] ss:$40 sps:$4 sm:$0xff]  }
 0x985   :  { %v25537_v48 = vld [vmem:[#allocation11 + $0xb0] ss:$40 sps:$4 sm:$0xff]  }
 0x986   :  { %17974 = vmatmul.mubr.bf16.vlgmr.msra.gmra.mrb[24].mxu0 %v27031_v31 }
 0x987   :  { %18188 = vmatpush1.bf16.msra.mxu0 %v25468_v30  ;;  %18219 = vmatprep.mubr.bf16.mxu0 %v26960_v49  ;;  %v25542_v30 = vld [vmem:[#allocation11 + $0x3dc] ss:$40 sps:$4 sm:$0xff]  }
 0x988   :  { %17751 = vmatpush1.bf16.msra.mxu1 %v25471_v53  ;;  %18189 = vmatprep.subr.bf16.mxu0 %v25476_v32  ;;  %v25545_v53 = vld [vmem:[#allocation11 + $0x104] ss:$40 sps:$4 sm:$0xff]   ;;  %v25540_v32 = vld [vmem:[#allocation11 + $0x3d8] ss:$40 sps:$4 sm:$0xff]  }
 0x989   :  { %17752 = vmatprep.subr.bf16.mxu1 %v25479_v10  ;;  %v25543_v10 = vld [vmem:[#allocation11 + $0x100] ss:$40 sps:$4 sm:$0xff]  }
 0x98b   :  { %18190 = vmatpush1.bf16.msra.mxu0 %v25474_v37  ;;  %v25548_v37 = vld [vmem:[#allocation11 + $0x42c] ss:$40 sps:$4 sm:$0xff]  }
 0x98c   :  { %17753 = vmatpush1.bf16.msra.mxu1 %v25477_v11  ;;  %18191 = vmatprep.subr.bf16.mxu0 %v25482_v15  ;;  %v25551_v11 = vld [vmem:[#allocation11 + $0x154] ss:$40 sps:$4 sm:$0xff]   ;;  %v25546_v15 = vld [vmem:[#allocation11 + $0x428] ss:$40 sps:$4 sm:$0xff]  }
 0x98d   :  { %17754 = vmatprep.subr.bf16.mxu1 %v25485_v38  ;;  %v25549_v38 = vld [vmem:[#allocation11 + $0x150] ss:$40 sps:$4 sm:$0xff]  }
 0x98f   :  { %18192 = vmatpush1.bf16.msra.mxu0 %v25480_v40  ;;  %v25554_v40 = vld [vmem:[#allocation11 + $0x47c] ss:$40 sps:$4 sm:$0xff]  }
 0x990   :  { %17755 = vmatpush1.bf16.msra.mxu1 %v25483_v47  ;;  %18193 = vmatprep.subr.bf16.mxu0 %v25488_v8  ;;  %v25557_v47 = vld [vmem:[#allocation11 + $0x1a4] ss:$40 sps:$4 sm:$0xff]   ;;  %v25552_v8 = vld [vmem:[#allocation11 + $0x478] ss:$40 sps:$4 sm:$0xff]  }
 0x991   :  { %17756 = vmatprep.subr.bf16.mxu1 %v25491_v45  ;;  %v25555_v45 = vld [vmem:[#allocation11 + $0x1a0] ss:$40 sps:$4 sm:$0xff]  }
 0x993   :  { %18194 = vmatpush1.bf16.msra.mxu0 %v25486_v50  ;;  %v25560_v50 = vld [vmem:[#allocation11 + $0x4cc] ss:$40 sps:$4 sm:$0xff]  }
 0x994   :  { %17757 = vmatpush1.bf16.msra.mxu1 %v25489_v5  ;;  %18195 = vmatprep.subr.bf16.mxu0 %v25494_v54  ;;  %v25563_v5 = vld [vmem:[#allocation11 + $0x1f4] ss:$40 sps:$4 sm:$0xff]   ;;  %v25558_v54 = vld [vmem:[#allocation11 + $0x4c8] ss:$40 sps:$4 sm:$0xff]  }
 0x995   :  { %17758 = vmatprep.subr.bf16.mxu1 %v25497_v17  ;;  %v25561_v17 = vld [vmem:[#allocation11 + $0x1f0] ss:$40 sps:$4 sm:$0xff]  }
 0x997   :  { %18196 = vmatpush1.bf16.msra.mxu0 %v25492_v29  ;;  %v25566_v29 = vld [vmem:[#allocation11 + $0x51c] ss:$40 sps:$4 sm:$0xff]  }
 0x998   :  { %17759 = vmatpush1.bf16.msra.mxu1 %v25495_v51  ;;  %18197 = vmatprep.subr.bf16.mxu0 %v25500_v57  ;;  %v25569_v51 = vld [vmem:[#allocation11 + $0x244] ss:$40 sps:$4 sm:$0xff]   ;;  %v25564_v57 = vld [vmem:[#allocation11 + $0x518] ss:$40 sps:$4 sm:$0xff]  }
 0x999   :  { %17760 = vmatprep.subr.bf16.mxu1 %v25503_v42  ;;  %v25567_v42 = vld [vmem:[#allocation11 + $0x240] ss:$40 sps:$4 sm:$0xff]  }
 0x99b   :  { %18198 = vmatpush1.bf16.msra.mxu0 %v25498_v55  ;;  %v25572_v55 = vld [vmem:[#allocation11 + $0x56c] ss:$40 sps:$4 sm:$0xff]  }
 0x99c   :  { %17761 = vmatpush1.bf16.msra.mxu1 %v25501_v58  ;;  %18199 = vmatprep.subr.bf16.mxu0 %v25506_v28  ;;  %v25575_v58 = vld [vmem:[#allocation11 + $0x294] ss:$40 sps:$4 sm:$0xff]   ;;  %v25570_v28 = vld [vmem:[#allocation11 + $0x568] ss:$40 sps:$4 sm:$0xff]  }
 0x99d   :  { %17762 = vmatprep.subr.bf16.mxu1 %v25509_v34  ;;  %v25573_v34 = vld [vmem:[#allocation11 + $0x290] ss:$40 sps:$4 sm:$0xff]  }
 0x99f   :  { %18200 = vmatpush1.bf16.msra.mxu0 %v25504_v61  ;;  %v25578_v61 = vld [vmem:[#allocation11 + $0x5bc] ss:$40 sps:$4 sm:$0xff]  }
 0x9a0   :  { %17763 = vmatpush1.bf16.msra.mxu1 %v25507_v1  ;;  %18201 = vmatprep.subr.bf16.mxu0 %v25512_v39  ;;  %v25581_v1 = vld [vmem:[#allocation11 + $0x2e4] ss:$40 sps:$4 sm:$0xff]   ;;  %v25576_v39 = vld [vmem:[#allocation11 + $0x5b8] ss:$40 sps:$4 sm:$0xff]  }
 0x9a1   :  { %17764 = vmatprep.subr.bf16.mxu1 %v25515_v3  ;;  %v25579_v3 = vld [vmem:[#allocation11 + $0x2e0] ss:$40 sps:$4 sm:$0xff]  }
 0x9a3   :  { %18202 = vmatpush1.bf16.msra.mxu0 %v25510_v9  ;;  %v25584_v9 = vld [vmem:[#allocation11 + $0x60c] ss:$40 sps:$4 sm:$0xff]  }
 0x9a4   :  { %17765 = vmatpush1.bf16.msra.mxu1 %v25513_v63  ;;  %18203 = vmatprep.subr.bf16.mxu0 %v25518_v6  ;;  %v25587_v63 = vld [vmem:[#allocation11 + $0x334] ss:$40 sps:$4 sm:$0xff]   ;;  %v25582_v6 = vld [vmem:[#allocation11 + $0x608] ss:$40 sps:$4 sm:$0xff]  }
 0x9a5   :  { %17766 = vmatprep.subr.bf16.mxu1 %v25521_v43  ;;  %v25585_v43 = vld [vmem:[#allocation11 + $0x330] ss:$40 sps:$4 sm:$0xff]  }
 0x9a7   :  { %18204 = vmatpush1.bf16.msra.mxu0 %v25516_v56  ;;  %v25590_v56 = vld [vmem:[#allocation11 + $0x65c] ss:$40 sps:$4 sm:$0xff]  }
 0x9a8   :  { %17767 = vmatpush1.bf16.msra.mxu1 %v25519_v7  ;;  %18205 = vmatprep.subr.bf16.mxu0 %v25524_v12  ;;  %v25593_v7 = vld [vmem:[#allocation11 + $0x384] ss:$40 sps:$4 sm:$0xff]   ;;  %v25588_v12 = vld [vmem:[#allocation11 + $0x658] ss:$40 sps:$4 sm:$0xff]  }
 0x9a9   :  { %17982 = vmatprep.subr.bf16.mxu1 %v25527_v62  ;;  %v25591_v62 = vld [vmem:[#allocation11 + $0x380] ss:$40 sps:$4 sm:$0xff]  }
 0x9ab   :  { %17769 = vmatmul.mubr.bf16.vlgmr.msra.gmra.mrb[20].mxu1 %v27031_v31  ;;  %18206 = vmatpush1.bf16.msra.mxu0 %v25522_v52  ;;  %v25596_v52 = vld [vmem:[#allocation11 + $0x6ac] ss:$40 sps:$4 sm:$0xff]  }
 0x9ac   :  { %17983 = vmatpush1.bf16.msra.mxu1 %v25525_v16  ;;  %18014 = vmatprep.mubr.bf16.mxu1 %v26960_v49  ;;  %v25599_v16 = vld [vmem:[#allocation11 + $0x3d4] ss:$40 sps:$4 sm:$0xff]  }
 0x9ad   :  { %18207 = vmatprep.subr.bf16.mxu0 %v25530_v22  ;;  %17984 = vmatprep.subr.bf16.mxu1 %v25533_v44  ;;  %v25594_v22 = vld [vmem:[#allocation11 + $0x6a8] ss:$40 sps:$4 sm:$0xff]  }
 0x9ae   :  { %v25597_v44 = vld [vmem:[#allocation11 + $0x3d0] ss:$40 sps:$4 sm:$0xff]  }
 0x9af   :  { %18208 = vmatpush1.bf16.msra.mxu0 %v25528_v35  ;;  %v25602_v35 = vld [vmem:[#allocation11 + $0x6fc] ss:$40 sps:$4 sm:$0xff]  }
 0x9b0   :  { %17985 = vmatpush1.bf16.msra.mxu1 %v25531_v26  ;;  %18209 = vmatprep.subr.bf16.mxu0 %v25536_v23  ;;  %v25605_v26 = vld [vmem:[#allocation11 + $0x424] ss:$40 sps:$4 sm:$0xff]   ;;  %v25600_v23 = vld [vmem:[#allocation11 + $0x6f8] ss:$40 sps:$4 sm:$0xff]  }
 0x9b1   :  { %17986 = vmatprep.subr.bf16.mxu1 %v25539_v60  ;;  %v25603_v60 = vld [vmem:[#allocation11 + $0x420] ss:$40 sps:$4 sm:$0xff]  }
 0x9b3   :  { %18210 = vmatpush1.bf16.msra.mxu0 %v25534_v36  ;;  %v25608_v36 = vld [vmem:[#allocation11 + $0x74c] ss:$40 sps:$4 sm:$0xff]  }
 0x9b4   :  { %17987 = vmatpush1.bf16.msra.mxu1 %v25537_v48  ;;  %18211 = vmatprep.subr.bf16.mxu0 %v25542_v30  ;;  %v25611_v48 = vld [vmem:[#allocation11 + $0x474] ss:$40 sps:$4 sm:$0xff]   ;;  %v25606_v30 = vld [vmem:[#allocation11 + $0x748] ss:$40 sps:$4 sm:$0xff]  }
 0x9b5   :  { %17988 = vmatprep.subr.bf16.mxu1 %v25545_v53  ;;  %v25609_v53 = vld [vmem:[#allocation11 + $0x470] ss:$40 sps:$4 sm:$0xff]  }
 0x9b7   :  { %18212 = vmatpush1.bf16.msra.mxu0 %v25540_v32  ;;  %v25614_v32 = vld [vmem:[#allocation11 + $0x79c] ss:$40 sps:$4 sm:$0xff]  }
 0x9b8   :  { %17989 = vmatpush1.bf16.msra.mxu1 %v25543_v10  ;;  %18213 = vmatprep.subr.bf16.mxu0 %v25548_v37  ;;  %v25617_v10 = vld [vmem:[#allocation11 + $0x4c4] ss:$40 sps:$4 sm:$0xff]   ;;  %v25612_v37 = vld [vmem:[#allocation11 + $0x798] ss:$40 sps:$4 sm:$0xff]  }
 0x9b9   :  { %17990 = vmatprep.subr.bf16.mxu1 %v25551_v11  ;;  %v25615_v11 = vld [vmem:[#allocation11 + $0x4c0] ss:$40 sps:$4 sm:$0xff]  }
 0x9bb   :  { %18214 = vmatpush1.bf16.msra.mxu0 %v25546_v15  ;;  %v25620_v15 = vld [vmem:[#allocation11 + $0x7ec] ss:$40 sps:$4 sm:$0xff]  }
 0x9bc   :  { %17991 = vmatpush1.bf16.msra.mxu1 %v25549_v38  ;;  %18215 = vmatprep.subr.bf16.mxu0 %v25554_v40  ;;  %v25623_v38 = vld [vmem:[#allocation11 + $0x514] ss:$40 sps:$4 sm:$0xff]   ;;  %v25618_v40 = vld [vmem:[#allocation11 + $0x7e8] ss:$40 sps:$4 sm:$0xff]  }
 0x9bd   :  { %17992 = vmatprep.subr.bf16.mxu1 %v25557_v47  ;;  %v25621_v47 = vld [vmem:[#allocation11 + $0x510] ss:$40 sps:$4 sm:$0xff]  }
 0x9bf   :  { %18216 = vmatpush1.bf16.msra.mxu0 %v25552_v8  ;;  %v25626_v8 = vld [vmem:[#allocation11 + $0x83c] ss:$40 sps:$4 sm:$0xff]  }
 0x9c0   :  { %17993 = vmatpush1.bf16.msra.mxu1 %v25555_v45  ;;  %18217 = vmatprep.subr.bf16.mxu0 %v25560_v50  ;;  %v25629_v45 = vld [vmem:[#allocation11 + $0x564] ss:$40 sps:$4 sm:$0xff]   ;;  %v25624_v50 = vld [vmem:[#allocation11 + $0x838] ss:$40 sps:$4 sm:$0xff]  }
 0x9c1   :  { %17994 = vmatprep.subr.bf16.mxu1 %v25563_v5  ;;  %v25627_v5 = vld [vmem:[#allocation11 + $0x560] ss:$40 sps:$4 sm:$0xff]  }
 0x9c3   :  { %18218 = vmatpush1.bf16.msra.mxu0 %v25558_v54  ;;  %v25632_v54 = vld [vmem:[#allocation11 + $0x88c] ss:$40 sps:$4 sm:$0xff]  }
 0x9c4   :  { %17995 = vmatpush1.bf16.msra.mxu1 %v25561_v17  ;;  %18228 = vmatprep.subr.bf16.mxu0 %v25566_v29  ;;  %v25635_v17 = vld [vmem:[#allocation11 + $0x5b4] ss:$40 sps:$4 sm:$0xff]   ;;  %v25630_v29 = vld [vmem:[#allocation11 + $0x888] ss:$40 sps:$4 sm:$0xff]  }
 0x9c5   :  { %17996 = vmatprep.subr.bf16.mxu1 %v25569_v51  ;;  %v25633_v51 = vld [vmem:[#allocation11 + $0x5b0] ss:$40 sps:$4 sm:$0xff]  }
 0x9c6   :  { %18220 = vmatmul.mubr.bf16.vlgmr.msra.gmra.mrb[28].mxu0 %v26969_v27 }
 0x9c7   :  { %18229 = vmatpush1.bf16.msra.mxu0 %v25564_v57  ;;  %18260 = vmatprep.mubr.bf16.mxu0 %v26980_v41  ;;  %v25638_v57 = vld [vmem:[#allocation11 + $0x8dc] ss:$40 sps:$4 sm:$0xff]  }
 0x9c8   :  { %17997 = vmatpush1.bf16.msra.mxu1 %v25567_v42  ;;  %18230 = vmatprep.subr.bf16.mxu0 %v25572_v55  ;;  %v25641_v42 = vld [vmem:[#allocation11 + $0x604] ss:$40 sps:$4 sm:$0xff]   ;;  %v25636_v55 = vld [vmem:[#allocation11 + $0x8d8] ss:$40 sps:$4 sm:$0xff]  }
 0x9c9   :  { %17998 = vmatprep.subr.bf16.mxu1 %v25575_v58  ;;  %v25639_v58 = vld [vmem:[#allocation11 + $0x600] ss:$40 sps:$4 sm:$0xff]  }
 0x9cb   :  { %18231 = vmatpush1.bf16.msra.mxu0 %v25570_v28  ;;  %v25644_v28 = vld [vmem:[#allocation11 + $0x92c] ss:$40 sps:$4 sm:$0xff]  }
 0x9cc   :  { %17999 = vmatpush1.bf16.msra.mxu1 %v25573_v34  ;;  %18232 = vmatprep.subr.bf16.mxu0 %v25578_v61  ;;  %v25647_v34 = vld [vmem:[#allocation11 + $0x654] ss:$40 sps:$4 sm:$0xff]   ;;  %v25642_v61 = vld [vmem:[#allocation11 + $0x928] ss:$40 sps:$4 sm:$0xff]  }
 0x9cd   :  { %18000 = vmatprep.subr.bf16.mxu1 %v25581_v1  ;;  %v25645_v1 = vld [vmem:[#allocation11 + $0x650] ss:$40 sps:$4 sm:$0xff]  }
 0x9cf   :  { %18233 = vmatpush1.bf16.msra.mxu0 %v25576_v39  ;;  %v25650_v39 = vld [vmem:[#allocation11 + $0x97c] ss:$40 sps:$4 sm:$0xff]  }
 0x9d0   :  { %18001 = vmatpush1.bf16.msra.mxu1 %v25579_v3  ;;  %18234 = vmatprep.subr.bf16.mxu0 %v25584_v9  ;;  %v25653_v3 = vld [vmem:[#allocation11 + $0x6a4] ss:$40 sps:$4 sm:$0xff]   ;;  %v25648_v9 = vld [vmem:[#allocation11 + $0x978] ss:$40 sps:$4 sm:$0xff]  }
 0x9d1   :  { %18002 = vmatprep.subr.bf16.mxu1 %v25587_v63  ;;  %v25651_v63 = vld [vmem:[#allocation11 + $0x6a0] ss:$40 sps:$4 sm:$0xff]  }
 0x9d3   :  { %18235 = vmatpush1.bf16.msra.mxu0 %v25582_v6  ;;  %v25656_v6 = vld [vmem:[#allocation11 + $0x9cc] ss:$40 sps:$4 sm:$0xff]  }
 0x9d4   :  { %18003 = vmatpush1.bf16.msra.mxu1 %v25585_v43  ;;  %18236 = vmatprep.subr.bf16.mxu0 %v25590_v56  ;;  %v25659_v43 = vld [vmem:[#allocation11 + $0x6f4] ss:$40 sps:$4 sm:$0xff]   ;;  %v25654_v56 = vld [vmem:[#allocation11 + $0x9c8] ss:$40 sps:$4 sm:$0xff]  }
 0x9d5   :  { %18004 = vmatprep.subr.bf16.mxu1 %v25593_v7  ;;  %v25657_v7 = vld [vmem:[#allocation11 + $0x6f0] ss:$40 sps:$4 sm:$0xff]  }
 0x9d7   :  { %18237 = vmatpush1.bf16.msra.mxu0 %v25588_v12  ;;  %v25662_v12 = vld [vmem:[#allocation11 + $0xa1c] ss:$40 sps:$4 sm:$0xff]  }
 0x9d8   :  { %18005 = vmatpush1.bf16.msra.mxu1 %v25591_v62  ;;  %18238 = vmatprep.subr.bf16.mxu0 %v25596_v52  ;;  %v25665_v62 = vld [vmem:[#allocation11 + $0x744] ss:$40 sps:$4 sm:$0xff]   ;;  %v25660_v52 = vld [vmem:[#allocation11 + $0xa18] ss:$40 sps:$4 sm:$0xff]  }
 0x9d9   :  { %18006 = vmatprep.subr.bf16.mxu1 %v25599_v16  ;;  %v25663_v16 = vld [vmem:[#allocation11 + $0x740] ss:$40 sps:$4 sm:$0xff]  }
 0x9db   :  { %18239 = vmatpush1.bf16.msra.mxu0 %v25594_v22  ;;  %v25668_v22 = vld [vmem:[#allocation11 + $0xa6c] ss:$40 sps:$4 sm:$0xff]  }
 0x9dc   :  { %18007 = vmatpush1.bf16.msra.mxu1 %v25597_v44  ;;  %18240 = vmatprep.subr.bf16.mxu0 %v25602_v35  ;;  %v25671_v44 = vld [vmem:[#allocation11 + $0x794] ss:$40 sps:$4 sm:$0xff]   ;;  %v25666_v35 = vld [vmem:[#allocation11 + $0xa68] ss:$40 sps:$4 sm:$0xff]  }
 0x9dd   :  { %18008 = vmatprep.subr.bf16.mxu1 %v25605_v26  ;;  %v25669_v26 = vld [vmem:[#allocation11 + $0x790] ss:$40 sps:$4 sm:$0xff]  }
 0x9df   :  { %18241 = vmatpush1.bf16.msra.mxu0 %v25600_v23  ;;  %v25674_v23 = vld [vmem:[#allocation11 + $0xabc] ss:$40 sps:$4 sm:$0xff]  }
 0x9e0   :  { %18009 = vmatpush1.bf16.msra.mxu1 %v25603_v60  ;;  %18242 = vmatprep.subr.bf16.mxu0 %v25608_v36  ;;  %v25677_v60 = vld [vmem:[#allocation11 + $0x7e4] ss:$40 sps:$4 sm:$0xff]   ;;  %v25672_v36 = vld [vmem:[#allocation11 + $0xab8] ss:$40 sps:$4 sm:$0xff]  }
 0x9e1   :  { %18010 = vmatprep.subr.bf16.mxu1 %v25611_v48  ;;  %v25675_v48 = vld [vmem:[#allocation11 + $0x7e0] ss:$40 sps:$4 sm:$0xff]  }
 0x9e3   :  { %18243 = vmatpush1.bf16.msra.mxu0 %v25606_v30  ;;  %v25680_v30 = vld [vmem:[#allocation11 + $0xb0c] ss:$40 sps:$4 sm:$0xff]  }
 0x9e4   :  { %18011 = vmatpush1.bf16.msra.mxu1 %v25609_v53  ;;  %18244 = vmatprep.subr.bf16.mxu0 %v25614_v32  ;;  %v25683_v53 = vld [vmem:[#allocation11 + $0x834] ss:$40 sps:$4 sm:$0xff]   ;;  %v25678_v32 = vld [vmem:[#allocation11 + $0xb08] ss:$40 sps:$4 sm:$0xff]  }
 0x9e5   :  { %18012 = vmatprep.subr.bf16.mxu1 %v25617_v10  ;;  %v25681_v10 = vld [vmem:[#allocation11 + $0x830] ss:$40 sps:$4 sm:$0xff]  }
 0x9e7   :  { %18245 = vmatpush1.bf16.msra.mxu0 %v25612_v37  ;;  %v25686_v37 = vld [vmem:[#allocation11 + $0xb5c] ss:$40 sps:$4 sm:$0xff]  }
 0x9e8   :  { %18013 = vmatpush1.bf16.msra.mxu1 %v25615_v11  ;;  %18246 = vmatprep.subr.bf16.mxu0 %v25620_v15  ;;  %v25689_v11 = vld [vmem:[#allocation11 + $0x884] ss:$40 sps:$4 sm:$0xff]   ;;  %v25684_v15 = vld [vmem:[#allocation11 + $0xb58] ss:$40 sps:$4 sm:$0xff]  }
 0x9e9   :  { %18023 = vmatprep.subr.bf16.mxu1 %v25623_v38  ;;  %v25687_v38 = vld [vmem:[#allocation11 + $0x880] ss:$40 sps:$4 sm:$0xff]  }
 0x9eb   :  { %18015 = vmatmul.mubr.bf16.vlgmr.msra.gmra.mrb[24].mxu1 %v26969_v27  ;;  %18247 = vmatpush1.bf16.msra.mxu0 %v25618_v40  ;;  %v25692_v40 = vld [vmem:[#allocation11 + $0xbac] ss:$40 sps:$4 sm:$0xff]  }
 0x9ec   :  { %18024 = vmatpush1.bf16.msra.mxu1 %v25621_v47  ;;  %18055 = vmatprep.mubr.bf16.mxu1 %v26980_v41  ;;  %v25695_v47 = vld [vmem:[#allocation11 + $0x8d4] ss:$40 sps:$4 sm:$0xff]  }
 0x9ed   :  { %18248 = vmatprep.subr.bf16.mxu0 %v25626_v8  ;;  %18025 = vmatprep.subr.bf16.mxu1 %v25629_v45  ;;  %v25690_v8 = vld [vmem:[#allocation11 + $0xba8] ss:$40 sps:$4 sm:$0xff]  }
 0x9ee   :  { %v25693_v45 = vld [vmem:[#allocation11 + $0x8d0] ss:$40 sps:$4 sm:$0xff]  }
 0x9ef   :  { %18249 = vmatpush1.bf16.msra.mxu0 %v25624_v50  ;;  %v25698_v50 = vld [vmem:[#allocation11 + $0xbfc] ss:$40 sps:$4 sm:$0xff]  }
 0x9f0   :  { %18026 = vmatpush1.bf16.msra.mxu1 %v25627_v5  ;;  %18250 = vmatprep.subr.bf16.mxu0 %v25632_v54  ;;  %v25701_v5 = vld [vmem:[#allocation11 + $0x924] ss:$40 sps:$4 sm:$0xff]   ;;  %v25696_v54 = vld [vmem:[#allocation11 + $0xbf8] ss:$40 sps:$4 sm:$0xff]  }
 0x9f1   :  { %18027 = vmatprep.subr.bf16.mxu1 %v25635_v17  ;;  %v25699_v17 = vld [vmem:[#allocation11 + $0x920] ss:$40 sps:$4 sm:$0xff]  }
 0x9f3   :  { %18251 = vmatpush1.bf16.msra.mxu0 %v25630_v29  ;;  %v25704_v29 = vld [vmem:[#allocation11 + $0xc4c] ss:$40 sps:$4 sm:$0xff]  }
 0x9f4   :  { %18028 = vmatpush1.bf16.msra.mxu1 %v25633_v51  ;;  %18252 = vmatprep.subr.bf16.mxu0 %v25638_v57  ;;  %v25707_v51 = vld [vmem:[#allocation11 + $0x974] ss:$40 sps:$4 sm:$0xff]   ;;  %v25702_v57 = vld [vmem:[#allocation11 + $0xc48] ss:$40 sps:$4 sm:$0xff]  }
 0x9f5   :  { %18029 = vmatprep.subr.bf16.mxu1 %v25641_v42  ;;  %v25705_v42 = vld [vmem:[#allocation11 + $0x970] ss:$40 sps:$4 sm:$0xff]  }
 0x9f7   :  { %18253 = vmatpush1.bf16.msra.mxu0 %v25636_v55  ;;  %v25710_v55 = vld [vmem:[#allocation11 + $0xc9c] ss:$40 sps:$4 sm:$0xff]  }
 0x9f8   :  { %18030 = vmatpush1.bf16.msra.mxu1 %v25639_v58  ;;  %18254 = vmatprep.subr.bf16.mxu0 %v25644_v28  ;;  %v25713_v58 = vld [vmem:[#allocation11 + $0x9c4] ss:$40 sps:$4 sm:$0xff]   ;;  %v25708_v28 = vld [vmem:[#allocation11 + $0xc98] ss:$40 sps:$4 sm:$0xff]  }
 0x9f9   :  { %18031 = vmatprep.subr.bf16.mxu1 %v25647_v34  ;;  %v25711_v34 = vld [vmem:[#allocation11 + $0x9c0] ss:$40 sps:$4 sm:$0xff]  }
 0x9fb   :  { %18255 = vmatpush1.bf16.msra.mxu0 %v25642_v61  ;;  %v25716_v61 = vld [vmem:[#allocation11 + $0xcec] ss:$40 sps:$4 sm:$0xff]  }
 0x9fc   :  { %18032 = vmatpush1.bf16.msra.mxu1 %v25645_v1  ;;  %18256 = vmatprep.subr.bf16.mxu0 %v25650_v39  ;;  %v25719_v1 = vld [vmem:[#allocation11 + $0xa14] ss:$40 sps:$4 sm:$0xff]   ;;  %v25714_v39 = vld [vmem:[#allocation11 + $0xce8] ss:$40 sps:$4 sm:$0xff]  }
 0x9fd   :  { %18033 = vmatprep.subr.bf16.mxu1 %v25653_v3  ;;  %v25717_v3 = vld [vmem:[#allocation11 + $0xa10] ss:$40 sps:$4 sm:$0xff]  }
 0x9ff   :  { %18257 = vmatpush1.bf16.msra.mxu0 %v25648_v9  ;;  %v25722_v9 = vld [vmem:[#allocation11 + $0xd3c] ss:$40 sps:$4 sm:$0xff]  }
 0xa00   :  { %18034 = vmatpush1.bf16.msra.mxu1 %v25651_v63  ;;  %18258 = vmatprep.subr.bf16.mxu0 %v25656_v6  ;;  %v25725_v63 = vld [vmem:[#allocation11 + $0xa64] ss:$40 sps:$4 sm:$0xff]   ;;  %v25720_v6 = vld [vmem:[#allocation11 + $0xd38] ss:$40 sps:$4 sm:$0xff]  }
 0xa01   :  { %18035 = vmatprep.subr.bf16.mxu1 %v25659_v43  ;;  %v25723_v43 = vld [vmem:[#allocation11 + $0xa60] ss:$40 sps:$4 sm:$0xff]  }
 0xa03   :  { %18259 = vmatpush1.bf16.msra.mxu0 %v25654_v56  ;;  %v25728_v56 = vld [vmem:[#allocation11 + $0xd8c] ss:$40 sps:$4 sm:$0xff]  }
 0xa04   :  { %18036 = vmatpush1.bf16.msra.mxu1 %v25657_v7  ;;  %18269 = vmatprep.subr.bf16.mxu0 %v25662_v12  ;;  %v25731_v7 = vld [vmem:[#allocation11 + $0xab4] ss:$40 sps:$4 sm:$0xff]   ;;  %v25726_v12 = vld [vmem:[#allocation11 + $0xd88] ss:$40 sps:$4 sm:$0xff]  }
 0xa05   :  { %18037 = vmatprep.subr.bf16.mxu1 %v25665_v62  ;;  %v25729_v62 = vld [vmem:[#allocation11 + $0xab0] ss:$40 sps:$4 sm:$0xff]  }
 0xa06   :  { %18261 = vmatmul.mubr.bf16.vlgmr.msra.gmra.mrb[28].mxu0 %v26984_v0 }
 0xa07   :  { %18270 = vmatpush1.bf16.msra.mxu0 %v25660_v52  ;;  %18301 = vmatprep.mubr.bf16.mxu0 %v26986_v2  ;;  %v25734_v52 = vld [vmem:[#allocation11 + $0xddc] ss:$40 sps:$4 sm:$0xff]  }
 0xa08   :  { %18038 = vmatpush1.bf16.msra.mxu1 %v25663_v16  ;;  %18271 = vmatprep.subr.bf16.mxu0 %v25668_v22  ;;  %v25737_v16 = vld [vmem:[#allocation11 + $0xb04] ss:$40 sps:$4 sm:$0xff]   ;;  %v25732_v22 = vld [vmem:[#allocation11 + $0xdd8] ss:$40 sps:$4 sm:$0xff]  }
 0xa09   :  { %18039 = vmatprep.subr.bf16.mxu1 %v25671_v44  ;;  %v25735_v44 = vld [vmem:[#allocation11 + $0xb00] ss:$40 sps:$4 sm:$0xff]  }
 0xa0b   :  { %18272 = vmatpush1.bf16.msra.mxu0 %v25666_v35  ;;  %v25740_v35 = vld [vmem:[#allocation11 + $0xe2c] ss:$40 sps:$4 sm:$0xff]  }
 0xa0c   :  { %18040 = vmatpush1.bf16.msra.mxu1 %v25669_v26  ;;  %18273 = vmatprep.subr.bf16.mxu0 %v25674_v23  ;;  %v25743_v26 = vld [vmem:[#allocation11 + $0xb54] ss:$40 sps:$4 sm:$0xff]   ;;  %v25738_v23 = vld [vmem:[#allocation11 + $0xe28] ss:$40 sps:$4 sm:$0xff]  }
 0xa0d   :  { %18041 = vmatprep.subr.bf16.mxu1 %v25677_v60  ;;  %v25741_v60 = vld [vmem:[#allocation11 + $0xb50] ss:$40 sps:$4 sm:$0xff]  }
 0xa0f   :  { %18274 = vmatpush1.bf16.msra.mxu0 %v25672_v36  ;;  %v25746_v36 = vld [vmem:[#allocation11 + $0xe7c] ss:$40 sps:$4 sm:$0xff]  }
 0xa10   :  { %18042 = vmatpush1.bf16.msra.mxu1 %v25675_v48  ;;  %18275 = vmatprep.subr.bf16.mxu0 %v25680_v30  ;;  %v25749_v48 = vld [vmem:[#allocation11 + $0xba4] ss:$40 sps:$4 sm:$0xff]   ;;  %v25744_v30 = vld [vmem:[#allocation11 + $0xe78] ss:$40 sps:$4 sm:$0xff]  }
 0xa11   :  { %18043 = vmatprep.subr.bf16.mxu1 %v25683_v53  ;;  %v25747_v53 = vld [vmem:[#allocation11 + $0xba0] ss:$40 sps:$4 sm:$0xff]  }
 0xa13   :  { %18276 = vmatpush1.bf16.msra.mxu0 %v25678_v32  ;;  %v25752_v32 = vld [vmem:[#allocation11 + $0xecc] ss:$40 sps:$4 sm:$0xff]  }
 0xa14   :  { %18044 = vmatpush1.bf16.msra.mxu1 %v25681_v10  ;;  %18277 = vmatprep.subr.bf16.mxu0 %v25686_v37  ;;  %v25755_v10 = vld [vmem:[#allocation11 + $0xbf4] ss:$40 sps:$4 sm:$0xff]   ;;  %v25750_v37 = vld [vmem:[#allocation11 + $0xec8] ss:$40 sps:$4 sm:$0xff]  }
 0xa15   :  { %18045 = vmatprep.subr.bf16.mxu1 %v25689_v11  ;;  %v25753_v11 = vld [vmem:[#allocation11 + $0xbf0] ss:$40 sps:$4 sm:$0xff]  }
 0xa17   :  { %18278 = vmatpush1.bf16.msra.mxu0 %v25684_v15  ;;  %v25758_v15 = vld [vmem:[#allocation11 + $0xf1c] ss:$40 sps:$4 sm:$0xff]  }
 0xa18   :  { %18046 = vmatpush1.bf16.msra.mxu1 %v25687_v38  ;;  %18279 = vmatprep.subr.bf16.mxu0 %v25692_v40  ;;  %v25761_v38 = vld [vmem:[#allocation11 + $0xc44] ss:$40 sps:$4 sm:$0xff]   ;;  %v25756_v40 = vld [vmem:[#allocation11 + $0xf18] ss:$40 sps:$4 sm:$0xff]  }
 0xa19   :  { %18047 = vmatprep.subr.bf16.mxu1 %v25695_v47  ;;  %v25759_v47 = vld [vmem:[#allocation11 + $0xc40] ss:$40 sps:$4 sm:$0xff]  }
 0xa1b   :  { %18280 = vmatpush1.bf16.msra.mxu0 %v25690_v8  ;;  %v25764_v8 = vld [vmem:[#allocation11 + $0xf6c] ss:$40 sps:$4 sm:$0xff]  }
 0xa1c   :  { %18048 = vmatpush1.bf16.msra.mxu1 %v25693_v45  ;;  %18281 = vmatprep.subr.bf16.mxu0 %v25698_v50  ;;  %v25767_v45 = vld [vmem:[#allocation11 + $0xc94] ss:$40 sps:$4 sm:$0xff]   ;;  %v25762_v50 = vld [vmem:[#allocation11 + $0xf68] ss:$40 sps:$4 sm:$0xff]  }
 0xa1d   :  { %18049 = vmatprep.subr.bf16.mxu1 %v25701_v5  ;;  %v25765_v5 = vld [vmem:[#allocation11 + $0xc90] ss:$40 sps:$4 sm:$0xff]  }
 0xa1f   :  { %18282 = vmatpush1.bf16.msra.mxu0 %v25696_v54  ;;  %v25770_v54 = vld [vmem:[#allocation11 + $0xfbc] ss:$40 sps:$4 sm:$0xff]  }
 0xa20   :  { %18050 = vmatpush1.bf16.msra.mxu1 %v25699_v17  ;;  %18283 = vmatprep.subr.bf16.mxu0 %v25704_v29  ;;  %v25773_v17 = vld [vmem:[#allocation11 + $0xce4] ss:$40 sps:$4 sm:$0xff]   ;;  %v25768_v29 = vld [vmem:[#allocation11 + $0xfb8] ss:$40 sps:$4 sm:$0xff]  }
 0xa21   :  { %18051 = vmatprep.subr.bf16.mxu1 %v25707_v51  ;;  %v25771_v51 = vld [vmem:[#allocation11 + $0xce0] ss:$40 sps:$4 sm:$0xff]  }
 0xa23   :  { %18284 = vmatpush1.bf16.msra.mxu0 %v25702_v57  ;;  %v25776_v57 = vld [vmem:[#allocation11 + $0x100c] ss:$40 sps:$4 sm:$0xff]  }
 0xa24   :  { %18052 = vmatpush1.bf16.msra.mxu1 %v25705_v42  ;;  %18285 = vmatprep.subr.bf16.mxu0 %v25710_v55  ;;  %v25779_v42 = vld [vmem:[#allocation11 + $0xd34] ss:$40 sps:$4 sm:$0xff]   ;;  %v25774_v55 = vld [vmem:[#allocation11 + $0x1008] ss:$40 sps:$4 sm:$0xff]  }
 0xa25   :  { %18053 = vmatprep.subr.bf16.mxu1 %v25713_v58  ;;  %v25777_v58 = vld [vmem:[#allocation11 + $0xd30] ss:$40 sps:$4 sm:$0xff]  }
 0xa27   :  { %18286 = vmatpush1.bf16.msra.mxu0 %v25708_v28  ;;  %v25782_v28 = vld [vmem:[#allocation11 + $0x105c] ss:$40 sps:$4 sm:$0xff]  }
 0xa28   :  { %18054 = vmatpush1.bf16.msra.mxu1 %v25711_v34  ;;  %18287 = vmatprep.subr.bf16.mxu0 %v25716_v61  ;;  %v25785_v34 = vld [vmem:[#allocation11 + $0xd84] ss:$40 sps:$4 sm:$0xff]   ;;  %v25780_v61 = vld [vmem:[#allocation11 + $0x1058] ss:$40 sps:$4 sm:$0xff]  }
 0xa29   :  { %18064 = vmatprep.subr.bf16.mxu1 %v25719_v1  ;;  %v25783_v1 = vld [vmem:[#allocation11 + $0xd80] ss:$40 sps:$4 sm:$0xff]  }
 0xa2b   :  { %18056 = vmatmul.mubr.bf16.vlgmr.msra.gmra.mrb[24].mxu1 %v26984_v0  ;;  %18288 = vmatpush1.bf16.msra.mxu0 %v25714_v39  ;;  %v25788_v39 = vld [vmem:[#allocation11 + $0x10ac] ss:$40 sps:$4 sm:$0xff]  }
 0xa2c   :  { %18065 = vmatpush1.bf16.msra.mxu1 %v25717_v3  ;;  %18096 = vmatprep.mubr.bf16.mxu1 %v26986_v2  ;;  %v25791_v3 = vld [vmem:[#allocation11 + $0xdd4] ss:$40 sps:$4 sm:$0xff]  }
 0xa2d   :  { %18289 = vmatprep.subr.bf16.mxu0 %v25722_v9  ;;  %18066 = vmatprep.subr.bf16.mxu1 %v25725_v63  ;;  %v25786_v9 = vld [vmem:[#allocation11 + $0x10a8] ss:$40 sps:$4 sm:$0xff]  }
 0xa2e   :  { %v25789_v63 = vld [vmem:[#allocation11 + $0xdd0] ss:$40 sps:$4 sm:$0xff]  }
 0xa2f   :  { %18290 = vmatpush1.bf16.msra.mxu0 %v25720_v6  ;;  %v25794_v6 = vld [vmem:[#allocation11 + $0x10fc] ss:$40 sps:$4 sm:$0xff]  }
 0xa30   :  { %18067 = vmatpush1.bf16.msra.mxu1 %v25723_v43  ;;  %18291 = vmatprep.subr.bf16.mxu0 %v25728_v56  ;;  %v25797_v56 = vld [vmem:[#allocation11 + $0xe24] ss:$40 sps:$4 sm:$0xff]  }
 0xa31   :  { %18068 = vmatprep.subr.bf16.mxu1 %v25731_v7 }
 0xa33   :  { %18292 = vmatpush1.bf16.msra.mxu0 %v25726_v12 }
 0xa34   :  { %18069 = vmatpush1.bf16.msra.mxu1 %v25729_v62  ;;  %18293 = vmatprep.subr.bf16.mxu0 %v25734_v52  ;;  %v25792_v62 = vld [vmem:[#allocation11 + $0x10f8] ss:$40 sps:$4 sm:$0xff]  }
 0xa35   :  { %18070 = vmatprep.subr.bf16.mxu1 %v25737_v16  ;;  %v25795_v16 = vld [vmem:[#allocation11 + $0xe20] ss:$40 sps:$4 sm:$0xff]  }
 0xa37   :  { %18294 = vmatpush1.bf16.msra.mxu0 %v25732_v22  ;;  %v25800_v22 = vld [vmem:[#allocation11 + $0x114c] ss:$40 sps:$4 sm:$0xff]  }
 0xa38   :  { %18071 = vmatpush1.bf16.msra.mxu1 %v25735_v44  ;;  %18295 = vmatprep.subr.bf16.mxu0 %v25740_v35  ;;  %v25803_v44 = vld [vmem:[#allocation11 + $0xe74] ss:$40 sps:$4 sm:$0xff]   ;;  %v25798_v35 = vld [vmem:[#allocation11 + $0x1148] ss:$40 sps:$4 sm:$0xff]  }
 0xa39   :  { %18072 = vmatprep.subr.bf16.mxu1 %v25743_v26  ;;  %v25801_v26 = vld [vmem:[#allocation11 + $0xe70] ss:$40 sps:$4 sm:$0xff]  }
 0xa3b   :  { %18296 = vmatpush1.bf16.msra.mxu0 %v25738_v23  ;;  %v25806_v23 = vld [vmem:[#allocation11 + $0x119c] ss:$40 sps:$4 sm:$0xff]  }
 0xa3c   :  { %18073 = vmatpush1.bf16.msra.mxu1 %v25741_v60  ;;  %18297 = vmatprep.subr.bf16.mxu0 %v25746_v36  ;;  %v25809_v60 = vld [vmem:[#allocation11 + $0xec4] ss:$40 sps:$4 sm:$0xff]   ;;  %v25804_v36 = vld [vmem:[#allocation11 + $0x1198] ss:$40 sps:$4 sm:$0xff]  }
 0xa3d   :  { %18074 = vmatprep.subr.bf16.mxu1 %v25749_v48  ;;  %v25807_v48 = vld [vmem:[#allocation11 + $0xec0] ss:$40 sps:$4 sm:$0xff]  }
 0xa3f   :  { %18298 = vmatpush1.bf16.msra.mxu0 %v25744_v30  ;;  %v25812_v30 = vld [vmem:[#allocation11 + $0x11ec] ss:$40 sps:$4 sm:$0xff]  }
 0xa40   :  { %18075 = vmatpush1.bf16.msra.mxu1 %v25747_v53  ;;  %18299 = vmatprep.subr.bf16.mxu0 %v25752_v32  ;;  %v25815_v53 = vld [vmem:[#allocation11 + $0xf14] ss:$40 sps:$4 sm:$0xff]   ;;  %v25810_v32 = vld [vmem:[#allocation11 + $0x11e8] ss:$40 sps:$4 sm:$0xff]  }
 0xa41   :  { %18076 = vmatprep.subr.bf16.mxu1 %v25755_v10  ;;  %v25813_v10 = vld [vmem:[#allocation11 + $0xf10] ss:$40 sps:$4 sm:$0xff]  }
 0xa43   :  { %18300 = vmatpush1.bf16.msra.mxu0 %v25750_v37  ;;  %v25818_v37 = vld [vmem:[#allocation11 + $0x123c] ss:$40 sps:$4 sm:$0xff]  }
 0xa44   :  { %18077 = vmatpush1.bf16.msra.mxu1 %v25753_v11  ;;  %18310 = vmatprep.subr.bf16.mxu0 %v25758_v15  ;;  %v25821_v11 = vld [vmem:[#allocation11 + $0xf64] ss:$40 sps:$4 sm:$0xff]   ;;  %v25816_v15 = vld [vmem:[#allocation11 + $0x1238] ss:$40 sps:$4 sm:$0xff]  }
 0xa45   :  { %18078 = vmatprep.subr.bf16.mxu1 %v25761_v38  ;;  %v25819_v38 = vld [vmem:[#allocation11 + $0xf60] ss:$40 sps:$4 sm:$0xff]  }
 0xa46   :  { %18302 = vmatmul.mubr.bf16.vlgmr.msra.gmra.mrb[28].mxu0 %v26995_v25 }
 0xa47   :  { %18311 = vmatpush1.bf16.msra.mxu0 %v25756_v40  ;;  %18342 = vmatprep.mubr.bf16.mxu0 %v27016_v59  ;;  %v25824_v40 = vld [vmem:[#allocation11 + $0x128c] ss:$40 sps:$4 sm:$0xff]  }
 0xa48   :  { %18079 = vmatpush1.bf16.msra.mxu1 %v25759_v47  ;;  %18312 = vmatprep.subr.bf16.mxu0 %v25764_v8  ;;  %v25827_v47 = vld [vmem:[#allocation11 + $0xfb4] ss:$40 sps:$4 sm:$0xff]   ;;  %v25822_v8 = vld [vmem:[#allocation11 + $0x1288] ss:$40 sps:$4 sm:$0xff]  }
 0xa49   :  { %18080 = vmatprep.subr.bf16.mxu1 %v25767_v45  ;;  %v25825_v45 = vld [vmem:[#allocation11 + $0xfb0] ss:$40 sps:$4 sm:$0xff]  }
 0xa4b   :  { %18313 = vmatpush1.bf16.msra.mxu0 %v25762_v50  ;;  %v25830_v50 = vld [vmem:[#allocation11 + $0x12dc] ss:$40 sps:$4 sm:$0xff]  }
 0xa4c   :  { %18081 = vmatpush1.bf16.msra.mxu1 %v25765_v5  ;;  %18314 = vmatprep.subr.bf16.mxu0 %v25770_v54  ;;  %v25833_v5 = vld [vmem:[#allocation11 + $0x1004] ss:$40 sps:$4 sm:$0xff]   ;;  %v25828_v54 = vld [vmem:[#allocation11 + $0x12d8] ss:$40 sps:$4 sm:$0xff]  }
 0xa4d   :  { %18082 = vmatprep.subr.bf16.mxu1 %v25773_v17  ;;  %v25831_v17 = vld [vmem:[#allocation11 + $0x1000] ss:$40 sps:$4 sm:$0xff]  }
 0xa4f   :  { %18315 = vmatpush1.bf16.msra.mxu0 %v25768_v29  ;;  %v25836_v29 = vld [vmem:[#allocation11 + $0x132c] ss:$40 sps:$4 sm:$0xff]  }
 0xa50   :  { %18083 = vmatpush1.bf16.msra.mxu1 %v25771_v51  ;;  %18316 = vmatprep.subr.bf16.mxu0 %v25776_v57  ;;  %v25839_v51 = vld [vmem:[#allocation11 + $0x1054] ss:$40 sps:$4 sm:$0xff]   ;;  %v25834_v57 = vld [vmem:[#allocation11 + $0x1328] ss:$40 sps:$4 sm:$0xff]  }
 0xa51   :  { %18084 = vmatprep.subr.bf16.mxu1 %v25779_v42  ;;  %v25837_v42 = vld [vmem:[#allocation11 + $0x1050] ss:$40 sps:$4 sm:$0xff]  }
 0xa53   :  { %18317 = vmatpush1.bf16.msra.mxu0 %v25774_v55  ;;  %v25842_v55 = vld [vmem:[#allocation11 + $0x137c] ss:$40 sps:$4 sm:$0xff]  }
 0xa54   :  { %18085 = vmatpush1.bf16.msra.mxu1 %v25777_v58  ;;  %18318 = vmatprep.subr.bf16.mxu0 %v25782_v28  ;;  %v25845_v58 = vld [vmem:[#allocation11 + $0x10a4] ss:$40 sps:$4 sm:$0xff]   ;;  %v25840_v28 = vld [vmem:[#allocation11 + $0x1378] ss:$40 sps:$4 sm:$0xff]  }
 0xa55   :  { %18086 = vmatprep.subr.bf16.mxu1 %v25785_v34  ;;  %v25843_v34 = vld [vmem:[#allocation11 + $0x10a0] ss:$40 sps:$4 sm:$0xff]  }
 0xa57   :  { %18319 = vmatpush1.bf16.msra.mxu0 %v25780_v61  ;;  %v25848_v61 = vld [vmem:[#allocation11 + $0x13cc] ss:$40 sps:$4 sm:$0xff]  }
 0xa58   :  { %18087 = vmatpush1.bf16.msra.mxu1 %v25783_v1  ;;  %18320 = vmatprep.subr.bf16.mxu0 %v25788_v39  ;;  %v25851_v1 = vld [vmem:[#allocation11 + $0x10f4] ss:$40 sps:$4 sm:$0xff]  }
 0xa59   :  { %v27047_v43 = vpop.f32.mrb[24].mxu0  ;;  %18088 = vmatprep.subr.bf16.mxu1 %v25791_v3 }
 0xa5a   :  { %v27049_v7 = vpop.f32.mrb[25].mxu0 }
 0xa5b   :  { %v17979_v12 = vpop.f32.mrb[26].mxu0  ;;  %18321 = vmatpush1.bf16.msra.mxu0 %v25786_v9  ;;  %v25846_v9 = vld [vmem:[#allocation11 + $0x13c8] ss:$40 sps:$4 sm:$0xff]  }
 0xa5c   :  { %v17980_v52 = vpop.f32.mrb[27].mxu0  ;;  %18089 = vmatpush1.bf16.msra.mxu1 %v25789_v63  ;;  %18322 = vmatprep.subr.bf16.mxu0 %v25794_v6  ;;  %v25849_v6 = vld [vmem:[#allocation11 + $0x10f0] ss:$40 sps:$4 sm:$0xff]  }
 0xa5d   :  { %18090 = vmatprep.subr.bf16.mxu1 %v25797_v56  ;;  %v25854_v56 = vld [vmem:[#allocation11 + $0x141c] ss:$40 sps:$4 sm:$0xff]   ;;  %v25852_v52 = vld [vmem:[#allocation11 + $0x1418] ss:$40 sps:$4 sm:$0xff]  }
 0xa5f   :  { %18323 = vmatpush1.bf16.msra.mxu0 %v25792_v62  ;;  %v25857_v62 = vld [vmem:[#allocation11 + $0x1144] ss:$40 sps:$4 sm:$0xff]  }
 0xa60   :  { %18091 = vmatpush1.bf16.msra.mxu1 %v25795_v16  ;;  %18324 = vmatprep.subr.bf16.mxu0 %v25800_v22  ;;  %v25855_v16 = vld [vmem:[#allocation11 + $0x1140] ss:$40 sps:$4 sm:$0xff]   ;;  %v25860_v22 = vld [vmem:[#allocation11 + $0x146c] ss:$40 sps:$4 sm:$0xff]  }
 0xa61   :  { %18092 = vmatprep.subr.bf16.mxu1 %v25803_v44  ;;  %v25863_v44 = vld [vmem:[#allocation11 + $0x1194] ss:$40 sps:$4 sm:$0xff]  }
 0xa63   :  { %18325 = vmatpush1.bf16.msra.mxu0 %v25798_v35  ;;  %v25858_v35 = vld [vmem:[#allocation11 + $0x1468] ss:$40 sps:$4 sm:$0xff]  }
 0xa64   :  { %18093 = vmatpush1.bf16.msra.mxu1 %v25801_v26  ;;  %18326 = vmatprep.subr.bf16.mxu0 %v25806_v23  ;;  %v25861_v26 = vld [vmem:[#allocation11 + $0x1190] ss:$40 sps:$4 sm:$0xff]   ;;  %v25866_v23 = vld [vmem:[#allocation11 + $0x14bc] ss:$40 sps:$4 sm:$0xff]  }
 0xa65   :  { %18094 = vmatprep.subr.bf16.mxu1 %v25809_v60  ;;  %v25869_v60 = vld [vmem:[#allocation11 + $0x11e4] ss:$40 sps:$4 sm:$0xff]  }
 0xa67   :  { %18327 = vmatpush1.bf16.msra.mxu0 %v25804_v36  ;;  %v25864_v36 = vld [vmem:[#allocation11 + $0x14b8] ss:$40 sps:$4 sm:$0xff]  }
 0xa68   :  { %18095 = vmatpush1.bf16.msra.mxu1 %v25807_v48  ;;  %18328 = vmatprep.subr.bf16.mxu0 %v25812_v30  ;;  %v25867_v48 = vld [vmem:[#allocation11 + $0x11e0] ss:$40 sps:$4 sm:$0xff]   ;;  %v25872_v30 = vld [vmem:[#allocation11 + $0x150c] ss:$40 sps:$4 sm:$0xff]  }
 0xa69   :  { %18105 = vmatprep.subr.bf16.mxu1 %v25815_v53  ;;  %v25875_v53 = vld [vmem:[#allocation11 + $0x1234] ss:$40 sps:$4 sm:$0xff]  }
 0xa6b   :  { %18097 = vmatmul.mubr.bf16.vlgmr.msra.gmra.mrb[24].mxu1 %v26995_v25  ;;  %18329 = vmatpush1.bf16.msra.mxu0 %v25810_v32  ;;  %v25870_v32 = vld [vmem:[#allocation11 + $0x1508] ss:$40 sps:$4 sm:$0xff]  }
 0xa6c   :  { %18106 = vmatpush1.bf16.msra.mxu1 %v25813_v10  ;;  %18137 = vmatprep.mubr.bf16.mxu1 %v27016_v59  ;;  %v25873_v10 = vld [vmem:[#allocation11 + $0x1230] ss:$40 sps:$4 sm:$0xff]  }
 0xa6d   :  { %18330 = vmatprep.subr.bf16.mxu0 %v25818_v37  ;;  %18107 = vmatprep.subr.bf16.mxu1 %v25821_v11  ;;  %v25878_v37 = vld [vmem:[#allocation11 + $0x155c] ss:$40 sps:$4 sm:$0xff]  }
 0xa6e   :  { %v25881_v11 = vld [vmem:[#allocation11 + $0x1284] ss:$40 sps:$4 sm:$0xff]  }
 0xa6f   :  { %18331 = vmatpush1.bf16.msra.mxu0 %v25816_v15  ;;  %v25876_v15 = vld [vmem:[#allocation11 + $0x1558] ss:$40 sps:$4 sm:$0xff]  }
 0xa70   :  { %18108 = vmatpush1.bf16.msra.mxu1 %v25819_v38  ;;  %18332 = vmatprep.subr.bf16.mxu0 %v25824_v40  ;;  %v25879_v38 = vld [vmem:[#allocation11 + $0x1280] ss:$40 sps:$4 sm:$0xff]   ;;  %v25884_v40 = vld [vmem:[#allocation11 + $0x15ac] ss:$40 sps:$4 sm:$0xff]  }
 0xa71   :  { %18109 = vmatprep.subr.bf16.mxu1 %v25827_v47  ;;  %v25887_v47 = vld [vmem:[#allocation11 + $0x12d4] ss:$40 sps:$4 sm:$0xff]  }
 0xa73   :  { %18333 = vmatpush1.bf16.msra.mxu0 %v25822_v8  ;;  %v25882_v8 = vld [vmem:[#allocation11 + $0x15a8] ss:$40 sps:$4 sm:$0xff]  }
 0xa74   :  { %18110 = vmatpush1.bf16.msra.mxu1 %v25825_v45  ;;  %18334 = vmatprep.subr.bf16.mxu0 %v25830_v50  ;;  %v25885_v45 = vld [vmem:[#allocation11 + $0x12d0] ss:$40 sps:$4 sm:$0xff]   ;;  %v25890_v50 = vld [vmem:[#allocation11 + $0x15fc] ss:$40 sps:$4 sm:$0xff]  }
 0xa75   :  { %18111 = vmatprep.subr.bf16.mxu1 %v25833_v5  ;;  %v25893_v5 = vld [vmem:[#allocation11 + $0x1324] ss:$40 sps:$4 sm:$0xff]  }
 0xa77   :  { %18335 = vmatpush1.bf16.msra.mxu0 %v25828_v54  ;;  %v25888_v54 = vld [vmem:[#allocation11 + $0x15f8] ss:$40 sps:$4 sm:$0xff]  }
 0xa78   :  { %18112 = vmatpush1.bf16.msra.mxu1 %v25831_v17  ;;  %18336 = vmatprep.subr.bf16.mxu0 %v25836_v29  ;;  %v25891_v17 = vld [vmem:[#allocation11 + $0x1320] ss:$40 sps:$4 sm:$0xff]   ;;  %v25896_v29 = vld [vmem:[#allocation11 + $0x164c] ss:$40 sps:$4 sm:$0xff]  }
 0xa79   :  { %18113 = vmatprep.subr.bf16.mxu1 %v25839_v51  ;;  %v25899_v51 = vld [vmem:[#allocation11 + $0x1374] ss:$40 sps:$4 sm:$0xff]  }
 0xa7b   :  { %18337 = vmatpush1.bf16.msra.mxu0 %v25834_v57  ;;  %v25894_v57 = vld [vmem:[#allocation11 + $0x1648] ss:$40 sps:$4 sm:$0xff]  }
 0xa7c   :  { %18114 = vmatpush1.bf16.msra.mxu1 %v25837_v42  ;;  %18338 = vmatprep.subr.bf16.mxu0 %v25842_v55  ;;  %v25897_v42 = vld [vmem:[#allocation11 + $0x1370] ss:$40 sps:$4 sm:$0xff]   ;;  %v25902_v55 = vld [vmem:[#allocation11 + $0x169c] ss:$40 sps:$4 sm:$0xff]  }
 0xa7d   :  { %18115 = vmatprep.subr.bf16.mxu1 %v25845_v58  ;;  %v25905_v58 = vld [vmem:[#allocation11 + $0x13c4] ss:$40 sps:$4 sm:$0xff]  }
 0xa7e   :  { %v27053_v39 = vpop.f32.mrb[20].mxu1 }
 0xa7f   :  { %v27055_v3 = vpop.f32.mrb[21].mxu1  ;;  %18339 = vmatpush1.bf16.msra.mxu0 %v25840_v28  ;;  %v25900_v28 = vld [vmem:[#allocation11 + $0x1698] ss:$40 sps:$4 sm:$0xff]  }
 0xa80   :  { %v17774_v63 = vpop.f32.mrb[22].mxu1  ;;  %18116 = vmatpush1.bf16.msra.mxu1 %v25843_v34  ;;  %18340 = vmatprep.subr.bf16.mxu0 %v25848_v61  ;;  %v25903_v34 = vld [vmem:[#allocation11 + $0x13c0] ss:$40 sps:$4 sm:$0xff]   ;;  %v25908_v61 = vld [vmem:[#allocation11 + $0x16ec] ss:$40 sps:$4 sm:$0xff]  }
 0xa81   :  { %v17775_v12 = vpop.f32.mrb[23].mxu1  ;;  %18117 = vmatprep.subr.bf16.mxu1 %v25851_v1  ;;  %v25911_v1 = vld [vmem:[#allocation11 + $0x1414] ss:$40 sps:$4 sm:$0xff]   ;;  %v25909_v63 = vld [vmem:[#allocation11 + $0x1410] ss:$40 sps:$4 sm:$0xff]  }
 0xa82   :  { %v25912_v12 = vld [vmem:[#allocation11 + $0x1738] ss:$40 sps:$4 sm:$0xff]  }
 0xa83   :  { %18341 = vmatpush1.bf16.msra.mxu0 %v25846_v9  ;;  %v25906_v9 = vld [vmem:[#allocation11 + $0x16e8] ss:$40 sps:$4 sm:$0xff]  }
 0xa84   :  { %18118 = vmatpush1.bf16.msra.mxu1 %v25849_v6  ;;  %18351 = vmatprep.subr.bf16.mxu0 %v25854_v56  ;;  %v25914_v6 = vld [vmem:[#allocation11 + $0x173c] ss:$40 sps:$4 sm:$0xff]  }
 0xa85   :  { %18119 = vmatprep.subr.bf16.mxu1 %v25857_v62  ;;  %v25917_v56 = vld [vmem:[#allocation11 + $0x1464] ss:$40 sps:$4 sm:$0xff]   ;;  %v25915_v62 = vld [vmem:[#allocation11 + $0x1460] ss:$40 sps:$4 sm:$0xff]  }
 0xa86   :  { %18343 = vmatmul.mubr.bf16.vlgmr.msra.gmra.mrb[28].mxu0 %v27018_v24 }
 0xa87   :  { %18352 = vmatpush1.bf16.msra.mxu0 %v25852_v52  ;;  %18383 = vmatprep.mubr.bf16.mxu0 %v27022_v4  ;;  %v25920_v52 = vld [vmem:[#allocation11 + $0x178c] ss:$40 sps:$4 sm:$0xff]  }
 0xa88   :  { %18120 = vmatpush1.bf16.msra.mxu1 %v25855_v16  ;;  %18353 = vmatprep.subr.bf16.mxu0 %v25860_v22  ;;  %v25923_v16 = vld [vmem:[#allocation11 + $0x14b4] ss:$40 sps:$4 sm:$0xff]   ;;  %v25918_v22 = vld [vmem:[#allocation11 + $0x1788] ss:$40 sps:$4 sm:$0xff]  }
 0xa89   :  { %18121 = vmatprep.subr.bf16.mxu1 %v25863_v44  ;;  %v25921_v44 = vld [vmem:[#allocation11 + $0x14b0] ss:$40 sps:$4 sm:$0xff]  }
 0xa8b   :  { %18354 = vmatpush1.bf16.msra.mxu0 %v25858_v35  ;;  %v25926_v35 = vld [vmem:[#allocation11 + $0x17dc] ss:$40 sps:$4 sm:$0xff]  }
 0xa8c   :  { %18122 = vmatpush1.bf16.msra.mxu1 %v25861_v26  ;;  %18355 = vmatprep.subr.bf16.mxu0 %v25866_v23  ;;  %v25929_v26 = vld [vmem:[#allocation11 + $0x1504] ss:$40 sps:$4 sm:$0xff]   ;;  %v25924_v23 = vld [vmem:[#allocation11 + $0x17d8] ss:$40 sps:$4 sm:$0xff]  }
 0xa8d   :  { %18123 = vmatprep.subr.bf16.mxu1 %v25869_v60  ;;  %v25927_v60 = vld [vmem:[#allocation11 + $0x1500] ss:$40 sps:$4 sm:$0xff]  }
 0xa8f   :  { %18356 = vmatpush1.bf16.msra.mxu0 %v25864_v36  ;;  %v25932_v36 = vld [vmem:[#allocation11 + $0x182c] ss:$40 sps:$4 sm:$0xff]  }
 0xa90   :  { %18124 = vmatpush1.bf16.msra.mxu1 %v25867_v48  ;;  %18357 = vmatprep.subr.bf16.mxu0 %v25872_v30  ;;  %v25935_v48 = vld [vmem:[#allocation11 + $0x1554] ss:$40 sps:$4 sm:$0xff]   ;;  %v25930_v30 = vld [vmem:[#allocation11 + $0x1828] ss:$40 sps:$4 sm:$0xff]  }
 0xa91   :  { %18125 = vmatprep.subr.bf16.mxu1 %v25875_v53  ;;  %v27061_v53 = vld [vmem:[#allocation13] sm:$0xff] }
 0xa93   :  { %18358 = vmatpush1.bf16.msra.mxu0 %v25870_v32  ;;  %v25933_v32 = vld [vmem:[#allocation11 + $0x1550] ss:$40 sps:$4 sm:$0xff]  }
 0xa94   :  { %18126 = vmatpush1.bf16.msra.mxu1 %v25873_v10  ;;  %18359 = vmatprep.subr.bf16.mxu0 %v25878_v37  ;;  %v25938_v10 = vld [vmem:[#allocation11 + $0x187c] ss:$40 sps:$4 sm:$0xff]   ;;  %v13529_v37 = vrot.slane %v27061_v53, %v26810_v33 }
 0xa95   :  { %18127 = vmatprep.subr.bf16.mxu1 %v25881_v11  ;;  %v25941_v11 = vld [vmem:[#allocation11 + $0x15a4] ss:$40 sps:$4 sm:$0xff]  }
 0xa97   :  { %18360 = vmatpush1.bf16.msra.mxu0 %v25876_v15  ;;  %v25936_v15 = vld [vmem:[#allocation11 + $0x1878] ss:$40 sps:$4 sm:$0xff]  }
 0xa98   :  { %18128 = vmatpush1.bf16.msra.mxu1 %v25879_v38  ;;  %18361 = vmatprep.subr.bf16.mxu0 %v25884_v40  ;;  %v25939_v38 = vld [vmem:[#allocation11 + $0x15a0] ss:$40 sps:$4 sm:$0xff]   ;;  %v25944_v40 = vld [vmem:[#allocation11 + $0x18cc] ss:$40 sps:$4 sm:$0xff]  }
 0xa99   :  { %18129 = vmatprep.subr.bf16.mxu1 %v25887_v47  ;;  %v22206_v47 = vadd.f32 %v27055_v3, %v13529_v37  ;;  %v25956_v3 = vld [vmem:[#allocation11 + $0x1694] ss:$40 sps:$4 sm:$0xff]   ;;  %v25983_v37 = vld [vmem:[#allocation14 + $0x78] sm:$0xff]  }
 0xa9b   :  { %18362 = vmatpush1.bf16.msra.mxu0 %v25882_v8  ;;  %v25947_v8 = vld [vmem:[#allocation11 + $0x15f4] ss:$40 sps:$4 sm:$0xff]  }
 0xa9c   :  { %18130 = vmatpush1.bf16.msra.mxu1 %v25885_v45  ;;  %18363 = vmatprep.subr.bf16.mxu0 %v25890_v50  ;;  %v25942_v45 = vld [vmem:[#allocation11 + $0x18c8] ss:$40 sps:$4 sm:$0xff]  }
 0xa9d   :  { %18131 = vmatprep.subr.bf16.mxu1 %v25893_v5  ;;  %v25945_v50 = vld [vmem:[#allocation11 + $0x15f0] ss:$40 sps:$4 sm:$0xff]  }
 0xa9e   :  { %v25948_v5 = vld [vmem:[#allocation14 + $0x40] sm:$0xff]  }
 0xa9f   :  { %18364 = vmatpush1.bf16.msra.mxu0 %v25888_v54  ;;  %v18598_v54 = vmax.f32 %v22206_v47, 0.0  ;;  %v25988_v47 = vld [vmem:[#allocation14 + $0xc0] sm:$0xff]  }
 0xaa0   :  { %18132 = vmatpush1.bf16.msra.mxu1 %v25891_v17  ;;  %18365 = vmatprep.subr.bf16.mxu0 %v25896_v29  ;;  %v25951_v17 = vld [vmem:[#allocation11 + $0x1644] ss:$40 sps:$4 sm:$0xff]  }
 0xaa1   :  { %18133 = vmatprep.subr.bf16.mxu1 %v25899_v51  ;;  %v25952_v29 = vld [vmem:[#allocation14] sm:$0xff]  }
 0xaa2   :  { %v25949_v51 = vld [vmem:[#allocation11 + $0x1640] ss:$40 sps:$4 sm:$0xff]  }
 0xaa3   :  { %18366 = vmatpush1.bf16.msra.mxu0 %v25894_v57  ;;  %v25953_v57 = vld [vmem:[#allocation14 + $0x48] sm:$0xff]  }
 0xaa4   :  { %18134 = vmatpush1.bf16.msra.mxu1 %v25897_v42  ;;  %18367 = vmatprep.subr.bf16.mxu0 %v25902_v55  ;;  %v18608_v42 = vpack.c.bf16 %v18598_v54, %v18598_v54  ;;  %v25957_v55 = vld [vmem:[#allocation14 + $0x8] sm:$0xff]  }
 0xaa5   :  { %18135 = vmatprep.subr.bf16.mxu1 %v25905_v58  ;;  %v25954_v58 = vld [vmem:[#allocation11 + $0x1690] ss:$40 sps:$4 sm:$0xff]  }
 0xaa6   :  { %v25993_v54 = vld [vmem:[#allocation14 + $0xc8] sm:$0xff]  }
 0xaa7   :  { %18368 = vmatpush1.bf16.msra.mxu0 %v25900_v28  ;;  %v25958_v28 = vld [vmem:[#allocation14 + $0x50] sm:$0xff]  }
 0xaa8   :  { %18136 = vmatpush1.bf16.msra.mxu1 %v25903_v34  ;;  %18369 = vmatprep.subr.bf16.mxu0 %v25908_v61  ;;  %v25961_v34 = vld [vmem:[#allocation11 + $0x16e4] ss:$40 sps:$4 sm:$0xff]   ;;  %v25962_v61 = vld [vmem:[#allocation14 + $0x10] sm:$0xff]  }
 0xaa9   :  { %18146 = vmatprep.subr.bf16.mxu1 %v25911_v1  ;;  %v25959_v1 = vld [vmem:[#allocation11 + $0x16e0] ss:$40 sps:$4 sm:$0xff]  }
 0xaab   :  { %18138 = vmatmul.mubr.bf16.vlgmr.msra.gmra.mrb[24].mxu1 %v27018_v24  ;;  %18370 = vmatpush1.bf16.msra.mxu0 %v25906_v9  ;;  %v25963_v9 = vld [vmem:[#allocation14 + $0x58] sm:$0xff]  }
 0xaac   :  { %18147 = vmatpush1.bf16.msra.mxu1 %v25909_v63  ;;  %18178 = vmatprep.mubr.bf16.mxu1 %v27022_v4  ;;  %v25966_v63 = vld [vmem:[#allocation11 + $0x1734] ss:$40 sps:$4 sm:$0xff]  }
 0xaad   :  { %18371 = vmatprep.subr.bf16.mxu0 %v25914_v6  ;;  %18148 = vmatprep.subr.bf16.mxu1 %v25917_v56  ;;  %v25967_v6 = vld [vmem:[#allocation14 + $0x18] sm:$0xff]   ;;  %v25964_v56 = vld [vmem:[#allocation11 + $0x1730] ss:$40 sps:$4 sm:$0xff]  }
 0xaaf   :  { %18372 = vmatpush1.bf16.msra.mxu0 %v25912_v12  ;;  %v25968_v12 = vld [vmem:[#allocation14 + $0x60] sm:$0xff]  }
 0xab0   :  { %18149 = vmatpush1.bf16.msra.mxu1 %v25915_v62  ;;  %18373 = vmatprep.subr.bf16.mxu0 %v25920_v52  ;;  %v25971_v62 = vld [vmem:[#allocation11 + $0x1784] ss:$40 sps:$4 sm:$0xff]  }
 0xab1   :  { %18150 = vmatprep.subr.bf16.mxu1 %v25923_v16  ;;  %v25972_v52 = vld [vmem:[#allocation14 + $0x20] sm:$0xff]  }
 0xab2   :  { %v25969_v16 = vld [vmem:[#allocation11 + $0x1780] ss:$40 sps:$4 sm:$0xff]  }
 0xab3   :  { %18374 = vmatpush1.bf16.msra.mxu0 %v25918_v22  ;;  %v25973_v22 = vld [vmem:[#allocation14 + $0x68] sm:$0xff]  }
 0xab4   :  { %18151 = vmatpush1.bf16.msra.mxu1 %v25921_v44  ;;  %18375 = vmatprep.subr.bf16.mxu0 %v25926_v35  ;;  %v25976_v44 = vld [vmem:[#allocation11 + $0x17d4] ss:$40 sps:$4 sm:$0xff]  }
 0xab5   :  { %18152 = vmatprep.subr.bf16.mxu1 %v25929_v26  ;;  %v25977_v35 = vld [vmem:[#allocation14 + $0x28] sm:$0xff]   ;;  %v13525_v26 = vrot.slane %v27061_v53, %v26830_v13 }
 0xab7   :  { %18376 = vmatpush1.bf16.msra.mxu0 %v25924_v23  ;;  %v25974_v23 = vld [vmem:[#allocation11 + $0x17d0] ss:$40 sps:$4 sm:$0xff]  }
 0xab8   :  { %18153 = vmatpush1.bf16.msra.mxu1 %v25927_v60  ;;  %18377 = vmatprep.subr.bf16.mxu0 %v25932_v36  ;;  %v25978_v60 = vld [vmem:[#allocation14 + $0x70] sm:$0xff]   ;;  %v13537_v36 = vrot.slane %v27061_v53, %v26803_v19 }
 0xab9   :  { %18154 = vmatprep.subr.bf16.mxu1 %v25935_v48  ;;  %v25981_v48 = vld [vmem:[#allocation11 + $0x1824] ss:$40 sps:$4 sm:$0xff]   ;;  %v25984_v19 = vld [vmem:[#allocation11 + $0x1870] ss:$40 sps:$4 sm:$0xff]  }
 0xabb   :  { %18378 = vmatpush1.bf16.msra.mxu0 %v25930_v30  ;;  %v25982_v30 = vld [vmem:[#allocation14 + $0x30] sm:$0xff]  }
 0xabc   :  { %18155 = vmatpush1.bf16.msra.mxu1 %v25933_v32  ;;  %18379 = vmatprep.subr.bf16.mxu0 %v25938_v10  ;;  %v22205_v32 = vadd.f32 %v27053_v39, %v13525_v26  ;;  %v25979_v10 = vld [vmem:[#allocation11 + $0x1820] ss:$40 sps:$4 sm:$0xff]   ;;  %v26019_v26 = vld [vmem:[#allocation11 + $0x1b0] ss:$40 sps:$4 sm:$0xff]  }
 0xabd   :  { %18156 = vmatprep.subr.bf16.mxu1 %v25941_v11  ;;  %v22208_v11 = vadd.f32 %v27049_v7, %v13537_v36  ;;  %v25992_v39 = vld [vmem:[#allocation14 + $0x80] sm:$0xff]   ;;  %v26027_v36 = vld [vmem:[#allocation14 + $0xb8] sm:$0xff]  }
 0xabf   :  { %18380 = vmatpush1.bf16.msra.mxu0 %v25936_v15  ;;  %v25986_v15 = vld [vmem:[#allocation11 + $0x1874] ss:$40 sps:$4 sm:$0xff]  }
 0xac0   :  { %18157 = vmatpush1.bf16.msra.mxu1 %v25939_v38  ;;  %18381 = vmatprep.subr.bf16.mxu0 %v25944_v40  ;;  %v25987_v38 = vld [vmem:[#allocation14 + $0x38] sm:$0xff]   ;;  %v18597_v40 = vmax.f32 %v22205_v32, 0.0 }
 0xac1   :  { %18158 = vmatprep.subr.bf16.mxu1 %v25947_v8  ;;  %v18600_v8 = vmax.f32 %v22208_v11, 0.0  ;;  %v26036_v11 = vld [vmem:[#allocation11 + $0x2f4] ss:$40 sps:$4 sm:$0xff]  }
 0xac3   :  { %18382 = vmatpush1.bf16.msra.mxu0 %v25942_v45  ;;  %v25991_v45 = vld [vmem:[#allocation11 + $0x18c4] ss:$40 sps:$4 sm:$0xff]   ;;  %v18610_v7 = vpack.c.bf16 %v18600_v8, %v18600_v8 }
 0xac4   :  { %18159 = vmatpush1.bf16.msra.mxu1 %v25945_v50  ;;  %22073 = vmatprep.subr.bf16.mxu0 %v25948_v5  ;;  %v18607_v50 = vpack.c.bf16 %v18597_v40, %v18597_v40  ;;  %v25989_v5 = vld [vmem:[#allocation11 + $0x18c0] ss:$40 sps:$4 sm:$0xff]   ;;  %v26045_v8 = vld [vmem:[#allocation11 + $0x3e4] ss:$40 sps:$4 sm:$0xff]  }
 0xac5   :  { %18160 = vmatprep.subr.bf16.mxu1 %v25951_v17  ;;  %v25996_v17 = vld [vmem:[#allocation11 + $0x24] ss:$40 sps:$4 sm:$0xff]   ;;  %v26037_v40 = vld [vmem:[#allocation11 + $0x340] ss:$40 sps:$4 sm:$0xff]  }
 0xac6   :  { %18384 = vmatmul.mubr.bf16.vlgmr.msra.gmra.mrb[28].mxu0 %v27031_v31 }
 0xac7   :  { %22074 = vmatpush3.bf16.msra.mxu0 %v25952_v29  ;;  %19296 = vmatprep.mubr.bf16.mxu0 %v18608_v42  ;;  %v25997_v29 = vld [vmem:[#allocation14 + $0x88] sm:$0xff]  }
 0xac8   :  { %18161 = vmatpush1.bf16.msra.mxu1 %v25949_v51  ;;  %22075 = vmatprep.subr.bf16.mxu0 %v25953_v57  ;;  %v25994_v51 = vld [vmem:[#allocation11 + $0x20] ss:$40 sps:$4 sm:$0xff]   ;;  %v26001_v42 = vld [vmem:[#allocation11 + $0x74] ss:$40 sps:$4 sm:$0xff]  }
 0xac9   :  { %18162 = vmatprep.subr.bf16.mxu1 %v25956_v3  ;;  %v25998_v57 = vld [vmem:[#allocation14 + $0xd0] sm:$0xff]  }
 0xaca   :  { %v26002_v3 = vld [vmem:[#allocation14 + $0x90] sm:$0xff]  }
 0xacb   :  { %22076 = vmatpush3.bf16.msra.mxu0 %v25957_v55  ;;  %v25999_v55 = vld [vmem:[#allocation11 + $0x70] ss:$40 sps:$4 sm:$0xff]  }
 0xacc   :  { %18163 = vmatpush1.bf16.msra.mxu1 %v25954_v58  ;;  %22077 = vmatprep.subr.bf16.mxu0 %v25958_v28  ;;  %v26003_v58 = vld [vmem:[#allocation14 + $0xd8] sm:$0xff]  }
 0xacd   :  { %18164 = vmatprep.subr.bf16.mxu1 %v25961_v34  ;;  %v26006_v28 = vld [vmem:[#allocation11 + $0xc4] ss:$40 sps:$4 sm:$0xff]  }
 0xace   :  { %v26007_v34 = vld [vmem:[#allocation14 + $0x98] sm:$0xff]  }
 0xacf   :  { %22078 = vmatpush3.bf16.msra.mxu0 %v25962_v61  ;;  %v26004_v61 = vld [vmem:[#allocation11 + $0xc0] ss:$40 sps:$4 sm:$0xff]  }
 0xad0   :  { %18165 = vmatpush1.bf16.msra.mxu1 %v25959_v1  ;;  %22079 = vmatprep.subr.bf16.mxu0 %v25963_v9  ;;  %v26008_v1 = vld [vmem:[#allocation14 + $0xe0] sm:$0xff]   ;;  %v26011_v9 = vld [vmem:[#allocation11 + $0x114] ss:$40 sps:$4 sm:$0xff]  }
 0xad1   :  { %18166 = vmatprep.subr.bf16.mxu1 %v25966_v63  ;;  %v26012_v63 = vld [vmem:[#allocation14 + $0xa0] sm:$0xff]  }
 0xad3   :  { %22080 = vmatpush3.bf16.msra.mxu0 %v25967_v6  ;;  %v26009_v6 = vld [vmem:[#allocation11 + $0x110] ss:$40 sps:$4 sm:$0xff]  }
 0xad4   :  { %18167 = vmatpush1.bf16.msra.mxu1 %v25964_v56  ;;  %22081 = vmatprep.subr.bf16.mxu0 %v25968_v12  ;;  %v26013_v56 = vld [vmem:[#allocation14 + $0xe8] sm:$0xff]  }
 0xad5   :  { %18168 = vmatprep.subr.bf16.mxu1 %v25971_v62  ;;  %v26017_v12 = vld [vmem:[#allocation14 + $0xa8] sm:$0xff]   ;;  %v13533_v62 = vrot.slane %v27061_v53, %v26798_v14  ;;  %v26024_v14 = vld [vmem:[#allocation11 + $0x200] ss:$40 sps:$4 sm:$0xff]  }
 0xad7   :  { %22082 = vmatpush3.bf16.msra.mxu0 %v25972_v52  ;;  %v26014_v52 = vld [vmem:[#allocation11 + $0x160] ss:$40 sps:$4 sm:$0xff]  }
 0xad8   :  { %18169 = vmatpush1.bf16.msra.mxu1 %v25969_v16  ;;  %22083 = vmatprep.subr.bf16.mxu0 %v25973_v22  ;;  %v26018_v16 = vld [vmem:[#allocation14 + $0xf0] sm:$0xff]  }
 0xad9   :  { %18170 = vmatprep.subr.bf16.mxu1 %v25976_v44  ;;  %v26021_v22 = vld [vmem:[#allocation11 + $0x1b4] ss:$40 sps:$4 sm:$0xff]  }
 0xada   :  { %v26022_v44 = vld [vmem:[#allocation14 + $0xb0] sm:$0xff]  }
 0xadb   :  { %22084 = vmatpush3.bf16.msra.mxu0 %v25977_v35  ;;  %v22207_v35 = vadd.f32 %v27047_v43, %v13533_v62  ;;  %v26033_v43 = vld [vmem:[#allocation11 + $0x2a4] ss:$40 sps:$4 sm:$0xff]   ;;  %v26067_v62 = vld [vmem:[#allocation11 + $0x660] ss:$40 sps:$4 sm:$0xff]  }
 0xadc   :  { %18171 = vmatpush1.bf16.msra.mxu1 %v25974_v23  ;;  %22085 = vmatprep.subr.bf16.mxu0 %v25978_v60  ;;  %v26023_v23 = vld [vmem:[#allocation14 + $0xf8] sm:$0xff]  }
 0xadd   :  { %18172 = vmatprep.subr.bf16.mxu1 %v25981_v48  ;;  %v26026_v60 = vld [vmem:[#allocation11 + $0x204] ss:$40 sps:$4 sm:$0xff]   ;;  %v18599_v48 = vmax.f32 %v22207_v35, 0.0  ;;  %v26178_v35 = vld [vmem:[#allocation14 + $0x170] sm:$0xff]  }
 0xadf   :  { %22086 = vmatpush3.bf16.msra.mxu0 %v25982_v30  ;;  %v26030_v30 = vld [vmem:[#allocation11 + $0x254] ss:$40 sps:$4 sm:$0xff]   ;;  %v18609_v32 = vpack.c.bf16 %v18599_v48, %v18599_v48 }
 0xae0   :  { %18173 = vmatpush1.bf16.msra.mxu1 %v25979_v10  ;;  %22087 = vmatprep.subr.bf16.mxu0 %v25983_v37  ;;  %v26028_v10 = vld [vmem:[#allocation11 + $0x250] ss:$40 sps:$4 sm:$0xff]   ;;  %v26031_v37 = vld [vmem:[#allocation11 + $0x2a0] ss:$40 sps:$4 sm:$0xff]   ;;  %v26078_v48 = vld [vmem:[#allocation11 + $0x754] ss:$40 sps:$4 sm:$0xff]  }
 0xae1   :  { %18174 = vmatprep.subr.bf16.mxu1 %v25986_v15  ;;  %v26034_v15 = vld [vmem:[#allocation11 + $0x2f0] ss:$40 sps:$4 sm:$0xff]  }
 0xae3   :  { %22088 = vmatpush3.bf16.msra.mxu0 %v25987_v38  ;;  %v26039_v38 = vld [vmem:[#allocation11 + $0x344] ss:$40 sps:$4 sm:$0xff]  }
 0xae4   :  { %18175 = vmatpush1.bf16.msra.mxu1 %v25984_v19  ;;  %22095 = vmatprep.subr.bf16.mxu0 %v25988_v47  ;;  %v26042_v19 = vld [vmem:[#allocation11 + $0x394] ss:$40 sps:$4 sm:$0xff]   ;;  %v26040_v47 = vld [vmem:[#allocation11 + $0x390] ss:$40 sps:$4 sm:$0xff]  }
 0xae5   :  { %18176 = vmatprep.subr.bf16.mxu1 %v25991_v45  ;;  %v26043_v45 = vld [vmem:[#allocation11 + $0x3e0] ss:$40 sps:$4 sm:$0xff]  }
 0xae6   :  { %19297 = vmatmul.mubr.bf16.vlgmr.msra.gmra.mrb[32].mxu0 %v18607_v50  ;;  %v26046_v50 = vld [vmem:[#allocation11 + $0x430] ss:$40 sps:$4 sm:$0xff]  }
 0xae7   :  { %22096 = vmatpush3.bf16.msra.mxu0 %v25992_v39  ;;  %19336 = vmatprep.mubr.bf16.mxu0 %v18610_v7  ;;  %v26048_v39 = vld [vmem:[#allocation11 + $0x434] ss:$40 sps:$4 sm:$0xff]  }
 0xae8   :  { %18177 = vmatpush1.bf16.msra.mxu1 %v25989_v5  ;;  %22097 = vmatprep.subr.bf16.mxu0 %v25993_v54  ;;  %v26051_v5 = vld [vmem:[#allocation11 + $0x484] ss:$40 sps:$4 sm:$0xff]   ;;  %v26049_v54 = vld [vmem:[#allocation11 + $0x480] ss:$40 sps:$4 sm:$0xff]   ;;  %v26054_v7 = vld [vmem:[#allocation11 + $0x4d4] ss:$40 sps:$4 sm:$0xff]  }
 0xae9   :  { %18392 = vmatprep.subr.bf16.mxu1 %v25996_v17  ;;  %v26052_v17 = vld [vmem:[#allocation11 + $0x4d0] ss:$40 sps:$4 sm:$0xff]  }
 0xaeb   :  { %18179 = vmatmul.mubr.bf16.vlgmr.msra.gmra.mrb[24].mxu1 %v27031_v31  ;;  %22098 = vmatpush3.bf16.msra.mxu0 %v25997_v29  ;;  %v26148_v29 = vld [vmem:[#allocation14 + $0x140] sm:$0xff]  }
 0xaec   :  { %18393 = vmatpush1.bf16.msra.mxu1 %v25994_v51  ;;  %18424 = vmatprep.mubr.bf16.mxu1 %v26960_v49  ;;  %v26016_v49 = vld [vmem:[#allocation11 + $0x164] ss:$40 sps:$4 sm:$0xff]  }
 0xaed   :  { %22099 = vmatprep.subr.bf16.mxu0 %v25998_v57  ;;  %18394 = vmatprep.subr.bf16.mxu1 %v26001_v42  ;;  %v26057_v51 = vld [vmem:[#allocation11 + $0x524] ss:$40 sps:$4 sm:$0xff]   ;;  %v26055_v42 = vld [vmem:[#allocation11 + $0x520] ss:$40 sps:$4 sm:$0xff]  }
 0xaee   :  { %v26152_v57 = vld [vmem:[#allocation14 + $0x100] sm:$0xff]  }
 0xaef   :  { %22100 = vmatpush3.bf16.msra.mxu0 %v26002_v3  ;;  %v26153_v3 = vld [vmem:[#allocation14 + $0x148] sm:$0xff]  }
 0xaf0   :  { %18395 = vmatpush1.bf16.msra.mxu1 %v25999_v55  ;;  %22101 = vmatprep.subr.bf16.mxu0 %v26003_v58  ;;  %v26060_v55 = vld [vmem:[#allocation11 + $0x574] ss:$40 sps:$4 sm:$0xff]  }
 0xaf1   :  { %18396 = vmatprep.subr.bf16.mxu1 %v26006_v28  ;;  %v26157_v58 = vld [vmem:[#allocation14 + $0x108] sm:$0xff]  }
 0xaf2   :  { %v26058_v28 = vld [vmem:[#allocation11 + $0x570] ss:$40 sps:$4 sm:$0xff]  }
 0xaf3   :  { %22102 = vmatpush3.bf16.msra.mxu0 %v26007_v34  ;;  %v26158_v34 = vld [vmem:[#allocation14 + $0x150] sm:$0xff]  }
 0xaf4   :  { %18397 = vmatpush1.bf16.msra.mxu1 %v26004_v61  ;;  %22103 = vmatprep.subr.bf16.mxu0 %v26008_v1  ;;  %v26063_v61 = vld [vmem:[#allocation11 + $0x5c4] ss:$40 sps:$4 sm:$0xff]   ;;  %v26162_v1 = vld [vmem:[#allocation14 + $0x110] sm:$0xff]  }
 0xaf5   :  { %18398 = vmatprep.subr.bf16.mxu1 %v26011_v9  ;;  %v26061_v9 = vld [vmem:[#allocation11 + $0x5c0] ss:$40 sps:$4 sm:$0xff]  }
 0xaf7   :  { %22104 = vmatpush3.bf16.msra.mxu0 %v26012_v63  ;;  %v26163_v63 = vld [vmem:[#allocation14 + $0x158] sm:$0xff]  }
 0xaf8   :  { %18399 = vmatpush1.bf16.msra.mxu1 %v26009_v6  ;;  %22105 = vmatprep.subr.bf16.mxu0 %v26013_v56  ;;  %v26066_v6 = vld [vmem:[#allocation11 + $0x614] ss:$40 sps:$4 sm:$0xff]   ;;  %v26167_v56 = vld [vmem:[#allocation14 + $0x118] sm:$0xff]  }
 0xaf9   :  { %18400 = vmatprep.subr.bf16.mxu1 %v26016_v49  ;;  %v26168_v49 = vld [vmem:[#allocation14 + $0x160] sm:$0xff]  }
 0xafb   :  { %22106 = vmatpush3.bf16.msra.mxu0 %v26017_v12  ;;  %v26172_v12 = vld [vmem:[#allocation14 + $0x120] sm:$0xff]  }
 0xafc   :  { %18401 = vmatpush1.bf16.msra.mxu1 %v26014_v52  ;;  %22107 = vmatprep.subr.bf16.mxu0 %v26018_v16  ;;  %v26173_v52 = vld [vmem:[#allocation14 + $0x168] sm:$0xff]  }
 0xafd   :  { %18402 = vmatprep.subr.bf16.mxu1 %v26021_v22  ;;  %v26072_v16 = vld [vmem:[#allocation11 + $0x6b4] ss:$40 sps:$4 sm:$0xff]  }
 0xafe   :  { %v26177_v22 = vld [vmem:[#allocation14 + $0x128] sm:$0xff]  }
 0xaff   :  { %22108 = vmatpush3.bf16.msra.mxu0 %v26022_v44  ;;  %v26070_v44 = vld [vmem:[#allocation11 + $0x6b0] ss:$40 sps:$4 sm:$0xff]  }
 0xb00   :  { %18403 = vmatpush1.bf16.msra.mxu1 %v26019_v26  ;;  %22109 = vmatprep.subr.bf16.mxu0 %v26023_v23  ;;  %v26075_v26 = vld [vmem:[#allocation11 + $0x704] ss:$40 sps:$4 sm:$0xff]   ;;  %v26182_v23 = vld [vmem:[#allocation14 + $0x130] sm:$0xff]  }
 0xb01   :  { %18404 = vmatprep.subr.bf16.mxu1 %v26026_v60  ;;  %v26073_v60 = vld [vmem:[#allocation11 + $0x700] ss:$40 sps:$4 sm:$0xff]  }
 0xb03   :  { %22110 = vmatpush3.bf16.msra.mxu0 %v26027_v36  ;;  %v26183_v36 = vld [vmem:[#allocation14 + $0x178] sm:$0xff]  }
 0xb04   :  { %18405 = vmatpush1.bf16.msra.mxu1 %v26024_v14  ;;  %22117 = vmatprep.subr.bf16.mxu0 %v26148_v29  ;;  %v26187_v14 = vld [vmem:[#allocation14 + $0x138] sm:$0xff]  }
 0xb05   :  { %18406 = vmatprep.subr.bf16.mxu1 %v26030_v30  ;;  %v26076_v30 = vld [vmem:[#allocation11 + $0x750] ss:$40 sps:$4 sm:$0xff]   ;;  %v26103_v29 = vld [vmem:[#allocation11 + $0xa20] ss:$40 sps:$4 sm:$0xff]  }
 0xb06   :  { %19337 = vmatmul.mubr.bf16.vlgmr.msra.gmra.mrb[36].mxu0 %v18609_v32  ;;  %v26188_v32 = vld [vmem:[#allocation14 + $0x1c0] sm:$0xff]  }
 0xb07   :  { %22118 = vmatpush3.bf16.msra.mxu0 %v26152_v57  ;;  %v26106_v57 = vld [vmem:[#allocation11 + $0xa70] ss:$40 sps:$4 sm:$0xff]  }
 0xb08   :  { %18407 = vmatpush1.bf16.msra.mxu1 %v26028_v10  ;;  %22119 = vmatprep.subr.bf16.mxu0 %v26153_v3  ;;  %v26081_v10 = vld [vmem:[#allocation11 + $0x7a4] ss:$40 sps:$4 sm:$0xff]   ;;  %v26109_v3 = vld [vmem:[#allocation11 + $0xac0] ss:$40 sps:$4 sm:$0xff]  }
 0xb09   :  { %18408 = vmatprep.subr.bf16.mxu1 %v26033_v43  ;;  %v26079_v43 = vld [vmem:[#allocation11 + $0x7a0] ss:$40 sps:$4 sm:$0xff]  }
 0xb0b   :  { %22120 = vmatpush3.bf16.msra.mxu0 %v26157_v58  ;;  %v26112_v58 = vld [vmem:[#allocation11 + $0xb10] ss:$40 sps:$4 sm:$0xff]  }
 0xb0c   :  { %18409 = vmatpush1.bf16.msra.mxu1 %v26031_v37  ;;  %22121 = vmatprep.subr.bf16.mxu0 %v26158_v34  ;;  %v26084_v37 = vld [vmem:[#allocation11 + $0x7f4] ss:$40 sps:$4 sm:$0xff]   ;;  %v26115_v34 = vld [vmem:[#allocation11 + $0xb60] ss:$40 sps:$4 sm:$0xff]  }
 0xb0d   :  { %18410 = vmatprep.subr.bf16.mxu1 %v26036_v11  ;;  %v26082_v11 = vld [vmem:[#allocation11 + $0x7f0] ss:$40 sps:$4 sm:$0xff]  }
 0xb0f   :  { %22122 = vmatpush3.bf16.msra.mxu0 %v26162_v1  ;;  %v26123_v1 = vld [vmem:[#allocation11 + $0xc04] ss:$40 sps:$4 sm:$0xff]  }
 0xb10   :  { %18411 = vmatpush1.bf16.msra.mxu1 %v26034_v15  ;;  %22123 = vmatprep.subr.bf16.mxu0 %v26163_v63  ;;  %v26087_v15 = vld [vmem:[#allocation11 + $0x844] ss:$40 sps:$4 sm:$0xff]   ;;  %v26124_v63 = vld [vmem:[#allocation11 + $0xc50] ss:$40 sps:$4 sm:$0xff]  }
 0xb11   :  { %18412 = vmatprep.subr.bf16.mxu1 %v26039_v38  ;;  %v26085_v38 = vld [vmem:[#allocation11 + $0x840] ss:$40 sps:$4 sm:$0xff]  }
 0xb13   :  { %22124 = vmatpush3.bf16.msra.mxu0 %v26167_v56  ;;  %v26127_v56 = vld [vmem:[#allocation11 + $0xca0] ss:$40 sps:$4 sm:$0xff]  }
 0xb14   :  { %18413 = vmatpush1.bf16.msra.mxu1 %v26037_v40  ;;  %22125 = vmatprep.subr.bf16.mxu0 %v26168_v49  ;;  %v26090_v40 = vld [vmem:[#allocation11 + $0x894] ss:$40 sps:$4 sm:$0xff]   ;;  %v26130_v49 = vld [vmem:[#allocation11 + $0xcf0] ss:$40 sps:$4 sm:$0xff]  }
 0xb15   :  { %18414 = vmatprep.subr.bf16.mxu1 %v26042_v19  ;;  %v26088_v19 = vld [vmem:[#allocation11 + $0x890] ss:$40 sps:$4 sm:$0xff]  }
 0xb17   :  { %22126 = vmatpush3.bf16.msra.mxu0 %v26172_v12  ;;  %v26133_v12 = vld [vmem:[#allocation11 + $0xd40] ss:$40 sps:$4 sm:$0xff]  }
 0xb18   :  { %18415 = vmatpush1.bf16.msra.mxu1 %v26040_v47  ;;  %22127 = vmatprep.subr.bf16.mxu0 %v26173_v52  ;;  %v26093_v47 = vld [vmem:[#allocation11 + $0x8e4] ss:$40 sps:$4 sm:$0xff]   ;;  %v26136_v52 = vld [vmem:[#allocation11 + $0xd90] ss:$40 sps:$4 sm:$0xff]  }
 0xb19   :  { %18416 = vmatprep.subr.bf16.mxu1 %v26045_v8  ;;  %v26091_v8 = vld [vmem:[#allocation11 + $0x8e0] ss:$40 sps:$4 sm:$0xff]  }
 0xb1b   :  { %22128 = vmatpush3.bf16.msra.mxu0 %v26177_v22  ;;  %v26139_v22 = vld [vmem:[#allocation11 + $0xde0] ss:$40 sps:$4 sm:$0xff]  }
 0xb1c   :  { %18417 = vmatpush1.bf16.msra.mxu1 %v26043_v45  ;;  %22129 = vmatprep.subr.bf16.mxu0 %v26178_v35  ;;  %v26096_v45 = vld [vmem:[#allocation11 + $0x934] ss:$40 sps:$4 sm:$0xff]  }
 0xb1d   :  { %18418 = vmatprep.subr.bf16.mxu1 %v26048_v39  ;;  %v26094_v39 = vld [vmem:[#allocation11 + $0x930] ss:$40 sps:$4 sm:$0xff]   ;;  %v26144_v35 = vld [vmem:[#allocation11 + $0xe34] ss:$40 sps:$4 sm:$0xff]  }
 0xb1f   :  { %22130 = vmatpush3.bf16.msra.mxu0 %v26182_v23 }
 0xb20   :  { %18419 = vmatpush1.bf16.msra.mxu1 %v26046_v50  ;;  %22131 = vmatprep.subr.bf16.mxu0 %v26183_v36  ;;  %v26099_v50 = vld [vmem:[#allocation11 + $0x984] ss:$40 sps:$4 sm:$0xff]   ;;  %v26142_v36 = vld [vmem:[#allocation11 + $0xe30] ss:$40 sps:$4 sm:$0xff]  }
 0xb21   :  { %18420 = vmatprep.subr.bf16.mxu1 %v26051_v5  ;;  %v26097_v5 = vld [vmem:[#allocation11 + $0x980] ss:$40 sps:$4 sm:$0xff]  }
 0xb23   :  { %22132 = vmatpush3.bf16.msra.mxu0 %v26187_v14  ;;  %v26145_v14 = vld [vmem:[#allocation11 + $0xe80] ss:$40 sps:$4 sm:$0xff]  }
 0xb24   :  { %18421 = vmatpush1.bf16.msra.mxu1 %v26049_v54  ;;  %22139 = vmatprep.subr.bf16.mxu0 %v26188_v32  ;;  %v26102_v54 = vld [vmem:[#allocation11 + $0x9d4] ss:$40 sps:$4 sm:$0xff]   ;;  %v26149_v32 = vld [vmem:[#allocation11 + $0xed0] ss:$40 sps:$4 sm:$0xff]  }
 0xb25   :  { %18422 = vmatprep.subr.bf16.mxu1 %v26054_v7  ;;  %v26100_v7 = vld [vmem:[#allocation11 + $0x9d0] ss:$40 sps:$4 sm:$0xff]  }
 0xb28   :  { %18423 = vmatpush1.bf16.msra.mxu1 %v26052_v17  ;;  %v26105_v17 = vld [vmem:[#allocation11 + $0xa24] ss:$40 sps:$4 sm:$0xff]  }
 0xb29   :  { %18433 = vmatprep.subr.bf16.mxu1 %v26057_v51  ;;  %v26108_v51 = vld [vmem:[#allocation11 + $0xa74] ss:$40 sps:$4 sm:$0xff]  }
 0xb2b   :  { %18425 = vmatmul.mubr.bf16.vlgmr.msra.gmra.mrb[28].mxu1 %v26969_v27  ;;  %v26064_v27 = vld [vmem:[#allocation11 + $0x610] ss:$40 sps:$4 sm:$0xff]  }
 0xb2c   :  { %18434 = vmatpush1.bf16.msra.mxu1 %v26055_v42  ;;  %18465 = vmatprep.mubr.bf16.mxu1 %v26980_v41  ;;  %v26069_v41 = vld [vmem:[#allocation11 + $0x664] ss:$40 sps:$4 sm:$0xff]  }
 0xb2d   :  { %18435 = vmatprep.subr.bf16.mxu1 %v26060_v55  ;;  %v26111_v42 = vld [vmem:[#allocation11 + $0xac4] ss:$40 sps:$4 sm:$0xff]   ;;  %v26114_v55 = vld [vmem:[#allocation11 + $0xb14] ss:$40 sps:$4 sm:$0xff]  }
 0xb30   :  { %18436 = vmatpush1.bf16.msra.mxu1 %v26058_v28  ;;  %v26117_v28 = vld [vmem:[#allocation11 + $0xb64] ss:$40 sps:$4 sm:$0xff]  }
 0xb31   :  { %18437 = vmatprep.subr.bf16.mxu1 %v26063_v61  ;;  %v26120_v61 = vld [vmem:[#allocation11 + $0xbb4] ss:$40 sps:$4 sm:$0xff]  }
 0xb34   :  { %18438 = vmatpush1.bf16.msra.mxu1 %v26061_v9  ;;  %v26126_v9 = vld [vmem:[#allocation11 + $0xc54] ss:$40 sps:$4 sm:$0xff]  }
 0xb35   :  { %18439 = vmatprep.subr.bf16.mxu1 %v26066_v6  ;;  %v26129_v6 = vld [vmem:[#allocation11 + $0xca4] ss:$40 sps:$4 sm:$0xff]  }
 0xb38   :  { %18440 = vmatpush1.bf16.msra.mxu1 %v26064_v27  ;;  %v26132_v27 = vld [vmem:[#allocation11 + $0xcf4] ss:$40 sps:$4 sm:$0xff]  }
 0xb39   :  { %18441 = vmatprep.subr.bf16.mxu1 %v26069_v41  ;;  %v26135_v41 = vld [vmem:[#allocation11 + $0xd44] ss:$40 sps:$4 sm:$0xff]  }
 0xb3c   :  { %18442 = vmatpush1.bf16.msra.mxu1 %v26067_v62  ;;  %v26138_v62 = vld [vmem:[#allocation11 + $0xd94] ss:$40 sps:$4 sm:$0xff]  }
 0xb3d   :  { %18443 = vmatprep.subr.bf16.mxu1 %v26072_v16  ;;  %v26141_v16 = vld [vmem:[#allocation11 + $0xde4] ss:$40 sps:$4 sm:$0xff]  }
 0xb40   :  { %18444 = vmatpush1.bf16.msra.mxu1 %v26070_v44 }
 0xb41   :  { %18445 = vmatprep.subr.bf16.mxu1 %v26075_v26 }
 0xb44   :  { %18446 = vmatpush1.bf16.msra.mxu1 %v26073_v60 }
 0xb45   :  { %18447 = vmatprep.subr.bf16.mxu1 %v26078_v48  ;;  %v26147_v48 = vld [vmem:[#allocation11 + $0xe84] ss:$40 sps:$4 sm:$0xff]  }
 0xb48   :  { %18448 = vmatpush1.bf16.msra.mxu1 %v26076_v30  ;;  %v26151_v30 = vld [vmem:[#allocation11 + $0xed4] ss:$40 sps:$4 sm:$0xff]  }
 0xb49   :  { %18449 = vmatprep.subr.bf16.mxu1 %v26081_v10  ;;  %v26156_v10 = vld [vmem:[#allocation11 + $0xf24] ss:$40 sps:$4 sm:$0xff]  }
 0xb4c   :  { %18450 = vmatpush1.bf16.msra.mxu1 %v26079_v43  ;;  %v26154_v43 = vld [vmem:[#allocation11 + $0xf20] ss:$40 sps:$4 sm:$0xff]  }
 0xb4d   :  { %18451 = vmatprep.subr.bf16.mxu1 %v26084_v37  ;;  %v26161_v37 = vld [vmem:[#allocation11 + $0xf74] ss:$40 sps:$4 sm:$0xff]  }
 0xb50   :  { %18452 = vmatpush1.bf16.msra.mxu1 %v26082_v11  ;;  %v26159_v11 = vld [vmem:[#allocation11 + $0xf70] ss:$40 sps:$4 sm:$0xff]  }
 0xb51   :  { %18453 = vmatprep.subr.bf16.mxu1 %v26087_v15  ;;  %v26166_v15 = vld [vmem:[#allocation11 + $0xfc4] ss:$40 sps:$4 sm:$0xff]  }
 0xb54   :  { %18454 = vmatpush1.bf16.msra.mxu1 %v26085_v38  ;;  %v26164_v38 = vld [vmem:[#allocation11 + $0xfc0] ss:$40 sps:$4 sm:$0xff]  }
 0xb55   :  { %18455 = vmatprep.subr.bf16.mxu1 %v26090_v40  ;;  %v26171_v40 = vld [vmem:[#allocation11 + $0x1014] ss:$40 sps:$4 sm:$0xff]  }
 0xb58   :  { %18456 = vmatpush1.bf16.msra.mxu1 %v26088_v19  ;;  %v26169_v19 = vld [vmem:[#allocation11 + $0x1010] ss:$40 sps:$4 sm:$0xff]  }
 0xb59   :  { %18457 = vmatprep.subr.bf16.mxu1 %v26093_v47  ;;  %v26176_v47 = vld [vmem:[#allocation11 + $0x1064] ss:$40 sps:$4 sm:$0xff]  }
 0xb5c   :  { %18458 = vmatpush1.bf16.msra.mxu1 %v26091_v8  ;;  %v26174_v8 = vld [vmem:[#allocation11 + $0x1060] ss:$40 sps:$4 sm:$0xff]  }
 0xb5d   :  { %18459 = vmatprep.subr.bf16.mxu1 %v26096_v45 }
 0xb60   :  { %18460 = vmatpush1.bf16.msra.mxu1 %v26094_v39  ;;  %v26181_v39 = vld [vmem:[#allocation11 + $0x10b4] ss:$40 sps:$4 sm:$0xff]  }
 0xb61   :  { %18461 = vmatprep.subr.bf16.mxu1 %v26099_v50 }
 0xb64   :  { %18462 = vmatpush1.bf16.msra.mxu1 %v26097_v5 }
 0xb65   :  { %18463 = vmatprep.subr.bf16.mxu1 %v26102_v54  ;;  %v13541_v54 = vrot.slane %v27061_v53, %v26867_v20  ;;  %v26191_v20 = vld [vmem:[#allocation11 + $0x1154] ss:$40 sps:$4 sm:$0xff]  }
 0xb68   :  { %18464 = vmatpush1.bf16.msra.mxu1 %v26100_v7 }
 0xb69   :  { %18474 = vmatprep.subr.bf16.mxu1 %v26105_v17  ;;  %v13545_v17 = vrot.slane %v27061_v53, %v26870_v21  ;;  %v26189_v21 = vld [vmem:[#allocation11 + $0x1150] ss:$40 sps:$4 sm:$0xff]  }
 0xb6b   :  { %18466 = vmatmul.mubr.bf16.vlgmr.msra.gmra.mrb[28].mxu1 %v26984_v0  ;;  %v26118_v0 = vld [vmem:[#allocation11 + $0xbb0] ss:$40 sps:$4 sm:$0xff]  }
 0xb6c   :  { %18475 = vmatpush1.bf16.msra.mxu1 %v26103_v29  ;;  %18506 = vmatprep.mubr.bf16.mxu1 %v26986_v2  ;;  %v26121_v2 = vld [vmem:[#allocation11 + $0xc00] ss:$40 sps:$4 sm:$0xff]   ;;  %v26179_v29 = vld [vmem:[#allocation11 + $0x10b0] ss:$40 sps:$4 sm:$0xff]  }
 0xb6d   :  { %18476 = vmatprep.subr.bf16.mxu1 %v26108_v51  ;;  %v26186_v51 = vld [vmem:[#allocation11 + $0x1104] ss:$40 sps:$4 sm:$0xff]  }
 0xb70   :  { %18477 = vmatpush1.bf16.msra.mxu1 %v26106_v57 }
 0xb71   :  { %18478 = vmatprep.subr.bf16.mxu1 %v26111_v42 }
 0xb74   :  { %18479 = vmatpush1.bf16.msra.mxu1 %v26109_v3 }
 0xb75   :  { %18480 = vmatprep.subr.bf16.mxu1 %v26114_v55 }
 0xb78   :  { %18481 = vmatpush1.bf16.msra.mxu1 %v26112_v58 }
 0xb79   :  { %18482 = vmatprep.subr.bf16.mxu1 %v26117_v28  ;;  %v26184_v28 = vld [vmem:[#allocation11 + $0x1100] ss:$40 sps:$4 sm:$0xff]  }
 0xb7c   :  { %18483 = vmatpush1.bf16.msra.mxu1 %v26115_v34 }
 0xb7d   :  { %18484 = vmatprep.subr.bf16.mxu1 %v26120_v61 }
 0xb80   :  { %18485 = vmatpush1.bf16.msra.mxu1 %v26118_v0 }
 0xb81   :  { %18486 = vmatprep.subr.bf16.mxu1 %v26123_v1 }
 0xb84   :  { %18487 = vmatpush1.bf16.msra.mxu1 %v26121_v2 }
 0xb85   :  { %18488 = vmatprep.subr.bf16.mxu1 %v26126_v9  ;;  %v26192_v9 = vld [vmem:[#allocation14 + $0x180] sm:$0xff]  }
 0xb88   :  { %18489 = vmatpush1.bf16.msra.mxu1 %v26124_v63 }
 0xb89   :  { %18490 = vmatprep.subr.bf16.mxu1 %v26129_v6  ;;  %v26193_v6 = vld [vmem:[#allocation14 + $0x1c8] sm:$0xff]  }
 0xb8c   :  { %18491 = vmatpush1.bf16.msra.mxu1 %v26127_v56  ;;  %v26196_v56 = vld [vmem:[#allocation11 + $0x11a4] ss:$40 sps:$4 sm:$0xff]  }
 0xb8d   :  { %18492 = vmatprep.subr.bf16.mxu1 %v26132_v27 }
 0xb90   :  { %18493 = vmatpush1.bf16.msra.mxu1 %v26130_v49  ;;  %v26194_v49 = vld [vmem:[#allocation11 + $0x11a0] ss:$40 sps:$4 sm:$0xff]  }
 0xb91   :  { %18494 = vmatprep.subr.bf16.mxu1 %v26135_v41  ;;  %v26197_v41 = vld [vmem:[#allocation14 + $0x188] sm:$0xff]  }
 0xb94   :  { %18495 = vmatpush1.bf16.msra.mxu1 %v26133_v12  ;;  %v26198_v12 = vld [vmem:[#allocation14 + $0x1d0] sm:$0xff]  }
 0xb95   :  { %18496 = vmatprep.subr.bf16.mxu1 %v26138_v62  ;;  %v26201_v62 = vld [vmem:[#allocation11 + $0x11f4] ss:$40 sps:$4 sm:$0xff]  }
 0xb98   :  { %18497 = vmatpush1.bf16.msra.mxu1 %v26136_v52  ;;  %v26199_v52 = vld [vmem:[#allocation11 + $0x11f0] ss:$40 sps:$4 sm:$0xff]  }
 0xb99   :  { %v27082_v44 = vpop.f32.mrb[28].mxu0  ;;  %18498 = vmatprep.subr.bf16.mxu1 %v26141_v16  ;;  %v26202_v16 = vld [vmem:[#allocation14 + $0x190] sm:$0xff]  }
 0xb9a   :  { %v18387_v26 = vpop.f32.mrb[29].mxu0 }
 0xb9b   :  { %v18389_v23 = vpop.f32.mrb[30].mxu0 }
 0xb9c   :  { %v18390_v60 = vpop.f32.mrb[31].mxu0  ;;  %18499 = vmatpush1.bf16.msra.mxu1 %v26139_v22  ;;  %v26203_v22 = vld [vmem:[#allocation14 + $0x1d8] sm:$0xff]  }
 0xb9d   :  { %18500 = vmatprep.subr.bf16.mxu1 %v26144_v35  ;;  %v26206_v35 = vld [vmem:[#allocation11 + $0x1244] ss:$40 sps:$4 sm:$0xff]  }
 0xb9e   :  { %v26207_v23 = vld [vmem:[#allocation14 + $0x198] sm:$0xff]   ;;  %v26208_v60 = vld [vmem:[#allocation14 + $0x1e0] sm:$0xff]  }
 0xba0   :  { %18501 = vmatpush1.bf16.msra.mxu1 %v26142_v36  ;;  %v26211_v36 = vld [vmem:[#allocation11 + $0x1294] ss:$40 sps:$4 sm:$0xff]  }
 0xba1   :  { %18502 = vmatprep.subr.bf16.mxu1 %v26147_v48  ;;  %v26209_v48 = vld [vmem:[#allocation11 + $0x1290] ss:$40 sps:$4 sm:$0xff]  }
 0xba4   :  { %18503 = vmatpush1.bf16.msra.mxu1 %v26145_v14  ;;  %v26212_v14 = vld [vmem:[#allocation14 + $0x1a0] sm:$0xff]  }
 0xba5   :  { %18504 = vmatprep.subr.bf16.mxu1 %v26151_v30  ;;  %v26213_v30 = vld [vmem:[#allocation14 + $0x1e8] sm:$0xff]  }
 0xba8   :  { %18505 = vmatpush1.bf16.msra.mxu1 %v26149_v32  ;;  %v26216_v32 = vld [vmem:[#allocation11 + $0x12e4] ss:$40 sps:$4 sm:$0xff]  }
 0xba9   :  { %18515 = vmatprep.subr.bf16.mxu1 %v26156_v10  ;;  %v21991_v10 = vld [vmem:[#allocation16] ss:$0 sm:$0xff] }
 0xbab   :  { %18507 = vmatmul.mubr.bf16.vlgmr.msra.gmra.mrb[28].mxu1 %v26995_v25 }
 0xbac   :  { %18516 = vmatpush1.bf16.msra.mxu1 %v26154_v43  ;;  %18547 = vmatprep.mubr.bf16.mxu1 %v27016_v59  ;;  %v13553_v59 = vrot.slane %v27061_v53, %v26864_v18  ;;  %v26214_v43 = vld [vmem:[#allocation11 + $0x12e0] ss:$40 sps:$4 sm:$0xff]  }
 0xbad   :  { %18517 = vmatprep.subr.bf16.mxu1 %v26161_v37  ;;  %v26217_v37 = vld [vmem:[#allocation14 + $0x1a8] sm:$0xff]  }
 0xbae   :  { %v22212_v42 = vadd.f32 %v18387_v26, %v13553_v59  ;;  %v26204_v26 = vld [vmem:[#allocation11 + $0x1240] ss:$40 sps:$4 sm:$0xff]  }
 0xbaf   :  { %v26222_v59 = vld [vmem:[#allocation14 + $0x1b0] sm:$0xff]  }
 0xbb0   :  { %18518 = vmatpush1.bf16.msra.mxu1 %v26159_v11  ;;  %v18604_v1 = vmax.f32 %v22212_v42, 0.0  ;;  %v13549_v11 = vrot.slane %v27061_v53, %v26893_v46  ;;  %v26223_v46 = vld [vmem:[#allocation14 + $0x1f8] sm:$0xff]  }
 0xbb1   :  { %18519 = vmatprep.subr.bf16.mxu1 %v26166_v15  ;;  %v26226_v53 = vld [vmem:[#allocation11 + $0x1384] ss:$40 sps:$4 sm:$0xff]   ;;  %v26231_v42 = vld [vmem:[#allocation11 + $0x1420] ss:$40 sps:$4 sm:$0xff]  }
 0xbb2   :  { %v18614_v27 = vpack.c.bf16 %v18604_v1, %v18604_v1  ;;  %v26251_v1 = vld [vmem:[#allocation11 + $0x1604] ss:$40 sps:$4 sm:$0xff]  }
 0xbb4   :  { %18520 = vmatpush1.bf16.msra.mxu1 %v26164_v38  ;;  %v26218_v38 = vld [vmem:[#allocation14 + $0x1f0] sm:$0xff]  }
 0xbb5   :  { %18521 = vmatprep.subr.bf16.mxu1 %v26171_v40  ;;  %v26221_v40 = vld [vmem:[#allocation11 + $0x1334] ss:$40 sps:$4 sm:$0xff]  }
 0xbb8   :  { %18522 = vmatpush1.bf16.msra.mxu1 %v26169_v19 }
 0xbb9   :  { %v22089_v45 = vpop.f32.mrb[32].mxu0  ;;  %18523 = vmatprep.subr.bf16.mxu1 %v26176_v47 }
 0xbba   :  { %v22090_v25 = vpop.f32.mrb[33].mxu0 }
 0xbbb   :  { %v27088_v50 = vadd.f32 %v22090_v25, %v22089_v45  ;;  %v22092_v5 = vpop.f32.mrb[34].mxu0  ;;  %v26219_v25 = vld [vmem:[#allocation11 + $0x1330] ss:$40 sps:$4 sm:$0xff]  }
 0xbbc   :  { %18524 = vmatpush1.bf16.msra.mxu1 %v26174_v8  ;;  %v22093_v7 = vpop.f32.mrb[35].mxu0  ;;  %v22211_v5 = vadd.f32 %v27082_v44, %v13549_v11  ;;  %v26233_v44 = vld [vmem:[#allocation11 + $0x1424] ss:$40 sps:$4 sm:$0xff]  }
 0xbbd   :  { %18525 = vmatprep.subr.bf16.mxu1 %v26181_v39  ;;  %v19299_v47 = vadd.f32 %v27088_v50, %v21991_v10  ;;  %v26224_v7 = vld [vmem:[#allocation11 + $0x1380] ss:$40 sps:$4 sm:$0xff]  }
 0xbbe   :  { %v18180_v57 = vpop.f32.mrb[24].mxu1  ;;  %v18603_v50 = vmax.f32 %v22211_v5, 0.0  ;;  %v26284_v10 = vld [vmem:[#allocation14 + $0x210] sm:$0xff]   ;;  %v26287_v11 = vld [vmem:[#allocation14 + $0x260] sm:$0xff]  }
 0xbbf   :  { %v22209_v3 = vadd.f32 %v18180_v57, %v13541_v54  ;;  %v18182_v55 = vpop.f32.mrb[25].mxu1 }
 0xbc0   :  { %v22210_v58 = vadd.f32 %v18182_v55, %v13545_v17  ;;  %v18184_v18 = vpop.f32.mrb[26].mxu1  ;;  %18526 = vmatpush1.bf16.msra.mxu1 %v26179_v29  ;;  %v26227_v17 = vld [vmem:[#allocation14 + $0x1b8] sm:$0xff]   ;;  %v26230_v29 = vld [vmem:[#allocation11 + $0x13d4] ss:$40 sps:$4 sm:$0xff]   ;;  %v18613_v57 = vpack.c.bf16 %v18603_v50, %v18603_v50  ;;  %v26234_v55 = vld [vmem:[#allocation11 + $0x1470] ss:$40 sps:$4 sm:$0xff]  }
 0xbc1   :  { %v18601_v34 = vmax.f32 %v22209_v3, 0.0  ;;  %v18185_v61 = vpop.f32.mrb[27].mxu1  ;;  %18527 = vmatprep.subr.bf16.mxu1 %v26186_v51  ;;  %v26228_v51 = vld [vmem:[#allocation11 + $0x13d0] ss:$40 sps:$4 sm:$0xff]   ;;  %v26236_v3 = vld [vmem:[#allocation11 + $0x1474] ss:$40 sps:$4 sm:$0xff]  }
 0xbc2   :  { %v18602_v0 = vmax.f32 %v22210_v58, 0.0  ;;  %v26239_v58 = vld [vmem:[#allocation11 + $0x14c4] ss:$40 sps:$4 sm:$0xff]   ;;  %v26237_v18 = vld [vmem:[#allocation11 + $0x14c0] ss:$40 sps:$4 sm:$0xff]  }
 0xbc3   :  { %v18611_v63 = vpack.c.bf16 %v18601_v34, %v18601_v34  ;;  %v26240_v34 = vld [vmem:[#allocation11 + $0x1510] ss:$40 sps:$4 sm:$0xff]   ;;  %v26245_v61 = vld [vmem:[#allocation11 + $0x1564] ss:$40 sps:$4 sm:$0xff]  }
 0xbc4   :  { %v18612_v2 = vpack.c.bf16 %v18602_v0, %v18602_v0  ;;  %18528 = vmatpush1.bf16.msra.mxu1 %v26184_v28  ;;  %v26242_v28 = vld [vmem:[#allocation11 + $0x1514] ss:$40 sps:$4 sm:$0xff]  }
 0xbc5   :  { %18529 = vmatprep.subr.bf16.mxu1 %v26191_v20  ;;  %v26243_v20 = vld [vmem:[#allocation11 + $0x1560] ss:$40 sps:$4 sm:$0xff]   ;;  %v26248_v0 = vld [vmem:[#allocation11 + $0x15b4] ss:$40 sps:$4 sm:$0xff]  }
 0xbc6   :  { %19376 = vmatprep.mubr.bf16.mxu0 %v18612_v2  ;;  %v26254_v2 = vld [vmem:[#allocation11 + $0x1654] ss:$40 sps:$4 sm:$0xff]  }
 0xbc7   :  { %19377 = vmatmul.mubr.bf16.vlgmr.msra.gmra.mrb[40].mxu0 %v18611_v63  ;;  %v26255_v63 = vld [vmem:[#allocation11 + $0x16a0] ss:$40 sps:$4 sm:$0xff]  }
 0xbc8   :  { %22140 = vmatpush3.bf16.msra.mxu0 %v26192_v9  ;;  %18530 = vmatpush1.bf16.msra.mxu1 %v26189_v21  ;;  %v26252_v21 = vld [vmem:[#allocation11 + $0x1650] ss:$40 sps:$4 sm:$0xff]   ;;  %v26257_v9 = vld [vmem:[#allocation11 + $0x16a4] ss:$40 sps:$4 sm:$0xff]  }
 0xbc9   :  { %19416 = vmatprep.mubr.bf16.mxu0 %v18614_v27  ;;  %22141 = vmatprep.subr.bf16.mxu0 %v26193_v6  ;;  %v26260_v6 = vld [vmem:[#allocation11 + $0x16f4] ss:$40 sps:$4 sm:$0xff]   ;;  %v26263_v27 = vld [vmem:[#allocation11 + $0x1744] ss:$40 sps:$4 sm:$0xff]  }
 0xbca   :  { %18531 = vmatprep.subr.bf16.mxu1 %v26196_v56  ;;  %v26258_v56 = vld [vmem:[#allocation11 + $0x16f0] ss:$40 sps:$4 sm:$0xff]  }
 0xbcc   :  { %22142 = vmatpush3.bf16.msra.mxu0 %v26197_v41  ;;  %18532 = vmatpush1.bf16.msra.mxu1 %v26194_v49  ;;  %v26261_v49 = vld [vmem:[#allocation11 + $0x1740] ss:$40 sps:$4 sm:$0xff]   ;;  %v26266_v41 = vld [vmem:[#allocation11 + $0x1794] ss:$40 sps:$4 sm:$0xff]  }
 0xbcd   :  { %22143 = vmatprep.subr.bf16.mxu0 %v26198_v12  ;;  %18533 = vmatprep.subr.bf16.mxu1 %v26201_v62  ;;  %v26264_v12 = vld [vmem:[#allocation11 + $0x1790] ss:$40 sps:$4 sm:$0xff]   ;;  %v26269_v62 = vld [vmem:[#allocation11 + $0x17e4] ss:$40 sps:$4 sm:$0xff]  }
 0xbd0   :  { %22144 = vmatpush3.bf16.msra.mxu0 %v26202_v16  ;;  %18534 = vmatpush1.bf16.msra.mxu1 %v26199_v52  ;;  %v26267_v52 = vld [vmem:[#allocation11 + $0x17e0] ss:$40 sps:$4 sm:$0xff]   ;;  %v26272_v16 = vld [vmem:[#allocation11 + $0x1834] ss:$40 sps:$4 sm:$0xff]  }
 0xbd1   :  { %22145 = vmatprep.subr.bf16.mxu0 %v26203_v22  ;;  %18535 = vmatprep.subr.bf16.mxu1 %v26206_v35  ;;  %v26270_v22 = vld [vmem:[#allocation11 + $0x1830] ss:$40 sps:$4 sm:$0xff]   ;;  %v26275_v35 = vld [vmem:[#allocation11 + $0x1884] ss:$40 sps:$4 sm:$0xff]  }
 0xbd4   :  { %22146 = vmatpush3.bf16.msra.mxu0 %v26207_v23  ;;  %18536 = vmatpush1.bf16.msra.mxu1 %v26204_v26  ;;  %v26273_v26 = vld [vmem:[#allocation11 + $0x1880] ss:$40 sps:$4 sm:$0xff]   ;;  %v26278_v23 = vld [vmem:[#allocation11 + $0x18d4] ss:$40 sps:$4 sm:$0xff]  }
 0xbd5   :  { %22147 = vmatprep.subr.bf16.mxu0 %v26208_v60  ;;  %18537 = vmatprep.subr.bf16.mxu1 %v26211_v36  ;;  %v26276_v60 = vld [vmem:[#allocation11 + $0x18d0] ss:$40 sps:$4 sm:$0xff]  }
 0xbd6   :  { %v26279_v36 = vld [vmem:[#allocation14 + $0x240] sm:$0xff]  }
 0xbd8   :  { %22148 = vmatpush3.bf16.msra.mxu0 %v26212_v14  ;;  %18538 = vmatpush1.bf16.msra.mxu1 %v26209_v48  ;;  %v26280_v48 = vld [vmem:[#allocation14 + $0x200] sm:$0xff]   ;;  %v26281_v14 = vld [vmem:[#allocation14 + $0x248] sm:$0xff]  }
 0xbd9   :  { %v22111_v15 = vpop.f32.mrb[36].mxu0  ;;  %22149 = vmatprep.subr.bf16.mxu0 %v26213_v30  ;;  %18539 = vmatprep.subr.bf16.mxu1 %v26216_v32  ;;  %v26282_v30 = vld [vmem:[#allocation14 + $0x208] sm:$0xff]   ;;  %v26283_v32 = vld [vmem:[#allocation14 + $0x250] sm:$0xff]  }
 0xbda   :  { %v22112_v19 = vpop.f32.mrb[37].mxu0 }
 0xbdb   :  { %v22113_v8 = vadd.f32 %v22112_v19, %v22111_v15  ;;  %v22114_v45 = vpop.f32.mrb[38].mxu0  ;;  %v26288_v15 = vld [vmem:[#allocation14 + $0x220] sm:$0xff]   ;;  %v26292_v19 = vld [vmem:[#allocation14 + $0x230] sm:$0xff]  }
 0xbdc   :  { %22150 = vmatpush3.bf16.msra.mxu0 %v26217_v37  ;;  %18540 = vmatpush1.bf16.msra.mxu1 %v26214_v43  ;;  %v22115_v39 = vpop.f32.mrb[39].mxu0  ;;  %v26285_v43 = vld [vmem:[#allocation14 + $0x258] sm:$0xff]  }
 0xbdd   :  { %v27098_v54 = vadd.f32 %v22113_v8, %v19299_v47  ;;  %22151 = vmatprep.subr.bf16.mxu0 %v26218_v38  ;;  %18541 = vmatprep.subr.bf16.mxu1 %v26221_v40  ;;  %v26286_v37 = vld [vmem:[#allocation14 + $0x218] sm:$0xff]   ;;  %v26290_v38 = vld [vmem:[#allocation14 + $0x228] sm:$0xff]   ;;  %v26291_v40 = vld [vmem:[#allocation14 + $0x270] sm:$0xff]  }
 0xbde   :  { %v26293_v47 = vld [vmem:[#allocation14 + $0x278] sm:$0xff]  }
 0xbdf   :  { %v26294_v8 = vld [vmem:[#allocation14 + $0x238] sm:$0xff]  }
 0xbe0   :  { %22152 = vmatpush3.bf16.msra.mxu0 %v26222_v59  ;;  %18542 = vmatpush1.bf16.msra.mxu1 %v26219_v25 }
 0xbe1   :  { %22153 = vmatprep.subr.bf16.mxu0 %v26223_v46  ;;  %18543 = vmatprep.subr.bf16.mxu1 %v26226_v53 }
 0xbe4   :  { %22154 = vmatpush3.bf16.msra.mxu0 %v26227_v17  ;;  %18544 = vmatpush1.bf16.msra.mxu1 %v26224_v7 }
 0xbe5   :  { %18545 = vmatprep.subr.bf16.mxu1 %v26230_v29  ;;  %22161 = vmatprep.subr.bf16.mxu0 %v26279_v36 }
 0xbe7   :  { %19417 = vmatmul.mubr.bf16.vlgmr.msra.gmra.mrb[44].mxu0 %v18613_v57  ;;  %v13519_v57 = vld [vmem:[#allocation13 + $0x8] sm:$0x3] }
 0xbe8   :  { %18546 = vmatpush1.bf16.msra.mxu1 %v26228_v51  ;;  %22162 = vmatpush3.bf16.msra.mxu0 %v26280_v48 }
 0xbe9   :  { %18556 = vmatprep.subr.bf16.mxu1 %v26233_v44  ;;  %22163 = vmatprep.subr.bf16.mxu0 %v26281_v14  ;;  %v13557_v44 = vrot.slane %v13519_v57, %v26830_v13 }
 0xbeb   :  { %18548 = vmatmul.mubr.bf16.vlgmr.msra.gmra.mrb[28].mxu1 %v27018_v24  ;;  %v26246_v24 = vld [vmem:[#allocation11 + $0x15b0] ss:$40 sps:$4 sm:$0xff]  }
 0xbec   :  { %18557 = vmatpush1.bf16.msra.mxu1 %v26231_v42  ;;  %18588 = vmatprep.mubr.bf16.mxu1 %v27022_v4  ;;  %v26249_v4 = vld [vmem:[#allocation11 + $0x1600] ss:$40 sps:$4 sm:$0xff]   ;;  %v13561_v42 = vrot.slane %v13519_v57, %v26810_v33 }
 0xbed   :  { %18558 = vmatprep.subr.bf16.mxu1 %v26236_v3  ;;  %22164 = vmatpush3.bf16.msra.mxu0 %v26282_v30 }
 0xbee   :  { %22165 = vmatprep.subr.bf16.mxu0 %v26283_v32 }
 0xbf0   :  { %18559 = vmatpush1.bf16.msra.mxu1 %v26234_v55 }
 0xbf1   :  { %18560 = vmatprep.subr.bf16.mxu1 %v26239_v58  ;;  %22166 = vmatpush3.bf16.msra.mxu0 %v26284_v10 }
 0xbf2   :  { %22167 = vmatprep.subr.bf16.mxu0 %v26285_v43 }
 0xbf4   :  { %18561 = vmatpush1.bf16.msra.mxu1 %v26237_v18 }
 0xbf5   :  { %18562 = vmatprep.subr.bf16.mxu1 %v26242_v28  ;;  %22168 = vmatpush3.bf16.msra.mxu0 %v26286_v37 }
 0xbf6   :  { %22169 = vmatprep.subr.bf16.mxu0 %v26287_v11 }
 0xbf8   :  { %18563 = vmatpush1.bf16.msra.mxu1 %v26240_v34 }
 0xbf9   :  { %18564 = vmatprep.subr.bf16.mxu1 %v26245_v61  ;;  %22170 = vmatpush3.bf16.msra.mxu0 %v26288_v15 }
 0xbfc   :  { %18565 = vmatpush1.bf16.msra.mxu1 %v26243_v20 }
 0xbfd   :  { %18566 = vmatprep.subr.bf16.mxu1 %v26248_v0 }
 0xc00   :  { %18567 = vmatpush1.bf16.msra.mxu1 %v26246_v24 }
 0xc01   :  { %18568 = vmatprep.subr.bf16.mxu1 %v26251_v1 }
 0xc04   :  { %18569 = vmatpush1.bf16.msra.mxu1 %v26249_v4 }
 0xc05   :  { %18570 = vmatprep.subr.bf16.mxu1 %v26254_v2 }
 0xc08   :  { %18571 = vmatpush1.bf16.msra.mxu1 %v26252_v21 }
 0xc09   :  { %18572 = vmatprep.subr.bf16.mxu1 %v26257_v9 }
 0xc0c   :  { %18573 = vmatpush1.bf16.msra.mxu1 %v26255_v63 }
 0xc0d   :  { %18574 = vmatprep.subr.bf16.mxu1 %v26260_v6 }
 0xc10   :  { %18575 = vmatpush1.bf16.msra.mxu1 %v26258_v56 }
 0xc11   :  { %18576 = vmatprep.subr.bf16.mxu1 %v26263_v27 }
 0xc14   :  { %18577 = vmatpush1.bf16.msra.mxu1 %v26261_v49 }
 0xc15   :  { %18578 = vmatprep.subr.bf16.mxu1 %v26266_v41 }
 0xc18   :  { %18579 = vmatpush1.bf16.msra.mxu1 %v26264_v12 }
 0xc19   :  { %18580 = vmatprep.subr.bf16.mxu1 %v26269_v62 }
 0xc1c   :  { %18581 = vmatpush1.bf16.msra.mxu1 %v26267_v52 }
 0xc1d   :  { %18582 = vmatprep.subr.bf16.mxu1 %v26272_v16 }
 0xc20   :  { %18583 = vmatpush1.bf16.msra.mxu1 %v26270_v22 }
 0xc21   :  { %18584 = vmatprep.subr.bf16.mxu1 %v26275_v35 }
 0xc24   :  { %18585 = vmatpush1.bf16.msra.mxu1 %v26273_v26 }
 0xc25   :  { %18586 = vmatprep.subr.bf16.mxu1 %v26278_v23 }
 0xc28   :  { %18587 = vmatpush1.bf16.msra.mxu1 %v26276_v60 }
 0xc2b   :  { %18589 = vmatmul.mubr.bf16.vlgmr.msra.gmra.mrb[28].mxu1 %v27031_v31  ;;  %v26289_v31 = vld [vmem:[#allocation14 + $0x268] sm:$0xff]  }
 0xc2c   :  { %22171 = vmatprep.subr.bf16.mxu0 %v26289_v31 }
 0xc2d   :  { %22172 = vmatpush3.bf16.msra.mxu0 %v26290_v38 }
 0xc2e   :  { %22173 = vmatprep.subr.bf16.mxu0 %v26291_v40 }
 0xc31   :  { %22174 = vmatpush3.bf16.msra.mxu0 %v26292_v19 }
 0xc32   :  { %22175 = vmatprep.subr.bf16.mxu0 %v26293_v47 }
 0xc35   :  { %22176 = vmatpush3.bf16.msra.mxu0 %v26294_v8 }
 0xc9a   :  { %v22133_v45 = vpop.f32.mrb[40].mxu0 }
 0xc9b   :  { %v22134_v39 = vpop.f32.mrb[41].mxu0 }
 0xc9c   :  { %v22135_v25 = vadd.f32 %v22134_v39, %v22133_v45  ;;  %v22136_v59 = vpop.f32.mrb[42].mxu0 }
 0xc9d   :  { %v22137_v5 = vpop.f32.mrb[43].mxu0 }
 0xc9e   :  { %v19379_v46 = vadd.f32 %v22135_v25, %v27098_v54 }
 0xcba   :  { %v22155_v53 = vpop.f32.mrb[44].mxu0 }
 0xcbb   :  { %v22156_v7 = vpop.f32.mrb[45].mxu0 }
 0xcbc   :  { %v22157_v17 = vadd.f32 %v22156_v7, %v22155_v53  ;;  %v22158_v50 = vpop.f32.mrb[46].mxu0 }
 0xcbd   :  { %v22159_v29 = vpop.f32.mrb[47].mxu0 }
 0xcbe   :  { %v19419_v51 = vadd.f32 %v22157_v17, %v19379_v46 }
 0xcfe   :  { %v18590_v3 = vpop.f32.mrb[28].mxu1 }
 0xcff   :  { %v22213_v55 = vadd.f32 %v18590_v3, %v13557_v44  ;;  %v18592_v58 = vpop.f32.mrb[29].mxu1 }
 0xd00   :  { %v22214_v18 = vadd.f32 %v18592_v58, %v13561_v42  ;;  %v18594_v28 = vpop.f32.mrb[30].mxu1 }
 0xd01   :  { %v18605_v34 = vmax.f32 %v22213_v55, 0.0  ;;  %v18595_v61 = vpop.f32.mrb[31].mxu1 }
 0xd02   :  { %v18606_v20 = vmax.f32 %v22214_v18, 0.0 }
 0xd03   :  { %v18615_v0 = vpack.c.bf16 %v18605_v34, %v18605_v34 }
 0xd04   :  { %v18616_v54 = vpack.c.bf16 %v18606_v20, %v18606_v20 }
 0xd06   :  { %19456 = vmatprep.mubr.bf16.mxu0 %v18616_v54 }
 0xd07   :  { %19457 = vmatmul.mubr.bf16.vlgmr.msra.gmra.mrb[48].mxu0 %v18615_v0 }
 0xdda   :  { %v22177_v24 = vpop.f32.mrb[48].mxu0 }
 0xddb   :  { %v22178_v1 = vpop.f32.mrb[49].mxu0 }
 0xddc   :  { %v22179_v4 = vadd.f32 %v22178_v1, %v22177_v24  ;;  %v22180_v2 = vpop.f32.mrb[50].mxu0 }
 0xddd   :  { %v22181_v21 = vpop.f32.mrb[51].mxu0 }
 0xdde   :  { %v19459_v13 = vadd.f32 %v22179_v4, %v19419_v51 }
 0xde0   :  { %v22072_v9 = vmul.f32 -1.442695, %v19459_v13 }
 0xde2   :  { %26295 = vpow2.f32 %v22072_v9 }
 0xdec   :  { %v26296_v33 = vpop.eup %26295 }
 0xded   :  { %v19467_v63 = vadd.f32 1.0, %v26296_v33 }
 0xdef   :  { %26297 = vrcp.f32 %v19467_v63 }
 0xdf9   :  { %v26298_v6 = vpop.eup %26297 }
 0xdfa   :  { %v19470_v56 = vpack.c.bf16 %v26298_v6, %v26298_v6 }
 0xdfc   :  { %19471 = vst [vmem:[#allocation17] sm:$0xf] %v19470_v56 }
 0xdfd   :  { %26510 = shalt.err (!%p26507_p6)
}
 0xdfe   :  { %s26511_s18 = scalar_lea.hbm %s27127_s9, 64 }
 0xdff   :  { %p26512_p7 = scmp.ne.s32.totalorder %s27127_s9, %s26511_s18  ;;  %p26515_p8 = scmp.lt.u32.totalorder %s26511_s18, %s27127_s9 }
 0xe01   :  { %p26517_p9 = pnand %p26515_p8, %p26512_p7 }
 0xe03   :  { %26520 = shalt.err (!%p26517_p9)
}
 0xe04   :  { %19481 = dma.vmem_to_hbm [thread:$0]  %s19479_s25, 64, %s27127_s9, [#allocation4]  }
 0xe05   :  { %26531 = dma.done.wait [#allocation4], 64  }
 0xe06   :  { %26532 = vsyncadd [#allocation4], 4294967232 }
 0xe07   :  { %19485 = vsyncpa [#allocation3], 1 }
 0xe08   :  { %19486 = vsyncpa [#allocation6], 1 }
 0xe09   :  { %19487 = vsyncpa [#allocation9], 1 }
 0xe0a   :  { %19488 = vsyncpa [#allocation12], 1 }
 0xe0b   :  { %19489 = vsyncpa [#allocation15], 1 }
 0xe0c   :  { %19490 = vsyncpa [#allocation4], 1 }

</bundles_post_ra>
